<compile_context>
chip_gen: v6e
topology: v6e:2x2x1
jax: 0.10.0
libtpu: 0.0.40
codegen_flags: <defaults>
</compile_context>

<pallas_src>
import jax
import jax.numpy as jnp
from jax import lax
from jax.experimental import pallas as pl
from jax.experimental.pallas import tpu as pltpu  # noqa: F401  (kept for parity)

# ---------------- model config (small, consistent with the module) -------------
BATCH = 2
SEQ_LEN = 8           # seq_len
NUM_FEATURE = 32      # num_feature
NUM_HEADS = 4         # num_heads
IS_QUANTILE = False

W_HIDDEN = NUM_FEATURE          # ts_layer == 'transformer' -> w_hidden_size = num_feature
CNN_HIDDEN = 256
K1, K2, K3 = 64, 16, 3
POOL = 3
FF_HIDDEN = 64
DFF_TR = 512                    # TransformerEncoderLayer dim_feedforward
N_LAYERS = 3
SIZE_AFTER_CNN = CNN_HIDDEN - K1 - K2 - K3 + 3 - POOL * 3 + 3    # = 170
D5 = W_HIDDEN + SIZE_AFTER_CNN                                   # = 202
EPS = 1e-5


# =============================== fused kernel ==================================

def _ln_lastdim(y, w, b):
    """LayerNorm over the last dim of a 2-D tile (weights broadcast from (1, F))."""
    mu = jnp.mean(y, axis=-1, keepdims=True)
    var = jnp.mean((y - mu) ** 2, axis=-1, keepdims=True)
    return (y - mu) * lax.rsqrt(var + EPS) * w + b


def fused_forward_kernel(x_ref, ln_wb_ref, hm_ref, hmt_ref,
                         wqkv_ref, bqkv_ref, wo_ref,
                         w1_ref, b1_ref, w2_ref, enc_vecs_ref,
                         st1_ref, w_weight_ref,
                         c1w_ref, c2w_ref, c3w_ref, cb_ref,
                         lin1_ref, lin1b_ref, lin2_ref, lin2b_ref,
                         o_ref):
    B, S, F = x_ref.shape
    H = NUM_HEADS
    hd = F // H
    att_scale = 1.0 / (float(hd) ** 0.5)

    ln_g = ln_wb_ref[0]           # (S, F)
    ln_b = ln_wb_ref[1]           # (S, F)
    hm = hm_ref[...]              # (F, H) one-hot head membership
    hmt = hmt_ref[...]            # (H, F)

    # ---- nn.LayerNorm([seq_len, num_feature]) per batch element ----
    rows = []
    for b in range(B):
        xb = x_ref[b]                                   # (S, F)
        mu = jnp.mean(xb)
        var = jnp.mean((xb - mu) ** 2)
        rows.append((xb - mu) * lax.rsqrt(var + EPS) * ln_g + ln_b)
    ts = jnp.concatenate(rows, axis=0)                  # (B*S, F), row = b*S + s

    # ---- 3x TransformerEncoderLayer (post-norm, ReLU, dropout=identity) ----
    # batch_first=False quirk: attention sequence axis == original batch axis B.
    for l in range(N_LAYERS):
        vecs = enc_vecs_ref[l]                          # (6, F) packed row vectors
        bo = vecs[0:1]
        b2 = vecs[1:2]
        ln1w = vecs[2:3]
        ln1b = vecs[3:4]
        ln2w = vecs[4:5]
        ln2b = vecs[5:6]

        qkv = jnp.dot(ts, wqkv_ref[l],
                      preferred_element_type=jnp.float32) + bqkv_ref[l]   # (B*S, 3F)
        q_all = qkv[:, 0:F]
        k_all = qkv[:, F:2 * F]
        v_all = qkv[:, 2 * F:3 * F]

        # head-wise scores for ALL (t, s) pairs in one mask matmul
        prods = []
        for t in range(B):
            qt = q_all[t * S:(t + 1) * S]                                 # (S, F)
            for s in range(B):
                prods.append(qt * k_all[s * S:(s + 1) * S])
        scores_all = jnp.dot(jnp.concatenate(prods, axis=0), hm,
                             preferred_element_type=jnp.float32) * att_scale  # (B*B*S, H)

        # softmax over key positions s (length B) per (t, transformer-batch row)
        probs = []
        for t in range(B):
            blocks = [scores_all[(t * B + s) * S:(t * B + s + 1) * S]
                      for s in range(B)]                                  # each (S, H)
            m = blocks[0]
            for s in range(1, B):
                m = jnp.maximum(m, blocks[s])
            es = [jnp.exp(bl - m) for bl in blocks]
            denom = es[0]
            for s in range(1, B):
                denom = denom + es[s]
            inv = pl.reciprocal(denom, approx=True)                       # (S, H)
            for s in range(B):
                probs.append(es[s] * inv)
        # expand per-head probabilities back to full F width (one mask matmul)
        probs_full = jnp.dot(jnp.concatenate(probs, axis=0), hmt,
                             preferred_element_type=jnp.float32)          # (B*B*S, F)

        ctx_rows = []
        for t in range(B):
            ctx = probs_full[(t * B) * S:(t * B + 1) * S] * v_all[0:S]
            for s in range(1, B):
                p = t * B + s
                ctx = ctx + probs_full[p * S:(p + 1) * S] * v_all[s * S:(s + 1) * S]
            ctx_rows.append(ctx)
        ctx = jnp.concatenate(ctx_rows, axis=0)                           # (B*S, F)

        attn = jnp.dot(ctx, wo_ref[l],
                       preferred_element_type=jnp.float32) + bo
        y = _ln_lastdim(ts + attn, ln1w, ln1b)
        ff = jnp.maximum(jnp.dot(y, w1_ref[l],
                                 preferred_element_type=jnp.float32) + b1_ref[l], 0.0)
        ff = jnp.dot(ff, w2_ref[l],
                     preferred_element_type=jnp.float32) + b2
        ts = _ln_lastdim(y + ff, ln2w, ln2b)                              # (B*S, F)

    # ---- BatchNorm1d(seq_len) folded to a per-row affine, then Linear+ReLU ----
    xn = ts * st1_ref[:, 0:1] + st1_ref[:, 1:2]                           # (B*S, F)
    hidden = jnp.maximum(
        jnp.dot(xn, w_weight_ref[...], preferred_element_type=jnp.float32), 0.0)
    # hidden: (B*S, 256)

    # ---- CNN stack: BN folded into im2col weights, one matmul per conv ----
    def conv_pool(xb, wm, cb, K, L_in):
        L_conv = L_in - K + 1
        L_out = L_conv - POOL + 1          # MaxPool1d(3, stride=1)
        # im2col slab: row k*S + i holds channel i shifted by tap k
        slab = jnp.concatenate([xb[:, k:k + L_conv] for k in range(K)], axis=0)
        acc = jnp.dot(wm, slab, preferred_element_type=jnp.float32) + cb  # (S, L_conv)
        return jnp.maximum(jnp.maximum(acc[:, 0:L_out], acc[:, 1:1 + L_out]),
                           acc[:, 2:2 + L_out])

    c1w, c2w, c3w = c1w_ref[...], c2w_ref[...], c3w_ref[...]
    c1b = cb_ref[:, 0:1]
    c2b = cb_ref[:, 1:2]
    c3b = cb_ref[:, 2:3]

    v_rows = []
    for b in range(B):
        hb = hidden[b * S:(b + 1) * S, :]                                 # (S, 256)
        h1 = conv_pool(hb, c1w, c1b, K1, CNN_HIDDEN)                      # (S, 191)
        h2 = conv_pool(h1, c2w, c2b, K2, h1.shape[1])                     # (S, 174)
        h3 = conv_pool(h2, c3w, c3b, K3, h2.shape[1])                     # (S, 170)
        # attention pooling:  s = tanh(mean(x,-1));  a = mean(s*x over seq)
        s_att = jnp.tanh(jnp.mean(h3, axis=-1, keepdims=True))            # (S, 1)
        a = jnp.mean(s_att * h3, axis=0, keepdims=True)                   # (1, 170)
        last_ht = ts[(b + 1) * S - 1:(b + 1) * S, :]                      # (1, F)
        v_rows.append(jnp.concatenate([last_ht, a], axis=-1))             # (1, D5)
    v = jnp.concatenate(v_rows, axis=0)                                   # (B, D5)

    # ---- Head: (BN5-folded) linear1 -> relu -> (BN6-folded) linear2 -> sigmoid
    c = jnp.maximum(
        jnp.dot(v, lin1_ref[...], preferred_element_type=jnp.float32) + lin1b_ref[...],
        0.0)
    out = jnp.dot(c, lin2_ref[...], preferred_element_type=jnp.float32) + lin2b_ref[...]
    if not IS_QUANTILE:
        out = jax.nn.sigmoid(out)
    o_ref[...] = out


# ============================ parameters & forward =============================

def init_params(key):
    keys = iter(jax.random.split(key, 64))

    def nrm(shape, scale=0.1):
        return scale * jax.random.normal(next(keys), shape, jnp.float32)

    def bn(n):
        return dict(mean=nrm((n,), 0.05),
                    var=jax.random.uniform(next(keys), (n,), jnp.float32, 0.5, 1.5),
                    gamma=1.0 + nrm((n,), 0.05),
                    beta=nrm((n,), 0.05))

    F = NUM_FEATURE
    L = N_LAYERS
    p = {}
    p['ln_g'] = 1.0 + nrm((SEQ_LEN, F), 0.05)
    p['ln_b'] = nrm((SEQ_LEN, F), 0.05)
    # encoder params stacked over the 3 layers (weights stored transposed: x @ W)
    p['enc'] = dict(
        wqkv=nrm((L, F, 3 * F)), bqkv=nrm((L, 1, 3 * F)),
        wo=nrm((L, F, F)), bo=nrm((L, 1, F)),
        w1=nrm((L, F, DFF_TR)), b1=nrm((L, 1, DFF_TR)),
        w2=nrm((L, DFF_TR, F)), b2=nrm((L, 1, F)),
        ln1w=1.0 + nrm((L, 1, F), 0.05), ln1b=nrm((L, 1, F), 0.05),
        ln2w=1.0 + nrm((L, 1, F), 0.05), ln2b=nrm((L, 1, F), 0.05))
    p['bn1'] = bn(SEQ_LEN)
    p['w_weight'] = nrm((W_HIDDEN, CNN_HIDDEN))            # Linear(w_hidden,256).weight.T
    p['bn2'] = bn(SEQ_LEN)
    p['cnn1_w'] = nrm((SEQ_LEN, SEQ_LEN, K1))              # Conv1d weight (out, in, K)
    p['cnn1_b'] = nrm((SEQ_LEN,))
    p['bn3'] = bn(SEQ_LEN)
    p['cnn2_w'] = nrm((SEQ_LEN, SEQ_LEN, K2))
    p['cnn2_b'] = nrm((SEQ_LEN,))
    p['bn4'] = bn(SEQ_LEN)
    p['cnn3_w'] = nrm((SEQ_LEN, SEQ_LEN, K3))
    p['cnn3_b'] = nrm((SEQ_LEN,))
    p['bn5'] = bn(D5)
    p['lin1_w'] = nrm((D5, FF_HIDDEN))
    p['bn6'] = bn(FF_HIDDEN)
    p['lin2_w'] = nrm((FF_HIDDEN, 1))
    return p


def forward(params, inputs):
    B, S, F = inputs.shape

    def bn_fold(bn):
        scale = bn['gamma'] / jnp.sqrt(bn['var'] + EPS)
        shift = bn['beta'] - bn['mean'] * scale
        return scale, shift

    # BN1 (per seq-channel) -> per-(b*S) row affine before the Linear
    s1, t1 = bn_fold(params['bn1'])                               # (S,)
    s1 = jnp.tile(s1.reshape(S, 1), (B, 1))                       # (B*S, 1)
    t1 = jnp.tile(t1.reshape(S, 1), (B, 1))
    st1 = jnp.concatenate([s1, t1], axis=-1)                      # (B*S, 2)

    # BN2/3/4 folded into conv weights + bias; conv weights laid out for im2col:
    # wm[o, k*S + i] = w[o, i, k] * bn_scale[i]
    def conv_fold(w, cb, bn):
        scale, shift = bn_fold(bn)                                # (S,)
        w_f = w * scale[None, :, None]
        b_f = cb + jnp.sum(w * shift[None, :, None], axis=(1, 2))
        K = w.shape[-1]
        wm = jnp.transpose(w_f, (0, 2, 1)).reshape(S, K * S)
        return wm, b_f.reshape(S, 1)

    c1w, c1b = conv_fold(params['cnn1_w'], params['cnn1_b'], params['bn2'])
    c2w, c2b = conv_fold(params['cnn2_w'], params['cnn2_b'], params['bn3'])
    c3w, c3b = conv_fold(params['cnn3_w'], params['cnn3_b'], params['bn4'])
    cbs = jnp.concatenate([c1b, c2b, c3b], axis=-1)               # (S, 3)

    # BN5 / BN6 folded into the head linears (exact in eval mode)
    s5, t5 = bn_fold(params['bn5'])
    lin1 = params['lin1_w'] * s5[:, None]                         # (D5, 64)
    lin1b = t5[None, :] @ params['lin1_w']                        # (1, 64)
    s6, t6 = bn_fold(params['bn6'])
    lin2 = params['lin2_w'] * s6[:, None]                         # (64, 1)
    lin2b = t6[None, :] @ params['lin2_w']                        # (1, 1)

    # one-hot head membership masks for head-batched attention
    H = NUM_HEADS
    hd = F // H
    head_of_f = jnp.arange(F) // hd
    hm = (head_of_f[:, None] == jnp.arange(H)[None, :]).astype(jnp.float32)   # (F, H)
    hmt = jnp.transpose(hm)                                                   # (H, F)

    enc = params['enc']
    ln_wb = jnp.stack([params['ln_g'], params['ln_b']], axis=0)               # (2, S, F)
    # pack the six per-layer (1, F) row vectors into one (L, 6, F) slab
    enc_vecs = jnp.concatenate(
        [enc['bo'], enc['b2'], enc['ln1w'], enc['ln1b'], enc['ln2w'], enc['ln2b']],
        axis=1)                                                                # (L, 6, F)

    return pl.pallas_call(
        fused_forward_kernel,
        out_shape=jax.ShapeDtypeStruct((B, 1), jnp.float32),
    )(inputs, ln_wb, hm, hmt,
      enc['wqkv'], enc['bqkv'], enc['wo'],
      enc['w1'], enc['b1'], enc['w2'], enc_vecs,
      st1, params['w_weight'],
      c1w, c2w, c3w, cbs,
      lin1, lin1b, lin2, lin2b)


if __name__ == "__main__":
    key = jax.random.PRNGKey(0)
    kp, kx = jax.random.split(key)
    params = init_params(kp)
    x = jax.random.normal(kx, (BATCH, SEQ_LEN, NUM_FEATURE), jnp.float32)
    out = jax.jit(forward)(params, x)
    jax.block_until_ready(out)
    assert out.shape == (BATCH, 1)
    assert out.dtype == jnp.float32
    print("KERNEL_OK")
</pallas_src>

<mosaic_0001>
module attributes {stable_mosaic.version = 11 : i64} {
  func.func @fused_forward_kernel(%arg0: memref<2x8x32xf32, #tpu.memory_space<vmem>>, %arg1: memref<2x8x32xf32, #tpu.memory_space<vmem>>, %arg2: memref<32x4xf32, #tpu.memory_space<vmem>>, %arg3: memref<4x32xf32, #tpu.memory_space<vmem>>, %arg4: memref<3x32x96xf32, #tpu.memory_space<vmem>>, %arg5: memref<3x1x96xf32, #tpu.memory_space<vmem>>, %arg6: memref<3x32x32xf32, #tpu.memory_space<vmem>>, %arg7: memref<3x32x512xf32, #tpu.memory_space<vmem>>, %arg8: memref<3x1x512xf32, #tpu.memory_space<vmem>>, %arg9: memref<3x512x32xf32, #tpu.memory_space<vmem>>, %arg10: memref<3x6x32xf32, #tpu.memory_space<vmem>>, %arg11: memref<16x2xf32, #tpu.memory_space<vmem>>, %arg12: memref<32x256xf32, #tpu.memory_space<vmem>>, %arg13: memref<8x512xf32, #tpu.memory_space<vmem>>, %arg14: memref<8x128xf32, #tpu.memory_space<vmem>>, %arg15: memref<8x24xf32, #tpu.memory_space<vmem>>, %arg16: memref<8x3xf32, #tpu.memory_space<vmem>>, %arg17: memref<202x64xf32, #tpu.memory_space<vmem>>, %arg18: memref<1x64xf32, #tpu.memory_space<vmem>>, %arg19: memref<64x1xf32, #tpu.memory_space<vmem>>, %arg20: memref<1x1xf32, #tpu.memory_space<vmem>>, %arg21: memref<2x1xf32, #tpu.memory_space<vmem>>) attributes {dimension_semantics = [], scalar_prefetch = 0 : i64, scratch_operands = 0 : i64, tpu.core_type = #tpu.core_type<tc>} {
    %c0 = arith.constant 0 : index
    %c0_0 = arith.constant 0 : index
    %c0_1 = arith.constant 0 : index
    %0 = vector.load %arg1[%c0, %c0_0, %c0_1] : memref<2x8x32xf32, #tpu.memory_space<vmem>>, vector<1x8x32xf32>
    %1 = vector.shape_cast %0 : vector<1x8x32xf32> to vector<8x32xf32>
    %c1 = arith.constant 1 : index
    %c0_2 = arith.constant 0 : index
    %c0_3 = arith.constant 0 : index
    %2 = vector.load %arg1[%c1, %c0_2, %c0_3] : memref<2x8x32xf32, #tpu.memory_space<vmem>>, vector<1x8x32xf32>
    %3 = vector.shape_cast %2 : vector<1x8x32xf32> to vector<8x32xf32>
    %c0_4 = arith.constant 0 : index
    %c0_5 = arith.constant 0 : index
    %4 = vector.load %arg2[%c0_4, %c0_5] : memref<32x4xf32, #tpu.memory_space<vmem>>, vector<32x4xf32>
    %c0_6 = arith.constant 0 : index
    %c0_7 = arith.constant 0 : index
    %5 = vector.load %arg3[%c0_6, %c0_7] : memref<4x32xf32, #tpu.memory_space<vmem>>, vector<4x32xf32>
    %c0_8 = arith.constant 0 : index
    %c0_9 = arith.constant 0 : index
    %c0_10 = arith.constant 0 : index
    %6 = vector.load %arg0[%c0_8, %c0_9, %c0_10] : memref<2x8x32xf32, #tpu.memory_space<vmem>>, vector<1x8x32xf32>
    %7 = vector.shape_cast %6 : vector<1x8x32xf32> to vector<8x32xf32>
    %8 = vector.shape_cast %7 : vector<8x32xf32> to vector<1x8x32xf32>
    %cst = arith.constant dense<0.000000e+00> : vector<1xf32>
    %9 = vector.multi_reduction <add>, %8, %cst [1, 2] : vector<1x8x32xf32> to vector<1xf32>
    %10 = vector.shape_cast %9 : vector<1xf32> to vector<1x1x1xf32>
    %11 = vector.extract %10[0, 0, 0] : f32 from vector<1x1x1xf32>
    %cst_11 = arith.constant 2.560000e+02 : f32
    %12 = arith.divf %11, %cst_11 : f32
    %13 = vector.broadcast %12 : f32 to vector<8x32xf32>
    %14 = arith.subf %7, %13 : vector<8x32xf32>
    %15 = arith.mulf %14, %14 : vector<8x32xf32>
    %16 = vector.shape_cast %15 : vector<8x32xf32> to vector<1x8x32xf32>
    %cst_12 = arith.constant dense<0.000000e+00> : vector<1xf32>
    %17 = vector.multi_reduction <add>, %16, %cst_12 [1, 2] : vector<1x8x32xf32> to vector<1xf32>
    %18 = vector.shape_cast %17 : vector<1xf32> to vector<1x1x1xf32>
    %19 = vector.extract %18[0, 0, 0] : f32 from vector<1x1x1xf32>
    %cst_13 = arith.constant 2.560000e+02 : f32
    %20 = arith.divf %19, %cst_13 : f32
    %21 = vector.broadcast %12 : f32 to vector<8x32xf32>
    %22 = arith.subf %7, %21 : vector<8x32xf32>
    %cst_14 = arith.constant 9.99999974E-6 : f32
    %23 = arith.addf %20, %cst_14 : f32
    %24 = math.rsqrt %23 : f32
    %25 = vector.broadcast %24 : f32 to vector<8x32xf32>
    %26 = arith.mulf %22, %25 : vector<8x32xf32>
    %27 = arith.mulf %26, %1 : vector<8x32xf32>
    %28 = arith.addf %27, %3 : vector<8x32xf32>
    %c1_15 = arith.constant 1 : index
    %c0_16 = arith.constant 0 : index
    %c0_17 = arith.constant 0 : index
    %29 = vector.load %arg0[%c1_15, %c0_16, %c0_17] : memref<2x8x32xf32, #tpu.memory_space<vmem>>, vector<1x8x32xf32>
    %30 = vector.shape_cast %29 : vector<1x8x32xf32> to vector<8x32xf32>
    %31 = vector.shape_cast %30 : vector<8x32xf32> to vector<1x8x32xf32>
    %cst_18 = arith.constant dense<0.000000e+00> : vector<1xf32>
    %32 = vector.multi_reduction <add>, %31, %cst_18 [1, 2] : vector<1x8x32xf32> to vector<1xf32>
    %33 = vector.shape_cast %32 : vector<1xf32> to vector<1x1x1xf32>
    %34 = vector.extract %33[0, 0, 0] : f32 from vector<1x1x1xf32>
    %cst_19 = arith.constant 2.560000e+02 : f32
    %35 = arith.divf %34, %cst_19 : f32
    %36 = vector.broadcast %35 : f32 to vector<8x32xf32>
    %37 = arith.subf %30, %36 : vector<8x32xf32>
    %38 = arith.mulf %37, %37 : vector<8x32xf32>
    %39 = vector.shape_cast %38 : vector<8x32xf32> to vector<1x8x32xf32>
    %cst_20 = arith.constant dense<0.000000e+00> : vector<1xf32>
    %40 = vector.multi_reduction <add>, %39, %cst_20 [1, 2] : vector<1x8x32xf32> to vector<1xf32>
    %41 = vector.shape_cast %40 : vector<1xf32> to vector<1x1x1xf32>
    %42 = vector.extract %41[0, 0, 0] : f32 from vector<1x1x1xf32>
    %cst_21 = arith.constant 2.560000e+02 : f32
    %43 = arith.divf %42, %cst_21 : f32
    %44 = vector.broadcast %35 : f32 to vector<8x32xf32>
    %45 = arith.subf %30, %44 : vector<8x32xf32>
    %cst_22 = arith.constant 9.99999974E-6 : f32
    %46 = arith.addf %43, %cst_22 : f32
    %47 = math.rsqrt %46 : f32
    %48 = vector.broadcast %47 : f32 to vector<8x32xf32>
    %49 = arith.mulf %45, %48 : vector<8x32xf32>
    %50 = arith.mulf %49, %1 : vector<8x32xf32>
    %51 = arith.addf %50, %3 : vector<8x32xf32>
    %52 = tpu.concatenate %28, %51 in 0 : vector<8x32xf32>, vector<8x32xf32> -> vector<16x32xf32>
    %c0_23 = arith.constant 0 : index
    %c0_24 = arith.constant 0 : index
    %c0_25 = arith.constant 0 : index
    %53 = vector.load %arg10[%c0_23, %c0_24, %c0_25] : memref<3x6x32xf32, #tpu.memory_space<vmem>>, vector<1x6x32xf32>
    %54 = vector.shape_cast %53 : vector<1x6x32xf32> to vector<6x32xf32>
    %55 = vector.extract_strided_slice %54 {offsets = [0, 0], sizes = [1, 32], strides = [1, 1]} : vector<6x32xf32> to vector<1x32xf32>
    %56 = vector.extract_strided_slice %54 {offsets = [1, 0], sizes = [1, 32], strides = [1, 1]} : vector<6x32xf32> to vector<1x32xf32>
    %57 = vector.extract_strided_slice %54 {offsets = [2, 0], sizes = [1, 32], strides = [1, 1]} : vector<6x32xf32> to vector<1x32xf32>
    %58 = vector.extract_strided_slice %54 {offsets = [3, 0], sizes = [1, 32], strides = [1, 1]} : vector<6x32xf32> to vector<1x32xf32>
    %59 = vector.extract_strided_slice %54 {offsets = [4, 0], sizes = [1, 32], strides = [1, 1]} : vector<6x32xf32> to vector<1x32xf32>
    %60 = vector.extract_strided_slice %54 {offsets = [5, 0], sizes = [1, 32], strides = [1, 1]} : vector<6x32xf32> to vector<1x32xf32>
    %c0_26 = arith.constant 0 : index
    %c0_27 = arith.constant 0 : index
    %c0_28 = arith.constant 0 : index
    %61 = vector.load %arg4[%c0_26, %c0_27, %c0_28] : memref<3x32x96xf32, #tpu.memory_space<vmem>>, vector<1x32x96xf32>
    %62 = vector.shape_cast %61 : vector<1x32x96xf32> to vector<32x96xf32>
    %cst_29 = arith.constant dense<0.000000e+00> : vector<16x96xf32>
    %63 = tpu.matmul %52, %62, %cst_29 {dimension_numbers = #tpu.dot_dimension_numbers<[1], [0], [0], [1], [0, 0, 1, 1], [], []>} : vector<16x32xf32>, vector<32x96xf32>, vector<16x96xf32> -> vector<16x96xf32>
    %c0_30 = arith.constant 0 : index
    %c0_31 = arith.constant 0 : index
    %c0_32 = arith.constant 0 : index
    %64 = vector.load %arg5[%c0_30, %c0_31, %c0_32] : memref<3x1x96xf32, #tpu.memory_space<vmem>>, vector<1x1x96xf32>
    %65 = vector.shape_cast %64 : vector<1x1x96xf32> to vector<1x96xf32>
    %66 = vector.broadcast %65 : vector<1x96xf32> to vector<16x96xf32>
    %67 = arith.addf %63, %66 : vector<16x96xf32>
    %68 = vector.extract_strided_slice %67 {offsets = [0, 0], sizes = [16, 32], strides = [1, 1]} : vector<16x96xf32> to vector<16x32xf32>
    %69 = vector.extract_strided_slice %67 {offsets = [0, 32], sizes = [16, 32], strides = [1, 1]} : vector<16x96xf32> to vector<16x32xf32>
    %70 = vector.extract_strided_slice %67 {offsets = [0, 64], sizes = [16, 32], strides = [1, 1]} : vector<16x96xf32> to vector<16x32xf32>
    %71 = vector.extract_strided_slice %68 {offsets = [0, 0], sizes = [8, 32], strides = [1, 1]} : vector<16x32xf32> to vector<8x32xf32>
    %72 = vector.extract_strided_slice %69 {offsets = [0, 0], sizes = [8, 32], strides = [1, 1]} : vector<16x32xf32> to vector<8x32xf32>
    %73 = arith.mulf %71, %72 : vector<8x32xf32>
    %74 = vector.extract_strided_slice %69 {offsets = [8, 0], sizes = [8, 32], strides = [1, 1]} : vector<16x32xf32> to vector<8x32xf32>
    %75 = arith.mulf %71, %74 : vector<8x32xf32>
    %76 = vector.extract_strided_slice %68 {offsets = [8, 0], sizes = [8, 32], strides = [1, 1]} : vector<16x32xf32> to vector<8x32xf32>
    %77 = vector.extract_strided_slice %69 {offsets = [0, 0], sizes = [8, 32], strides = [1, 1]} : vector<16x32xf32> to vector<8x32xf32>
    %78 = arith.mulf %76, %77 : vector<8x32xf32>
    %79 = vector.extract_strided_slice %69 {offsets = [8, 0], sizes = [8, 32], strides = [1, 1]} : vector<16x32xf32> to vector<8x32xf32>
    %80 = arith.mulf %76, %79 : vector<8x32xf32>
    %81 = tpu.concatenate %73, %75, %78, %80 in 0 : vector<8x32xf32>, vector<8x32xf32>, vector<8x32xf32>, vector<8x32xf32> -> vector<32x32xf32>
    %cst_33 = arith.constant dense<0.000000e+00> : vector<32x4xf32>
    %82 = tpu.matmul %81, %4, %cst_33 {dimension_numbers = #tpu.dot_dimension_numbers<[1], [0], [0], [1], [0, 0, 1, 1], [], []>} : vector<32x32xf32>, vector<32x4xf32>, vector<32x4xf32> -> vector<32x4xf32>
    %cst_34 = arith.constant 0.353553385 : f32
    %83 = vector.broadcast %cst_34 : f32 to vector<32x4xf32>
    %84 = arith.mulf %82, %83 : vector<32x4xf32>
    %85 = vector.extract_strided_slice %84 {offsets = [0, 0], sizes = [8, 4], strides = [1, 1]} : vector<32x4xf32> to vector<8x4xf32>
    %86 = vector.extract_strided_slice %84 {offsets = [8, 0], sizes = [8, 4], strides = [1, 1]} : vector<32x4xf32> to vector<8x4xf32>
    %87 = arith.maximumf %85, %86 : vector<8x4xf32>
    %88 = arith.subf %85, %87 : vector<8x4xf32>
    %89 = math.exp %88 : vector<8x4xf32>
    %90 = arith.subf %86, %87 : vector<8x4xf32>
    %91 = math.exp %90 : vector<8x4xf32>
    %92 = arith.addf %89, %91 : vector<8x4xf32>
    %93 = tpu.reciprocal %92 {approx = true} : vector<8x4xf32> -> vector<8x4xf32>
    %94 = arith.mulf %89, %93 : vector<8x4xf32>
    %95 = arith.mulf %91, %93 : vector<8x4xf32>
    %96 = vector.extract_strided_slice %84 {offsets = [16, 0], sizes = [8, 4], strides = [1, 1]} : vector<32x4xf32> to vector<8x4xf32>
    %97 = vector.extract_strided_slice %84 {offsets = [24, 0], sizes = [8, 4], strides = [1, 1]} : vector<32x4xf32> to vector<8x4xf32>
    %98 = arith.maximumf %96, %97 : vector<8x4xf32>
    %99 = arith.subf %96, %98 : vector<8x4xf32>
    %100 = math.exp %99 : vector<8x4xf32>
    %101 = arith.subf %97, %98 : vector<8x4xf32>
    %102 = math.exp %101 : vector<8x4xf32>
    %103 = arith.addf %100, %102 : vector<8x4xf32>
    %104 = tpu.reciprocal %103 {approx = true} : vector<8x4xf32> -> vector<8x4xf32>
    %105 = arith.mulf %100, %104 : vector<8x4xf32>
    %106 = arith.mulf %102, %104 : vector<8x4xf32>
    %107 = tpu.concatenate %94, %95, %105, %106 in 0 : vector<8x4xf32>, vector<8x4xf32>, vector<8x4xf32>, vector<8x4xf32> -> vector<32x4xf32>
    %cst_35 = arith.constant dense<0.000000e+00> : vector<32x32xf32>
    %108 = tpu.matmul %107, %5, %cst_35 {dimension_numbers = #tpu.dot_dimension_numbers<[1], [0], [0], [1], [0, 0, 1, 1], [], []>} : vector<32x4xf32>, vector<4x32xf32>, vector<32x32xf32> -> vector<32x32xf32>
    %109 = vector.extract_strided_slice %108 {offsets = [0, 0], sizes = [8, 32], strides = [1, 1]} : vector<32x32xf32> to vector<8x32xf32>
    %110 = vector.extract_strided_slice %70 {offsets = [0, 0], sizes = [8, 32], strides = [1, 1]} : vector<16x32xf32> to vector<8x32xf32>
    %111 = arith.mulf %109, %110 : vector<8x32xf32>
    %112 = vector.extract_strided_slice %108 {offsets = [8, 0], sizes = [8, 32], strides = [1, 1]} : vector<32x32xf32> to vector<8x32xf32>
    %113 = vector.extract_strided_slice %70 {offsets = [8, 0], sizes = [8, 32], strides = [1, 1]} : vector<16x32xf32> to vector<8x32xf32>
    %114 = arith.mulf %112, %113 : vector<8x32xf32>
    %115 = arith.addf %111, %114 : vector<8x32xf32>
    %116 = vector.extract_strided_slice %108 {offsets = [16, 0], sizes = [8, 32], strides = [1, 1]} : vector<32x32xf32> to vector<8x32xf32>
    %117 = vector.extract_strided_slice %70 {offsets = [0, 0], sizes = [8, 32], strides = [1, 1]} : vector<16x32xf32> to vector<8x32xf32>
    %118 = arith.mulf %116, %117 : vector<8x32xf32>
    %119 = vector.extract_strided_slice %108 {offsets = [24, 0], sizes = [8, 32], strides = [1, 1]} : vector<32x32xf32> to vector<8x32xf32>
    %120 = vector.extract_strided_slice %70 {offsets = [8, 0], sizes = [8, 32], strides = [1, 1]} : vector<16x32xf32> to vector<8x32xf32>
    %121 = arith.mulf %119, %120 : vector<8x32xf32>
    %122 = arith.addf %118, %121 : vector<8x32xf32>
    %123 = tpu.concatenate %115, %122 in 0 : vector<8x32xf32>, vector<8x32xf32> -> vector<16x32xf32>
    %c0_36 = arith.constant 0 : index
    %c0_37 = arith.constant 0 : index
    %c0_38 = arith.constant 0 : index
    %124 = vector.load %arg6[%c0_36, %c0_37, %c0_38] : memref<3x32x32xf32, #tpu.memory_space<vmem>>, vector<1x32x32xf32>
    %125 = vector.shape_cast %124 : vector<1x32x32xf32> to vector<32x32xf32>
    %cst_39 = arith.constant dense<0.000000e+00> : vector<16x32xf32>
    %126 = tpu.matmul %123, %125, %cst_39 {dimension_numbers = #tpu.dot_dimension_numbers<[1], [0], [0], [1], [0, 0, 1, 1], [], []>} : vector<16x32xf32>, vector<32x32xf32>, vector<16x32xf32> -> vector<16x32xf32>
    %127 = vector.broadcast %55 : vector<1x32xf32> to vector<16x32xf32>
    %128 = arith.addf %126, %127 : vector<16x32xf32>
    %129 = arith.addf %52, %128 : vector<16x32xf32>
    %cst_40 = arith.constant dense<0.000000e+00> : vector<16xf32>
    %130 = vector.multi_reduction <add>, %129, %cst_40 [1] : vector<16x32xf32> to vector<16xf32>
    %131 = vector.shape_cast %130 : vector<16xf32> to vector<16x1xf32>
    %cst_41 = arith.constant 3.200000e+01 : f32
    %132 = vector.broadcast %cst_41 : f32 to vector<16x1xf32>
    %133 = arith.divf %131, %132 : vector<16x1xf32>
    %134 = vector.broadcast %133 : vector<16x1xf32> to vector<16x32xf32>
    %135 = arith.subf %129, %134 : vector<16x32xf32>
    %136 = arith.mulf %135, %135 : vector<16x32xf32>
    %cst_42 = arith.constant dense<0.000000e+00> : vector<16xf32>
    %137 = vector.multi_reduction <add>, %136, %cst_42 [1] : vector<16x32xf32> to vector<16xf32>
    %138 = vector.shape_cast %137 : vector<16xf32> to vector<16x1xf32>
    %cst_43 = arith.constant 3.200000e+01 : f32
    %139 = vector.broadcast %cst_43 : f32 to vector<16x1xf32>
    %140 = arith.divf %138, %139 : vector<16x1xf32>
    %141 = vector.broadcast %133 : vector<16x1xf32> to vector<16x32xf32>
    %142 = arith.subf %129, %141 : vector<16x32xf32>
    %cst_44 = arith.constant 9.99999974E-6 : f32
    %143 = vector.broadcast %cst_44 : f32 to vector<16x1xf32>
    %144 = arith.addf %140, %143 : vector<16x1xf32>
    %145 = math.rsqrt %144 : vector<16x1xf32>
    %146 = vector.broadcast %145 : vector<16x1xf32> to vector<16x32xf32>
    %147 = arith.mulf %142, %146 : vector<16x32xf32>
    %148 = vector.broadcast %57 : vector<1x32xf32> to vector<16x32xf32>
    %149 = arith.mulf %147, %148 : vector<16x32xf32>
    %150 = vector.broadcast %58 : vector<1x32xf32> to vector<16x32xf32>
    %151 = arith.addf %149, %150 : vector<16x32xf32>
    %c0_45 = arith.constant 0 : index
    %c0_46 = arith.constant 0 : index
    %c0_47 = arith.constant 0 : index
    %152 = vector.load %arg7[%c0_45, %c0_46, %c0_47] : memref<3x32x512xf32, #tpu.memory_space<vmem>>, vector<1x32x512xf32>
    %153 = vector.shape_cast %152 : vector<1x32x512xf32> to vector<32x512xf32>
    %cst_48 = arith.constant dense<0.000000e+00> : vector<16x512xf32>
    %154 = tpu.matmul %151, %153, %cst_48 {dimension_numbers = #tpu.dot_dimension_numbers<[1], [0], [0], [1], [0, 0, 1, 1], [], []>} : vector<16x32xf32>, vector<32x512xf32>, vector<16x512xf32> -> vector<16x512xf32>
    %c0_49 = arith.constant 0 : index
    %c0_50 = arith.constant 0 : index
    %c0_51 = arith.constant 0 : index
    %155 = vector.load %arg8[%c0_49, %c0_50, %c0_51] : memref<3x1x512xf32, #tpu.memory_space<vmem>>, vector<1x1x512xf32>
    %156 = vector.shape_cast %155 : vector<1x1x512xf32> to vector<1x512xf32>
    %157 = vector.broadcast %156 : vector<1x512xf32> to vector<16x512xf32>
    %158 = arith.addf %154, %157 : vector<16x512xf32>
    %cst_52 = arith.constant 0.000000e+00 : f32
    %159 = vector.broadcast %cst_52 : f32 to vector<16x512xf32>
    %160 = arith.maximumf %158, %159 : vector<16x512xf32>
    %c0_53 = arith.constant 0 : index
    %c0_54 = arith.constant 0 : index
    %c0_55 = arith.constant 0 : index
    %161 = vector.load %arg9[%c0_53, %c0_54, %c0_55] : memref<3x512x32xf32, #tpu.memory_space<vmem>>, vector<1x512x32xf32>
    %162 = vector.shape_cast %161 : vector<1x512x32xf32> to vector<512x32xf32>
    %cst_56 = arith.constant dense<0.000000e+00> : vector<16x32xf32>
    %163 = tpu.matmul %160, %162, %cst_56 {dimension_numbers = #tpu.dot_dimension_numbers<[1], [0], [0], [1], [0, 0, 1, 1], [], []>} : vector<16x512xf32>, vector<512x32xf32>, vector<16x32xf32> -> vector<16x32xf32>
    %164 = vector.broadcast %56 : vector<1x32xf32> to vector<16x32xf32>
    %165 = arith.addf %163, %164 : vector<16x32xf32>
    %166 = arith.addf %151, %165 : vector<16x32xf32>
    %cst_57 = arith.constant dense<0.000000e+00> : vector<16xf32>
    %167 = vector.multi_reduction <add>, %166, %cst_57 [1] : vector<16x32xf32> to vector<16xf32>
    %168 = vector.shape_cast %167 : vector<16xf32> to vector<16x1xf32>
    %cst_58 = arith.constant 3.200000e+01 : f32
    %169 = vector.broadcast %cst_58 : f32 to vector<16x1xf32>
    %170 = arith.divf %168, %169 : vector<16x1xf32>
    %171 = vector.broadcast %170 : vector<16x1xf32> to vector<16x32xf32>
    %172 = arith.subf %166, %171 : vector<16x32xf32>
    %173 = arith.mulf %172, %172 : vector<16x32xf32>
    %cst_59 = arith.constant dense<0.000000e+00> : vector<16xf32>
    %174 = vector.multi_reduction <add>, %173, %cst_59 [1] : vector<16x32xf32> to vector<16xf32>
    %175 = vector.shape_cast %174 : vector<16xf32> to vector<16x1xf32>
    %cst_60 = arith.constant 3.200000e+01 : f32
    %176 = vector.broadcast %cst_60 : f32 to vector<16x1xf32>
    %177 = arith.divf %175, %176 : vector<16x1xf32>
    %178 = vector.broadcast %170 : vector<16x1xf32> to vector<16x32xf32>
    %179 = arith.subf %166, %178 : vector<16x32xf32>
    %cst_61 = arith.constant 9.99999974E-6 : f32
    %180 = vector.broadcast %cst_61 : f32 to vector<16x1xf32>
    %181 = arith.addf %177, %180 : vector<16x1xf32>
    %182 = math.rsqrt %181 : vector<16x1xf32>
    %183 = vector.broadcast %182 : vector<16x1xf32> to vector<16x32xf32>
    %184 = arith.mulf %179, %183 : vector<16x32xf32>
    %185 = vector.broadcast %59 : vector<1x32xf32> to vector<16x32xf32>
    %186 = arith.mulf %184, %185 : vector<16x32xf32>
    %187 = vector.broadcast %60 : vector<1x32xf32> to vector<16x32xf32>
    %188 = arith.addf %186, %187 : vector<16x32xf32>
    %c1_62 = arith.constant 1 : index
    %c0_63 = arith.constant 0 : index
    %c0_64 = arith.constant 0 : index
    %189 = vector.load %arg10[%c1_62, %c0_63, %c0_64] : memref<3x6x32xf32, #tpu.memory_space<vmem>>, vector<1x6x32xf32>
    %190 = vector.shape_cast %189 : vector<1x6x32xf32> to vector<6x32xf32>
    %191 = vector.extract_strided_slice %190 {offsets = [0, 0], sizes = [1, 32], strides = [1, 1]} : vector<6x32xf32> to vector<1x32xf32>
    %192 = vector.extract_strided_slice %190 {offsets = [1, 0], sizes = [1, 32], strides = [1, 1]} : vector<6x32xf32> to vector<1x32xf32>
    %193 = vector.extract_strided_slice %190 {offsets = [2, 0], sizes = [1, 32], strides = [1, 1]} : vector<6x32xf32> to vector<1x32xf32>
    %194 = vector.extract_strided_slice %190 {offsets = [3, 0], sizes = [1, 32], strides = [1, 1]} : vector<6x32xf32> to vector<1x32xf32>
    %195 = vector.extract_strided_slice %190 {offsets = [4, 0], sizes = [1, 32], strides = [1, 1]} : vector<6x32xf32> to vector<1x32xf32>
    %196 = vector.extract_strided_slice %190 {offsets = [5, 0], sizes = [1, 32], strides = [1, 1]} : vector<6x32xf32> to vector<1x32xf32>
    %c1_65 = arith.constant 1 : index
    %c0_66 = arith.constant 0 : index
    %c0_67 = arith.constant 0 : index
    %197 = vector.load %arg4[%c1_65, %c0_66, %c0_67] : memref<3x32x96xf32, #tpu.memory_space<vmem>>, vector<1x32x96xf32>
    %198 = vector.shape_cast %197 : vector<1x32x96xf32> to vector<32x96xf32>
    %cst_68 = arith.constant dense<0.000000e+00> : vector<16x96xf32>
    %199 = tpu.matmul %188, %198, %cst_68 {dimension_numbers = #tpu.dot_dimension_numbers<[1], [0], [0], [1], [0, 0, 1, 1], [], []>} : vector<16x32xf32>, vector<32x96xf32>, vector<16x96xf32> -> vector<16x96xf32>
    %c1_69 = arith.constant 1 : index
    %c0_70 = arith.constant 0 : index
    %c0_71 = arith.constant 0 : index
    %200 = vector.load %arg5[%c1_69, %c0_70, %c0_71] : memref<3x1x96xf32, #tpu.memory_space<vmem>>, vector<1x1x96xf32>
    %201 = vector.shape_cast %200 : vector<1x1x96xf32> to vector<1x96xf32>
    %202 = vector.broadcast %201 : vector<1x96xf32> to vector<16x96xf32>
    %203 = arith.addf %199, %202 : vector<16x96xf32>
    %204 = vector.extract_strided_slice %203 {offsets = [0, 0], sizes = [16, 32], strides = [1, 1]} : vector<16x96xf32> to vector<16x32xf32>
    %205 = vector.extract_strided_slice %203 {offsets = [0, 32], sizes = [16, 32], strides = [1, 1]} : vector<16x96xf32> to vector<16x32xf32>
    %206 = vector.extract_strided_slice %203 {offsets = [0, 64], sizes = [16, 32], strides = [1, 1]} : vector<16x96xf32> to vector<16x32xf32>
    %207 = vector.extract_strided_slice %204 {offsets = [0, 0], sizes = [8, 32], strides = [1, 1]} : vector<16x32xf32> to vector<8x32xf32>
    %208 = vector.extract_strided_slice %205 {offsets = [0, 0], sizes = [8, 32], strides = [1, 1]} : vector<16x32xf32> to vector<8x32xf32>
    %209 = arith.mulf %207, %208 : vector<8x32xf32>
    %210 = vector.extract_strided_slice %205 {offsets = [8, 0], sizes = [8, 32], strides = [1, 1]} : vector<16x32xf32> to vector<8x32xf32>
    %211 = arith.mulf %207, %210 : vector<8x32xf32>
    %212 = vector.extract_strided_slice %204 {offsets = [8, 0], sizes = [8, 32], strides = [1, 1]} : vector<16x32xf32> to vector<8x32xf32>
    %213 = vector.extract_strided_slice %205 {offsets = [0, 0], sizes = [8, 32], strides = [1, 1]} : vector<16x32xf32> to vector<8x32xf32>
    %214 = arith.mulf %212, %213 : vector<8x32xf32>
    %215 = vector.extract_strided_slice %205 {offsets = [8, 0], sizes = [8, 32], strides = [1, 1]} : vector<16x32xf32> to vector<8x32xf32>
    %216 = arith.mulf %212, %215 : vector<8x32xf32>
    %217 = tpu.concatenate %209, %211, %214, %216 in 0 : vector<8x32xf32>, vector<8x32xf32>, vector<8x32xf32>, vector<8x32xf32> -> vector<32x32xf32>
    %cst_72 = arith.constant dense<0.000000e+00> : vector<32x4xf32>
    %218 = tpu.matmul %217, %4, %cst_72 {dimension_numbers = #tpu.dot_dimension_numbers<[1], [0], [0], [1], [0, 0, 1, 1], [], []>} : vector<32x32xf32>, vector<32x4xf32>, vector<32x4xf32> -> vector<32x4xf32>
    %cst_73 = arith.constant 0.353553385 : f32
    %219 = vector.broadcast %cst_73 : f32 to vector<32x4xf32>
    %220 = arith.mulf %218, %219 : vector<32x4xf32>
    %221 = vector.extract_strided_slice %220 {offsets = [0, 0], sizes = [8, 4], strides = [1, 1]} : vector<32x4xf32> to vector<8x4xf32>
    %222 = vector.extract_strided_slice %220 {offsets = [8, 0], sizes = [8, 4], strides = [1, 1]} : vector<32x4xf32> to vector<8x4xf32>
    %223 = arith.maximumf %221, %222 : vector<8x4xf32>
    %224 = arith.subf %221, %223 : vector<8x4xf32>
    %225 = math.exp %224 : vector<8x4xf32>
    %226 = arith.subf %222, %223 : vector<8x4xf32>
    %227 = math.exp %226 : vector<8x4xf32>
    %228 = arith.addf %225, %227 : vector<8x4xf32>
    %229 = tpu.reciprocal %228 {approx = true} : vector<8x4xf32> -> vector<8x4xf32>
    %230 = arith.mulf %225, %229 : vector<8x4xf32>
    %231 = arith.mulf %227, %229 : vector<8x4xf32>
    %232 = vector.extract_strided_slice %220 {offsets = [16, 0], sizes = [8, 4], strides = [1, 1]} : vector<32x4xf32> to vector<8x4xf32>
    %233 = vector.extract_strided_slice %220 {offsets = [24, 0], sizes = [8, 4], strides = [1, 1]} : vector<32x4xf32> to vector<8x4xf32>
    %234 = arith.maximumf %232, %233 : vector<8x4xf32>
    %235 = arith.subf %232, %234 : vector<8x4xf32>
    %236 = math.exp %235 : vector<8x4xf32>
    %237 = arith.subf %233, %234 : vector<8x4xf32>
    %238 = math.exp %237 : vector<8x4xf32>
    %239 = arith.addf %236, %238 : vector<8x4xf32>
    %240 = tpu.reciprocal %239 {approx = true} : vector<8x4xf32> -> vector<8x4xf32>
    %241 = arith.mulf %236, %240 : vector<8x4xf32>
    %242 = arith.mulf %238, %240 : vector<8x4xf32>
    %243 = tpu.concatenate %230, %231, %241, %242 in 0 : vector<8x4xf32>, vector<8x4xf32>, vector<8x4xf32>, vector<8x4xf32> -> vector<32x4xf32>
    %cst_74 = arith.constant dense<0.000000e+00> : vector<32x32xf32>
    %244 = tpu.matmul %243, %5, %cst_74 {dimension_numbers = #tpu.dot_dimension_numbers<[1], [0], [0], [1], [0, 0, 1, 1], [], []>} : vector<32x4xf32>, vector<4x32xf32>, vector<32x32xf32> -> vector<32x32xf32>
    %245 = vector.extract_strided_slice %244 {offsets = [0, 0], sizes = [8, 32], strides = [1, 1]} : vector<32x32xf32> to vector<8x32xf32>
    %246 = vector.extract_strided_slice %206 {offsets = [0, 0], sizes = [8, 32], strides = [1, 1]} : vector<16x32xf32> to vector<8x32xf32>
    %247 = arith.mulf %245, %246 : vector<8x32xf32>
    %248 = vector.extract_strided_slice %244 {offsets = [8, 0], sizes = [8, 32], strides = [1, 1]} : vector<32x32xf32> to vector<8x32xf32>
    %249 = vector.extract_strided_slice %206 {offsets = [8, 0], sizes = [8, 32], strides = [1, 1]} : vector<16x32xf32> to vector<8x32xf32>
    %250 = arith.mulf %248, %249 : vector<8x32xf32>
    %251 = arith.addf %247, %250 : vector<8x32xf32>
    %252 = vector.extract_strided_slice %244 {offsets = [16, 0], sizes = [8, 32], strides = [1, 1]} : vector<32x32xf32> to vector<8x32xf32>
    %253 = vector.extract_strided_slice %206 {offsets = [0, 0], sizes = [8, 32], strides = [1, 1]} : vector<16x32xf32> to vector<8x32xf32>
    %254 = arith.mulf %252, %253 : vector<8x32xf32>
    %255 = vector.extract_strided_slice %244 {offsets = [24, 0], sizes = [8, 32], strides = [1, 1]} : vector<32x32xf32> to vector<8x32xf32>
    %256 = vector.extract_strided_slice %206 {offsets = [8, 0], sizes = [8, 32], strides = [1, 1]} : vector<16x32xf32> to vector<8x32xf32>
    %257 = arith.mulf %255, %256 : vector<8x32xf32>
    %258 = arith.addf %254, %257 : vector<8x32xf32>
    %259 = tpu.concatenate %251, %258 in 0 : vector<8x32xf32>, vector<8x32xf32> -> vector<16x32xf32>
    %c1_75 = arith.constant 1 : index
    %c0_76 = arith.constant 0 : index
    %c0_77 = arith.constant 0 : index
    %260 = vector.load %arg6[%c1_75, %c0_76, %c0_77] : memref<3x32x32xf32, #tpu.memory_space<vmem>>, vector<1x32x32xf32>
    %261 = vector.shape_cast %260 : vector<1x32x32xf32> to vector<32x32xf32>
    %cst_78 = arith.constant dense<0.000000e+00> : vector<16x32xf32>
    %262 = tpu.matmul %259, %261, %cst_78 {dimension_numbers = #tpu.dot_dimension_numbers<[1], [0], [0], [1], [0, 0, 1, 1], [], []>} : vector<16x32xf32>, vector<32x32xf32>, vector<16x32xf32> -> vector<16x32xf32>
    %263 = vector.broadcast %191 : vector<1x32xf32> to vector<16x32xf32>
    %264 = arith.addf %262, %263 : vector<16x32xf32>
    %265 = arith.addf %188, %264 : vector<16x32xf32>
    %cst_79 = arith.constant dense<0.000000e+00> : vector<16xf32>
    %266 = vector.multi_reduction <add>, %265, %cst_79 [1] : vector<16x32xf32> to vector<16xf32>
    %267 = vector.shape_cast %266 : vector<16xf32> to vector<16x1xf32>
    %cst_80 = arith.constant 3.200000e+01 : f32
    %268 = vector.broadcast %cst_80 : f32 to vector<16x1xf32>
    %269 = arith.divf %267, %268 : vector<16x1xf32>
    %270 = vector.broadcast %269 : vector<16x1xf32> to vector<16x32xf32>
    %271 = arith.subf %265, %270 : vector<16x32xf32>
    %272 = arith.mulf %271, %271 : vector<16x32xf32>
    %cst_81 = arith.constant dense<0.000000e+00> : vector<16xf32>
    %273 = vector.multi_reduction <add>, %272, %cst_81 [1] : vector<16x32xf32> to vector<16xf32>
    %274 = vector.shape_cast %273 : vector<16xf32> to vector<16x1xf32>
    %cst_82 = arith.constant 3.200000e+01 : f32
    %275 = vector.broadcast %cst_82 : f32 to vector<16x1xf32>
    %276 = arith.divf %274, %275 : vector<16x1xf32>
    %277 = vector.broadcast %269 : vector<16x1xf32> to vector<16x32xf32>
    %278 = arith.subf %265, %277 : vector<16x32xf32>
    %cst_83 = arith.constant 9.99999974E-6 : f32
    %279 = vector.broadcast %cst_83 : f32 to vector<16x1xf32>
    %280 = arith.addf %276, %279 : vector<16x1xf32>
    %281 = math.rsqrt %280 : vector<16x1xf32>
    %282 = vector.broadcast %281 : vector<16x1xf32> to vector<16x32xf32>
    %283 = arith.mulf %278, %282 : vector<16x32xf32>
    %284 = vector.broadcast %193 : vector<1x32xf32> to vector<16x32xf32>
    %285 = arith.mulf %283, %284 : vector<16x32xf32>
    %286 = vector.broadcast %194 : vector<1x32xf32> to vector<16x32xf32>
    %287 = arith.addf %285, %286 : vector<16x32xf32>
    %c1_84 = arith.constant 1 : index
    %c0_85 = arith.constant 0 : index
    %c0_86 = arith.constant 0 : index
    %288 = vector.load %arg7[%c1_84, %c0_85, %c0_86] : memref<3x32x512xf32, #tpu.memory_space<vmem>>, vector<1x32x512xf32>
    %289 = vector.shape_cast %288 : vector<1x32x512xf32> to vector<32x512xf32>
    %cst_87 = arith.constant dense<0.000000e+00> : vector<16x512xf32>
    %290 = tpu.matmul %287, %289, %cst_87 {dimension_numbers = #tpu.dot_dimension_numbers<[1], [0], [0], [1], [0, 0, 1, 1], [], []>} : vector<16x32xf32>, vector<32x512xf32>, vector<16x512xf32> -> vector<16x512xf32>
    %c1_88 = arith.constant 1 : index
    %c0_89 = arith.constant 0 : index
    %c0_90 = arith.constant 0 : index
    %291 = vector.load %arg8[%c1_88, %c0_89, %c0_90] : memref<3x1x512xf32, #tpu.memory_space<vmem>>, vector<1x1x512xf32>
    %292 = vector.shape_cast %291 : vector<1x1x512xf32> to vector<1x512xf32>
    %293 = vector.broadcast %292 : vector<1x512xf32> to vector<16x512xf32>
    %294 = arith.addf %290, %293 : vector<16x512xf32>
    %cst_91 = arith.constant 0.000000e+00 : f32
    %295 = vector.broadcast %cst_91 : f32 to vector<16x512xf32>
    %296 = arith.maximumf %294, %295 : vector<16x512xf32>
    %c1_92 = arith.constant 1 : index
    %c0_93 = arith.constant 0 : index
    %c0_94 = arith.constant 0 : index
    %297 = vector.load %arg9[%c1_92, %c0_93, %c0_94] : memref<3x512x32xf32, #tpu.memory_space<vmem>>, vector<1x512x32xf32>
    %298 = vector.shape_cast %297 : vector<1x512x32xf32> to vector<512x32xf32>
    %cst_95 = arith.constant dense<0.000000e+00> : vector<16x32xf32>
    %299 = tpu.matmul %296, %298, %cst_95 {dimension_numbers = #tpu.dot_dimension_numbers<[1], [0], [0], [1], [0, 0, 1, 1], [], []>} : vector<16x512xf32>, vector<512x32xf32>, vector<16x32xf32> -> vector<16x32xf32>
    %300 = vector.broadcast %192 : vector<1x32xf32> to vector<16x32xf32>
    %301 = arith.addf %299, %300 : vector<16x32xf32>
    %302 = arith.addf %287, %301 : vector<16x32xf32>
    %cst_96 = arith.constant dense<0.000000e+00> : vector<16xf32>
    %303 = vector.multi_reduction <add>, %302, %cst_96 [1] : vector<16x32xf32> to vector<16xf32>
    %304 = vector.shape_cast %303 : vector<16xf32> to vector<16x1xf32>
    %cst_97 = arith.constant 3.200000e+01 : f32
    %305 = vector.broadcast %cst_97 : f32 to vector<16x1xf32>
    %306 = arith.divf %304, %305 : vector<16x1xf32>
    %307 = vector.broadcast %306 : vector<16x1xf32> to vector<16x32xf32>
    %308 = arith.subf %302, %307 : vector<16x32xf32>
    %309 = arith.mulf %308, %308 : vector<16x32xf32>
    %cst_98 = arith.constant dense<0.000000e+00> : vector<16xf32>
    %310 = vector.multi_reduction <add>, %309, %cst_98 [1] : vector<16x32xf32> to vector<16xf32>
    %311 = vector.shape_cast %310 : vector<16xf32> to vector<16x1xf32>
    %cst_99 = arith.constant 3.200000e+01 : f32
    %312 = vector.broadcast %cst_99 : f32 to vector<16x1xf32>
    %313 = arith.divf %311, %312 : vector<16x1xf32>
    %314 = vector.broadcast %306 : vector<16x1xf32> to vector<16x32xf32>
    %315 = arith.subf %302, %314 : vector<16x32xf32>
    %cst_100 = arith.constant 9.99999974E-6 : f32
    %316 = vector.broadcast %cst_100 : f32 to vector<16x1xf32>
    %317 = arith.addf %313, %316 : vector<16x1xf32>
    %318 = math.rsqrt %317 : vector<16x1xf32>
    %319 = vector.broadcast %318 : vector<16x1xf32> to vector<16x32xf32>
    %320 = arith.mulf %315, %319 : vector<16x32xf32>
    %321 = vector.broadcast %195 : vector<1x32xf32> to vector<16x32xf32>
    %322 = arith.mulf %320, %321 : vector<16x32xf32>
    %323 = vector.broadcast %196 : vector<1x32xf32> to vector<16x32xf32>
    %324 = arith.addf %322, %323 : vector<16x32xf32>
    %c2 = arith.constant 2 : index
    %c0_101 = arith.constant 0 : index
    %c0_102 = arith.constant 0 : index
    %325 = vector.load %arg10[%c2, %c0_101, %c0_102] : memref<3x6x32xf32, #tpu.memory_space<vmem>>, vector<1x6x32xf32>
    %326 = vector.shape_cast %325 : vector<1x6x32xf32> to vector<6x32xf32>
    %327 = vector.extract_strided_slice %326 {offsets = [0, 0], sizes = [1, 32], strides = [1, 1]} : vector<6x32xf32> to vector<1x32xf32>
    %328 = vector.extract_strided_slice %326 {offsets = [1, 0], sizes = [1, 32], strides = [1, 1]} : vector<6x32xf32> to vector<1x32xf32>
    %329 = vector.extract_strided_slice %326 {offsets = [2, 0], sizes = [1, 32], strides = [1, 1]} : vector<6x32xf32> to vector<1x32xf32>
    %330 = vector.extract_strided_slice %326 {offsets = [3, 0], sizes = [1, 32], strides = [1, 1]} : vector<6x32xf32> to vector<1x32xf32>
    %331 = vector.extract_strided_slice %326 {offsets = [4, 0], sizes = [1, 32], strides = [1, 1]} : vector<6x32xf32> to vector<1x32xf32>
    %332 = vector.extract_strided_slice %326 {offsets = [5, 0], sizes = [1, 32], strides = [1, 1]} : vector<6x32xf32> to vector<1x32xf32>
    %c2_103 = arith.constant 2 : index
    %c0_104 = arith.constant 0 : index
    %c0_105 = arith.constant 0 : index
    %333 = vector.load %arg4[%c2_103, %c0_104, %c0_105] : memref<3x32x96xf32, #tpu.memory_space<vmem>>, vector<1x32x96xf32>
    %334 = vector.shape_cast %333 : vector<1x32x96xf32> to vector<32x96xf32>
    %cst_106 = arith.constant dense<0.000000e+00> : vector<16x96xf32>
    %335 = tpu.matmul %324, %334, %cst_106 {dimension_numbers = #tpu.dot_dimension_numbers<[1], [0], [0], [1], [0, 0, 1, 1], [], []>} : vector<16x32xf32>, vector<32x96xf32>, vector<16x96xf32> -> vector<16x96xf32>
    %c2_107 = arith.constant 2 : index
    %c0_108 = arith.constant 0 : index
    %c0_109 = arith.constant 0 : index
    %336 = vector.load %arg5[%c2_107, %c0_108, %c0_109] : memref<3x1x96xf32, #tpu.memory_space<vmem>>, vector<1x1x96xf32>
    %337 = vector.shape_cast %336 : vector<1x1x96xf32> to vector<1x96xf32>
    %338 = vector.broadcast %337 : vector<1x96xf32> to vector<16x96xf32>
    %339 = arith.addf %335, %338 : vector<16x96xf32>
    %340 = vector.extract_strided_slice %339 {offsets = [0, 0], sizes = [16, 32], strides = [1, 1]} : vector<16x96xf32> to vector<16x32xf32>
    %341 = vector.extract_strided_slice %339 {offsets = [0, 32], sizes = [16, 32], strides = [1, 1]} : vector<16x96xf32> to vector<16x32xf32>
    %342 = vector.extract_strided_slice %339 {offsets = [0, 64], sizes = [16, 32], strides = [1, 1]} : vector<16x96xf32> to vector<16x32xf32>
    %343 = vector.extract_strided_slice %340 {offsets = [0, 0], sizes = [8, 32], strides = [1, 1]} : vector<16x32xf32> to vector<8x32xf32>
    %344 = vector.extract_strided_slice %341 {offsets = [0, 0], sizes = [8, 32], strides = [1, 1]} : vector<16x32xf32> to vector<8x32xf32>
    %345 = arith.mulf %343, %344 : vector<8x32xf32>
    %346 = vector.extract_strided_slice %341 {offsets = [8, 0], sizes = [8, 32], strides = [1, 1]} : vector<16x32xf32> to vector<8x32xf32>
    %347 = arith.mulf %343, %346 : vector<8x32xf32>
    %348 = vector.extract_strided_slice %340 {offsets = [8, 0], sizes = [8, 32], strides = [1, 1]} : vector<16x32xf32> to vector<8x32xf32>
    %349 = vector.extract_strided_slice %341 {offsets = [0, 0], sizes = [8, 32], strides = [1, 1]} : vector<16x32xf32> to vector<8x32xf32>
    %350 = arith.mulf %348, %349 : vector<8x32xf32>
    %351 = vector.extract_strided_slice %341 {offsets = [8, 0], sizes = [8, 32], strides = [1, 1]} : vector<16x32xf32> to vector<8x32xf32>
    %352 = arith.mulf %348, %351 : vector<8x32xf32>
    %353 = tpu.concatenate %345, %347, %350, %352 in 0 : vector<8x32xf32>, vector<8x32xf32>, vector<8x32xf32>, vector<8x32xf32> -> vector<32x32xf32>
    %cst_110 = arith.constant dense<0.000000e+00> : vector<32x4xf32>
    %354 = tpu.matmul %353, %4, %cst_110 {dimension_numbers = #tpu.dot_dimension_numbers<[1], [0], [0], [1], [0, 0, 1, 1], [], []>} : vector<32x32xf32>, vector<32x4xf32>, vector<32x4xf32> -> vector<32x4xf32>
    %cst_111 = arith.constant 0.353553385 : f32
    %355 = vector.broadcast %cst_111 : f32 to vector<32x4xf32>
    %356 = arith.mulf %354, %355 : vector<32x4xf32>
    %357 = vector.extract_strided_slice %356 {offsets = [0, 0], sizes = [8, 4], strides = [1, 1]} : vector<32x4xf32> to vector<8x4xf32>
    %358 = vector.extract_strided_slice %356 {offsets = [8, 0], sizes = [8, 4], strides = [1, 1]} : vector<32x4xf32> to vector<8x4xf32>
    %359 = arith.maximumf %357, %358 : vector<8x4xf32>
    %360 = arith.subf %357, %359 : vector<8x4xf32>
    %361 = math.exp %360 : vector<8x4xf32>
    %362 = arith.subf %358, %359 : vector<8x4xf32>
    %363 = math.exp %362 : vector<8x4xf32>
    %364 = arith.addf %361, %363 : vector<8x4xf32>
    %365 = tpu.reciprocal %364 {approx = true} : vector<8x4xf32> -> vector<8x4xf32>
    %366 = arith.mulf %361, %365 : vector<8x4xf32>
    %367 = arith.mulf %363, %365 : vector<8x4xf32>
    %368 = vector.extract_strided_slice %356 {offsets = [16, 0], sizes = [8, 4], strides = [1, 1]} : vector<32x4xf32> to vector<8x4xf32>
    %369 = vector.extract_strided_slice %356 {offsets = [24, 0], sizes = [8, 4], strides = [1, 1]} : vector<32x4xf32> to vector<8x4xf32>
    %370 = arith.maximumf %368, %369 : vector<8x4xf32>
    %371 = arith.subf %368, %370 : vector<8x4xf32>
    %372 = math.exp %371 : vector<8x4xf32>
    %373 = arith.subf %369, %370 : vector<8x4xf32>
    %374 = math.exp %373 : vector<8x4xf32>
    %375 = arith.addf %372, %374 : vector<8x4xf32>
    %376 = tpu.reciprocal %375 {approx = true} : vector<8x4xf32> -> vector<8x4xf32>
    %377 = arith.mulf %372, %376 : vector<8x4xf32>
    %378 = arith.mulf %374, %376 : vector<8x4xf32>
    %379 = tpu.concatenate %366, %367, %377, %378 in 0 : vector<8x4xf32>, vector<8x4xf32>, vector<8x4xf32>, vector<8x4xf32> -> vector<32x4xf32>
    %cst_112 = arith.constant dense<0.000000e+00> : vector<32x32xf32>
    %380 = tpu.matmul %379, %5, %cst_112 {dimension_numbers = #tpu.dot_dimension_numbers<[1], [0], [0], [1], [0, 0, 1, 1], [], []>} : vector<32x4xf32>, vector<4x32xf32>, vector<32x32xf32> -> vector<32x32xf32>
    %381 = vector.extract_strided_slice %380 {offsets = [0, 0], sizes = [8, 32], strides = [1, 1]} : vector<32x32xf32> to vector<8x32xf32>
    %382 = vector.extract_strided_slice %342 {offsets = [0, 0], sizes = [8, 32], strides = [1, 1]} : vector<16x32xf32> to vector<8x32xf32>
    %383 = arith.mulf %381, %382 : vector<8x32xf32>
    %384 = vector.extract_strided_slice %380 {offsets = [8, 0], sizes = [8, 32], strides = [1, 1]} : vector<32x32xf32> to vector<8x32xf32>
    %385 = vector.extract_strided_slice %342 {offsets = [8, 0], sizes = [8, 32], strides = [1, 1]} : vector<16x32xf32> to vector<8x32xf32>
    %386 = arith.mulf %384, %385 : vector<8x32xf32>
    %387 = arith.addf %383, %386 : vector<8x32xf32>
    %388 = vector.extract_strided_slice %380 {offsets = [16, 0], sizes = [8, 32], strides = [1, 1]} : vector<32x32xf32> to vector<8x32xf32>
    %389 = vector.extract_strided_slice %342 {offsets = [0, 0], sizes = [8, 32], strides = [1, 1]} : vector<16x32xf32> to vector<8x32xf32>
    %390 = arith.mulf %388, %389 : vector<8x32xf32>
    %391 = vector.extract_strided_slice %380 {offsets = [24, 0], sizes = [8, 32], strides = [1, 1]} : vector<32x32xf32> to vector<8x32xf32>
    %392 = vector.extract_strided_slice %342 {offsets = [8, 0], sizes = [8, 32], strides = [1, 1]} : vector<16x32xf32> to vector<8x32xf32>
    %393 = arith.mulf %391, %392 : vector<8x32xf32>
    %394 = arith.addf %390, %393 : vector<8x32xf32>
    %395 = tpu.concatenate %387, %394 in 0 : vector<8x32xf32>, vector<8x32xf32> -> vector<16x32xf32>
    %c2_113 = arith.constant 2 : index
    %c0_114 = arith.constant 0 : index
    %c0_115 = arith.constant 0 : index
    %396 = vector.load %arg6[%c2_113, %c0_114, %c0_115] : memref<3x32x32xf32, #tpu.memory_space<vmem>>, vector<1x32x32xf32>
    %397 = vector.shape_cast %396 : vector<1x32x32xf32> to vector<32x32xf32>
    %cst_116 = arith.constant dense<0.000000e+00> : vector<16x32xf32>
    %398 = tpu.matmul %395, %397, %cst_116 {dimension_numbers = #tpu.dot_dimension_numbers<[1], [0], [0], [1], [0, 0, 1, 1], [], []>} : vector<16x32xf32>, vector<32x32xf32>, vector<16x32xf32> -> vector<16x32xf32>
    %399 = vector.broadcast %327 : vector<1x32xf32> to vector<16x32xf32>
    %400 = arith.addf %398, %399 : vector<16x32xf32>
    %401 = arith.addf %324, %400 : vector<16x32xf32>
    %cst_117 = arith.constant dense<0.000000e+00> : vector<16xf32>
    %402 = vector.multi_reduction <add>, %401, %cst_117 [1] : vector<16x32xf32> to vector<16xf32>
    %403 = vector.shape_cast %402 : vector<16xf32> to vector<16x1xf32>
    %cst_118 = arith.constant 3.200000e+01 : f32
    %404 = vector.broadcast %cst_118 : f32 to vector<16x1xf32>
    %405 = arith.divf %403, %404 : vector<16x1xf32>
    %406 = vector.broadcast %405 : vector<16x1xf32> to vector<16x32xf32>
    %407 = arith.subf %401, %406 : vector<16x32xf32>
    %408 = arith.mulf %407, %407 : vector<16x32xf32>
    %cst_119 = arith.constant dense<0.000000e+00> : vector<16xf32>
    %409 = vector.multi_reduction <add>, %408, %cst_119 [1] : vector<16x32xf32> to vector<16xf32>
    %410 = vector.shape_cast %409 : vector<16xf32> to vector<16x1xf32>
    %cst_120 = arith.constant 3.200000e+01 : f32
    %411 = vector.broadcast %cst_120 : f32 to vector<16x1xf32>
    %412 = arith.divf %410, %411 : vector<16x1xf32>
    %413 = vector.broadcast %405 : vector<16x1xf32> to vector<16x32xf32>
    %414 = arith.subf %401, %413 : vector<16x32xf32>
    %cst_121 = arith.constant 9.99999974E-6 : f32
    %415 = vector.broadcast %cst_121 : f32 to vector<16x1xf32>
    %416 = arith.addf %412, %415 : vector<16x1xf32>
    %417 = math.rsqrt %416 : vector<16x1xf32>
    %418 = vector.broadcast %417 : vector<16x1xf32> to vector<16x32xf32>
    %419 = arith.mulf %414, %418 : vector<16x32xf32>
    %420 = vector.broadcast %329 : vector<1x32xf32> to vector<16x32xf32>
    %421 = arith.mulf %419, %420 : vector<16x32xf32>
    %422 = vector.broadcast %330 : vector<1x32xf32> to vector<16x32xf32>
    %423 = arith.addf %421, %422 : vector<16x32xf32>
    %c2_122 = arith.constant 2 : index
    %c0_123 = arith.constant 0 : index
    %c0_124 = arith.constant 0 : index
    %424 = vector.load %arg7[%c2_122, %c0_123, %c0_124] : memref<3x32x512xf32, #tpu.memory_space<vmem>>, vector<1x32x512xf32>
    %425 = vector.shape_cast %424 : vector<1x32x512xf32> to vector<32x512xf32>
    %cst_125 = arith.constant dense<0.000000e+00> : vector<16x512xf32>
    %426 = tpu.matmul %423, %425, %cst_125 {dimension_numbers = #tpu.dot_dimension_numbers<[1], [0], [0], [1], [0, 0, 1, 1], [], []>} : vector<16x32xf32>, vector<32x512xf32>, vector<16x512xf32> -> vector<16x512xf32>
    %c2_126 = arith.constant 2 : index
    %c0_127 = arith.constant 0 : index
    %c0_128 = arith.constant 0 : index
    %427 = vector.load %arg8[%c2_126, %c0_127, %c0_128] : memref<3x1x512xf32, #tpu.memory_space<vmem>>, vector<1x1x512xf32>
    %428 = vector.shape_cast %427 : vector<1x1x512xf32> to vector<1x512xf32>
    %429 = vector.broadcast %428 : vector<1x512xf32> to vector<16x512xf32>
    %430 = arith.addf %426, %429 : vector<16x512xf32>
    %cst_129 = arith.constant 0.000000e+00 : f32
    %431 = vector.broadcast %cst_129 : f32 to vector<16x512xf32>
    %432 = arith.maximumf %430, %431 : vector<16x512xf32>
    %c2_130 = arith.constant 2 : index
    %c0_131 = arith.constant 0 : index
    %c0_132 = arith.constant 0 : index
    %433 = vector.load %arg9[%c2_130, %c0_131, %c0_132] : memref<3x512x32xf32, #tpu.memory_space<vmem>>, vector<1x512x32xf32>
    %434 = vector.shape_cast %433 : vector<1x512x32xf32> to vector<512x32xf32>
    %cst_133 = arith.constant dense<0.000000e+00> : vector<16x32xf32>
    %435 = tpu.matmul %432, %434, %cst_133 {dimension_numbers = #tpu.dot_dimension_numbers<[1], [0], [0], [1], [0, 0, 1, 1], [], []>} : vector<16x512xf32>, vector<512x32xf32>, vector<16x32xf32> -> vector<16x32xf32>
    %436 = vector.broadcast %328 : vector<1x32xf32> to vector<16x32xf32>
    %437 = arith.addf %435, %436 : vector<16x32xf32>
    %438 = arith.addf %423, %437 : vector<16x32xf32>
    %cst_134 = arith.constant dense<0.000000e+00> : vector<16xf32>
    %439 = vector.multi_reduction <add>, %438, %cst_134 [1] : vector<16x32xf32> to vector<16xf32>
    %440 = vector.shape_cast %439 : vector<16xf32> to vector<16x1xf32>
    %cst_135 = arith.constant 3.200000e+01 : f32
    %441 = vector.broadcast %cst_135 : f32 to vector<16x1xf32>
    %442 = arith.divf %440, %441 : vector<16x1xf32>
    %443 = vector.broadcast %442 : vector<16x1xf32> to vector<16x32xf32>
    %444 = arith.subf %438, %443 : vector<16x32xf32>
    %445 = arith.mulf %444, %444 : vector<16x32xf32>
    %cst_136 = arith.constant dense<0.000000e+00> : vector<16xf32>
    %446 = vector.multi_reduction <add>, %445, %cst_136 [1] : vector<16x32xf32> to vector<16xf32>
    %447 = vector.shape_cast %446 : vector<16xf32> to vector<16x1xf32>
    %cst_137 = arith.constant 3.200000e+01 : f32
    %448 = vector.broadcast %cst_137 : f32 to vector<16x1xf32>
    %449 = arith.divf %447, %448 : vector<16x1xf32>
    %450 = vector.broadcast %442 : vector<16x1xf32> to vector<16x32xf32>
    %451 = arith.subf %438, %450 : vector<16x32xf32>
    %cst_138 = arith.constant 9.99999974E-6 : f32
    %452 = vector.broadcast %cst_138 : f32 to vector<16x1xf32>
    %453 = arith.addf %449, %452 : vector<16x1xf32>
    %454 = math.rsqrt %453 : vector<16x1xf32>
    %455 = vector.broadcast %454 : vector<16x1xf32> to vector<16x32xf32>
    %456 = arith.mulf %451, %455 : vector<16x32xf32>
    %457 = vector.broadcast %331 : vector<1x32xf32> to vector<16x32xf32>
    %458 = arith.mulf %456, %457 : vector<16x32xf32>
    %459 = vector.broadcast %332 : vector<1x32xf32> to vector<16x32xf32>
    %460 = arith.addf %458, %459 : vector<16x32xf32>
    %c0_139 = arith.constant 0 : index
    %c0_140 = arith.constant 0 : index
    %461 = vector.load %arg11[%c0_139, %c0_140] : memref<16x2xf32, #tpu.memory_space<vmem>>, vector<16x1xf32>
    %462 = vector.broadcast %461 : vector<16x1xf32> to vector<16x32xf32>
    %463 = arith.mulf %460, %462 : vector<16x32xf32>
    %c0_141 = arith.constant 0 : index
    %c1_142 = arith.constant 1 : index
    %464 = vector.load %arg11[%c0_141, %c1_142] : memref<16x2xf32, #tpu.memory_space<vmem>>, vector<16x1xf32>
    %465 = vector.broadcast %464 : vector<16x1xf32> to vector<16x32xf32>
    %466 = arith.addf %463, %465 : vector<16x32xf32>
    %c0_143 = arith.constant 0 : index
    %c0_144 = arith.constant 0 : index
    %467 = vector.load %arg12[%c0_143, %c0_144] : memref<32x256xf32, #tpu.memory_space<vmem>>, vector<32x256xf32>
    %cst_145 = arith.constant dense<0.000000e+00> : vector<16x256xf32>
    %468 = tpu.matmul %466, %467, %cst_145 {dimension_numbers = #tpu.dot_dimension_numbers<[1], [0], [0], [1], [0, 0, 1, 1], [], []>} : vector<16x32xf32>, vector<32x256xf32>, vector<16x256xf32> -> vector<16x256xf32>
    %cst_146 = arith.constant 0.000000e+00 : f32
    %469 = vector.broadcast %cst_146 : f32 to vector<16x256xf32>
    %470 = arith.maximumf %468, %469 : vector<16x256xf32>
    %c0_147 = arith.constant 0 : index
    %c0_148 = arith.constant 0 : index
    %471 = vector.load %arg13[%c0_147, %c0_148] : memref<8x512xf32, #tpu.memory_space<vmem>>, vector<8x512xf32>
    %c0_149 = arith.constant 0 : index
    %c0_150 = arith.constant 0 : index
    %472 = vector.load %arg14[%c0_149, %c0_150] : memref<8x128xf32, #tpu.memory_space<vmem>>, vector<8x128xf32>
    %c0_151 = arith.constant 0 : index
    %c0_152 = arith.constant 0 : index
    %473 = vector.load %arg15[%c0_151, %c0_152] : memref<8x24xf32, #tpu.memory_space<vmem>>, vector<8x24xf32>
    %c0_153 = arith.constant 0 : index
    %c0_154 = arith.constant 0 : index
    %474 = vector.load %arg16[%c0_153, %c0_154] : memref<8x3xf32, #tpu.memory_space<vmem>>, vector<8x1xf32>
    %c0_155 = arith.constant 0 : index
    %c1_156 = arith.constant 1 : index
    %475 = vector.load %arg16[%c0_155, %c1_156] : memref<8x3xf32, #tpu.memory_space<vmem>>, vector<8x1xf32>
    %c0_157 = arith.constant 0 : index
    %c2_158 = arith.constant 2 : index
    %476 = vector.load %arg16[%c0_157, %c2_158] : memref<8x3xf32, #tpu.memory_space<vmem>>, vector<8x1xf32>
    %477 = vector.extract_strided_slice %470 {offsets = [0, 0], sizes = [8, 256], strides = [1, 1]} : vector<16x256xf32> to vector<8x256xf32>
    %478 = vector.extract_strided_slice %477 {offsets = [0, 0], sizes = [8, 193], strides = [1, 1]} : vector<8x256xf32> to vector<8x193xf32>
    %479 = vector.extract_strided_slice %477 {offsets = [0, 1], sizes = [8, 193], strides = [1, 1]} : vector<8x256xf32> to vector<8x193xf32>
    %480 = vector.extract_strided_slice %477 {offsets = [0, 2], sizes = [8, 193], strides = [1, 1]} : vector<8x256xf32> to vector<8x193xf32>
    %481 = vector.extract_strided_slice %477 {offsets = [0, 3], sizes = [8, 193], strides = [1, 1]} : vector<8x256xf32> to vector<8x193xf32>
    %482 = vector.extract_strided_slice %477 {offsets = [0, 4], sizes = [8, 193], strides = [1, 1]} : vector<8x256xf32> to vector<8x193xf32>
    %483 = vector.extract_strided_slice %477 {offsets = [0, 5], sizes = [8, 193], strides = [1, 1]} : vector<8x256xf32> to vector<8x193xf32>
    %484 = vector.extract_strided_slice %477 {offsets = [0, 6], sizes = [8, 193], strides = [1, 1]} : vector<8x256xf32> to vector<8x193xf32>
    %485 = vector.extract_strided_slice %477 {offsets = [0, 7], sizes = [8, 193], strides = [1, 1]} : vector<8x256xf32> to vector<8x193xf32>
    %486 = vector.extract_strided_slice %477 {offsets = [0, 8], sizes = [8, 193], strides = [1, 1]} : vector<8x256xf32> to vector<8x193xf32>
    %487 = vector.extract_strided_slice %477 {offsets = [0, 9], sizes = [8, 193], strides = [1, 1]} : vector<8x256xf32> to vector<8x193xf32>
    %488 = vector.extract_strided_slice %477 {offsets = [0, 10], sizes = [8, 193], strides = [1, 1]} : vector<8x256xf32> to vector<8x193xf32>
    %489 = vector.extract_strided_slice %477 {offsets = [0, 11], sizes = [8, 193], strides = [1, 1]} : vector<8x256xf32> to vector<8x193xf32>
    %490 = vector.extract_strided_slice %477 {offsets = [0, 12], sizes = [8, 193], strides = [1, 1]} : vector<8x256xf32> to vector<8x193xf32>
    %491 = vector.extract_strided_slice %477 {offsets = [0, 13], sizes = [8, 193], strides = [1, 1]} : vector<8x256xf32> to vector<8x193xf32>
    %492 = vector.extract_strided_slice %477 {offsets = [0, 14], sizes = [8, 193], strides = [1, 1]} : vector<8x256xf32> to vector<8x193xf32>
    %493 = vector.extract_strided_slice %477 {offsets = [0, 15], sizes = [8, 193], strides = [1, 1]} : vector<8x256xf32> to vector<8x193xf32>
    %494 = vector.extract_strided_slice %477 {offsets = [0, 16], sizes = [8, 193], strides = [1, 1]} : vector<8x256xf32> to vector<8x193xf32>
    %495 = vector.extract_strided_slice %477 {offsets = [0, 17], sizes = [8, 193], strides = [1, 1]} : vector<8x256xf32> to vector<8x193xf32>
    %496 = vector.extract_strided_slice %477 {offsets = [0, 18], sizes = [8, 193], strides = [1, 1]} : vector<8x256xf32> to vector<8x193xf32>
    %497 = vector.extract_strided_slice %477 {offsets = [0, 19], sizes = [8, 193], strides = [1, 1]} : vector<8x256xf32> to vector<8x193xf32>
    %498 = vector.extract_strided_slice %477 {offsets = [0, 20], sizes = [8, 193], strides = [1, 1]} : vector<8x256xf32> to vector<8x193xf32>
    %499 = vector.extract_strided_slice %477 {offsets = [0, 21], sizes = [8, 193], strides = [1, 1]} : vector<8x256xf32> to vector<8x193xf32>
    %500 = vector.extract_strided_slice %477 {offsets = [0, 22], sizes = [8, 193], strides = [1, 1]} : vector<8x256xf32> to vector<8x193xf32>
    %501 = vector.extract_strided_slice %477 {offsets = [0, 23], sizes = [8, 193], strides = [1, 1]} : vector<8x256xf32> to vector<8x193xf32>
    %502 = vector.extract_strided_slice %477 {offsets = [0, 24], sizes = [8, 193], strides = [1, 1]} : vector<8x256xf32> to vector<8x193xf32>
    %503 = vector.extract_strided_slice %477 {offsets = [0, 25], sizes = [8, 193], strides = [1, 1]} : vector<8x256xf32> to vector<8x193xf32>
    %504 = vector.extract_strided_slice %477 {offsets = [0, 26], sizes = [8, 193], strides = [1, 1]} : vector<8x256xf32> to vector<8x193xf32>
    %505 = vector.extract_strided_slice %477 {offsets = [0, 27], sizes = [8, 193], strides = [1, 1]} : vector<8x256xf32> to vector<8x193xf32>
    %506 = vector.extract_strided_slice %477 {offsets = [0, 28], sizes = [8, 193], strides = [1, 1]} : vector<8x256xf32> to vector<8x193xf32>
    %507 = vector.extract_strided_slice %477 {offsets = [0, 29], sizes = [8, 193], strides = [1, 1]} : vector<8x256xf32> to vector<8x193xf32>
    %508 = vector.extract_strided_slice %477 {offsets = [0, 30], sizes = [8, 193], strides = [1, 1]} : vector<8x256xf32> to vector<8x193xf32>
    %509 = vector.extract_strided_slice %477 {offsets = [0, 31], sizes = [8, 193], strides = [1, 1]} : vector<8x256xf32> to vector<8x193xf32>
    %510 = vector.extract_strided_slice %477 {offsets = [0, 32], sizes = [8, 193], strides = [1, 1]} : vector<8x256xf32> to vector<8x193xf32>
    %511 = vector.extract_strided_slice %477 {offsets = [0, 33], sizes = [8, 193], strides = [1, 1]} : vector<8x256xf32> to vector<8x193xf32>
    %512 = vector.extract_strided_slice %477 {offsets = [0, 34], sizes = [8, 193], strides = [1, 1]} : vector<8x256xf32> to vector<8x193xf32>
    %513 = vector.extract_strided_slice %477 {offsets = [0, 35], sizes = [8, 193], strides = [1, 1]} : vector<8x256xf32> to vector<8x193xf32>
    %514 = vector.extract_strided_slice %477 {offsets = [0, 36], sizes = [8, 193], strides = [1, 1]} : vector<8x256xf32> to vector<8x193xf32>
    %515 = vector.extract_strided_slice %477 {offsets = [0, 37], sizes = [8, 193], strides = [1, 1]} : vector<8x256xf32> to vector<8x193xf32>
    %516 = vector.extract_strided_slice %477 {offsets = [0, 38], sizes = [8, 193], strides = [1, 1]} : vector<8x256xf32> to vector<8x193xf32>
    %517 = vector.extract_strided_slice %477 {offsets = [0, 39], sizes = [8, 193], strides = [1, 1]} : vector<8x256xf32> to vector<8x193xf32>
    %518 = vector.extract_strided_slice %477 {offsets = [0, 40], sizes = [8, 193], strides = [1, 1]} : vector<8x256xf32> to vector<8x193xf32>
    %519 = vector.extract_strided_slice %477 {offsets = [0, 41], sizes = [8, 193], strides = [1, 1]} : vector<8x256xf32> to vector<8x193xf32>
    %520 = vector.extract_strided_slice %477 {offsets = [0, 42], sizes = [8, 193], strides = [1, 1]} : vector<8x256xf32> to vector<8x193xf32>
    %521 = vector.extract_strided_slice %477 {offsets = [0, 43], sizes = [8, 193], strides = [1, 1]} : vector<8x256xf32> to vector<8x193xf32>
    %522 = vector.extract_strided_slice %477 {offsets = [0, 44], sizes = [8, 193], strides = [1, 1]} : vector<8x256xf32> to vector<8x193xf32>
    %523 = vector.extract_strided_slice %477 {offsets = [0, 45], sizes = [8, 193], strides = [1, 1]} : vector<8x256xf32> to vector<8x193xf32>
    %524 = vector.extract_strided_slice %477 {offsets = [0, 46], sizes = [8, 193], strides = [1, 1]} : vector<8x256xf32> to vector<8x193xf32>
    %525 = vector.extract_strided_slice %477 {offsets = [0, 47], sizes = [8, 193], strides = [1, 1]} : vector<8x256xf32> to vector<8x193xf32>
    %526 = vector.extract_strided_slice %477 {offsets = [0, 48], sizes = [8, 193], strides = [1, 1]} : vector<8x256xf32> to vector<8x193xf32>
    %527 = vector.extract_strided_slice %477 {offsets = [0, 49], sizes = [8, 193], strides = [1, 1]} : vector<8x256xf32> to vector<8x193xf32>
    %528 = vector.extract_strided_slice %477 {offsets = [0, 50], sizes = [8, 193], strides = [1, 1]} : vector<8x256xf32> to vector<8x193xf32>
    %529 = vector.extract_strided_slice %477 {offsets = [0, 51], sizes = [8, 193], strides = [1, 1]} : vector<8x256xf32> to vector<8x193xf32>
    %530 = vector.extract_strided_slice %477 {offsets = [0, 52], sizes = [8, 193], strides = [1, 1]} : vector<8x256xf32> to vector<8x193xf32>
    %531 = vector.extract_strided_slice %477 {offsets = [0, 53], sizes = [8, 193], strides = [1, 1]} : vector<8x256xf32> to vector<8x193xf32>
    %532 = vector.extract_strided_slice %477 {offsets = [0, 54], sizes = [8, 193], strides = [1, 1]} : vector<8x256xf32> to vector<8x193xf32>
    %533 = vector.extract_strided_slice %477 {offsets = [0, 55], sizes = [8, 193], strides = [1, 1]} : vector<8x256xf32> to vector<8x193xf32>
    %534 = vector.extract_strided_slice %477 {offsets = [0, 56], sizes = [8, 193], strides = [1, 1]} : vector<8x256xf32> to vector<8x193xf32>
    %535 = vector.extract_strided_slice %477 {offsets = [0, 57], sizes = [8, 193], strides = [1, 1]} : vector<8x256xf32> to vector<8x193xf32>
    %536 = vector.extract_strided_slice %477 {offsets = [0, 58], sizes = [8, 193], strides = [1, 1]} : vector<8x256xf32> to vector<8x193xf32>
    %537 = vector.extract_strided_slice %477 {offsets = [0, 59], sizes = [8, 193], strides = [1, 1]} : vector<8x256xf32> to vector<8x193xf32>
    %538 = vector.extract_strided_slice %477 {offsets = [0, 60], sizes = [8, 193], strides = [1, 1]} : vector<8x256xf32> to vector<8x193xf32>
    %539 = vector.extract_strided_slice %477 {offsets = [0, 61], sizes = [8, 193], strides = [1, 1]} : vector<8x256xf32> to vector<8x193xf32>
    %540 = vector.extract_strided_slice %477 {offsets = [0, 62], sizes = [8, 193], strides = [1, 1]} : vector<8x256xf32> to vector<8x193xf32>
    %541 = vector.extract_strided_slice %477 {offsets = [0, 63], sizes = [8, 193], strides = [1, 1]} : vector<8x256xf32> to vector<8x193xf32>
    %542 = tpu.concatenate %478, %479, %480, %481, %482, %483, %484, %485, %486, %487, %488, %489, %490, %491, %492, %493 in 0 : vector<8x193xf32>, vector<8x193xf32>, vector<8x193xf32>, vector<8x193xf32>, vector<8x193xf32>, vector<8x193xf32>, vector<8x193xf32>, vector<8x193xf32>, vector<8x193xf32>, vector<8x193xf32>, vector<8x193xf32>, vector<8x193xf32>, vector<8x193xf32>, vector<8x193xf32>, vector<8x193xf32>, vector<8x193xf32> -> vector<128x193xf32>
    %543 = tpu.concatenate %494, %495, %496, %497, %498, %499, %500, %501, %502, %503, %504, %505, %506, %507, %508, %509 in 0 : vector<8x193xf32>, vector<8x193xf32>, vector<8x193xf32>, vector<8x193xf32>, vector<8x193xf32>, vector<8x193xf32>, vector<8x193xf32>, vector<8x193xf32>, vector<8x193xf32>, vector<8x193xf32>, vector<8x193xf32>, vector<8x193xf32>, vector<8x193xf32>, vector<8x193xf32>, vector<8x193xf32>, vector<8x193xf32> -> vector<128x193xf32>
    %544 = tpu.concatenate %510, %511, %512, %513, %514, %515, %516, %517, %518, %519, %520, %521, %522, %523, %524, %525 in 0 : vector<8x193xf32>, vector<8x193xf32>, vector<8x193xf32>, vector<8x193xf32>, vector<8x193xf32>, vector<8x193xf32>, vector<8x193xf32>, vector<8x193xf32>, vector<8x193xf32>, vector<8x193xf32>, vector<8x193xf32>, vector<8x193xf32>, vector<8x193xf32>, vector<8x193xf32>, vector<8x193xf32>, vector<8x193xf32> -> vector<128x193xf32>
    %545 = tpu.concatenate %526, %527, %528, %529, %530, %531, %532, %533, %534, %535, %536, %537, %538, %539, %540, %541 in 0 : vector<8x193xf32>, vector<8x193xf32>, vector<8x193xf32>, vector<8x193xf32>, vector<8x193xf32>, vector<8x193xf32>, vector<8x193xf32>, vector<8x193xf32>, vector<8x193xf32>, vector<8x193xf32>, vector<8x193xf32>, vector<8x193xf32>, vector<8x193xf32>, vector<8x193xf32>, vector<8x193xf32>, vector<8x193xf32> -> vector<128x193xf32>
    %546 = tpu.concatenate %542, %543, %544, %545 in 0 : vector<128x193xf32>, vector<128x193xf32>, vector<128x193xf32>, vector<128x193xf32> -> vector<512x193xf32>
    %cst_159 = arith.constant dense<0.000000e+00> : vector<8x193xf32>
    %547 = tpu.matmul %471, %546, %cst_159 {dimension_numbers = #tpu.dot_dimension_numbers<[1], [0], [0], [1], [0, 0, 1, 1], [], []>} : vector<8x512xf32>, vector<512x193xf32>, vector<8x193xf32> -> vector<8x193xf32>
    %548 = vector.broadcast %474 : vector<8x1xf32> to vector<8x193xf32>
    %549 = arith.addf %547, %548 : vector<8x193xf32>
    %550 = vector.extract_strided_slice %549 {offsets = [0, 0], sizes = [8, 191], strides = [1, 1]} : vector<8x193xf32> to vector<8x191xf32>
    %551 = vector.extract_strided_slice %549 {offsets = [0, 1], sizes = [8, 191], strides = [1, 1]} : vector<8x193xf32> to vector<8x191xf32>
    %552 = arith.maximumf %550, %551 : vector<8x191xf32>
    %553 = vector.extract_strided_slice %549 {offsets = [0, 2], sizes = [8, 191], strides = [1, 1]} : vector<8x193xf32> to vector<8x191xf32>
    %554 = arith.maximumf %552, %553 : vector<8x191xf32>
    %555 = vector.extract_strided_slice %554 {offsets = [0, 0], sizes = [8, 176], strides = [1, 1]} : vector<8x191xf32> to vector<8x176xf32>
    %556 = vector.extract_strided_slice %554 {offsets = [0, 1], sizes = [8, 176], strides = [1, 1]} : vector<8x191xf32> to vector<8x176xf32>
    %557 = vector.extract_strided_slice %554 {offsets = [0, 2], sizes = [8, 176], strides = [1, 1]} : vector<8x191xf32> to vector<8x176xf32>
    %558 = vector.extract_strided_slice %554 {offsets = [0, 3], sizes = [8, 176], strides = [1, 1]} : vector<8x191xf32> to vector<8x176xf32>
    %559 = vector.extract_strided_slice %554 {offsets = [0, 4], sizes = [8, 176], strides = [1, 1]} : vector<8x191xf32> to vector<8x176xf32>
    %560 = vector.extract_strided_slice %554 {offsets = [0, 5], sizes = [8, 176], strides = [1, 1]} : vector<8x191xf32> to vector<8x176xf32>
    %561 = vector.extract_strided_slice %554 {offsets = [0, 6], sizes = [8, 176], strides = [1, 1]} : vector<8x191xf32> to vector<8x176xf32>
    %562 = vector.extract_strided_slice %554 {offsets = [0, 7], sizes = [8, 176], strides = [1, 1]} : vector<8x191xf32> to vector<8x176xf32>
    %563 = vector.extract_strided_slice %554 {offsets = [0, 8], sizes = [8, 176], strides = [1, 1]} : vector<8x191xf32> to vector<8x176xf32>
    %564 = vector.extract_strided_slice %554 {offsets = [0, 9], sizes = [8, 176], strides = [1, 1]} : vector<8x191xf32> to vector<8x176xf32>
    %565 = vector.extract_strided_slice %554 {offsets = [0, 10], sizes = [8, 176], strides = [1, 1]} : vector<8x191xf32> to vector<8x176xf32>
    %566 = vector.extract_strided_slice %554 {offsets = [0, 11], sizes = [8, 176], strides = [1, 1]} : vector<8x191xf32> to vector<8x176xf32>
    %567 = vector.extract_strided_slice %554 {offsets = [0, 12], sizes = [8, 176], strides = [1, 1]} : vector<8x191xf32> to vector<8x176xf32>
    %568 = vector.extract_strided_slice %554 {offsets = [0, 13], sizes = [8, 176], strides = [1, 1]} : vector<8x191xf32> to vector<8x176xf32>
    %569 = vector.extract_strided_slice %554 {offsets = [0, 14], sizes = [8, 176], strides = [1, 1]} : vector<8x191xf32> to vector<8x176xf32>
    %570 = vector.extract_strided_slice %554 {offsets = [0, 15], sizes = [8, 176], strides = [1, 1]} : vector<8x191xf32> to vector<8x176xf32>
    %571 = tpu.concatenate %555, %556, %557, %558, %559, %560, %561, %562, %563, %564, %565, %566, %567, %568, %569, %570 in 0 : vector<8x176xf32>, vector<8x176xf32>, vector<8x176xf32>, vector<8x176xf32>, vector<8x176xf32>, vector<8x176xf32>, vector<8x176xf32>, vector<8x176xf32>, vector<8x176xf32>, vector<8x176xf32>, vector<8x176xf32>, vector<8x176xf32>, vector<8x176xf32>, vector<8x176xf32>, vector<8x176xf32>, vector<8x176xf32> -> vector<128x176xf32>
    %cst_160 = arith.constant dense<0.000000e+00> : vector<8x176xf32>
    %572 = tpu.matmul %472, %571, %cst_160 {dimension_numbers = #tpu.dot_dimension_numbers<[1], [0], [0], [1], [0, 0, 1, 1], [], []>} : vector<8x128xf32>, vector<128x176xf32>, vector<8x176xf32> -> vector<8x176xf32>
    %573 = vector.broadcast %475 : vector<8x1xf32> to vector<8x176xf32>
    %574 = arith.addf %572, %573 : vector<8x176xf32>
    %575 = vector.extract_strided_slice %574 {offsets = [0, 0], sizes = [8, 174], strides = [1, 1]} : vector<8x176xf32> to vector<8x174xf32>
    %576 = vector.extract_strided_slice %574 {offsets = [0, 1], sizes = [8, 174], strides = [1, 1]} : vector<8x176xf32> to vector<8x174xf32>
    %577 = arith.maximumf %575, %576 : vector<8x174xf32>
    %578 = vector.extract_strided_slice %574 {offsets = [0, 2], sizes = [8, 174], strides = [1, 1]} : vector<8x176xf32> to vector<8x174xf32>
    %579 = arith.maximumf %577, %578 : vector<8x174xf32>
    %580 = vector.extract_strided_slice %579 {offsets = [0, 0], sizes = [8, 172], strides = [1, 1]} : vector<8x174xf32> to vector<8x172xf32>
    %581 = vector.extract_strided_slice %579 {offsets = [0, 1], sizes = [8, 172], strides = [1, 1]} : vector<8x174xf32> to vector<8x172xf32>
    %582 = vector.extract_strided_slice %579 {offsets = [0, 2], sizes = [8, 172], strides = [1, 1]} : vector<8x174xf32> to vector<8x172xf32>
    %583 = tpu.concatenate %580, %581, %582 in 0 : vector<8x172xf32>, vector<8x172xf32>, vector<8x172xf32> -> vector<24x172xf32>
    %cst_161 = arith.constant dense<0.000000e+00> : vector<8x172xf32>
    %584 = tpu.matmul %473, %583, %cst_161 {dimension_numbers = #tpu.dot_dimension_numbers<[1], [0], [0], [1], [0, 0, 1, 1], [], []>} : vector<8x24xf32>, vector<24x172xf32>, vector<8x172xf32> -> vector<8x172xf32>
    %585 = vector.broadcast %476 : vector<8x1xf32> to vector<8x172xf32>
    %586 = arith.addf %584, %585 : vector<8x172xf32>
    %587 = vector.extract_strided_slice %586 {offsets = [0, 0], sizes = [8, 170], strides = [1, 1]} : vector<8x172xf32> to vector<8x170xf32>
    %588 = vector.extract_strided_slice %586 {offsets = [0, 1], sizes = [8, 170], strides = [1, 1]} : vector<8x172xf32> to vector<8x170xf32>
    %589 = arith.maximumf %587, %588 : vector<8x170xf32>
    %590 = vector.extract_strided_slice %586 {offsets = [0, 2], sizes = [8, 170], strides = [1, 1]} : vector<8x172xf32> to vector<8x170xf32>
    %591 = arith.maximumf %589, %590 : vector<8x170xf32>
    %cst_162 = arith.constant dense<0.000000e+00> : vector<8xf32>
    %592 = vector.multi_reduction <add>, %591, %cst_162 [1] : vector<8x170xf32> to vector<8xf32>
    %593 = vector.shape_cast %592 : vector<8xf32> to vector<8x1xf32>
    %cst_163 = arith.constant 1.700000e+02 : f32
    %594 = vector.broadcast %cst_163 : f32 to vector<8x1xf32>
    %595 = arith.divf %593, %594 : vector<8x1xf32>
    %596 = math.tanh %595 : vector<8x1xf32>
    %597 = vector.broadcast %596 : vector<8x1xf32> to vector<8x170xf32>
    %598 = arith.mulf %597, %591 : vector<8x170xf32>
    %cst_164 = arith.constant dense<0.000000e+00> : vector<170xf32>
    %599 = vector.multi_reduction <add>, %598, %cst_164 [0] : vector<8x170xf32> to vector<170xf32>
    %600 = vector.shape_cast %599 : vector<170xf32> to vector<1x170xf32>
    %cst_165 = arith.constant 8.000000e+00 : f32
    %601 = vector.broadcast %cst_165 : f32 to vector<1x170xf32>
    %602 = arith.divf %600, %601 : vector<1x170xf32>
    %603 = vector.extract_strided_slice %460 {offsets = [7, 0], sizes = [1, 32], strides = [1, 1]} : vector<16x32xf32> to vector<1x32xf32>
    %604 = tpu.concatenate %603, %602 in 1 : vector<1x32xf32>, vector<1x170xf32> -> vector<1x202xf32>
    %605 = vector.extract_strided_slice %470 {offsets = [8, 0], sizes = [8, 256], strides = [1, 1]} : vector<16x256xf32> to vector<8x256xf32>
    %606 = vector.extract_strided_slice %605 {offsets = [0, 0], sizes = [8, 193], strides = [1, 1]} : vector<8x256xf32> to vector<8x193xf32>
    %607 = vector.extract_strided_slice %605 {offsets = [0, 1], sizes = [8, 193], strides = [1, 1]} : vector<8x256xf32> to vector<8x193xf32>
    %608 = vector.extract_strided_slice %605 {offsets = [0, 2], sizes = [8, 193], strides = [1, 1]} : vector<8x256xf32> to vector<8x193xf32>
    %609 = vector.extract_strided_slice %605 {offsets = [0, 3], sizes = [8, 193], strides = [1, 1]} : vector<8x256xf32> to vector<8x193xf32>
    %610 = vector.extract_strided_slice %605 {offsets = [0, 4], sizes = [8, 193], strides = [1, 1]} : vector<8x256xf32> to vector<8x193xf32>
    %611 = vector.extract_strided_slice %605 {offsets = [0, 5], sizes = [8, 193], strides = [1, 1]} : vector<8x256xf32> to vector<8x193xf32>
    %612 = vector.extract_strided_slice %605 {offsets = [0, 6], sizes = [8, 193], strides = [1, 1]} : vector<8x256xf32> to vector<8x193xf32>
    %613 = vector.extract_strided_slice %605 {offsets = [0, 7], sizes = [8, 193], strides = [1, 1]} : vector<8x256xf32> to vector<8x193xf32>
    %614 = vector.extract_strided_slice %605 {offsets = [0, 8], sizes = [8, 193], strides = [1, 1]} : vector<8x256xf32> to vector<8x193xf32>
    %615 = vector.extract_strided_slice %605 {offsets = [0, 9], sizes = [8, 193], strides = [1, 1]} : vector<8x256xf32> to vector<8x193xf32>
    %616 = vector.extract_strided_slice %605 {offsets = [0, 10], sizes = [8, 193], strides = [1, 1]} : vector<8x256xf32> to vector<8x193xf32>
    %617 = vector.extract_strided_slice %605 {offsets = [0, 11], sizes = [8, 193], strides = [1, 1]} : vector<8x256xf32> to vector<8x193xf32>
    %618 = vector.extract_strided_slice %605 {offsets = [0, 12], sizes = [8, 193], strides = [1, 1]} : vector<8x256xf32> to vector<8x193xf32>
    %619 = vector.extract_strided_slice %605 {offsets = [0, 13], sizes = [8, 193], strides = [1, 1]} : vector<8x256xf32> to vector<8x193xf32>
    %620 = vector.extract_strided_slice %605 {offsets = [0, 14], sizes = [8, 193], strides = [1, 1]} : vector<8x256xf32> to vector<8x193xf32>
    %621 = vector.extract_strided_slice %605 {offsets = [0, 15], sizes = [8, 193], strides = [1, 1]} : vector<8x256xf32> to vector<8x193xf32>
    %622 = vector.extract_strided_slice %605 {offsets = [0, 16], sizes = [8, 193], strides = [1, 1]} : vector<8x256xf32> to vector<8x193xf32>
    %623 = vector.extract_strided_slice %605 {offsets = [0, 17], sizes = [8, 193], strides = [1, 1]} : vector<8x256xf32> to vector<8x193xf32>
    %624 = vector.extract_strided_slice %605 {offsets = [0, 18], sizes = [8, 193], strides = [1, 1]} : vector<8x256xf32> to vector<8x193xf32>
    %625 = vector.extract_strided_slice %605 {offsets = [0, 19], sizes = [8, 193], strides = [1, 1]} : vector<8x256xf32> to vector<8x193xf32>
    %626 = vector.extract_strided_slice %605 {offsets = [0, 20], sizes = [8, 193], strides = [1, 1]} : vector<8x256xf32> to vector<8x193xf32>
    %627 = vector.extract_strided_slice %605 {offsets = [0, 21], sizes = [8, 193], strides = [1, 1]} : vector<8x256xf32> to vector<8x193xf32>
    %628 = vector.extract_strided_slice %605 {offsets = [0, 22], sizes = [8, 193], strides = [1, 1]} : vector<8x256xf32> to vector<8x193xf32>
    %629 = vector.extract_strided_slice %605 {offsets = [0, 23], sizes = [8, 193], strides = [1, 1]} : vector<8x256xf32> to vector<8x193xf32>
    %630 = vector.extract_strided_slice %605 {offsets = [0, 24], sizes = [8, 193], strides = [1, 1]} : vector<8x256xf32> to vector<8x193xf32>
    %631 = vector.extract_strided_slice %605 {offsets = [0, 25], sizes = [8, 193], strides = [1, 1]} : vector<8x256xf32> to vector<8x193xf32>
    %632 = vector.extract_strided_slice %605 {offsets = [0, 26], sizes = [8, 193], strides = [1, 1]} : vector<8x256xf32> to vector<8x193xf32>
    %633 = vector.extract_strided_slice %605 {offsets = [0, 27], sizes = [8, 193], strides = [1, 1]} : vector<8x256xf32> to vector<8x193xf32>
    %634 = vector.extract_strided_slice %605 {offsets = [0, 28], sizes = [8, 193], strides = [1, 1]} : vector<8x256xf32> to vector<8x193xf32>
    %635 = vector.extract_strided_slice %605 {offsets = [0, 29], sizes = [8, 193], strides = [1, 1]} : vector<8x256xf32> to vector<8x193xf32>
    %636 = vector.extract_strided_slice %605 {offsets = [0, 30], sizes = [8, 193], strides = [1, 1]} : vector<8x256xf32> to vector<8x193xf32>
    %637 = vector.extract_strided_slice %605 {offsets = [0, 31], sizes = [8, 193], strides = [1, 1]} : vector<8x256xf32> to vector<8x193xf32>
    %638 = vector.extract_strided_slice %605 {offsets = [0, 32], sizes = [8, 193], strides = [1, 1]} : vector<8x256xf32> to vector<8x193xf32>
    %639 = vector.extract_strided_slice %605 {offsets = [0, 33], sizes = [8, 193], strides = [1, 1]} : vector<8x256xf32> to vector<8x193xf32>
    %640 = vector.extract_strided_slice %605 {offsets = [0, 34], sizes = [8, 193], strides = [1, 1]} : vector<8x256xf32> to vector<8x193xf32>
    %641 = vector.extract_strided_slice %605 {offsets = [0, 35], sizes = [8, 193], strides = [1, 1]} : vector<8x256xf32> to vector<8x193xf32>
    %642 = vector.extract_strided_slice %605 {offsets = [0, 36], sizes = [8, 193], strides = [1, 1]} : vector<8x256xf32> to vector<8x193xf32>
    %643 = vector.extract_strided_slice %605 {offsets = [0, 37], sizes = [8, 193], strides = [1, 1]} : vector<8x256xf32> to vector<8x193xf32>
    %644 = vector.extract_strided_slice %605 {offsets = [0, 38], sizes = [8, 193], strides = [1, 1]} : vector<8x256xf32> to vector<8x193xf32>
    %645 = vector.extract_strided_slice %605 {offsets = [0, 39], sizes = [8, 193], strides = [1, 1]} : vector<8x256xf32> to vector<8x193xf32>
    %646 = vector.extract_strided_slice %605 {offsets = [0, 40], sizes = [8, 193], strides = [1, 1]} : vector<8x256xf32> to vector<8x193xf32>
    %647 = vector.extract_strided_slice %605 {offsets = [0, 41], sizes = [8, 193], strides = [1, 1]} : vector<8x256xf32> to vector<8x193xf32>
    %648 = vector.extract_strided_slice %605 {offsets = [0, 42], sizes = [8, 193], strides = [1, 1]} : vector<8x256xf32> to vector<8x193xf32>
    %649 = vector.extract_strided_slice %605 {offsets = [0, 43], sizes = [8, 193], strides = [1, 1]} : vector<8x256xf32> to vector<8x193xf32>
    %650 = vector.extract_strided_slice %605 {offsets = [0, 44], sizes = [8, 193], strides = [1, 1]} : vector<8x256xf32> to vector<8x193xf32>
    %651 = vector.extract_strided_slice %605 {offsets = [0, 45], sizes = [8, 193], strides = [1, 1]} : vector<8x256xf32> to vector<8x193xf32>
    %652 = vector.extract_strided_slice %605 {offsets = [0, 46], sizes = [8, 193], strides = [1, 1]} : vector<8x256xf32> to vector<8x193xf32>
    %653 = vector.extract_strided_slice %605 {offsets = [0, 47], sizes = [8, 193], strides = [1, 1]} : vector<8x256xf32> to vector<8x193xf32>
    %654 = vector.extract_strided_slice %605 {offsets = [0, 48], sizes = [8, 193], strides = [1, 1]} : vector<8x256xf32> to vector<8x193xf32>
    %655 = vector.extract_strided_slice %605 {offsets = [0, 49], sizes = [8, 193], strides = [1, 1]} : vector<8x256xf32> to vector<8x193xf32>
    %656 = vector.extract_strided_slice %605 {offsets = [0, 50], sizes = [8, 193], strides = [1, 1]} : vector<8x256xf32> to vector<8x193xf32>
    %657 = vector.extract_strided_slice %605 {offsets = [0, 51], sizes = [8, 193], strides = [1, 1]} : vector<8x256xf32> to vector<8x193xf32>
    %658 = vector.extract_strided_slice %605 {offsets = [0, 52], sizes = [8, 193], strides = [1, 1]} : vector<8x256xf32> to vector<8x193xf32>
    %659 = vector.extract_strided_slice %605 {offsets = [0, 53], sizes = [8, 193], strides = [1, 1]} : vector<8x256xf32> to vector<8x193xf32>
    %660 = vector.extract_strided_slice %605 {offsets = [0, 54], sizes = [8, 193], strides = [1, 1]} : vector<8x256xf32> to vector<8x193xf32>
    %661 = vector.extract_strided_slice %605 {offsets = [0, 55], sizes = [8, 193], strides = [1, 1]} : vector<8x256xf32> to vector<8x193xf32>
    %662 = vector.extract_strided_slice %605 {offsets = [0, 56], sizes = [8, 193], strides = [1, 1]} : vector<8x256xf32> to vector<8x193xf32>
    %663 = vector.extract_strided_slice %605 {offsets = [0, 57], sizes = [8, 193], strides = [1, 1]} : vector<8x256xf32> to vector<8x193xf32>
    %664 = vector.extract_strided_slice %605 {offsets = [0, 58], sizes = [8, 193], strides = [1, 1]} : vector<8x256xf32> to vector<8x193xf32>
    %665 = vector.extract_strided_slice %605 {offsets = [0, 59], sizes = [8, 193], strides = [1, 1]} : vector<8x256xf32> to vector<8x193xf32>
    %666 = vector.extract_strided_slice %605 {offsets = [0, 60], sizes = [8, 193], strides = [1, 1]} : vector<8x256xf32> to vector<8x193xf32>
    %667 = vector.extract_strided_slice %605 {offsets = [0, 61], sizes = [8, 193], strides = [1, 1]} : vector<8x256xf32> to vector<8x193xf32>
    %668 = vector.extract_strided_slice %605 {offsets = [0, 62], sizes = [8, 193], strides = [1, 1]} : vector<8x256xf32> to vector<8x193xf32>
    %669 = vector.extract_strided_slice %605 {offsets = [0, 63], sizes = [8, 193], strides = [1, 1]} : vector<8x256xf32> to vector<8x193xf32>
    %670 = tpu.concatenate %606, %607, %608, %609, %610, %611, %612, %613, %614, %615, %616, %617, %618, %619, %620, %621 in 0 : vector<8x193xf32>, vector<8x193xf32>, vector<8x193xf32>, vector<8x193xf32>, vector<8x193xf32>, vector<8x193xf32>, vector<8x193xf32>, vector<8x193xf32>, vector<8x193xf32>, vector<8x193xf32>, vector<8x193xf32>, vector<8x193xf32>, vector<8x193xf32>, vector<8x193xf32>, vector<8x193xf32>, vector<8x193xf32> -> vector<128x193xf32>
    %671 = tpu.concatenate %622, %623, %624, %625, %626, %627, %628, %629, %630, %631, %632, %633, %634, %635, %636, %637 in 0 : vector<8x193xf32>, vector<8x193xf32>, vector<8x193xf32>, vector<8x193xf32>, vector<8x193xf32>, vector<8x193xf32>, vector<8x193xf32>, vector<8x193xf32>, vector<8x193xf32>, vector<8x193xf32>, vector<8x193xf32>, vector<8x193xf32>, vector<8x193xf32>, vector<8x193xf32>, vector<8x193xf32>, vector<8x193xf32> -> vector<128x193xf32>
    %672 = tpu.concatenate %638, %639, %640, %641, %642, %643, %644, %645, %646, %647, %648, %649, %650, %651, %652, %653 in 0 : vector<8x193xf32>, vector<8x193xf32>, vector<8x193xf32>, vector<8x193xf32>, vector<8x193xf32>, vector<8x193xf32>, vector<8x193xf32>, vector<8x193xf32>, vector<8x193xf32>, vector<8x193xf32>, vector<8x193xf32>, vector<8x193xf32>, vector<8x193xf32>, vector<8x193xf32>, vector<8x193xf32>, vector<8x193xf32> -> vector<128x193xf32>
    %673 = tpu.concatenate %654, %655, %656, %657, %658, %659, %660, %661, %662, %663, %664, %665, %666, %667, %668, %669 in 0 : vector<8x193xf32>, vector<8x193xf32>, vector<8x193xf32>, vector<8x193xf32>, vector<8x193xf32>, vector<8x193xf32>, vector<8x193xf32>, vector<8x193xf32>, vector<8x193xf32>, vector<8x193xf32>, vector<8x193xf32>, vector<8x193xf32>, vector<8x193xf32>, vector<8x193xf32>, vector<8x193xf32>, vector<8x193xf32> -> vector<128x193xf32>
    %674 = tpu.concatenate %670, %671, %672, %673 in 0 : vector<128x193xf32>, vector<128x193xf32>, vector<128x193xf32>, vector<128x193xf32> -> vector<512x193xf32>
    %cst_166 = arith.constant dense<0.000000e+00> : vector<8x193xf32>
    %675 = tpu.matmul %471, %674, %cst_166 {dimension_numbers = #tpu.dot_dimension_numbers<[1], [0], [0], [1], [0, 0, 1, 1], [], []>} : vector<8x512xf32>, vector<512x193xf32>, vector<8x193xf32> -> vector<8x193xf32>
    %676 = vector.broadcast %474 : vector<8x1xf32> to vector<8x193xf32>
    %677 = arith.addf %675, %676 : vector<8x193xf32>
    %678 = vector.extract_strided_slice %677 {offsets = [0, 0], sizes = [8, 191], strides = [1, 1]} : vector<8x193xf32> to vector<8x191xf32>
    %679 = vector.extract_strided_slice %677 {offsets = [0, 1], sizes = [8, 191], strides = [1, 1]} : vector<8x193xf32> to vector<8x191xf32>
    %680 = arith.maximumf %678, %679 : vector<8x191xf32>
    %681 = vector.extract_strided_slice %677 {offsets = [0, 2], sizes = [8, 191], strides = [1, 1]} : vector<8x193xf32> to vector<8x191xf32>
    %682 = arith.maximumf %680, %681 : vector<8x191xf32>
    %683 = vector.extract_strided_slice %682 {offsets = [0, 0], sizes = [8, 176], strides = [1, 1]} : vector<8x191xf32> to vector<8x176xf32>
    %684 = vector.extract_strided_slice %682 {offsets = [0, 1], sizes = [8, 176], strides = [1, 1]} : vector<8x191xf32> to vector<8x176xf32>
    %685 = vector.extract_strided_slice %682 {offsets = [0, 2], sizes = [8, 176], strides = [1, 1]} : vector<8x191xf32> to vector<8x176xf32>
    %686 = vector.extract_strided_slice %682 {offsets = [0, 3], sizes = [8, 176], strides = [1, 1]} : vector<8x191xf32> to vector<8x176xf32>
    %687 = vector.extract_strided_slice %682 {offsets = [0, 4], sizes = [8, 176], strides = [1, 1]} : vector<8x191xf32> to vector<8x176xf32>
    %688 = vector.extract_strided_slice %682 {offsets = [0, 5], sizes = [8, 176], strides = [1, 1]} : vector<8x191xf32> to vector<8x176xf32>
    %689 = vector.extract_strided_slice %682 {offsets = [0, 6], sizes = [8, 176], strides = [1, 1]} : vector<8x191xf32> to vector<8x176xf32>
    %690 = vector.extract_strided_slice %682 {offsets = [0, 7], sizes = [8, 176], strides = [1, 1]} : vector<8x191xf32> to vector<8x176xf32>
    %691 = vector.extract_strided_slice %682 {offsets = [0, 8], sizes = [8, 176], strides = [1, 1]} : vector<8x191xf32> to vector<8x176xf32>
    %692 = vector.extract_strided_slice %682 {offsets = [0, 9], sizes = [8, 176], strides = [1, 1]} : vector<8x191xf32> to vector<8x176xf32>
    %693 = vector.extract_strided_slice %682 {offsets = [0, 10], sizes = [8, 176], strides = [1, 1]} : vector<8x191xf32> to vector<8x176xf32>
    %694 = vector.extract_strided_slice %682 {offsets = [0, 11], sizes = [8, 176], strides = [1, 1]} : vector<8x191xf32> to vector<8x176xf32>
    %695 = vector.extract_strided_slice %682 {offsets = [0, 12], sizes = [8, 176], strides = [1, 1]} : vector<8x191xf32> to vector<8x176xf32>
    %696 = vector.extract_strided_slice %682 {offsets = [0, 13], sizes = [8, 176], strides = [1, 1]} : vector<8x191xf32> to vector<8x176xf32>
    %697 = vector.extract_strided_slice %682 {offsets = [0, 14], sizes = [8, 176], strides = [1, 1]} : vector<8x191xf32> to vector<8x176xf32>
    %698 = vector.extract_strided_slice %682 {offsets = [0, 15], sizes = [8, 176], strides = [1, 1]} : vector<8x191xf32> to vector<8x176xf32>
    %699 = tpu.concatenate %683, %684, %685, %686, %687, %688, %689, %690, %691, %692, %693, %694, %695, %696, %697, %698 in 0 : vector<8x176xf32>, vector<8x176xf32>, vector<8x176xf32>, vector<8x176xf32>, vector<8x176xf32>, vector<8x176xf32>, vector<8x176xf32>, vector<8x176xf32>, vector<8x176xf32>, vector<8x176xf32>, vector<8x176xf32>, vector<8x176xf32>, vector<8x176xf32>, vector<8x176xf32>, vector<8x176xf32>, vector<8x176xf32> -> vector<128x176xf32>
    %cst_167 = arith.constant dense<0.000000e+00> : vector<8x176xf32>
    %700 = tpu.matmul %472, %699, %cst_167 {dimension_numbers = #tpu.dot_dimension_numbers<[1], [0], [0], [1], [0, 0, 1, 1], [], []>} : vector<8x128xf32>, vector<128x176xf32>, vector<8x176xf32> -> vector<8x176xf32>
    %701 = vector.broadcast %475 : vector<8x1xf32> to vector<8x176xf32>
    %702 = arith.addf %700, %701 : vector<8x176xf32>
    %703 = vector.extract_strided_slice %702 {offsets = [0, 0], sizes = [8, 174], strides = [1, 1]} : vector<8x176xf32> to vector<8x174xf32>
    %704 = vector.extract_strided_slice %702 {offsets = [0, 1], sizes = [8, 174], strides = [1, 1]} : vector<8x176xf32> to vector<8x174xf32>
    %705 = arith.maximumf %703, %704 : vector<8x174xf32>
    %706 = vector.extract_strided_slice %702 {offsets = [0, 2], sizes = [8, 174], strides = [1, 1]} : vector<8x176xf32> to vector<8x174xf32>
    %707 = arith.maximumf %705, %706 : vector<8x174xf32>
    %708 = vector.extract_strided_slice %707 {offsets = [0, 0], sizes = [8, 172], strides = [1, 1]} : vector<8x174xf32> to vector<8x172xf32>
    %709 = vector.extract_strided_slice %707 {offsets = [0, 1], sizes = [8, 172], strides = [1, 1]} : vector<8x174xf32> to vector<8x172xf32>
    %710 = vector.extract_strided_slice %707 {offsets = [0, 2], sizes = [8, 172], strides = [1, 1]} : vector<8x174xf32> to vector<8x172xf32>
    %711 = tpu.concatenate %708, %709, %710 in 0 : vector<8x172xf32>, vector<8x172xf32>, vector<8x172xf32> -> vector<24x172xf32>
    %cst_168 = arith.constant dense<0.000000e+00> : vector<8x172xf32>
    %712 = tpu.matmul %473, %711, %cst_168 {dimension_numbers = #tpu.dot_dimension_numbers<[1], [0], [0], [1], [0, 0, 1, 1], [], []>} : vector<8x24xf32>, vector<24x172xf32>, vector<8x172xf32> -> vector<8x172xf32>
    %713 = vector.broadcast %476 : vector<8x1xf32> to vector<8x172xf32>
    %714 = arith.addf %712, %713 : vector<8x172xf32>
    %715 = vector.extract_strided_slice %714 {offsets = [0, 0], sizes = [8, 170], strides = [1, 1]} : vector<8x172xf32> to vector<8x170xf32>
    %716 = vector.extract_strided_slice %714 {offsets = [0, 1], sizes = [8, 170], strides = [1, 1]} : vector<8x172xf32> to vector<8x170xf32>
    %717 = arith.maximumf %715, %716 : vector<8x170xf32>
    %718 = vector.extract_strided_slice %714 {offsets = [0, 2], sizes = [8, 170], strides = [1, 1]} : vector<8x172xf32> to vector<8x170xf32>
    %719 = arith.maximumf %717, %718 : vector<8x170xf32>
    %cst_169 = arith.constant dense<0.000000e+00> : vector<8xf32>
    %720 = vector.multi_reduction <add>, %719, %cst_169 [1] : vector<8x170xf32> to vector<8xf32>
    %721 = vector.shape_cast %720 : vector<8xf32> to vector<8x1xf32>
    %cst_170 = arith.constant 1.700000e+02 : f32
    %722 = vector.broadcast %cst_170 : f32 to vector<8x1xf32>
    %723 = arith.divf %721, %722 : vector<8x1xf32>
    %724 = math.tanh %723 : vector<8x1xf32>
    %725 = vector.broadcast %724 : vector<8x1xf32> to vector<8x170xf32>
    %726 = arith.mulf %725, %719 : vector<8x170xf32>
    %cst_171 = arith.constant dense<0.000000e+00> : vector<170xf32>
    %727 = vector.multi_reduction <add>, %726, %cst_171 [0] : vector<8x170xf32> to vector<170xf32>
    %728 = vector.shape_cast %727 : vector<170xf32> to vector<1x170xf32>
    %cst_172 = arith.constant 8.000000e+00 : f32
    %729 = vector.broadcast %cst_172 : f32 to vector<1x170xf32>
    %730 = arith.divf %728, %729 : vector<1x170xf32>
    %731 = vector.extract_strided_slice %460 {offsets = [15, 0], sizes = [1, 32], strides = [1, 1]} : vector<16x32xf32> to vector<1x32xf32>
    %732 = tpu.concatenate %731, %730 in 1 : vector<1x32xf32>, vector<1x170xf32> -> vector<1x202xf32>
    %733 = tpu.concatenate %604, %732 in 0 : vector<1x202xf32>, vector<1x202xf32> -> vector<2x202xf32>
    %c0_173 = arith.constant 0 : index
    %c0_174 = arith.constant 0 : index
    %734 = vector.load %arg17[%c0_173, %c0_174] : memref<202x64xf32, #tpu.memory_space<vmem>>, vector<202x64xf32>
    %cst_175 = arith.constant dense<0.000000e+00> : vector<2x64xf32>
    %735 = tpu.matmul %733, %734, %cst_175 {dimension_numbers = #tpu.dot_dimension_numbers<[1], [0], [0], [1], [0, 0, 1, 1], [], []>} : vector<2x202xf32>, vector<202x64xf32>, vector<2x64xf32> -> vector<2x64xf32>
    %c0_176 = arith.constant 0 : index
    %c0_177 = arith.constant 0 : index
    %736 = vector.load %arg18[%c0_176, %c0_177] : memref<1x64xf32, #tpu.memory_space<vmem>>, vector<1x64xf32>
    %737 = vector.broadcast %736 : vector<1x64xf32> to vector<2x64xf32>
    %738 = arith.addf %735, %737 : vector<2x64xf32>
    %cst_178 = arith.constant 0.000000e+00 : f32
    %739 = vector.broadcast %cst_178 : f32 to vector<2x64xf32>
    %740 = arith.maximumf %738, %739 : vector<2x64xf32>
    %c0_179 = arith.constant 0 : index
    %c0_180 = arith.constant 0 : index
    %741 = vector.load %arg19[%c0_179, %c0_180] : memref<64x1xf32, #tpu.memory_space<vmem>>, vector<64x1xf32>
    %cst_181 = arith.constant dense<0.000000e+00> : vector<2x1xf32>
    %742 = tpu.matmul %740, %741, %cst_181 {dimension_numbers = #tpu.dot_dimension_numbers<[1], [0], [0], [1], [0, 0, 1, 1], [], []>} : vector<2x64xf32>, vector<64x1xf32>, vector<2x1xf32> -> vector<2x1xf32>
    %c0_182 = arith.constant 0 : index
    %c0_183 = arith.constant 0 : index
    %743 = vector.load %arg20[%c0_182, %c0_183] : memref<1x1xf32, #tpu.memory_space<vmem>>, vector<1x1xf32>
    %744 = vector.broadcast %743 : vector<1x1xf32> to vector<2x1xf32>
    %745 = arith.addf %742, %744 : vector<2x1xf32>
    %746 = arith.negf %745 : vector<2x1xf32>
    %747 = math.exp %746 : vector<2x1xf32>
    %cst_184 = arith.constant 1.000000e+00 : f32
    %748 = vector.broadcast %cst_184 : f32 to vector<2x1xf32>
    %749 = arith.addf %748, %747 : vector<2x1xf32>
    %750 = arith.divf %748, %749 : vector<2x1xf32>
    %c0_185 = arith.constant 0 : index
    %c0_186 = arith.constant 0 : index
    %751 = vector.load %arg21[%c0_185, %c0_186] : memref<2x1xf32, #tpu.memory_space<vmem>>, vector<2x1xf32>
    tpu.vector_store %arg21[%c0_185, %c0_186], %750 {strides = array<i32>} : memref<2x1xf32, #tpu.memory_space<vmem>>, vector<2x1xf32>,
    return
  }
}

</mosaic_0001>

<bundles_post_ra>
// kernel: forward.1
= control target key start
LH: loop header
LB: loop body
LE: loop exit
PB: predicated region body
PF: predicated region fallthrough
CT: control target
= control target key end

     0   :  { %vm9003_vm0 = vcmask 261120   ;;  %vm397_vm1 = vcmask 1043456   ;;  %vm384_vm2 = vcmask 31744   ;;  %s6086_s25 = smov 116   ;;  %vm3210_vm3 = vcmask 924672   ;;  %s8971_s0 = inlined_call_operand.vmem [shape: f32[2,8,32], index: 0, kind: input, shape index: {}]   ;;  %s8972_s1 = inlined_call_operand.vmem [shape: f32[2,8,32], index: 1, kind: input, shape index: {}]   ;;  %s8973_s4 = inlined_call_operand.vmem [shape: f32[3,32,96], index: 4, kind: input, shape index: {}]   ;;  %s8974_s2 = inlined_call_operand.vmem [shape: f32[32,4], index: 2, kind: input, shape index: {}]   ;;  %s8975_s5 = inlined_call_operand.vmem [shape: f32[3,1,96], index: 5, kind: input, shape index: {}]   ;;  %s8976_s3 = inlined_call_operand.vmem [shape: f32[4,32], index: 3, kind: input, shape index: {}]   ;;  %s8977_s6 = inlined_call_operand.vmem [shape: f32[3,32,32], index: 6, kind: input, shape index: {}]   ;;  %s8978_s10 = inlined_call_operand.vmem [shape: f32[3,6,32], index: 10, kind: input, shape index: {}]   ;;  %s8979_s7 = inlined_call_operand.vmem [shape: f32[3,32,512], index: 7, kind: input, shape index: {}]   ;;  %s8980_s9 = inlined_call_operand.vmem [shape: f32[3,512,32], index: 9, kind: input, shape index: {}]   ;;  %s8981_s8 = inlined_call_operand.vmem [shape: f32[3,1,512], index: 8, kind: input, shape index: {}]   ;;  %s8982_s11 = inlined_call_operand.vmem [shape: f32[16,2], index: 11, kind: input, shape index: {}]   ;;  %s8983_s12 = inlined_call_operand.vmem [shape: f32[32,256], index: 12, kind: input, shape index: {}]   ;;  %s8984_s13 = inlined_call_operand.vmem [shape: f32[8,512], index: 13, kind: input, shape index: {}]   ;;  %s8985_s16 = inlined_call_operand.vmem [shape: f32[8,3], index: 16, kind: input, shape index: {}]   ;;  %s8986_s14 = inlined_call_operand.vmem [shape: f32[8,128], index: 14, kind: input, shape index: {}]   ;;  %s8987_s15 = inlined_call_operand.vmem [shape: f32[8,24], index: 15, kind: input, shape index: {}]   ;;  %s8988_s17 = inlined_call_operand.vmem [shape: f32[202,64], index: 17, kind: input, shape index: {}]   ;;  %s8989_s19 = inlined_call_operand.vmem [shape: f32[64,1], index: 19, kind: input, shape index: {}]   ;;  %s8990_s20 = inlined_call_operand.<no memory space> [shape: f32[1,1], index: 20, kind: input, shape index: {}]   ;;  %s8991_s18 = inlined_call_operand.vmem [shape: f32[1,64], index: 18, kind: input, shape index: {}]   ;;  %s8992_s21 = inlined_call_operand.vmem [shape: f32[2,1], index: 21, kind: output, shape index: {}]  }
   0x1   :  { %9011 = sst [smem:[#allocation3_spill]] %s8971_s0  ;;  %vm3202_vm4 = vcmask 932864   ;;  %vm3194_vm5 = vcmask 941056   ;;  %vm3186_vm6 = vcmask 949248   ;;  %vm3178_vm7 = vcmask 957440  }
   0x2   :  { %9012 = sst [smem:[#allocation4_spill]] %s8972_s1  ;;  %vm3170_vm8 = vcmask 965632   ;;  %vm3162_vm9 = vcmask 973824   ;;  %vm3154_vm10 = vcmask 982016   ;;  %vm3146_vm11 = vcmask 990208  }
   0x3   :  { %9013 = sst [smem:[#allocation5_spill]] %s8973_s4  ;;  %vm9010_vm12 = vcmask 998400   ;;  %vm9009_vm13 = vcmask 1006592   ;;  %vm9005_vm14 = vcmask 1014784   ;;  %vm9004_vm15 = vcmask 1022976  }
   0x4   :  { %9014 = sst [smem:[#allocation6_spill]] %s8974_s2 }
   0x5   :  { %9015 = sst [smem:[#allocation7_spill]] %s8975_s5 }
   0x6   :  { %9016 = sst [smem:[#allocation8_spill]] %s8976_s3 }
   0x7   :  { %s9017_s26 = sld [smem:[#allocation3_spill]] }
   0x8   :  { %s9018_s24 = sld [smem:[#allocation4_spill]] }
   0x9   :  { %s9020_s27 = sld [smem:[#allocation6_spill]] }
   0xa   :  { %s9022_s2 = sld [smem:[#allocation8_spill]] }
   0xd   :  { %v78_v0 = vld [vmem:[%s9017_s26] sm:$0xff]  ;;  %v5241_v2 = vld [vmem:[%s9017_s26 + $0x8] sm:$0xff]  ;;  %s6087_s26 = smov 120  }
   0xe   :  { %v80_v1 = vsel %vm9003_vm0, %v78_v0, 0.0  ;;  %v119_v3 = vsel %vm9003_vm0, %v5241_v2, 0.0  ;;  %v70_v32 = vld [vmem:[%s9018_s24] sm:$0xff]  ;;  %v5240_v34 = vld [vmem:[%s9018_s24 + $0x8] sm:$0xff] }
   0xf   :  { %81 = vadd.xlane.f32.xlu0 %v80_v1  ;;  %120 = vadd.xlane.f32.xlu1 %v119_v3  ;;  %v6251_v58 = vld [vmem:[%s9020_s27 + $0x18] sm:$0xff]  ;;  %v6256_v59 = vld [vmem:[%s9020_s27 + $0x10] sm:$0xff]  ;;  %v6265_v60 = vld [vmem:[%s9020_s27 + $0x8] sm:$0xff] }
  0x10   :  { %v6272_v61 = vld [vmem:[%s9020_s27] sm:$0xff] }
  0x98   :  { %v82_v4 = vpop.xlane.xlu0 %81  ;;  %v121_v22 = vpop.xlane.xlu1 %120 }
  0x99   :  { %v83_v5 = vrot.slane %v82_v4, 4  ;;  %v122_v23 = vrot.slane %v121_v22, 4 }
  0x9b   :  { %v84_v6 = vadd.f32 %v83_v5, %v82_v4  ;;  %v123_v24 = vadd.f32 %v122_v23, %v121_v22 }
  0x9d   :  { %v85_v7 = vrot.slane %v84_v6, 2  ;;  %v124_v26 = vrot.slane %v123_v24, 2 }
  0x9f   :  { %v86_v8 = vadd.f32 %v85_v7, %v84_v6  ;;  %v125_v27 = vadd.f32 %v124_v26, %v123_v24 }
  0xa1   :  { %v87_v9 = vrot.slane %v86_v8, 1  ;;  %v126_v28 = vrot.slane %v125_v27, 1 }
  0xa3   :  { %v88_v10 = vadd.f32 %v87_v9, %v86_v8  ;;  %v127_v30 = vadd.f32 %v126_v28, %v125_v27  ;;  %v6290_v9 = vld [vmem:[%s9022_s2] sm:$0xf] }
  0xa5   :  { %5951 = vpush %v88_v10 }
  0xd6   :  { %s5952_s28 = spop %5951 }
  0xd7   :  { %s92_s29 = smul.f32 0.00390625, %s5952_s28  ;;  %s9019_s28 = sld [smem:[#allocation5_spill]] }
  0xd9   :  { %v93_v11 = vstv %s92_s29  ;;  %s6090_s29 = smov 118  }
  0xda   :  { %v94_v12 = vsub.f32 %v78_v0, %v93_v11 }
  0xdc   :  { %v95_v13 = vmul.f32 %v94_v12, %v94_v12 }
  0xdd   :  { %v160_v43 = vld [vmem:[%s9019_s28 + $0x18] sm:$0xff]  ;;  %v159_v45 = vld [vmem:[%s9019_s28 + $0x10] sm:$0xff]  ;;  %v158_v47 = vld [vmem:[%s9019_s28 + $0x8] sm:$0xff] }
  0xde   :  { %v96_v14 = vsel %vm9003_vm0, %v95_v13, 0.0  ;;  %5800 = vmatprep.subr.mxu0 %v160_v43  ;;  %v157_v49 = vld [vmem:[%s9019_s28] sm:$0xff] }
  0xdf   :  { %97 = vadd.xlane.f32.xlu0 %v96_v14  ;;  %5801 = vmatpush3.msra.mxu0 %v160_v43  ;;  %v499_v43 = vld [vmem:[%s8977_s6 + $0x8] sm:$0xff] }
  0xe0   :  { %5802 = vmatprep.subr.mxu0 %v159_v45 }
  0xe1   :  { %5803 = vmatpush3.msra.mxu0 %v159_v45 }
  0xe2   :  { %5804 = vmatprep.subr.mxu0 %v158_v47 }
  0xe3   :  { %5805 = vmatpush3.msra.mxu0 %v158_v47 }
  0xe4   :  { %5806 = vmatprep.subr.mxu0 %v157_v49 }
  0xe5   :  { %5807 = vmatpush3.msra.mxu0 %v157_v49 }
  0xe6   :  { %5811 = vmatprep.subr.mxu0 %v6251_v58 }
 0x168   :  { %v98_v15 = vpop.xlane.xlu0 %97 }
 0x169   :  { %v99_v16 = vrot.slane %v98_v15, 4 }
 0x16b   :  { %v100_v17 = vadd.f32 %v99_v16, %v98_v15 }
 0x16d   :  { %v101_v18 = vrot.slane %v100_v17, 2 }
 0x16f   :  { %v102_v19 = vadd.f32 %v101_v18, %v100_v17 }
 0x171   :  { %v103_v20 = vrot.slane %v102_v19, 1 }
 0x173   :  { %v104_v21 = vadd.f32 %v103_v20, %v102_v19 }
 0x175   :  { %5953 = vpush %v104_v21 }
 0x1a6   :  { %s5954_s0 = spop %5953 }
 0x1a7   :  { %s108_s5 = smul.f32 0.00390625, %s5954_s0  ;;  %s6092_s0 = smov 123  }
 0x1a9   :  { %s109_s30 = sadd.f32 1e-05, %s108_s5  ;;  %s6093_s5 = smov 112  }
 0x1ab   :  { %v110_v25 = vstv %s109_s30  ;;  %s9023_s30 = smov 64  }
 0x1ac   :  { %5995 = vrsqrt.f32 %v110_v25 }
 0x1b9   :  { %v5996_v29 = vpop.eup %5995 }
 0x1ba   :  { %5955 = vpush %v5996_v29 }
 0x1bb   :  { %5957 = vpush %v127_v30 }
 0x1eb   :  { %s5956_s3 = spop %5955 }
 0x1ec   :  { %v113_v31 = vstv %s5956_s3  ;;  %s5958_s22 = spop %5957  ;;  %s9024_s3 = smov 96  }
 0x1ed   :  { %v114_v33 = vmul.f32 %v113_v31, %v94_v12  ;;  %s131_s4 = smul.f32 0.00390625, %s5958_s22 }
 0x1ef   :  { %v132_v35 = vstv %s131_s4  ;;  %v115_v36 = vmul.f32 %v114_v33, %v70_v32 }
 0x1f0   :  { %v133_v37 = vsub.f32 %v5241_v2, %v132_v35 }
 0x1f1   :  { %v6227_v38 = vadd.f32 %v5240_v34, %v115_v36 }
 0x1f2   :  { %v134_v39 = vmul.f32 %v133_v37, %v133_v37 }
 0x1f3   :  { %5808 = vmatprep.mubr.msk.f32.mxu0 %vm9003_vm0, %v6227_v38 }
 0x1f4   :  { %v135_v40 = vsel %vm9003_vm0, %v134_v39, 0.0 }
 0x1f5   :  { %136 = vadd.xlane.f32.xlu1 %v135_v40 }
 0x27e   :  { %v137_v41 = vpop.xlane.xlu1 %136 }
 0x27f   :  { %v138_v42 = vrot.slane %v137_v41, 4 }
 0x281   :  { %v139_v44 = vadd.f32 %v138_v42, %v137_v41  ;;  %v501_v41 = vld [vmem:[%s8977_s6 + $0x18] sm:$0xff]  ;;  %v500_v42 = vld [vmem:[%s8977_s6 + $0x10] sm:$0xff] }
 0x282   :  { %5833 = vmatprep.subr.mxu1 %v501_v41 }
 0x283   :  { %v140_v46 = vrot.slane %v139_v44, 2  ;;  %5834 = vmatpush3.msra.mxu1 %v501_v41 }
 0x284   :  { %5835 = vmatprep.subr.mxu1 %v500_v42 }
 0x285   :  { %v141_v48 = vadd.f32 %v140_v46, %v139_v44  ;;  %5836 = vmatpush3.msra.mxu1 %v500_v42  ;;  %v498_v44 = vld [vmem:[%s8977_s6] sm:$0xff] }
 0x286   :  { %5837 = vmatprep.subr.mxu1 %v499_v43 }
 0x287   :  { %v142_v50 = vrot.slane %v141_v48, 1  ;;  %5838 = vmatpush3.msra.mxu1 %v499_v43 }
 0x288   :  { %5839 = vmatprep.subr.mxu1 %v498_v44 }
 0x289   :  { %v143_v51 = vadd.f32 %v142_v50, %v141_v48  ;;  %5840 = vmatpush3.msra.mxu1 %v498_v44 }
 0x28b   :  { %5959 = vpush %v143_v51 }
 0x2bc   :  { %s5960_s23 = spop %5959 }
 0x2bd   :  { %s147_s1 = smul.f32 0.00390625, %s5960_s23  ;;  %s6085_s23 = smov 119  }
 0x2bf   :  { %s148_s24 = sadd.f32 1e-05, %s147_s1 }
 0x2c0   :  { %s9021_s1 = sld [smem:[#allocation7_spill]] }
 0x2c1   :  { %v149_v52 = vstv %s148_s24  ;;  %s9001_s24 = smov 96  }
 0x2c2   :  { %5997 = vrsqrt.f32 %v149_v52 }
 0x2c6   :  { %v5242_v62 = vld [vmem:[%s9021_s1] ss:$0 sm:$0xff] }
 0x2cf   :  { %v5998_v53 = vpop.eup %5997 }
 0x2d0   :  { %5961 = vpush %v5998_v53 }
 0x301   :  { %s5962_s4 = spop %5961 }
 0x302   :  { %v152_v54 = vstv %s5962_s4  ;;  %s8999_s4 = smov 64  }
 0x303   :  { %v153_v55 = vmul.f32 %v152_v54, %v133_v37 }
 0x305   :  { %v154_v56 = vmul.f32 %v153_v55, %v70_v32 }
 0x307   :  { %v6244_v57 = vadd.f32 %v5240_v34, %v154_v56 }
 0x309   :  { %5809 = vmatmul.mubr.msk.f32.vlgmr.msra.gmra.mxu0 %vm9003_vm0, %v6244_v57 }
 0x30a   :  { %5812 = vmatpush3.msra.mxu0 %v6251_v58 }
 0x30b   :  { %5813 = vmatprep.subr.mxu0 %v6256_v59 }
 0x30c   :  { %5814 = vmatpush3.msra.mxu0 %v6256_v59 }
 0x30d   :  { %5815 = vmatprep.subr.mxu0 %v6265_v60 }
 0x30e   :  { %5816 = vmatpush3.msra.mxu0 %v6265_v60 }
 0x30f   :  { %5817 = vmatprep.subr.mxu0 %v6272_v61 }
 0x310   :  { %5818 = vmatpush3.msra.mxu0 %v6272_v61 }
 0x311   :  { %5825 = vmatprep.subr.msk.mxu0 %vm397_vm1, %v6290_v9 }
 0x3c9   :  { %v5810_v63 = vpop.f32.mrf.mxu0 }
 0x3ca   :  { %v246_v0 = vadd.f32 %v5810_v63, %v5242_v62 }
 0x3cb   :  { %v240_v1 = vpop.f32.mrf.mxu0 }
 0x3cc   :  { %v241_v2 = vadd.f32 %v5242_v62, %v240_v1  ;;  %255 = vrot.lane.b32.xlu1 %v246_v0, %s9001_s24  ;;  %v502_v62 = vlaneseq  ;;  %v6322_v1 = vld [vmem:[%s8978_s10] sm:$0x3f] }
 0x3ce   :  { %250 = vrot.lane.b32.xlu0 %v241_v2, %s9001_s24  ;;  %v6314_v63 = vshrl.u32 %v502_v62, 7  ;;  %v881_v62 = vld [vmem:[%s8980_s9 + $0x178] sm:$0xff] }
 0x3d0   :  { %486 = vrot.lane.b32.xlu1 %v241_v2, %s8999_s4 }
 0x3d4   :  { %490 = vrot.lane.b32.xlu1 %v246_v0, %s8999_s4  ;;  %s6088_s4 = smov 117  }
 0x43e   :  { %v256_v3 = vpop.permute.xlu1 %255 }
 0x43f   :  { %v258_v6 = vmul.f32 %v256_v3, %v241_v2  ;;  %v260_v8 = vmul.f32 %v256_v3, %v246_v0 }
 0x440   :  { %v251_v4 = vpop.permute.xlu0 %250 }
 0x441   :  { %v253_v5 = vmul.f32 %v251_v4, %v241_v2  ;;  %v259_v7 = vmul.f32 %v251_v4, %v246_v0  ;;  %v6317_v0 = vsub.s32 0, %v6314_v63 }
 0x442   :  { %v487_v45 = vpop.permute.xlu1 %486 }
 0x443   :  { %5819 = vmatprep.mubr.msk.f32.mxu0 %vm9003_vm0, %v253_v5  ;;  %v505_v2 = vrot.slane %v6322_v1, %v6317_v0 }
 0x444   :  { %5820 = vmatmul.mubr.msk.f32.vlgmr.msra.gmra.mxu0 %vm9003_vm0, %v258_v6 }
 0x445   :  { %5822 = vmatprep.mubr.msk.f32.mxu0 %vm9003_vm0, %v259_v7  ;;  %5826 = vmatpush3.msk.msra.mxu0 %vm397_vm1, %v6290_v9 }
 0x446   :  { %v491_v47 = vpop.permute.xlu1 %490 }
 0x448   :  { %5823 = vmatmul.mubr.msk.f32.gmra.mxu0 %vm9003_vm0, %v260_v8 }
 0x504   :  { %v5821_v10 = vpop.f32.mrf.mxu0 }
 0x505   :  { %v359_v12 = vmul.f32 0.35355338, %v5821_v10 }
 0x506   :  { %v339_v11 = vpop.f32.mrf.mxu0 }
 0x507   :  { %v358_v13 = vmul.f32 0.35355338, %v339_v11 }
 0x508   :  { %v5824_v14 = vpop.f32.mrf.mxu0 }
 0x509   :  { %v362_v15 = vmax.f32 %v358_v13, %v359_v12  ;;  %v361_v19 = vmul.f32 0.35355338, %v5824_v14 }
 0x50a   :  { %v349_v16 = vpop.f32.mrf.mxu0 }
 0x50b   :  { %v363_v17 = vsub.f32 %v358_v13, %v362_v15  ;;  %v366_v18 = vsub.f32 %v359_v12, %v362_v15  ;;  %v360_v20 = vmul.f32 0.35355338, %v349_v16 }
 0x50d   :  { %v364_v21 = vmul.f32 1.442695, %v363_v17  ;;  %v367_v22 = vmul.f32 1.442695, %v366_v18  ;;  %v373_v23 = vmax.f32 %v360_v20, %v361_v19 }
 0x50f   :  { %5999 = vpow2.f32 %v364_v21  ;;  %v374_v24 = vsub.f32 %v360_v20, %v373_v23  ;;  %v377_v25 = vsub.f32 %v361_v19, %v373_v23  ;;  %v641_v20 = vld [vmem:[%s8979_s7 + $0x68] sm:$0xff]  ;;  %v643_v21 = vld [vmem:[%s8979_s7 + $0x78] sm:$0xff]  ;;  %v642_v23 = vld [vmem:[%s8979_s7 + $0x70] sm:$0xff] }
 0x510   :  { %6001 = vpow2.f32 %v367_v22  ;;  %696 = vmatprep.subr.mxu0 %v641_v20  ;;  %v640_v22 = vld [vmem:[%s8979_s7 + $0x60] sm:$0xff]  ;;  %773 = vmatprep.subr.mxu1 %v643_v21  ;;  %v892_v20 = vld [vmem:[%s8980_s9 + $0x1d0] sm:$0xff] }
 0x511   :  { %v375_v26 = vmul.f32 1.442695, %v374_v24  ;;  %v378_v27 = vmul.f32 1.442695, %v377_v25  ;;  %v637_v24 = vld [vmem:[%s8979_s7 + $0x48] sm:$0xff]  ;;  %v639_v25 = vld [vmem:[%s8979_s7 + $0x58] sm:$0xff] }
 0x512   :  { %v844_v21 = vld [vmem:[%s8980_s9 + $0x50] sm:$0xff] }
 0x513   :  { %6003 = vpow2.f32 %v375_v26  ;;  %v636_v26 = vld [vmem:[%s8979_s7 + $0x40] sm:$0xff] }
 0x514   :  { %6005 = vpow2.f32 %v378_v27  ;;  %v638_v27 = vld [vmem:[%s8979_s7 + $0x50] sm:$0xff] }
 0x51c   :  { %v6000_v28 = vpop.eup %5999 }
 0x51d   :  { %v6002_v29 = vpop.eup %6001 }
 0x51e   :  { %v369_v30 = vadd.f32 %v6002_v29, %v6000_v28 }
 0x520   :  { %v6004_v31 = vpop.eup %6003  ;;  %6007 = vrcp.f32 %v369_v30  ;;  %v632_v30 = vld [vmem:[%s8979_s7 + $0x20] sm:$0xff] }
 0x521   :  { %v6006_v32 = vpop.eup %6005 }
 0x522   :  { %v380_v33 = vadd.f32 %v6006_v32, %v6004_v31 }
 0x524   :  { %6009 = vrcp.f32 %v380_v33  ;;  %v628_v33 = vld [vmem:[%s8979_s7] sm:$0xff] }
 0x52d   :  { %v6008_v34 = vpop.eup %6007 }
 0x52e   :  { %v371_v35 = vmul.f32 %v6008_v34, %v6000_v28  ;;  %v372_v36 = vmul.f32 %v6008_v34, %v6002_v29  ;;  %v633_v28 = vld [vmem:[%s8979_s7 + $0x28] sm:$0xff]  ;;  %v635_v29 = vld [vmem:[%s8979_s7 + $0x38] sm:$0xff] }
 0x52f   :  { %v631_v34 = vld [vmem:[%s8979_s7 + $0x18] sm:$0xff] }
 0x530   :  { %5827 = vmatprep.mubr.msk.f32.mxu0 %vm384_vm2, %v371_v35  ;;  %v630_v35 = vld [vmem:[%s8979_s7 + $0x10] sm:$0xff] }
 0x531   :  { %v6010_v37 = vpop.eup %6009  ;;  %5828 = vmatmul.mubr.msk.f32.vlgmr.msra.gmra.mxu0 %vm384_vm2, %v372_v36  ;;  %v6079_v36 = vmov 0.0  }
 0x532   :  { %v382_v39 = vmul.f32 %v6010_v37, %v6004_v31  ;;  %v383_v40 = vmul.f32 %v6010_v37, %v6006_v32  ;;  %697 = vmatpush1.msra.mxu0 %v640_v22  ;;  %v629_v31 = vld [vmem:[%s8979_s7 + $0x8] sm:$0xff]  ;;  %v634_v32 = vld [vmem:[%s8979_s7 + $0x30] sm:$0xff]  ;;  %v865_v37 = vld [vmem:[%s8980_s9 + $0xf8] sm:$0xff] }
 0x533   :  { %698 = vmatprep.subr.mxu0 %v637_v24  ;;  %v876_v22 = vld [vmem:[%s8980_s9 + $0x150] sm:$0xff]  ;;  %v891_v24 = vld [vmem:[%s8980_s9 + $0x1c8] sm:$0xff] }
 0x534   :  { %5830 = vmatprep.mubr.msk.f32.mxu0 %vm384_vm2, %v382_v39  ;;  %699 = vmatpush1.msra.mxu0 %v636_v26  ;;  %v897_v39 = vld [vmem:[%s8980_s9 + $0x1f8] sm:$0xff]  ;;  %v875_v26 = vld [vmem:[%s8980_s9 + $0x148] sm:$0xff] }
 0x535   :  { %5831 = vmatmul.mubr.msk.f32.gmra.mxu0 %vm384_vm2, %v383_v40  ;;  %700 = vmatprep.subr.mxu0 %v633_v28  ;;  %v890_v28 = vld [vmem:[%s8980_s9 + $0x1c0] sm:$0xff] }
 0x536   :  { %701 = vmatpush1.msra.mxu0 %v632_v30  ;;  %736 = vmatprep.mubr.f32.mxu0 %v6079_v36  ;;  %v874_v30 = vld [vmem:[%s8980_s9 + $0x140] sm:$0xff] }
 0x537   :  { %702 = vmatprep.subr.mxu0 %v629_v31  ;;  %v857_v31 = vld [vmem:[%s8980_s9 + $0xb8] sm:$0xff] }
 0x538   :  { %703 = vmatpush1.msra.mxu0 %v628_v33  ;;  %v841_v33 = vld [vmem:[%s8980_s9 + $0x38] sm:$0xff] }
 0x539   :  { %5513 = vmatprep.subr.mxu0 %v865_v37  ;;  %v888_v37 = vld [vmem:[%s8980_s9 + $0x1b0] sm:$0xff] }
 0x5f1   :  { %v5829_v46 = vpop.f32.mrf.mxu0 }
 0x5f2   :  { %v493_v49 = vmul.f32 %v5829_v46, %v491_v47  ;;  %v6393_v46 = vsub.s32 2, %v6314_v63 }
 0x5f3   :  { %v467_v48 = vpop.f32.mrf.mxu0 }
 0x5f4   :  { %v489_v50 = vmul.f32 %v487_v45, %v467_v48  ;;  %v619_v48 = vrot.slane %v6322_v1, %v6393_v46 }
 0x5f5   :  { %v5832_v51 = vpop.f32.mrf.mxu0 }
 0x5f6   :  { %v494_v52 = vadd.f32 %v493_v49, %v489_v50  ;;  %v496_v54 = vmul.f32 %v5832_v51, %v491_v47  ;;  %v6396_v47 = vsub.s32 3, %v6314_v63 }
 0x5f7   :  { %v477_v53 = vpop.f32.mrf.mxu0 }
 0x5f8   :  { %v495_v55 = vmul.f32 %v487_v45, %v477_v53  ;;  %5841 = vmatprep.mubr.msk.f32.mxu1 %vm9003_vm0, %v494_v52  ;;  %v625_v51 = vrot.slane %v6322_v1, %v6396_v47 }
 0x5fa   :  { %v497_v56 = vadd.f32 %v496_v54, %v495_v55 }
 0x5fc   :  { %5842 = vmatmul.mubr.msk.f32.vlgmr.msra.gmra.mxu1 %vm9003_vm0, %v497_v56  ;;  %v849_v56 = vld [vmem:[%s8980_s9 + $0x78] sm:$0xff] }
 0x5fd   :  { %774 = vmatpush1.msra.mxu1 %v642_v23  ;;  %813 = vmatprep.mubr.f32.mxu1 %v6079_v36  ;;  %v859_v23 = vld [vmem:[%s8980_s9 + $0xc8] sm:$0xff] }
 0x5fe   :  { %775 = vmatprep.subr.mxu1 %v639_v25  ;;  %v843_v25 = vld [vmem:[%s8980_s9 + $0x48] sm:$0xff] }
 0x5ff   :  { %776 = vmatpush1.msra.mxu1 %v638_v27  ;;  %v858_v27 = vld [vmem:[%s8980_s9 + $0xc0] sm:$0xff] }
 0x600   :  { %777 = vmatprep.subr.mxu1 %v635_v29  ;;  %v842_v29 = vld [vmem:[%s8980_s9 + $0x40] sm:$0xff] }
 0x601   :  { %778 = vmatpush1.msra.mxu1 %v634_v32  ;;  %v889_v32 = vld [vmem:[%s8980_s9 + $0x1b8] sm:$0xff] }
 0x602   :  { %779 = vmatprep.subr.mxu1 %v631_v34  ;;  %v873_v34 = vld [vmem:[%s8980_s9 + $0x138] sm:$0xff] }
 0x603   :  { %780 = vmatpush1.msra.mxu1 %v630_v35  ;;  %v856_v35 = vld [vmem:[%s8980_s9 + $0xb0] sm:$0xff] }
 0x604   :  { %5551 = vmatprep.subr.mxu1 %v897_v39  ;;  %v840_v39 = vld [vmem:[%s8980_s9 + $0x30] sm:$0xff] }
 0x6bc   :  { %v5843_v3 = vpop.f32.mrf.mxu1 }
 0x6bd   :  { %v584_v4 = vadd.f32 %v5843_v3, %v505_v2  ;;  %v864_v3 = vld [vmem:[%s8980_s9 + $0xf0] sm:$0xff] }
 0x6be   :  { %v578_v5 = vpop.f32.mrf.mxu1 }
 0x6bf   :  { %v579_v6 = vadd.f32 %v578_v5, %v505_v2  ;;  %v588_v7 = vadd.f32 %v584_v4, %v6244_v57  ;;  %v896_v4 = vld [vmem:[%s8980_s9 + $0x1f0] sm:$0xff] }
 0x6c1   :  { %v592_v8 = vsel %vm9003_vm0, %v588_v7, 0.0  ;;  %v587_v10 = vadd.f32 %v579_v6, %v6227_v38  ;;  %v848_v6 = vld [vmem:[%s8980_s9 + $0x70] sm:$0xff] }
 0x6c2   :  { %593 = vadd.xlane.f32.xlu1 %v592_v8  ;;  %v863_v8 = vld [vmem:[%s8980_s9 + $0xe8] sm:$0xff] }
 0x6c3   :  { %v589_v11 = vsel %vm9003_vm0, %v587_v10, 0.0 }
 0x6c4   :  { %590 = vadd.xlane.f32.xlu0 %v589_v11  ;;  %v847_v11 = vld [vmem:[%s8980_s9 + $0x68] sm:$0xff] }
 0x74b   :  { %v594_v12 = vpop.xlane.xlu1 %593 }
 0x74c   :  { %v597_v13 = vmul.f32 0.03125, %v594_v12  ;;  %v879_v12 = vld [vmem:[%s8980_s9 + $0x168] sm:$0xff] }
 0x74d   :  { %v591_v14 = vpop.xlane.xlu0 %590 }
 0x74e   :  { %v596_v15 = vmul.f32 0.03125, %v591_v14  ;;  %v6330_v16 = vsub.f32 %v588_v7, %v597_v13  ;;  %v880_v7 = vld [vmem:[%s8980_s9 + $0x170] sm:$0xff]  ;;  %v862_v13 = vld [vmem:[%s8980_s9 + $0xe0] sm:$0xff] }
 0x74f   :  { %v894_v14 = vld [vmem:[%s8980_s9 + $0x1e0] sm:$0xff] }
 0x750   :  { %v598_v17 = vsub.f32 %v587_v10, %v596_v15  ;;  %v601_v57 = vmul.f32 %v6330_v16, %v6330_v16  ;;  %v895_v10 = vld [vmem:[%s8980_s9 + $0x1e8] sm:$0xff]  ;;  %v846_v15 = vld [vmem:[%s8980_s9 + $0x60] sm:$0xff] }
 0x752   :  { %v600_v18 = vmul.f32 %v598_v17, %v598_v17  ;;  %v605_v38 = vsel %vm9003_vm0, %v601_v57, 0.0  ;;  %v877_v57 = vld [vmem:[%s8980_s9 + $0x158] sm:$0xff] }
 0x754   :  { %v602_v19 = vsel %vm9003_vm0, %v600_v18, 0.0  ;;  %v893_v18 = vld [vmem:[%s8980_s9 + $0x1d8] sm:$0xff] }
 0x755   :  { %603 = vadd.xlane.f32.xlu0 %v602_v19  ;;  %v845_v19 = vld [vmem:[%s8980_s9 + $0x58] sm:$0xff] }
 0x759   :  { %606 = vadd.xlane.f32.xlu0 %v605_v38  ;;  %v860_v38 = vld [vmem:[%s8980_s9 + $0xd0] sm:$0xff] }
 0x7de   :  { %v604_v40 = vpop.xlane.xlu0 %603 }
 0x7df   :  { %v608_v41 = vmul.f32 0.03125, %v604_v40  ;;  %v872_v40 = vld [vmem:[%s8980_s9 + $0x130] sm:$0xff] }
 0x7e1   :  { %v610_v42 = vadd.f32 1e-05, %v608_v41  ;;  %v855_v41 = vld [vmem:[%s8980_s9 + $0xa8] sm:$0xff] }
 0x7e2   :  { %v607_v43 = vpop.xlane.xlu0 %606 }
 0x7e3   :  { %6011 = vrsqrt.f32 %v610_v42  ;;  %v609_v44 = vmul.f32 0.03125, %v607_v43  ;;  %v887_v42 = vld [vmem:[%s8980_s9 + $0x1a8] sm:$0xff] }
 0x7e4   :  { %v839_v43 = vld [vmem:[%s8980_s9 + $0x28] sm:$0xff] }
 0x7e5   :  { %v611_v45 = vadd.f32 1e-05, %v609_v44  ;;  %v871_v44 = vld [vmem:[%s8980_s9 + $0x128] sm:$0xff] }
 0x7e7   :  { %6013 = vrsqrt.f32 %v611_v45  ;;  %v854_v45 = vld [vmem:[%s8980_s9 + $0xa0] sm:$0xff] }
 0x7f0   :  { %v6012_v49 = vpop.eup %6011 }
 0x7f1   :  { %v614_v50 = vmul.f32 %v6012_v49, %v598_v17  ;;  %v861_v17 = vld [vmem:[%s8980_s9 + $0xd8] sm:$0xff]  ;;  %v838_v49 = vld [vmem:[%s8980_s9 + $0x20] sm:$0xff] }
 0x7f3   :  { %v620_v52 = vmul.f32 %v619_v48, %v614_v50  ;;  %v870_v50 = vld [vmem:[%s8980_s9 + $0x120] sm:$0xff] }
 0x7f4   :  { %v6014_v53 = vpop.eup %6013 }
 0x7f5   :  { %v6402_v54 = vadd.f32 %v625_v51, %v620_v52  ;;  %v615_v55 = vmul.f32 %v6014_v53, %v6330_v16  ;;  %v878_v16 = vld [vmem:[%s8980_s9 + $0x160] sm:$0xff]  ;;  %v885_v52 = vld [vmem:[%s8980_s9 + $0x198] sm:$0xff] }
 0x7f6   :  { %v837_v53 = vld [vmem:[%s8980_s9 + $0x18] sm:$0xff] }
 0x7f7   :  { %5256 = vmatmul.mubr.msk.f32.vlgmr.msra.gmra.mxu0 %vm9003_vm0, %v6402_v54  ;;  %5258 = vmatmul.mubr.msk.f32.vlgmr.msra.gmra.mxu1 %vm9003_vm0, %v6402_v54  ;;  %v621_v2 = vmul.f32 %v619_v48, %v615_v55  ;;  %v886_v48 = vld [vmem:[%s8980_s9 + $0x1a0] sm:$0xff]  ;;  %v869_v55 = vld [vmem:[%s8980_s9 + $0x118] sm:$0xff] }
 0x7f8   :  { %742 = vmatprep.mubr.f32.mxu0 %v6079_v36  ;;  %819 = vmatprep.mubr.f32.mxu1 %v6079_v36 }
 0x7f9   :  { %v6423_v5 = vadd.f32 %v625_v51, %v621_v2  ;;  %5514 = vmatpush3.msra.mxu0 %v849_v56  ;;  %5552 = vmatpush3.msra.mxu1 %v881_v62  ;;  %v853_v51 = vld [vmem:[%s8980_s9 + $0x98] sm:$0xff]  ;;  %v852_v56 = vld [vmem:[%s8980_s9 + $0x90] sm:$0xff] }
 0x7fa   :  { %5515 = vmatprep.subr.mxu0 %v864_v3  ;;  %5553 = vmatprep.subr.mxu1 %v896_v4  ;;  %v884_v62 = vld [vmem:[%s8980_s9 + $0x190] sm:$0xff]  ;;  %v851_v4 = vld [vmem:[%s8980_s9 + $0x88] sm:$0xff] }
 0x7fb   :  { %5257 = vmatmul.mubr.msk.f32.gmra.mxu0 %vm9003_vm0, %v6423_v5  ;;  %5259 = vmatmul.mubr.msk.f32.gmra.mxu1 %vm9003_vm0, %v6423_v5  ;;  %v836_v2 = vld [vmem:[%s8980_s9 + $0x10] sm:$0xff] }
 0x7fc   :  { %5516 = vmatpush3.msra.mxu0 %v848_v6  ;;  %5554 = vmatpush3.msra.mxu1 %v880_v7  ;;  %v868_v3 = vld [vmem:[%s8980_s9 + $0x110] sm:$0xff]  ;;  %v883_v6 = vld [vmem:[%s8980_s9 + $0x188] sm:$0xff] }
 0x7fd   :  { %5517 = vmatprep.subr.mxu0 %v863_v8  ;;  %5555 = vmatprep.subr.mxu1 %v895_v10  ;;  %v835_v7 = vld [vmem:[%s8980_s9 + $0x8] sm:$0xff]  ;;  %v850_v10 = vld [vmem:[%s8980_s9 + $0x80] sm:$0xff] }
 0x7fe   :  { %5518 = vmatpush3.msra.mxu0 %v847_v11  ;;  %5556 = vmatpush3.msra.mxu1 %v879_v12  ;;  %v867_v8 = vld [vmem:[%s8980_s9 + $0x108] sm:$0xff]  ;;  %v882_v11 = vld [vmem:[%s8980_s9 + $0x180] sm:$0xff] }
 0x7ff   :  { %5519 = vmatprep.subr.mxu0 %v862_v13  ;;  %5557 = vmatprep.subr.mxu1 %v894_v14  ;;  %v834_v12 = vld [vmem:[%s8980_s9] sm:$0xff] }
 0x800   :  { %5520 = vmatpush3.msra.mxu0 %v846_v15  ;;  %5558 = vmatpush3.msra.mxu1 %v878_v16  ;;  %v866_v13 = vld [vmem:[%s8980_s9 + $0x100] sm:$0xff]  ;;  %v6608_v15 = vsub.s32 1, %v6314_v63 }
 0x801   :  { %5521 = vmatprep.subr.mxu0 %v861_v17  ;;  %5559 = vmatprep.subr.mxu1 %v893_v18  ;;  %v644_v14 = vld [vmem:[%s8981_s8] sm:$0xf] }
 0x802   :  { %5522 = vmatpush3.msra.mxu0 %v845_v19  ;;  %5560 = vmatpush3.msra.mxu1 %v877_v57  ;;  %v649_v16 = vrot.slane %v644_v14, %v6317_v0  ;;  %v657_v17 = vrot.slane %v644_v14, %v6393_v46  ;;  %v653_v18 = vrot.slane %v644_v14, %v6608_v15 }
 0x803   :  { %5523 = vmatprep.subr.mxu0 %v860_v38  ;;  %5561 = vmatprep.subr.mxu1 %v892_v20  ;;  %v661_v19 = vrot.slane %v644_v14, %v6396_v47 }
 0x804   :  { %5524 = vmatpush3.msra.mxu0 %v844_v21  ;;  %5562 = vmatpush3.msra.mxu1 %v876_v22 }
 0x805   :  { %5525 = vmatprep.subr.mxu0 %v859_v23  ;;  %5563 = vmatprep.subr.mxu1 %v891_v24 }
 0x806   :  { %5526 = vmatpush3.msra.mxu0 %v843_v25  ;;  %5564 = vmatpush3.msra.mxu1 %v875_v26 }
 0x807   :  { %5527 = vmatprep.subr.mxu0 %v858_v27  ;;  %5565 = vmatprep.subr.mxu1 %v890_v28 }
 0x808   :  { %5528 = vmatpush3.msra.mxu0 %v842_v29  ;;  %5566 = vmatpush3.msra.mxu1 %v874_v30 }
 0x809   :  { %5529 = vmatprep.subr.mxu0 %v857_v31  ;;  %5567 = vmatprep.subr.mxu1 %v889_v32 }
 0x80a   :  { %5530 = vmatpush3.msra.mxu0 %v841_v33  ;;  %5568 = vmatpush3.msra.mxu1 %v873_v34 }
 0x80b   :  { %5531 = vmatprep.subr.mxu0 %v856_v35  ;;  %5569 = vmatprep.subr.mxu1 %v888_v37 }
 0x80c   :  { %5532 = vmatpush3.msra.mxu0 %v840_v39  ;;  %5570 = vmatpush3.msra.mxu1 %v872_v40 }
 0x80d   :  { %5533 = vmatprep.subr.mxu0 %v855_v41  ;;  %5571 = vmatprep.subr.mxu1 %v887_v42 }
 0x80e   :  { %5534 = vmatpush3.msra.mxu0 %v839_v43  ;;  %5572 = vmatpush3.msra.mxu1 %v871_v44 }
 0x80f   :  { %5535 = vmatprep.subr.mxu0 %v854_v45  ;;  %5573 = vmatprep.subr.mxu1 %v886_v48  ;;  %v901_v45 = vrot.slane %v6322_v1, %v6608_v15 }
 0x810   :  { %5536 = vmatpush3.msra.mxu0 %v838_v49  ;;  %5574 = vmatpush3.msra.mxu1 %v870_v50 }
 0x811   :  { %5537 = vmatprep.subr.mxu0 %v853_v51  ;;  %5575 = vmatprep.subr.mxu1 %v885_v52 }
 0x812   :  { %5538 = vmatpush3.msra.mxu0 %v837_v53  ;;  %5576 = vmatpush3.msra.mxu1 %v869_v55 }
 0x813   :  { %5539 = vmatprep.subr.mxu0 %v852_v56  ;;  %5577 = vmatprep.subr.mxu1 %v884_v62 }
 0x814   :  { %5540 = vmatpush3.msra.mxu0 %v836_v2  ;;  %5578 = vmatpush3.msra.mxu1 %v868_v3 }
 0x815   :  { %5541 = vmatprep.subr.mxu0 %v851_v4  ;;  %5579 = vmatprep.subr.mxu1 %v883_v6 }
 0x816   :  { %5542 = vmatpush3.msra.mxu0 %v835_v7  ;;  %5580 = vmatpush3.msra.mxu1 %v867_v8 }
 0x817   :  { %5543 = vmatprep.subr.mxu0 %v850_v10  ;;  %5581 = vmatprep.subr.mxu1 %v882_v11 }
 0x818   :  { %5544 = vmatpush3.msra.mxu0 %v834_v12  ;;  %5582 = vmatpush3.msra.mxu1 %v866_v13 }
 0x819   :  { %5855 = vmatprep.subr.mxu1 %v6251_v58 }
 0x8b7   :  { %v738_v57 = vpop.f32.mrf.mxu0  ;;  %v815_v38 = vpop.f32.mrf.mxu1 }
 0x8b8   :  { %v739_v20 = vadd.f32 %v738_v57, %v649_v16  ;;  %v816_v21 = vadd.f32 %v815_v38, %v657_v17  ;;  %v5263_v57 = vld [vmem:[%s9019_s28 + $0x30] sm:$0xff]  ;;  %v5262_v38 = vld [vmem:[%s9019_s28 + $0x28] sm:$0xff] }
 0x8b9   :  { %v740_v22 = vpop.f32.mrf.mxu0  ;;  %v817_v23 = vpop.f32.mrf.mxu1 }
 0x8ba   :  { %v741_v24 = vadd.f32 %v740_v22, %v653_v18  ;;  %v818_v25 = vadd.f32 %v817_v23, %v661_v19  ;;  %v826_v30 = vmax.f32 %v739_v20, 0.0  ;;  %v828_v31 = vmax.f32 %v816_v21, 0.0  ;;  %v5261_v20 = vld [vmem:[%s9019_s28 + $0x20] sm:$0xff] }
 0x8bb   :  { %v744_v26 = vpop.f32.mrf.mxu0  ;;  %v821_v27 = vpop.f32.mrf.mxu1 }
 0x8bc   :  { %v827_v28 = vmax.f32 %v741_v24, 0.0  ;;  %v829_v29 = vmax.f32 %v818_v25, 0.0  ;;  %v745_v32 = vadd.f32 %v744_v26, %v649_v16  ;;  %v822_v33 = vadd.f32 %v821_v27, %v657_v17 }
 0x8bd   :  { %v746_v34 = vpop.f32.mrf.mxu0  ;;  %v823_v35 = vpop.f32.mrf.mxu1  ;;  %v6644_v27 = vsub.s32 4, %v6314_v63 }
 0x8be   :  { %v747_v37 = vadd.f32 %v746_v34, %v653_v18  ;;  %v824_v39 = vadd.f32 %v823_v35, %v661_v19  ;;  %966 = vmatprep.mubr.f32.mxu0 %v827_v28  ;;  %1041 = vmatprep.mubr.f32.mxu1 %v829_v29  ;;  %v830_v42 = vmax.f32 %v745_v32, 0.0  ;;  %v832_v43 = vmax.f32 %v822_v33, 0.0 }
 0x8bf   :  { %967 = vmatmul.mubr.f32.vlgmr.msra.gmra.mxu0 %v826_v30  ;;  %1042 = vmatmul.mubr.f32.vlgmr.msra.gmra.mxu1 %v828_v31  ;;  %v6647_v28 = vsub.s32 5, %v6314_v63  ;;  %v1083_v29 = vrot.slane %v6322_v1, %v6644_v27  ;;  %v5266_v63 = vld [vmem:[%s9021_s1 + $0x1] ss:$0 sm:$0xff] }
 0x8c0   :  { %v831_v40 = vmax.f32 %v747_v37, 0.0  ;;  %v833_v41 = vmax.f32 %v824_v39, 0.0  ;;  %5856 = vmatpush3.msra.mxu1 %v6251_v58 }
 0x8c1   :  { %5857 = vmatprep.subr.mxu1 %v6256_v59  ;;  %v1089_v32 = vrot.slane %v6322_v1, %v6647_v28 }
 0x8c2   :  { %971 = vmatprep.mubr.f32.mxu0 %v831_v40  ;;  %1046 = vmatprep.mubr.f32.mxu1 %v833_v41 }
 0x8c3   :  { %972 = vmatmul.mubr.f32.gmra.mxu0 %v830_v42  ;;  %1047 = vmatmul.mubr.f32.gmra.mxu1 %v832_v43 }
 0x8c4   :  { %5858 = vmatpush3.msra.mxu1 %v6256_v59 }
 0x8c5   :  { %5859 = vmatprep.subr.mxu1 %v6265_v60 }
 0x8c6   :  { %5860 = vmatpush3.msra.mxu1 %v6265_v60 }
 0x8c7   :  { %5861 = vmatprep.subr.mxu1 %v6272_v61 }
 0x8c8   :  { %5862 = vmatpush3.msra.mxu1 %v6272_v61 }
 0x97f   :  { %v5545_v44 = vpop.f32.mrf.mxu0  ;;  %v5583_v58 = vpop.f32.mrf.mxu1 }
 0x981   :  { %v5546_v48 = vpop.f32.mrf.mxu0  ;;  %v5584_v49 = vpop.f32.mrf.mxu1 }
 0x982   :  { %v5547_v50 = vadd.f32 %v5546_v48, %v5545_v44  ;;  %v5585_v59 = vadd.f32 %v5584_v49, %v5583_v58 }
 0x983   :  { %v5548_v51 = vpop.f32.mrf.mxu0  ;;  %v5586_v52 = vpop.f32.mrf.mxu1 }
 0x984   :  { %v969_v53 = vadd.f32 %v5547_v50, %v901_v45 }
 0x985   :  { %v5549_v55 = vpop.f32.mrf.mxu0  ;;  %v5587_v56 = vpop.f32.mrf.mxu1 }
 0x986   :  { %v1044_v62 = vadd.f32 %v5585_v59, %v969_v53  ;;  %v5550_v60 = vadd.f32 %v5549_v55, %v5548_v51  ;;  %v5588_v3 = vadd.f32 %v5587_v56, %v5586_v52 }
 0x988   :  { %v974_v2 = vadd.f32 %v5550_v60, %v901_v45  ;;  %v1052_v61 = vadd.f32 %v1044_v62, %v6402_v54 }
 0x98a   :  { %v1049_v4 = vadd.f32 %v5588_v3, %v974_v2  ;;  %v1054_v6 = vsel %vm9003_vm0, %v1052_v61, 0.0 }
 0x98b   :  { %1055 = vadd.xlane.f32.xlu0 %v1054_v6 }
 0x98c   :  { %v1053_v7 = vadd.f32 %v1049_v4, %v6423_v5  ;;  %v5264_v5 = vld [vmem:[%s9019_s28 + $0x38] sm:$0xff] }
 0x98d   :  { %5844 = vmatprep.subr.mxu0 %v5264_v5 }
 0x98e   :  { %v1057_v8 = vsel %vm9003_vm0, %v1053_v7, 0.0  ;;  %5845 = vmatpush3.msra.mxu0 %v5264_v5 }
 0x98f   :  { %1058 = vadd.xlane.f32.xlu1 %v1057_v8  ;;  %5846 = vmatprep.subr.mxu0 %v5263_v57 }
 0x990   :  { %5847 = vmatpush3.msra.mxu0 %v5263_v57 }
 0x991   :  { %5848 = vmatprep.subr.mxu0 %v5262_v38 }
 0x992   :  { %5849 = vmatpush3.msra.mxu0 %v5262_v38 }
 0x993   :  { %5850 = vmatprep.subr.mxu0 %v5261_v20 }
 0x994   :  { %5851 = vmatpush3.msra.mxu0 %v5261_v20 }
 0x995   :  { %5869 = vmatprep.subr.msk.mxu0 %vm397_vm1, %v6290_v9 }
 0xa14   :  { %v1056_v10 = vpop.xlane.xlu0 %1055 }
 0xa15   :  { %v1060_v11 = vmul.f32 0.03125, %v1056_v10 }
 0xa17   :  { %v1062_v12 = vsub.f32 %v1052_v61, %v1060_v11 }
 0xa18   :  { %v1059_v13 = vpop.xlane.xlu1 %1058 }
 0xa19   :  { %v1061_v14 = vmul.f32 0.03125, %v1059_v13  ;;  %v1064_v16 = vmul.f32 %v1062_v12, %v1062_v12 }
 0xa1b   :  { %v1063_v17 = vsub.f32 %v1053_v7, %v1061_v14  ;;  %v1066_v18 = vsel %vm9003_vm0, %v1064_v16, 0.0 }
 0xa1c   :  { %1067 = vadd.xlane.f32.xlu0 %v1066_v18 }
 0xa1d   :  { %v1065_v54 = vmul.f32 %v1063_v17, %v1063_v17 }
 0xa1f   :  { %v1069_v19 = vsel %vm9003_vm0, %v1065_v54, 0.0 }
 0xa20   :  { %1070 = vadd.xlane.f32.xlu1 %v1069_v19 }
 0xaa5   :  { %v1068_v21 = vpop.xlane.xlu0 %1067 }
 0xaa6   :  { %v1072_v22 = vmul.f32 0.03125, %v1068_v21  ;;  %v5281_v21 = vld [vmem:[%s8977_s6 + $0x38] sm:$0xff] }
 0xaa8   :  { %v1074_v23 = vadd.f32 1e-05, %v1072_v22  ;;  %v5280_v22 = vld [vmem:[%s8977_s6 + $0x30] sm:$0xff] }
 0xaa9   :  { %v1071_v24 = vpop.xlane.xlu1 %1070 }
 0xaaa   :  { %6015 = vrsqrt.f32 %v1074_v23  ;;  %v1073_v25 = vmul.f32 0.03125, %v1071_v24  ;;  %v5279_v23 = vld [vmem:[%s8977_s6 + $0x28] sm:$0xff]  ;;  %v5278_v24 = vld [vmem:[%s8977_s6 + $0x20] sm:$0xff] }
 0xaac   :  { %v1075_v26 = vadd.f32 1e-05, %v1073_v25 }
 0xaae   :  { %6017 = vrsqrt.f32 %v1075_v26 }
 0xab7   :  { %v6016_v30 = vpop.eup %6015 }
 0xab8   :  { %v1078_v31 = vmul.f32 %v6016_v30, %v1062_v12 }
 0xaba   :  { %v1084_v33 = vmul.f32 %v1083_v29, %v1078_v31 }
 0xabb   :  { %v6018_v34 = vpop.eup %6017 }
 0xabc   :  { %v1079_v35 = vmul.f32 %v6018_v34, %v1063_v17  ;;  %v6653_v37 = vadd.f32 %v1089_v32, %v1084_v33 }
 0xabe   :  { %v1085_v39 = vmul.f32 %v1083_v29, %v1079_v35  ;;  %5852 = vmatprep.mubr.msk.f32.mxu0 %vm9003_vm0, %v6653_v37 }
 0xac0   :  { %v6657_v40 = vadd.f32 %v1089_v32, %v1085_v39 }
 0xac2   :  { %5853 = vmatmul.mubr.msk.f32.vlgmr.msra.gmra.mxu0 %vm9003_vm0, %v6657_v40 }
 0xac3   :  { %5870 = vmatpush3.msk.msra.mxu0 %vm397_vm1, %v6290_v9 }
 0xac4   :  { %5877 = vmatprep.subr.mxu0 %v5281_v21 }
 0xb82   :  { %v5854_v1 = vpop.f32.mrf.mxu0 }
 0xb83   :  { %v1185_v41 = vadd.f32 %v5854_v1, %v5266_v63 }
 0xb84   :  { %v1179_v42 = vpop.f32.mrf.mxu0 }
 0xb85   :  { %v1180_v43 = vadd.f32 %v5266_v63, %v1179_v42  ;;  %1194 = vrot.lane.b32.xlu1 %v1185_v41, %s9001_s24 }
 0xb87   :  { %1189 = vrot.lane.b32.xlu0 %v1180_v43, %s9001_s24  ;;  %s6094_s24 = smov 124  }
 0xb89   :  { %1420 = vrot.lane.b32.xlu1 %v1180_v43, %s9023_s30 }
 0xb8d   :  { %1424 = vrot.lane.b32.xlu1 %v1185_v41, %s9023_s30 }
 0xbf7   :  { %v1195_v44 = vpop.permute.xlu1 %1194 }
 0xbf8   :  { %v1197_v9 = vmul.f32 %v1195_v44, %v1180_v43  ;;  %v1199_v49 = vmul.f32 %v1195_v44, %v1185_v41 }
 0xbf9   :  { %v1190_v58 = vpop.permute.xlu0 %1189 }
 0xbfa   :  { %v1192_v45 = vmul.f32 %v1190_v58, %v1180_v43  ;;  %v1198_v48 = vmul.f32 %v1190_v58, %v1185_v41  ;;  %v6697_v41 = vld [vmem:[%s8978_s10 + $0x8] sm:$0x3f] }
 0xbfb   :  { %v1421_v25 = vpop.permute.xlu1 %1420  ;;  %v1440_v42 = vrot.slane %v6697_v41, %v6317_v0 }
 0xbfc   :  { %5863 = vmatprep.mubr.msk.f32.mxu1 %vm9003_vm0, %v1192_v45 }
 0xbfd   :  { %5864 = vmatmul.mubr.msk.f32.vlgmr.msra.gmra.mxu1 %vm9003_vm0, %v1197_v9 }
 0xbfe   :  { %5866 = vmatprep.mubr.msk.f32.mxu1 %vm9003_vm0, %v1198_v48 }
 0xbff   :  { %v1425_v29 = vpop.permute.xlu1 %1424 }
 0xc01   :  { %5867 = vmatmul.mubr.msk.f32.gmra.mxu1 %vm9003_vm0, %v1199_v49 }
 0xc02   :  { %1672 = vmatprep.mubr.f32.mxu1 %v6079_v36 }
 0xcbd   :  { %v5865_v50 = vpop.f32.mrf.mxu1 }
 0xcbe   :  { %v1298_v52 = vmul.f32 0.35355338, %v5865_v50 }
 0xcbf   :  { %v1278_v51 = vpop.f32.mrf.mxu1 }
 0xcc0   :  { %v1297_v53 = vmul.f32 0.35355338, %v1278_v51 }
 0xcc1   :  { %v5868_v59 = vpop.f32.mrf.mxu1 }
 0xcc2   :  { %v1301_v55 = vmax.f32 %v1297_v53, %v1298_v52  ;;  %v1300_v2 = vmul.f32 0.35355338, %v5868_v59 }
 0xcc3   :  { %v1288_v56 = vpop.f32.mrf.mxu1 }
 0xcc4   :  { %v1302_v62 = vsub.f32 %v1297_v53, %v1301_v55  ;;  %v1305_v60 = vsub.f32 %v1298_v52, %v1301_v55  ;;  %v1299_v3 = vmul.f32 0.35355338, %v1288_v56 }
 0xcc6   :  { %v1303_v61 = vmul.f32 1.442695, %v1302_v62  ;;  %v1306_v4 = vmul.f32 1.442695, %v1305_v60  ;;  %v1312_v6 = vmax.f32 %v1299_v3, %v1300_v2 }
 0xcc8   :  { %6019 = vpow2.f32 %v1303_v61  ;;  %v1313_v7 = vsub.f32 %v1299_v3, %v1312_v6  ;;  %v1316_v8 = vsub.f32 %v1300_v2, %v1312_v6  ;;  %v5299_v3 = vld [vmem:[%s8979_s7 + $0xf8] sm:$0xff]  ;;  %v5296_v61 = vld [vmem:[%s8979_s7 + $0xe0] sm:$0xff]  ;;  %v5293_v6 = vld [vmem:[%s8979_s7 + $0xc8] sm:$0xff] }
 0xcc9   :  { %6021 = vpow2.f32 %v1306_v4  ;;  %v5298_v4 = vld [vmem:[%s8979_s7 + $0xf0] sm:$0xff] }
 0xcca   :  { %v1314_v10 = vmul.f32 1.442695, %v1313_v7  ;;  %v1317_v11 = vmul.f32 1.442695, %v1316_v8  ;;  %v5295_v7 = vld [vmem:[%s8979_s7 + $0xd8] sm:$0xff]  ;;  %v5292_v8 = vld [vmem:[%s8979_s7 + $0xc0] sm:$0xff] }
 0xccc   :  { %6023 = vpow2.f32 %v1314_v10  ;;  %v5294_v10 = vld [vmem:[%s8979_s7 + $0xd0] sm:$0xff] }
 0xccd   :  { %6025 = vpow2.f32 %v1317_v11  ;;  %v5289_v11 = vld [vmem:[%s8979_s7 + $0xa8] sm:$0xff] }
 0xcd5   :  { %v6020_v12 = vpop.eup %6019 }
 0xcd6   :  { %v6022_v13 = vpop.eup %6021 }
 0xcd7   :  { %v1308_v14 = vadd.f32 %v6022_v13, %v6020_v12 }
 0xcd9   :  { %v6024_v16 = vpop.eup %6023  ;;  %6027 = vrcp.f32 %v1308_v14  ;;  %v5285_v14 = vld [vmem:[%s8979_s7 + $0x88] sm:$0xff] }
 0xcda   :  { %v6026_v17 = vpop.eup %6025 }
 0xcdb   :  { %v1319_v18 = vadd.f32 %v6026_v17, %v6024_v16 }
 0xcdd   :  { %6029 = vrcp.f32 %v1319_v18  ;;  %v5287_v18 = vld [vmem:[%s8979_s7 + $0x98] sm:$0xff] }
 0xce6   :  { %v6028_v54 = vpop.eup %6027 }
 0xce7   :  { %v1310_v19 = vmul.f32 %v6028_v54, %v6020_v12  ;;  %v1311_v5 = vmul.f32 %v6028_v54, %v6022_v13  ;;  %v5291_v12 = vld [vmem:[%s8979_s7 + $0xb8] sm:$0xff]  ;;  %v5288_v13 = vld [vmem:[%s8979_s7 + $0xa0] sm:$0xff]  ;;  %v5286_v54 = vld [vmem:[%s8979_s7 + $0x90] sm:$0xff] }
 0xce9   :  { %5871 = vmatprep.mubr.msk.f32.mxu0 %vm384_vm2, %v1310_v19  ;;  %v5336_v19 = vld [vmem:[%s8980_s9 + $0x2f8] sm:$0xff] }
 0xcea   :  { %v6030_v57 = vpop.eup %6029  ;;  %5872 = vmatmul.mubr.msk.f32.vlgmr.msra.gmra.mxu0 %vm384_vm2, %v1311_v5  ;;  %v5368_v5 = vld [vmem:[%s8980_s9 + $0x3f8] sm:$0xff] }
 0xceb   :  { %v1321_v38 = vmul.f32 %v6030_v57, %v6024_v16  ;;  %v1322_v20 = vmul.f32 %v6030_v57, %v6026_v17  ;;  %5878 = vmatpush3.msra.mxu0 %v5281_v21  ;;  %v5290_v16 = vld [vmem:[%s8979_s7 + $0xb0] sm:$0xff]  ;;  %v5284_v17 = vld [vmem:[%s8979_s7 + $0x80] sm:$0xff] }
 0xcec   :  { %5879 = vmatprep.subr.mxu0 %v5280_v22 }
 0xced   :  { %5874 = vmatprep.mubr.msk.f32.mxu0 %vm384_vm2, %v1321_v38  ;;  %5880 = vmatpush3.msra.mxu0 %v5280_v22 }
 0xcee   :  { %5875 = vmatmul.mubr.msk.f32.gmra.mxu0 %vm384_vm2, %v1322_v20  ;;  %5881 = vmatprep.subr.mxu0 %v5279_v23 }
 0xcef   :  { %5882 = vmatpush3.msra.mxu0 %v5279_v23 }
 0xcf0   :  { %5883 = vmatprep.subr.mxu0 %v5278_v24 }
 0xcf1   :  { %5884 = vmatpush3.msra.mxu0 %v5278_v24  ;;  %v1553_v24 = vrot.slane %v6697_v41, %v6393_v46 }
 0xcf2   :  { %1709 = vmatprep.subr.mxu0 %v5299_v3  ;;  %v5362_v3 = vld [vmem:[%s8980_s9 + $0x3c8] sm:$0xff] }
 0xdaa   :  { %v5873_v26 = vpop.f32.mrf.mxu0 }
 0xdab   :  { %v1427_v31 = vmul.f32 %v5873_v26, %v1425_v29 }
 0xdac   :  { %v1401_v30 = vpop.f32.mrf.mxu0 }
 0xdad   :  { %v1423_v32 = vmul.f32 %v1421_v25, %v1401_v30 }
 0xdae   :  { %v5876_v33 = vpop.f32.mrf.mxu0 }
 0xdaf   :  { %v1428_v34 = vadd.f32 %v1427_v31, %v1423_v32  ;;  %v1430_v39 = vmul.f32 %v5876_v33, %v1425_v29  ;;  %v1559_v29 = vrot.slane %v6697_v41, %v6396_v47 }
 0xdb0   :  { %v1411_v35 = vpop.f32.mrf.mxu0 }
 0xdb1   :  { %v1429_v63 = vmul.f32 %v1421_v25, %v1411_v35  ;;  %5885 = vmatprep.mubr.msk.f32.mxu0 %vm9003_vm0, %v1428_v34  ;;  %v5320_v34 = vld [vmem:[%s8980_s9 + $0x278] sm:$0xff] }
 0xdb2   :  { %v5352_v35 = vld [vmem:[%s8980_s9 + $0x378] sm:$0xff] }
 0xdb3   :  { %v1431_v1 = vadd.f32 %v1430_v39, %v1429_v63  ;;  %v5335_v63 = vld [vmem:[%s8980_s9 + $0x2f0] sm:$0xff] }
 0xdb5   :  { %5886 = vmatmul.mubr.msk.f32.vlgmr.msra.gmra.mxu0 %vm9003_vm0, %v1431_v1  ;;  %v5367_v1 = vld [vmem:[%s8980_s9 + $0x3f0] sm:$0xff] }
 0xdb6   :  { %1749 = vmatprep.mubr.f32.mxu0 %v6079_v36  ;;  %1710 = vmatpush1.msra.mxu0 %v5298_v4  ;;  %v5346_v4 = vld [vmem:[%s8980_s9 + $0x348] sm:$0xff] }
 0xdb7   :  { %1711 = vmatprep.subr.mxu0 %v5295_v7  ;;  %v5361_v7 = vld [vmem:[%s8980_s9 + $0x3c0] sm:$0xff] }
 0xdb8   :  { %1712 = vmatpush1.msra.mxu0 %v5294_v10  ;;  %v5345_v10 = vld [vmem:[%s8980_s9 + $0x340] sm:$0xff] }
 0xdb9   :  { %1713 = vmatprep.subr.mxu0 %v5291_v12  ;;  %v5360_v12 = vld [vmem:[%s8980_s9 + $0x3b8] sm:$0xff] }
 0xdba   :  { %1714 = vmatpush1.msra.mxu0 %v5290_v16  ;;  %v5327_v16 = vld [vmem:[%s8980_s9 + $0x2b0] sm:$0xff] }
 0xdbb   :  { %1715 = vmatprep.subr.mxu0 %v5287_v18  ;;  %v5311_v18 = vld [vmem:[%s8980_s9 + $0x230] sm:$0xff] }
 0xdbc   :  { %1716 = vmatpush1.msra.mxu0 %v5286_v54  ;;  %v5343_v54 = vld [vmem:[%s8980_s9 + $0x330] sm:$0xff] }
 0xdbd   :  { %5652 = vmatprep.subr.mxu0 %v5368_v5  ;;  %v5358_v5 = vld [vmem:[%s8980_s9 + $0x3a8] sm:$0xff] }
 0xe75   :  { %v5887_v43 = vpop.f32.mrf.mxu0 }
 0xe76   :  { %v1519_v44 = vadd.f32 %v5887_v43, %v1440_v42  ;;  %v5319_v43 = vld [vmem:[%s8980_s9 + $0x270] sm:$0xff] }
 0xe77   :  { %v1513_v58 = vpop.f32.mrf.mxu0 }
 0xe78   :  { %v1514_v45 = vadd.f32 %v1513_v58, %v1440_v42  ;;  %v1523_v9 = vadd.f32 %v1519_v44, %v6657_v40  ;;  %v5351_v44 = vld [vmem:[%s8980_s9 + $0x370] sm:$0xff]  ;;  %v5334_v58 = vld [vmem:[%s8980_s9 + $0x2e8] sm:$0xff] }
 0xe7a   :  { %v1527_v48 = vsel %vm9003_vm0, %v1523_v9, 0.0  ;;  %v1522_v49 = vadd.f32 %v1514_v45, %v6653_v37  ;;  %v5297_v37 = vld [vmem:[%s8979_s7 + $0xe8] sm:$0xff] }
 0xe7b   :  { %1528 = vadd.xlane.f32.xlu1 %v1527_v48  ;;  %1632 = vmatprep.subr.mxu1 %v5297_v37  ;;  %v5366_v45 = vld [vmem:[%s8980_s9 + $0x3e8] sm:$0xff] }
 0xe7c   :  { %v1524_v50 = vsel %vm9003_vm0, %v1522_v49, 0.0  ;;  %1633 = vmatpush1.msra.mxu1 %v5296_v61  ;;  %v5350_v48 = vld [vmem:[%s8980_s9 + $0x368] sm:$0xff] }
 0xe7d   :  { %1525 = vadd.xlane.f32.xlu0 %v1524_v50  ;;  %1634 = vmatprep.subr.mxu1 %v5293_v6  ;;  %v5365_v50 = vld [vmem:[%s8980_s9 + $0x3e0] sm:$0xff]  ;;  %v5330_v37 = vld [vmem:[%s8980_s9 + $0x2c8] sm:$0xff] }
 0xe7e   :  { %1635 = vmatpush1.msra.mxu1 %v5292_v8  ;;  %v5314_v61 = vld [vmem:[%s8980_s9 + $0x248] sm:$0xff]  ;;  %v5329_v6 = vld [vmem:[%s8980_s9 + $0x2c0] sm:$0xff] }
 0xe7f   :  { %1636 = vmatprep.subr.mxu1 %v5289_v11  ;;  %v5313_v8 = vld [vmem:[%s8980_s9 + $0x240] sm:$0xff]  ;;  %v5328_v11 = vld [vmem:[%s8980_s9 + $0x2b8] sm:$0xff] }
 0xe80   :  { %1637 = vmatpush1.msra.mxu1 %v5288_v13  ;;  %v5312_v13 = vld [vmem:[%s8980_s9 + $0x238] sm:$0xff] }
 0xe81   :  { %1638 = vmatprep.subr.mxu1 %v5285_v14  ;;  %v5344_v14 = vld [vmem:[%s8980_s9 + $0x338] sm:$0xff] }
 0xe82   :  { %1639 = vmatpush1.msra.mxu1 %v5284_v17  ;;  %v5359_v17 = vld [vmem:[%s8980_s9 + $0x3b0] sm:$0xff] }
 0xe83   :  { %5614 = vmatprep.subr.mxu1 %v5336_v19  ;;  %v5326_v19 = vld [vmem:[%s8980_s9 + $0x2a8] sm:$0xff] }
 0xf04   :  { %v1529_v51 = vpop.xlane.xlu1 %1528 }
 0xf05   :  { %v1531_v52 = vmul.f32 0.03125, %v1529_v51  ;;  %v5317_v51 = vld [vmem:[%s8980_s9 + $0x260] sm:$0xff] }
 0xf06   :  { %v1526_v53 = vpop.xlane.xlu0 %1525 }
 0xf07   :  { %v1530_v59 = vmul.f32 0.03125, %v1526_v53  ;;  %v1533_v55 = vsub.f32 %v1523_v9, %v1531_v52  ;;  %v5318_v9 = vld [vmem:[%s8980_s9 + $0x268] sm:$0xff]  ;;  %v5349_v52 = vld [vmem:[%s8980_s9 + $0x360] sm:$0xff]  ;;  %v5332_v53 = vld [vmem:[%s8980_s9 + $0x2d8] sm:$0xff] }
 0xf09   :  { %v1532_v56 = vsub.f32 %v1522_v49, %v1530_v59  ;;  %v1535_v2 = vmul.f32 %v1533_v55, %v1533_v55  ;;  %v5333_v49 = vld [vmem:[%s8980_s9 + $0x2e0] sm:$0xff]  ;;  %v5364_v59 = vld [vmem:[%s8980_s9 + $0x3d8] sm:$0xff] }
 0xf0b   :  { %v1534_v62 = vmul.f32 %v1532_v56, %v1532_v56  ;;  %v1539_v40 = vsel %vm9003_vm0, %v1535_v2, 0.0  ;;  %v5315_v2 = vld [vmem:[%s8980_s9 + $0x250] sm:$0xff] }
 0xf0d   :  { %v1536_v60 = vsel %vm9003_vm0, %v1534_v62, 0.0  ;;  %v5331_v62 = vld [vmem:[%s8980_s9 + $0x2d0] sm:$0xff] }
 0xf0e   :  { %1537 = vadd.xlane.f32.xlu0 %v1536_v60  ;;  %v5363_v60 = vld [vmem:[%s8980_s9 + $0x3d0] sm:$0xff] }
 0xf12   :  { %1540 = vadd.xlane.f32.xlu0 %v1539_v40  ;;  %v5347_v40 = vld [vmem:[%s8980_s9 + $0x350] sm:$0xff] }
 0xf97   :  { %v1538_v57 = vpop.xlane.xlu0 %1537 }
 0xf98   :  { %v1542_v38 = vmul.f32 0.03125, %v1538_v57  ;;  %v5310_v57 = vld [vmem:[%s8980_s9 + $0x228] sm:$0xff] }
 0xf9a   :  { %v1544_v20 = vadd.f32 1e-05, %v1542_v38  ;;  %v5342_v38 = vld [vmem:[%s8980_s9 + $0x328] sm:$0xff] }
 0xf9b   :  { %v1541_v21 = vpop.xlane.xlu0 %1540 }
 0xf9c   :  { %6031 = vrsqrt.f32 %v1544_v20  ;;  %v1543_v22 = vmul.f32 0.03125, %v1541_v21  ;;  %v5325_v20 = vld [vmem:[%s8980_s9 + $0x2a0] sm:$0xff] }
 0xf9d   :  { %v5357_v21 = vld [vmem:[%s8980_s9 + $0x3a0] sm:$0xff] }
 0xf9e   :  { %v1545_v23 = vadd.f32 1e-05, %v1543_v22  ;;  %v5309_v22 = vld [vmem:[%s8980_s9 + $0x220] sm:$0xff] }
 0xfa0   :  { %6033 = vrsqrt.f32 %v1545_v23  ;;  %v5341_v23 = vld [vmem:[%s8980_s9 + $0x320] sm:$0xff] }
 0xfa9   :  { %v6032_v25 = vpop.eup %6031 }
 0xfaa   :  { %v1548_v26 = vmul.f32 %v6032_v25, %v1532_v56  ;;  %v5348_v56 = vld [vmem:[%s8980_s9 + $0x358] sm:$0xff] }
 0xfab   :  { %v5356_v25 = vld [vmem:[%s8980_s9 + $0x398] sm:$0xff] }
 0xfac   :  { %v1554_v30 = vmul.f32 %v1553_v24, %v1548_v26  ;;  %v5308_v26 = vld [vmem:[%s8980_s9 + $0x218] sm:$0xff] }
 0xfad   :  { %v6034_v31 = vpop.eup %6033 }
 0xfae   :  { %v6765_v32 = vadd.f32 %v1559_v29, %v1554_v30  ;;  %v1549_v33 = vmul.f32 %v6034_v31, %v1533_v55  ;;  %v5316_v55 = vld [vmem:[%s8980_s9 + $0x258] sm:$0xff]  ;;  %v5323_v30 = vld [vmem:[%s8980_s9 + $0x290] sm:$0xff] }
 0xfaf   :  { %v5355_v31 = vld [vmem:[%s8980_s9 + $0x390] sm:$0xff] }
 0xfb0   :  { %5301 = vmatmul.mubr.msk.f32.vlgmr.msra.gmra.mxu1 %vm9003_vm0, %v6765_v32  ;;  %5303 = vmatmul.mubr.msk.f32.vlgmr.msra.gmra.mxu0 %vm9003_vm0, %v6765_v32  ;;  %v1555_v39 = vmul.f32 %v1553_v24, %v1549_v33  ;;  %v5324_v24 = vld [vmem:[%s8980_s9 + $0x298] sm:$0xff]  ;;  %v5307_v33 = vld [vmem:[%s8980_s9 + $0x210] sm:$0xff] }
 0xfb1   :  { %1678 = vmatprep.mubr.f32.mxu1 %v6079_v36  ;;  %1755 = vmatprep.mubr.f32.mxu0 %v6079_v36 }
 0xfb2   :  { %v6785_v42 = vadd.f32 %v1559_v29, %v1555_v39  ;;  %5615 = vmatpush3.msra.mxu1 %v5320_v34  ;;  %5653 = vmatpush3.msra.mxu0 %v5352_v35  ;;  %v5340_v29 = vld [vmem:[%s8980_s9 + $0x318] sm:$0xff]  ;;  %v5339_v34 = vld [vmem:[%s8980_s9 + $0x310] sm:$0xff]  ;;  %v5322_v35 = vld [vmem:[%s8980_s9 + $0x288] sm:$0xff] }
 0xfb3   :  { %5616 = vmatprep.subr.mxu1 %v5335_v63  ;;  %5654 = vmatprep.subr.mxu0 %v5367_v1  ;;  %v5354_v39 = vld [vmem:[%s8980_s9 + $0x388] sm:$0xff] }
 0xfb4   :  { %5302 = vmatmul.mubr.msk.f32.gmra.mxu1 %vm9003_vm0, %v6785_v42  ;;  %5304 = vmatmul.mubr.msk.f32.gmra.mxu0 %vm9003_vm0, %v6785_v42  ;;  %v5306_v63 = vld [vmem:[%s8980_s9 + $0x208] sm:$0xff] }
 0xfb5   :  { %5617 = vmatpush3.msra.mxu1 %v5319_v43  ;;  %5655 = vmatpush3.msra.mxu0 %v5351_v44  ;;  %v5338_v1 = vld [vmem:[%s8980_s9 + $0x308] sm:$0xff]  ;;  %v5321_v43 = vld [vmem:[%s8980_s9 + $0x280] sm:$0xff] }
 0xfb6   :  { %5618 = vmatprep.subr.mxu1 %v5334_v58  ;;  %5656 = vmatprep.subr.mxu0 %v5366_v45  ;;  %v5353_v44 = vld [vmem:[%s8980_s9 + $0x380] sm:$0xff] }
 0xfb7   :  { %5619 = vmatpush3.msra.mxu1 %v5318_v9  ;;  %5657 = vmatpush3.msra.mxu0 %v5350_v48  ;;  %v5305_v58 = vld [vmem:[%s8980_s9 + $0x200] sm:$0xff]  ;;  %v6067_v9 = vld [vmem:[%s9020_s27 + $0x18] sm:$0xff] }
 0xfb8   :  { %5620 = vmatprep.subr.mxu1 %v5333_v49  ;;  %5658 = vmatprep.subr.mxu0 %v5365_v50  ;;  %v5337_v45 = vld [vmem:[%s8980_s9 + $0x300] sm:$0xff] }
 0xfb9   :  { %5621 = vmatpush3.msra.mxu1 %v5317_v51  ;;  %5659 = vmatpush3.msra.mxu0 %v5349_v52  ;;  %v5300_v48 = vld [vmem:[%s8981_s8 + $0x4] sm:$0xf] }
 0xfba   :  { %5622 = vmatprep.subr.mxu1 %v5332_v53  ;;  %5660 = vmatprep.subr.mxu0 %v5364_v59  ;;  %v1585_v49 = vrot.slane %v5300_v48, %v6317_v0  ;;  %v1593_v50 = vrot.slane %v5300_v48, %v6393_v46  ;;  %v1589_v51 = vrot.slane %v5300_v48, %v6608_v15 }
 0xfbb   :  { %5623 = vmatpush3.msra.mxu1 %v5316_v55  ;;  %5661 = vmatpush3.msra.mxu0 %v5348_v56  ;;  %v1597_v52 = vrot.slane %v5300_v48, %v6396_v47 }
 0xfbc   :  { %5624 = vmatprep.subr.mxu1 %v5331_v62  ;;  %5662 = vmatprep.subr.mxu0 %v5363_v60 }
 0xfbd   :  { %5625 = vmatpush3.msra.mxu1 %v5315_v2  ;;  %5663 = vmatpush3.msra.mxu0 %v5347_v40 }
 0xfbe   :  { %5626 = vmatprep.subr.mxu1 %v5330_v37  ;;  %5664 = vmatprep.subr.mxu0 %v5362_v3 }
 0xfbf   :  { %5627 = vmatpush3.msra.mxu1 %v5314_v61  ;;  %5665 = vmatpush3.msra.mxu0 %v5346_v4 }
 0xfc0   :  { %5628 = vmatprep.subr.mxu1 %v5329_v6  ;;  %5666 = vmatprep.subr.mxu0 %v5361_v7 }
 0xfc1   :  { %5629 = vmatpush3.msra.mxu1 %v5313_v8  ;;  %5667 = vmatpush3.msra.mxu0 %v5345_v10 }
 0xfc2   :  { %5630 = vmatprep.subr.mxu1 %v5328_v11  ;;  %5668 = vmatprep.subr.mxu0 %v5360_v12 }
 0xfc3   :  { %5631 = vmatpush3.msra.mxu1 %v5312_v13  ;;  %5669 = vmatpush3.msra.mxu0 %v5344_v14 }
 0xfc4   :  { %5632 = vmatprep.subr.mxu1 %v5327_v16  ;;  %5670 = vmatprep.subr.mxu0 %v5359_v17 }
 0xfc5   :  { %5633 = vmatpush3.msra.mxu1 %v5311_v18  ;;  %5671 = vmatpush3.msra.mxu0 %v5343_v54 }
 0xfc6   :  { %5634 = vmatprep.subr.mxu1 %v5326_v19  ;;  %5672 = vmatprep.subr.mxu0 %v5358_v5  ;;  %v6068_v19 = vld [vmem:[%s9020_s27 + $0x10] sm:$0xff]  ;;  %v6069_v5 = vld [vmem:[%s9020_s27 + $0x8] sm:$0xff] }
 0xfc7   :  { %5635 = vmatpush3.msra.mxu1 %v5310_v57  ;;  %5673 = vmatpush3.msra.mxu0 %v5342_v38  ;;  %v6070_v57 = vld [vmem:[%s9020_s27] sm:$0xff] }
 0xfc8   :  { %5636 = vmatprep.subr.mxu1 %v5325_v20  ;;  %5674 = vmatprep.subr.mxu0 %v5357_v21  ;;  %v1838_v21 = vrot.slane %v6697_v41, %v6608_v15 }
 0xfc9   :  { %5637 = vmatpush3.msra.mxu1 %v5309_v22  ;;  %5675 = vmatpush3.msra.mxu0 %v5341_v23 }
 0xfca   :  { %5638 = vmatprep.subr.mxu1 %v5324_v24  ;;  %5676 = vmatprep.subr.mxu0 %v5356_v25 }
 0xfcb   :  { %5639 = vmatpush3.msra.mxu1 %v5308_v26  ;;  %5677 = vmatpush3.msra.mxu0 %v5340_v29 }
 0xfcc   :  { %5640 = vmatprep.subr.mxu1 %v5323_v30  ;;  %5678 = vmatprep.subr.mxu0 %v5355_v31 }
 0xfcd   :  { %5641 = vmatpush3.msra.mxu1 %v5307_v33  ;;  %5679 = vmatpush3.msra.mxu0 %v5339_v34 }
 0xfce   :  { %5642 = vmatprep.subr.mxu1 %v5322_v35  ;;  %5680 = vmatprep.subr.mxu0 %v5354_v39 }
 0xfcf   :  { %5643 = vmatpush3.msra.mxu1 %v5306_v63  ;;  %5681 = vmatpush3.msra.mxu0 %v5338_v1 }
 0xfd0   :  { %5644 = vmatprep.subr.mxu1 %v5321_v43  ;;  %5682 = vmatprep.subr.mxu0 %v5353_v44 }
 0xfd1   :  { %5645 = vmatpush3.msra.mxu1 %v5305_v58  ;;  %5683 = vmatpush3.msra.mxu0 %v5337_v45 }
 0xfd2   :  { %5899 = vmatprep.subr.mxu0 %v6067_v9 }
0x1070   :  { %v1674_v53 = vpop.f32.mrf.mxu1  ;;  %v1751_v59 = vpop.f32.mrf.mxu0 }
0x1071   :  { %v1675_v55 = vadd.f32 %v1674_v53, %v1585_v49  ;;  %v1752_v56 = vadd.f32 %v1751_v59, %v1593_v50 }
0x1072   :  { %v1676_v62 = vpop.f32.mrf.mxu1  ;;  %v1753_v60 = vpop.f32.mrf.mxu0 }
0x1073   :  { %v1677_v2 = vadd.f32 %v1676_v62, %v1589_v51  ;;  %v1754_v40 = vadd.f32 %v1753_v60, %v1597_v52  ;;  %v1762_v6 = vmax.f32 %v1675_v55, 0.0  ;;  %v1764_v7 = vmax.f32 %v1752_v56, 0.0  ;;  %v5372_v56 = vld [vmem:[%s9019_s28 + $0x50] sm:$0xff]  ;;  %v5371_v62 = vld [vmem:[%s9019_s28 + $0x48] sm:$0xff]  ;;  %v5370_v60 = vld [vmem:[%s9019_s28 + $0x40] sm:$0xff] }
0x1074   :  { %v1680_v37 = vpop.f32.mrf.mxu1  ;;  %v1757_v3 = vpop.f32.mrf.mxu0 }
0x1075   :  { %v1763_v61 = vmax.f32 %v1677_v2, 0.0  ;;  %v1765_v4 = vmax.f32 %v1754_v40, 0.0  ;;  %v1681_v8 = vadd.f32 %v1680_v37, %v1585_v49  ;;  %v1758_v10 = vadd.f32 %v1757_v3, %v1593_v50  ;;  %v6071_v2 = vld [vmem:[%s9022_s2] sm:$0xf]  ;;  %s6097_s2 = smov 127  }
0x1076   :  { %v1682_v11 = vpop.f32.mrf.mxu1  ;;  %v1759_v12 = vpop.f32.mrf.mxu0 }
0x1077   :  { %v1683_v13 = vadd.f32 %v1682_v11, %v1589_v51  ;;  %v1760_v14 = vadd.f32 %v1759_v12, %v1597_v52  ;;  %1903 = vmatprep.mubr.f32.mxu1 %v1763_v61  ;;  %1978 = vmatprep.mubr.f32.mxu0 %v1765_v4  ;;  %v1766_v18 = vmax.f32 %v1681_v8, 0.0  ;;  %v1768_v54 = vmax.f32 %v1758_v10, 0.0 }
0x1078   :  { %1904 = vmatmul.mubr.f32.vlgmr.msra.gmra.mxu1 %v1762_v6  ;;  %1979 = vmatmul.mubr.f32.vlgmr.msra.gmra.mxu0 %v1764_v7  ;;  %v2020_v7 = vrot.slane %v6697_v41, %v6644_v27  ;;  %v2026_v11 = vrot.slane %v6697_v41, %v6647_v28  ;;  %v5375_v41 = vld [vmem:[%s9021_s1 + $0x2] ss:$0 sm:$0xff]  ;;  %s6098_s1 = smov 80  }
0x1079   :  { %v1767_v16 = vmax.f32 %v1683_v13, 0.0  ;;  %v1769_v17 = vmax.f32 %v1760_v14, 0.0  ;;  %5900 = vmatpush3.msra.mxu0 %v6067_v9 }
0x107a   :  { %5901 = vmatprep.subr.mxu0 %v6068_v19 }
0x107b   :  { %1908 = vmatprep.mubr.f32.mxu1 %v1767_v16  ;;  %1983 = vmatprep.mubr.f32.mxu0 %v1769_v17 }
0x107c   :  { %1909 = vmatmul.mubr.f32.gmra.mxu1 %v1766_v18  ;;  %1984 = vmatmul.mubr.f32.gmra.mxu0 %v1768_v54 }
0x107d   :  { %5902 = vmatpush3.msra.mxu0 %v6068_v19 }
0x107e   :  { %5903 = vmatprep.subr.mxu0 %v6069_v5 }
0x107f   :  { %5904 = vmatpush3.msra.mxu0 %v6069_v5 }
0x1080   :  { %5905 = vmatprep.subr.mxu0 %v6070_v57 }
0x1081   :  { %5906 = vmatpush3.msra.mxu0 %v6070_v57 }
0x1138   :  { %v5646_v38 = vpop.f32.mrf.mxu1  ;;  %v5684_v20 = vpop.f32.mrf.mxu0 }
0x113a   :  { %v5647_v22 = vpop.f32.mrf.mxu1  ;;  %v5685_v23 = vpop.f32.mrf.mxu0 }
0x113b   :  { %v5648_v24 = vadd.f32 %v5647_v22, %v5646_v38  ;;  %v5686_v30 = vadd.f32 %v5685_v23, %v5684_v20 }
0x113c   :  { %v5649_v25 = vpop.f32.mrf.mxu1  ;;  %v5687_v26 = vpop.f32.mrf.mxu0 }
0x113d   :  { %v1906_v29 = vadd.f32 %v5648_v24, %v1838_v21 }
0x113e   :  { %v5650_v31 = vpop.f32.mrf.mxu1  ;;  %v5688_v33 = vpop.f32.mrf.mxu0 }
0x113f   :  { %v1981_v34 = vadd.f32 %v5686_v30, %v1906_v29  ;;  %v5651_v35 = vadd.f32 %v5650_v31, %v5649_v25  ;;  %v5689_v63 = vadd.f32 %v5688_v33, %v5687_v26 }
0x1141   :  { %v1911_v39 = vadd.f32 %v5651_v35, %v1838_v21  ;;  %v1989_v1 = vadd.f32 %v1981_v34, %v6765_v32 }
0x1143   :  { %v1986_v43 = vadd.f32 %v5689_v63, %v1911_v39  ;;  %v1991_v44 = vsel %vm9003_vm0, %v1989_v1, 0.0 }
0x1144   :  { %1992 = vadd.xlane.f32.xlu0 %v1991_v44 }
0x1145   :  { %v1990_v58 = vadd.f32 %v1986_v43, %v6785_v42  ;;  %v5373_v42 = vld [vmem:[%s9019_s28 + $0x58] sm:$0xff]  ;;  %s6096_s28 = smov 126  }
0x1146   :  { %5888 = vmatprep.subr.mxu1 %v5373_v42 }
0x1147   :  { %v1994_v45 = vsel %vm9003_vm0, %v1990_v58, 0.0  ;;  %5889 = vmatpush3.msra.mxu1 %v5373_v42 }
0x1148   :  { %1995 = vadd.xlane.f32.xlu1 %v1994_v45  ;;  %5890 = vmatprep.subr.mxu1 %v5372_v56 }
0x1149   :  { %5891 = vmatpush3.msra.mxu1 %v5372_v56 }
0x114a   :  { %5892 = vmatprep.subr.mxu1 %v5371_v62 }
0x114b   :  { %5893 = vmatpush3.msra.mxu1 %v5371_v62 }
0x114c   :  { %5894 = vmatprep.subr.mxu1 %v5370_v60 }
0x114d   :  { %5895 = vmatpush3.msra.mxu1 %v5370_v60 }
0x114e   :  { %5913 = vmatprep.subr.msk.mxu1 %vm397_vm1, %v6071_v2 }
0x11cd   :  { %v1993_v9 = vpop.xlane.xlu0 %1992 }
0x11ce   :  { %v1997_v48 = vmul.f32 0.03125, %v1993_v9 }
0x11d0   :  { %v1999_v49 = vsub.f32 %v1989_v1, %v1997_v48 }
0x11d1   :  { %v1996_v50 = vpop.xlane.xlu1 %1995 }
0x11d2   :  { %v1998_v51 = vmul.f32 0.03125, %v1996_v50  ;;  %v2001_v52 = vmul.f32 %v1999_v49, %v1999_v49 }
0x11d4   :  { %v2000_v53 = vsub.f32 %v1990_v58, %v1998_v51  ;;  %v2003_v59 = vsel %vm9003_vm0, %v2001_v52, 0.0 }
0x11d5   :  { %2004 = vadd.xlane.f32.xlu0 %v2003_v59 }
0x11d6   :  { %v2002_v32 = vmul.f32 %v2000_v53, %v2000_v53 }
0x11d8   :  { %v2006_v55 = vsel %vm9003_vm0, %v2002_v32, 0.0 }
0x11d9   :  { %2007 = vadd.xlane.f32.xlu1 %v2006_v55 }
0x125e   :  { %v2005_v40 = vpop.xlane.xlu0 %2004 }
0x125f   :  { %v2009_v37 = vmul.f32 0.03125, %v2005_v40  ;;  %v5390_v40 = vld [vmem:[%s8977_s6 + $0x58] sm:$0xff] }
0x1261   :  { %v2011_v3 = vadd.f32 1e-05, %v2009_v37  ;;  %v5389_v37 = vld [vmem:[%s8977_s6 + $0x50] sm:$0xff] }
0x1262   :  { %v2008_v61 = vpop.xlane.xlu1 %2007 }
0x1263   :  { %6035 = vrsqrt.f32 %v2011_v3  ;;  %v2010_v4 = vmul.f32 0.03125, %v2008_v61  ;;  %v5388_v3 = vld [vmem:[%s8977_s6 + $0x48] sm:$0xff]  ;;  %v5387_v61 = vld [vmem:[%s8977_s6 + $0x40] sm:$0xff]  ;;  %s6089_s6 = smov 121  }
0x1265   :  { %v2012_v6 = vadd.f32 1e-05, %v2010_v4 }
0x1267   :  { %6037 = vrsqrt.f32 %v2012_v6 }
0x1270   :  { %v6036_v8 = vpop.eup %6035 }
0x1271   :  { %v2015_v10 = vmul.f32 %v6036_v8, %v1999_v49 }
0x1273   :  { %v2021_v12 = vmul.f32 %v2020_v7, %v2015_v10 }
0x1274   :  { %v6038_v13 = vpop.eup %6037 }
0x1275   :  { %v2016_v14 = vmul.f32 %v6038_v13, %v2000_v53  ;;  %v7012_v16 = vadd.f32 %v2026_v11, %v2021_v12 }
0x1277   :  { %v2022_v17 = vmul.f32 %v2020_v7, %v2016_v14  ;;  %5896 = vmatprep.mubr.msk.f32.mxu1 %vm9003_vm0, %v7012_v16 }
0x1279   :  { %v7016_v18 = vadd.f32 %v2026_v11, %v2022_v17 }
0x127b   :  { %5897 = vmatmul.mubr.msk.f32.vlgmr.msra.gmra.mxu1 %vm9003_vm0, %v7016_v18 }
0x127c   :  { %5914 = vmatpush3.msk.msra.mxu1 %vm397_vm1, %v6071_v2  ;;  %vm3106_vm1 = vcmask 1031168  }
0x127d   :  { %5921 = vmatprep.subr.mxu1 %v5390_v40 }
0x133b   :  { %v5898_v54 = vpop.f32.mrf.mxu1 }
0x133c   :  { %v2122_v19 = vadd.f32 %v5898_v54, %v5375_v41 }
0x133d   :  { %v2116_v5 = vpop.f32.mrf.mxu1 }
0x133e   :  { %v2117_v57 = vadd.f32 %v5375_v41, %v2116_v5  ;;  %2131 = vrot.lane.b32.xlu1 %v2122_v19, %s9024_s3 }
0x1340   :  { %2126 = vrot.lane.b32.xlu0 %v2117_v57, %s9024_s3 }
0x1342   :  { %2357 = vrot.lane.b32.xlu1 %v2117_v57, %s9023_s30 }
0x1346   :  { %2361 = vrot.lane.b32.xlu1 %v2122_v19, %s9023_s30 }
0x13b0   :  { %v2132_v38 = vpop.permute.xlu1 %2131 }
0x13b1   :  { %v2134_v22 = vmul.f32 %v2132_v38, %v2117_v57  ;;  %v2136_v24 = vmul.f32 %v2132_v38, %v2122_v19 }
0x13b2   :  { %v2127_v20 = vpop.permute.xlu0 %2126 }
0x13b3   :  { %v2129_v21 = vmul.f32 %v2127_v20, %v2117_v57  ;;  %v2135_v23 = vmul.f32 %v2127_v20, %v2122_v19  ;;  %v7055_v19 = vld [vmem:[%s8978_s10 + $0x10] sm:$0x3f]  ;;  %s6091_s10 = smov 122  }
0x13b4   :  { %v2358_v4 = vpop.permute.xlu1 %2357  ;;  %v2377_v5 = vrot.slane %v7055_v19, %v6317_v0 }
0x13b5   :  { %5907 = vmatprep.mubr.msk.f32.mxu0 %vm9003_vm0, %v2129_v21 }
0x13b6   :  { %5908 = vmatmul.mubr.msk.f32.vlgmr.msra.gmra.mxu0 %vm9003_vm0, %v2134_v22 }
0x13b7   :  { %5910 = vmatprep.mubr.msk.f32.mxu0 %vm9003_vm0, %v2135_v23 }
0x13b8   :  { %v2362_v7 = vpop.permute.xlu1 %2361 }
0x13ba   :  { %5911 = vmatmul.mubr.msk.f32.gmra.mxu0 %vm9003_vm0, %v2136_v24 }
0x13bb   :  { %2609 = vmatprep.mubr.f32.mxu0 %v6079_v36 }
0x1476   :  { %v5909_v25 = vpop.f32.mrf.mxu0 }
0x1477   :  { %v2235_v29 = vmul.f32 0.35355338, %v5909_v25 }
0x1478   :  { %v2215_v26 = vpop.f32.mrf.mxu0 }
0x1479   :  { %v2234_v30 = vmul.f32 0.35355338, %v2215_v26 }
0x147a   :  { %v5912_v31 = vpop.f32.mrf.mxu0 }
0x147b   :  { %v2238_v33 = vmax.f32 %v2234_v30, %v2235_v29  ;;  %v2237_v63 = vmul.f32 0.35355338, %v5912_v31 }
0x147c   :  { %v2225_v34 = vpop.f32.mrf.mxu0 }
0x147d   :  { %v2239_v35 = vsub.f32 %v2234_v30, %v2238_v33  ;;  %v2242_v39 = vsub.f32 %v2235_v29, %v2238_v33  ;;  %v2236_v1 = vmul.f32 0.35355338, %v2225_v34 }
0x147f   :  { %v2240_v43 = vmul.f32 1.442695, %v2239_v35  ;;  %v2243_v44 = vmul.f32 1.442695, %v2242_v39  ;;  %v2249_v58 = vmax.f32 %v2236_v1, %v2237_v63 }
0x1481   :  { %6039 = vpow2.f32 %v2240_v43  ;;  %v2250_v45 = vsub.f32 %v2236_v1, %v2249_v58  ;;  %v2253_v9 = vsub.f32 %v2237_v63, %v2249_v58  ;;  %v5408_v1 = vld [vmem:[%s8979_s7 + $0x178] sm:$0xff]  ;;  %v5405_v43 = vld [vmem:[%s8979_s7 + $0x160] sm:$0xff]  ;;  %v5402_v58 = vld [vmem:[%s8979_s7 + $0x148] sm:$0xff] }
0x1482   :  { %6041 = vpow2.f32 %v2243_v44  ;;  %v5407_v44 = vld [vmem:[%s8979_s7 + $0x170] sm:$0xff] }
0x1483   :  { %v2251_v48 = vmul.f32 1.442695, %v2250_v45  ;;  %v2254_v49 = vmul.f32 1.442695, %v2253_v9  ;;  %v5404_v45 = vld [vmem:[%s8979_s7 + $0x158] sm:$0xff]  ;;  %v5401_v9 = vld [vmem:[%s8979_s7 + $0x140] sm:$0xff] }
0x1485   :  { %6043 = vpow2.f32 %v2251_v48  ;;  %v5403_v48 = vld [vmem:[%s8979_s7 + $0x150] sm:$0xff] }
0x1486   :  { %6045 = vpow2.f32 %v2254_v49  ;;  %v5398_v49 = vld [vmem:[%s8979_s7 + $0x128] sm:$0xff] }
0x148e   :  { %v6040_v50 = vpop.eup %6039 }
0x148f   :  { %v6042_v51 = vpop.eup %6041 }
0x1490   :  { %v2245_v52 = vadd.f32 %v6042_v51, %v6040_v50 }
0x1492   :  { %v6044_v53 = vpop.eup %6043  ;;  %6047 = vrcp.f32 %v2245_v52  ;;  %v5394_v52 = vld [vmem:[%s8979_s7 + $0x108] sm:$0xff] }
0x1493   :  { %v6046_v59 = vpop.eup %6045 }
0x1494   :  { %v2256_v32 = vadd.f32 %v6046_v59, %v6044_v53 }
0x1496   :  { %6049 = vrcp.f32 %v2256_v32  ;;  %v5396_v32 = vld [vmem:[%s8979_s7 + $0x118] sm:$0xff] }
0x149f   :  { %v6048_v55 = vpop.eup %6047 }
0x14a0   :  { %v2247_v42 = vmul.f32 %v6048_v55, %v6040_v50  ;;  %v2248_v56 = vmul.f32 %v6048_v55, %v6042_v51  ;;  %v5400_v50 = vld [vmem:[%s8979_s7 + $0x138] sm:$0xff]  ;;  %v5397_v51 = vld [vmem:[%s8979_s7 + $0x120] sm:$0xff]  ;;  %v5395_v55 = vld [vmem:[%s8979_s7 + $0x110] sm:$0xff] }
0x14a2   :  { %5915 = vmatprep.mubr.msk.f32.mxu1 %vm384_vm2, %v2247_v42  ;;  %v5445_v42 = vld [vmem:[%s8980_s9 + $0x4f8] sm:$0xff] }
0x14a3   :  { %v6050_v62 = vpop.eup %6049  ;;  %5916 = vmatmul.mubr.msk.f32.vlgmr.msra.gmra.mxu1 %vm384_vm2, %v2248_v56  ;;  %v5477_v56 = vld [vmem:[%s8980_s9 + $0x5f8] sm:$0xff] }
0x14a4   :  { %v2258_v60 = vmul.f32 %v6050_v62, %v6044_v53  ;;  %v2259_v2 = vmul.f32 %v6050_v62, %v6046_v59  ;;  %5922 = vmatpush3.msra.mxu1 %v5390_v40  ;;  %v5399_v53 = vld [vmem:[%s8979_s7 + $0x130] sm:$0xff]  ;;  %v5393_v59 = vld [vmem:[%s8979_s7 + $0x100] sm:$0xff] }
0x14a5   :  { %5923 = vmatprep.subr.mxu1 %v5389_v37 }
0x14a6   :  { %5918 = vmatprep.mubr.msk.f32.mxu1 %vm384_vm2, %v2258_v60  ;;  %5924 = vmatpush3.msra.mxu1 %v5389_v37 }
0x14a7   :  { %5919 = vmatmul.mubr.msk.f32.gmra.mxu1 %vm384_vm2, %v2259_v2  ;;  %5925 = vmatprep.subr.mxu1 %v5388_v3  ;;  %vm3098_vm2 = vcmask 1039360  }
0x14a8   :  { %5926 = vmatpush3.msra.mxu1 %v5388_v3 }
0x14a9   :  { %5927 = vmatprep.subr.mxu1 %v5387_v61 }
0x14aa   :  { %5928 = vmatpush3.msra.mxu1 %v5387_v61  ;;  %v2490_v61 = vrot.slane %v7055_v19, %v6393_v46 }
0x14ab   :  { %2646 = vmatprep.subr.mxu1 %v5408_v1  ;;  %v5471_v1 = vld [vmem:[%s8980_s9 + $0x5c8] sm:$0xff] }
0x1563   :  { %v5917_v6 = vpop.f32.mrf.mxu1 }
0x1564   :  { %v2364_v10 = vmul.f32 %v5917_v6, %v2362_v7 }
0x1565   :  { %v2338_v8 = vpop.f32.mrf.mxu1 }
0x1566   :  { %v2360_v11 = vmul.f32 %v2358_v4, %v2338_v8 }
0x1567   :  { %v5920_v12 = vpop.f32.mrf.mxu1 }
0x1568   :  { %v2365_v13 = vadd.f32 %v2364_v10, %v2360_v11  ;;  %v2367_v17 = vmul.f32 %v5920_v12, %v2362_v7  ;;  %v2496_v7 = vrot.slane %v7055_v19, %v6396_v47 }
0x1569   :  { %v2348_v14 = vpop.f32.mrf.mxu1 }
0x156a   :  { %v2366_v41 = vmul.f32 %v2358_v4, %v2348_v14  ;;  %5929 = vmatprep.mubr.msk.f32.mxu1 %vm9003_vm0, %v2365_v13  ;;  %v5429_v13 = vld [vmem:[%s8980_s9 + $0x478] sm:$0xff] }
0x156b   :  { %v5461_v14 = vld [vmem:[%s8980_s9 + $0x578] sm:$0xff] }
0x156c   :  { %v2368_v54 = vadd.f32 %v2367_v17, %v2366_v41  ;;  %v5444_v41 = vld [vmem:[%s8980_s9 + $0x4f0] sm:$0xff] }
0x156e   :  { %5930 = vmatmul.mubr.msk.f32.vlgmr.msra.gmra.mxu1 %vm9003_vm0, %v2368_v54  ;;  %v5476_v54 = vld [vmem:[%s8980_s9 + $0x5f0] sm:$0xff] }
0x156f   :  { %2686 = vmatprep.mubr.f32.mxu1 %v6079_v36  ;;  %2647 = vmatpush1.msra.mxu1 %v5407_v44  ;;  %v5455_v44 = vld [vmem:[%s8980_s9 + $0x548] sm:$0xff] }
0x1570   :  { %2648 = vmatprep.subr.mxu1 %v5404_v45  ;;  %v5470_v45 = vld [vmem:[%s8980_s9 + $0x5c0] sm:$0xff] }
0x1571   :  { %2649 = vmatpush1.msra.mxu1 %v5403_v48  ;;  %v5454_v48 = vld [vmem:[%s8980_s9 + $0x540] sm:$0xff] }
0x1572   :  { %2650 = vmatprep.subr.mxu1 %v5400_v50  ;;  %v5469_v50 = vld [vmem:[%s8980_s9 + $0x5b8] sm:$0xff] }
0x1573   :  { %2651 = vmatpush1.msra.mxu1 %v5399_v53  ;;  %v5436_v53 = vld [vmem:[%s8980_s9 + $0x4b0] sm:$0xff] }
0x1574   :  { %2652 = vmatprep.subr.mxu1 %v5396_v32  ;;  %v5420_v32 = vld [vmem:[%s8980_s9 + $0x430] sm:$0xff] }
0x1575   :  { %2653 = vmatpush1.msra.mxu1 %v5395_v55  ;;  %v5452_v55 = vld [vmem:[%s8980_s9 + $0x530] sm:$0xff] }
0x1576   :  { %5753 = vmatprep.subr.mxu1 %v5477_v56  ;;  %v5467_v56 = vld [vmem:[%s8980_s9 + $0x5a8] sm:$0xff] }
0x162e   :  { %v5931_v57 = vpop.f32.mrf.mxu1 }
0x162f   :  { %v2456_v20 = vadd.f32 %v5931_v57, %v2377_v5  ;;  %v5428_v57 = vld [vmem:[%s8980_s9 + $0x470] sm:$0xff] }
0x1630   :  { %v2450_v38 = vpop.f32.mrf.mxu1 }
0x1631   :  { %v2451_v21 = vadd.f32 %v2450_v38, %v2377_v5  ;;  %v2460_v24 = vadd.f32 %v2456_v20, %v7016_v18  ;;  %v5406_v18 = vld [vmem:[%s8979_s7 + $0x168] sm:$0xff]  ;;  %v5460_v38 = vld [vmem:[%s8980_s9 + $0x570] sm:$0xff]  ;;  %s6095_s7 = smov 125  }
0x1632   :  { %2569 = vmatprep.subr.mxu0 %v5406_v18  ;;  %v5443_v20 = vld [vmem:[%s8980_s9 + $0x4e8] sm:$0xff] }
0x1633   :  { %v2459_v22 = vadd.f32 %v2451_v21, %v7012_v16  ;;  %v2464_v25 = vsel %vm9003_vm0, %v2460_v24, 0.0  ;;  %2570 = vmatpush1.msra.mxu0 %v5405_v43  ;;  %v5475_v21 = vld [vmem:[%s8980_s9 + $0x5e8] sm:$0xff] }
0x1634   :  { %2571 = vmatprep.subr.mxu0 %v5402_v58  ;;  %v5439_v18 = vld [vmem:[%s8980_s9 + $0x4c8] sm:$0xff]  ;;  %v5438_v58 = vld [vmem:[%s8980_s9 + $0x4c0] sm:$0xff] }
0x1635   :  { %v2461_v23 = vsel %vm9003_vm0, %v2459_v22, 0.0  ;;  %2572 = vmatpush1.msra.mxu0 %v5401_v9  ;;  %v5423_v43 = vld [vmem:[%s8980_s9 + $0x448] sm:$0xff]  ;;  %v5422_v9 = vld [vmem:[%s8980_s9 + $0x440] sm:$0xff] }
0x1636   :  { %2462 = vadd.xlane.f32.xlu0 %v2461_v23  ;;  %2573 = vmatprep.subr.mxu0 %v5398_v49  ;;  %v5459_v23 = vld [vmem:[%s8980_s9 + $0x568] sm:$0xff]  ;;  %v5437_v49 = vld [vmem:[%s8980_s9 + $0x4b8] sm:$0xff] }
0x1637   :  { %2574 = vmatpush1.msra.mxu0 %v5397_v51  ;;  %v5421_v51 = vld [vmem:[%s8980_s9 + $0x438] sm:$0xff] }
0x1638   :  { %2575 = vmatprep.subr.mxu0 %v5394_v52  ;;  %v5453_v52 = vld [vmem:[%s8980_s9 + $0x538] sm:$0xff] }
0x1639   :  { %2576 = vmatpush1.msra.mxu0 %v5393_v59  ;;  %v5468_v59 = vld [vmem:[%s8980_s9 + $0x5b0] sm:$0xff] }
0x163a   :  { %2465 = vadd.xlane.f32.xlu0 %v2464_v25  ;;  %5715 = vmatprep.subr.mxu0 %v5445_v42  ;;  %v5474_v25 = vld [vmem:[%s8980_s9 + $0x5e0] sm:$0xff]  ;;  %v5435_v42 = vld [vmem:[%s8980_s9 + $0x4a8] sm:$0xff] }
0x16bf   :  { %v2463_v26 = vpop.xlane.xlu0 %2462 }
0x16c0   :  { %v2467_v29 = vmul.f32 0.03125, %v2463_v26  ;;  %v5426_v26 = vld [vmem:[%s8980_s9 + $0x460] sm:$0xff] }
0x16c2   :  { %v2469_v30 = vsub.f32 %v2459_v22, %v2467_v29  ;;  %v5427_v22 = vld [vmem:[%s8980_s9 + $0x468] sm:$0xff]  ;;  %v5458_v29 = vld [vmem:[%s8980_s9 + $0x560] sm:$0xff] }
0x16c3   :  { %v2466_v31 = vpop.xlane.xlu0 %2465 }
0x16c4   :  { %v2468_v33 = vmul.f32 0.03125, %v2466_v31  ;;  %v2471_v34 = vmul.f32 %v2469_v30, %v2469_v30  ;;  %v5473_v31 = vld [vmem:[%s8980_s9 + $0x5d8] sm:$0xff] }
0x16c6   :  { %v2470_v35 = vsub.f32 %v2460_v24, %v2468_v33  ;;  %v2473_v39 = vsel %vm9003_vm0, %v2471_v34, 0.0  ;;  %v5442_v24 = vld [vmem:[%s8980_s9 + $0x4e0] sm:$0xff]  ;;  %v5425_v33 = vld [vmem:[%s8980_s9 + $0x458] sm:$0xff] }
0x16c7   :  { %2474 = vadd.xlane.f32.xlu1 %v2473_v39  ;;  %v5457_v34 = vld [vmem:[%s8980_s9 + $0x558] sm:$0xff]  ;;  %v5472_v39 = vld [vmem:[%s8980_s9 + $0x5d0] sm:$0xff] }
0x16c8   :  { %v2472_v63 = vmul.f32 %v2470_v35, %v2470_v35 }
0x16ca   :  { %v2476_v16 = vsel %vm9003_vm0, %v2472_v63, 0.0  ;;  %v5424_v63 = vld [vmem:[%s8980_s9 + $0x450] sm:$0xff] }
0x16cb   :  { %2477 = vadd.xlane.f32.xlu0 %v2476_v16  ;;  %v5456_v16 = vld [vmem:[%s8980_s9 + $0x550] sm:$0xff] }
0x1750   :  { %v2475_v62 = vpop.xlane.xlu1 %2474 }
0x1751   :  { %v2479_v60 = vmul.f32 0.03125, %v2475_v62  ;;  %v5419_v62 = vld [vmem:[%s8980_s9 + $0x428] sm:$0xff] }
0x1753   :  { %v2481_v2 = vadd.f32 1e-05, %v2479_v60  ;;  %v5451_v60 = vld [vmem:[%s8980_s9 + $0x528] sm:$0xff] }
0x1754   :  { %v2478_v40 = vpop.xlane.xlu0 %2477 }
0x1755   :  { %6051 = vrsqrt.f32 %v2481_v2  ;;  %v2480_v37 = vmul.f32 0.03125, %v2478_v40  ;;  %v5434_v2 = vld [vmem:[%s8980_s9 + $0x4a0] sm:$0xff] }
0x1756   :  { %v5466_v40 = vld [vmem:[%s8980_s9 + $0x5a0] sm:$0xff] }
0x1757   :  { %v2482_v3 = vadd.f32 1e-05, %v2480_v37  ;;  %v5418_v37 = vld [vmem:[%s8980_s9 + $0x420] sm:$0xff] }
0x1759   :  { %6053 = vrsqrt.f32 %v2482_v3  ;;  %v5450_v3 = vld [vmem:[%s8980_s9 + $0x520] sm:$0xff] }
0x1762   :  { %v6052_v4 = vpop.eup %6051 }
0x1763   :  { %v2485_v6 = vmul.f32 %v6052_v4, %v2469_v30  ;;  %v5441_v30 = vld [vmem:[%s8980_s9 + $0x4d8] sm:$0xff] }
0x1764   :  { %v5465_v4 = vld [vmem:[%s8980_s9 + $0x598] sm:$0xff] }
0x1765   :  { %v2491_v8 = vmul.f32 %v2490_v61, %v2485_v6  ;;  %v5417_v6 = vld [vmem:[%s8980_s9 + $0x418] sm:$0xff] }
0x1766   :  { %v6054_v10 = vpop.eup %6053 }
0x1767   :  { %v7123_v11 = vadd.f32 %v2496_v7, %v2491_v8  ;;  %v2486_v12 = vmul.f32 %v6054_v10, %v2470_v35  ;;  %v5440_v35 = vld [vmem:[%s8980_s9 + $0x4d0] sm:$0xff] }
0x1768   :  { %v5432_v8 = vld [vmem:[%s8980_s9 + $0x490] sm:$0xff] }
0x1769   :  { %5410 = vmatmul.mubr.msk.f32.vlgmr.msra.gmra.mxu0 %vm9003_vm0, %v7123_v11  ;;  %5412 = vmatmul.mubr.msk.f32.vlgmr.msra.gmra.mxu1 %vm9003_vm0, %v7123_v11  ;;  %v2492_v17 = vmul.f32 %v2490_v61, %v2486_v12  ;;  %v5433_v61 = vld [vmem:[%s8980_s9 + $0x498] sm:$0xff]  ;;  %v5464_v10 = vld [vmem:[%s8980_s9 + $0x590] sm:$0xff] }
0x176a   :  { %2615 = vmatprep.mubr.f32.mxu0 %v6079_v36  ;;  %2692 = vmatprep.mubr.f32.mxu1 %v6079_v36  ;;  %v5416_v12 = vld [vmem:[%s8980_s9 + $0x410] sm:$0xff] }
0x176b   :  { %v7143_v5 = vadd.f32 %v2496_v7, %v2492_v17  ;;  %5716 = vmatpush3.msra.mxu0 %v5429_v13  ;;  %5754 = vmatpush3.msra.mxu1 %v5461_v14  ;;  %v5449_v7 = vld [vmem:[%s8980_s9 + $0x518] sm:$0xff]  ;;  %v5448_v13 = vld [vmem:[%s8980_s9 + $0x510] sm:$0xff]  ;;  %v5431_v14 = vld [vmem:[%s8980_s9 + $0x488] sm:$0xff] }
0x176c   :  { %5717 = vmatprep.subr.mxu0 %v5444_v41  ;;  %5755 = vmatprep.subr.mxu1 %v5476_v54  ;;  %v5463_v17 = vld [vmem:[%s8980_s9 + $0x588] sm:$0xff] }
0x176d   :  { %5411 = vmatmul.mubr.msk.f32.gmra.mxu0 %vm9003_vm0, %v7143_v5  ;;  %5413 = vmatmul.mubr.msk.f32.gmra.mxu1 %vm9003_vm0, %v7143_v5  ;;  %v5415_v41 = vld [vmem:[%s8980_s9 + $0x408] sm:$0xff] }
0x176e   :  { %5718 = vmatpush3.msra.mxu0 %v5428_v57  ;;  %5756 = vmatpush3.msra.mxu1 %v5460_v38  ;;  %v5447_v54 = vld [vmem:[%s8980_s9 + $0x508] sm:$0xff]  ;;  %v5430_v57 = vld [vmem:[%s8980_s9 + $0x480] sm:$0xff] }
0x176f   :  { %5719 = vmatprep.subr.mxu0 %v5443_v20  ;;  %5757 = vmatprep.subr.mxu1 %v5475_v21  ;;  %v5462_v38 = vld [vmem:[%s8980_s9 + $0x580] sm:$0xff] }
0x1770   :  { %5720 = vmatpush3.msra.mxu0 %v5427_v22  ;;  %5758 = vmatpush3.msra.mxu1 %v5459_v23  ;;  %v5414_v20 = vld [vmem:[%s8980_s9 + $0x400] sm:$0xff]  ;;  %v5409_v22 = vld [vmem:[%s8981_s8 + $0x8] sm:$0xf] }
0x1771   :  { %5721 = vmatprep.subr.mxu0 %v5442_v24  ;;  %5759 = vmatprep.subr.mxu1 %v5474_v25  ;;  %v5446_v21 = vld [vmem:[%s8980_s9 + $0x500] sm:$0xff]  ;;  %v2522_v23 = vrot.slane %v5409_v22, %v6317_v0  ;;  %v2530_v24 = vrot.slane %v5409_v22, %v6393_v46  ;;  %v2526_v25 = vrot.slane %v5409_v22, %v6608_v15  ;;  %s6084_s9 = smov 115  }
0x1772   :  { %5722 = vmatpush3.msra.mxu0 %v5426_v26  ;;  %5760 = vmatpush3.msra.mxu1 %v5458_v29  ;;  %v2534_v26 = vrot.slane %v5409_v22, %v6396_v47 }
0x1773   :  { %5723 = vmatprep.subr.mxu0 %v5441_v30  ;;  %5761 = vmatprep.subr.mxu1 %v5473_v31 }
0x1774   :  { %5724 = vmatpush3.msra.mxu0 %v5425_v33  ;;  %5762 = vmatpush3.msra.mxu1 %v5457_v34 }
0x1775   :  { %5725 = vmatprep.subr.mxu0 %v5440_v35  ;;  %5763 = vmatprep.subr.mxu1 %v5472_v39 }
0x1776   :  { %5726 = vmatpush3.msra.mxu0 %v5424_v63  ;;  %5764 = vmatpush3.msra.mxu1 %v5456_v16 }
0x1777   :  { %5727 = vmatprep.subr.mxu0 %v5439_v18  ;;  %5765 = vmatprep.subr.mxu1 %v5471_v1 }
0x1778   :  { %5728 = vmatpush3.msra.mxu0 %v5423_v43  ;;  %5766 = vmatpush3.msra.mxu1 %v5455_v44 }
0x1779   :  { %5729 = vmatprep.subr.mxu0 %v5438_v58  ;;  %5767 = vmatprep.subr.mxu1 %v5470_v45 }
0x177a   :  { %5730 = vmatpush3.msra.mxu0 %v5422_v9  ;;  %5768 = vmatpush3.msra.mxu1 %v5454_v48 }
0x177b   :  { %5731 = vmatprep.subr.mxu0 %v5437_v49  ;;  %5769 = vmatprep.subr.mxu1 %v5469_v50 }
0x177c   :  { %5732 = vmatpush3.msra.mxu0 %v5421_v51  ;;  %5770 = vmatpush3.msra.mxu1 %v5453_v52 }
0x177d   :  { %5733 = vmatprep.subr.mxu0 %v5436_v53  ;;  %5771 = vmatprep.subr.mxu1 %v5468_v59 }
0x177e   :  { %5734 = vmatpush3.msra.mxu0 %v5420_v32  ;;  %5772 = vmatpush3.msra.mxu1 %v5452_v55  ;;  %v2775_v32 = vrot.slane %v7055_v19, %v6608_v15 }
0x177f   :  { %5735 = vmatprep.subr.mxu0 %v5435_v42  ;;  %5773 = vmatprep.subr.mxu1 %v5467_v56 }
0x1780   :  { %5736 = vmatpush3.msra.mxu0 %v5419_v62  ;;  %5774 = vmatpush3.msra.mxu1 %v5451_v60 }
0x1781   :  { %5737 = vmatprep.subr.mxu0 %v5434_v2  ;;  %5775 = vmatprep.subr.mxu1 %v5466_v40 }
0x1782   :  { %5738 = vmatpush3.msra.mxu0 %v5418_v37  ;;  %5776 = vmatpush3.msra.mxu1 %v5450_v3  ;;  %v6080_v3 = vmov 1  }
0x1783   :  { %5739 = vmatprep.subr.mxu0 %v5433_v61  ;;  %5777 = vmatprep.subr.mxu1 %v5465_v4  ;;  %v2966_v61 = vld [vmem:[%s8982_s11] sm:$0xff]  ;;  %v6081_v4 = vmov 0  }
0x1784   :  { %5740 = vmatpush3.msra.mxu0 %v5417_v6  ;;  %5778 = vmatpush3.msra.mxu1 %v5449_v7 }
0x1785   :  { %5741 = vmatprep.subr.mxu0 %v5432_v8  ;;  %5779 = vmatprep.subr.mxu1 %v5464_v10  ;;  %v2997_v10 = vld [vmem:[%s8983_s12 + $0x38] sm:$0xff] }
0x1786   :  { %5742 = vmatpush3.msra.mxu0 %v5416_v12  ;;  %5780 = vmatpush3.msra.mxu1 %v5448_v13  ;;  %v2996_v12 = vld [vmem:[%s8983_s12 + $0x30] sm:$0xff]  ;;  %v2995_v13 = vld [vmem:[%s8983_s12 + $0x28] sm:$0xff] }
0x1787   :  { %5743 = vmatprep.subr.mxu0 %v5431_v14  ;;  %5781 = vmatprep.subr.mxu1 %v5463_v17  ;;  %v2994_v14 = vld [vmem:[%s8983_s12 + $0x20] sm:$0xff]  ;;  %v2993_v17 = vld [vmem:[%s8983_s12 + $0x18] sm:$0xff] }
0x1788   :  { %5744 = vmatpush3.msra.mxu0 %v5415_v41  ;;  %5782 = vmatpush3.msra.mxu1 %v5447_v54 }
0x1789   :  { %5745 = vmatprep.subr.mxu0 %v5430_v57  ;;  %5783 = vmatprep.subr.mxu1 %v5462_v38  ;;  %v2967_v57 = vld [vmem:[%s8982_s11 + $0x8] sm:$0xff]  ;;  %v2992_v38 = vld [vmem:[%s8983_s12 + $0x10] sm:$0xff]  ;;  %s6082_s11 = smov 114  }
0x178a   :  { %5746 = vmatpush3.msra.mxu0 %v5414_v20  ;;  %5784 = vmatpush3.msra.mxu1 %v5446_v21  ;;  %v2991_v20 = vld [vmem:[%s8983_s12 + $0x8] sm:$0xff] }
0x178b   :  { %5989 = vset.pattern.permute.xlu1 %v6080_v3  ;;  %5988 = vset.pattern.permute.xlu0 %v6081_v4 }
0x178c   :  { %3028 = vmatprep.subr.mxu0 %v2997_v10 }
0x1829   :  { %v2611_v29 = vpop.f32.mrf.mxu0  ;;  %v2688_v30 = vpop.f32.mrf.mxu1 }
0x182a   :  { %v2612_v31 = vadd.f32 %v2611_v29, %v2522_v23  ;;  %v2689_v33 = vadd.f32 %v2688_v30, %v2530_v24 }
0x182b   :  { %v2613_v34 = vpop.f32.mrf.mxu0  ;;  %v2690_v35 = vpop.f32.mrf.mxu1 }
0x182c   :  { %v2614_v39 = vadd.f32 %v2613_v34, %v2526_v25  ;;  %v2691_v63 = vadd.f32 %v2690_v35, %v2534_v26  ;;  %v2699_v44 = vmax.f32 %v2612_v31, 0.0  ;;  %v2701_v0 = vmax.f32 %v2689_v33, 0.0 }
0x182d   :  { %v2617_v16 = vpop.f32.mrf.mxu0  ;;  %v2694_v18 = vpop.f32.mrf.mxu1 }
0x182e   :  { %v2700_v1 = vmax.f32 %v2614_v39, 0.0  ;;  %v2702_v43 = vmax.f32 %v2691_v63, 0.0  ;;  %v2618_v58 = vadd.f32 %v2617_v16, %v2522_v23  ;;  %v2695_v46 = vadd.f32 %v2694_v18, %v2530_v24  ;;  %v2990_v23 = vld [vmem:[%s8983_s12] sm:$0xff]  ;;  %s6083_s12 = smov 113  }
0x182f   :  { %v2619_v45 = vpop.f32.mrf.mxu0  ;;  %v2696_v9 = vpop.f32.mrf.mxu1  ;;  %v2957_v39 = vrot.slane %v7055_v19, %v6644_v27  ;;  %v2963_v18 = vrot.slane %v7055_v19, %v6647_v28 }
0x1830   :  { %v2620_v48 = vadd.f32 %v2619_v45, %v2526_v25  ;;  %v2697_v47 = vadd.f32 %v2696_v9, %v2534_v26  ;;  %2840 = vmatprep.mubr.f32.mxu0 %v2700_v1  ;;  %2915 = vmatprep.mubr.f32.mxu1 %v2702_v43  ;;  %v2703_v51 = vmax.f32 %v2618_v58, 0.0  ;;  %v2705_v52 = vmax.f32 %v2695_v46, 0.0 }
0x1831   :  { %2841 = vmatmul.mubr.f32.vlgmr.msra.gmra.mxu0 %v2699_v44  ;;  %2916 = vmatmul.mubr.f32.vlgmr.msra.gmra.mxu1 %v2701_v0 }
0x1832   :  { %v2704_v49 = vmax.f32 %v2620_v48, 0.0  ;;  %v2706_v50 = vmax.f32 %v2697_v47, 0.0  ;;  %3029 = vmatpush1.msra.mxu0 %v2996_v12 }
0x1833   :  { %3030 = vmatprep.subr.mxu0 %v2995_v13 }
0x1834   :  { %2845 = vmatprep.mubr.f32.mxu0 %v2704_v49  ;;  %2920 = vmatprep.mubr.f32.mxu1 %v2706_v50 }
0x1835   :  { %2846 = vmatmul.mubr.f32.gmra.mxu0 %v2703_v51  ;;  %2921 = vmatmul.mubr.f32.gmra.mxu1 %v2705_v52 }
0x1836   :  { %3068 = vmatprep.mubr.f32.mxu0 %v6079_v36  ;;  %3031 = vmatpush1.msra.mxu0 %v2994_v14 }
0x1837   :  { %3032 = vmatprep.subr.mxu0 %v2993_v17 }
0x1838   :  { %3033 = vmatpush1.msra.mxu0 %v2992_v38 }
0x1839   :  { %3034 = vmatprep.subr.mxu0 %v2991_v20 }
0x183a   :  { %3035 = vmatpush1.msra.mxu0 %v2990_v23 }
0x18f1   :  { %v5747_v53 = vpop.f32.mrf.mxu0  ;;  %v5785_v59 = vpop.f32.mrf.mxu1 }
0x18f3   :  { %v5748_v55 = vpop.f32.mrf.mxu0  ;;  %v5786_v42 = vpop.f32.mrf.mxu1 }
0x18f4   :  { %v5749_v56 = vadd.f32 %v5748_v55, %v5747_v53  ;;  %v5787_v60 = vadd.f32 %v5786_v42, %v5785_v59 }
0x18f5   :  { %v5750_v41 = vpop.f32.mrf.mxu0  ;;  %v5788_v21 = vpop.f32.mrf.mxu1 }
0x18f6   :  { %v2843_v62 = vadd.f32 %v5749_v56, %v2775_v32 }
0x18f7   :  { %v5751_v54 = vpop.f32.mrf.mxu0  ;;  %v5789_v24 = vpop.f32.mrf.mxu1 }
0x18f8   :  { %v2918_v2 = vadd.f32 %v5787_v60, %v2843_v62  ;;  %v5752_v22 = vadd.f32 %v5751_v54, %v5750_v41  ;;  %v5790_v26 = vadd.f32 %v5789_v24, %v5788_v21 }
0x18fa   :  { %v2926_v40 = vadd.f32 %v2918_v2, %v7123_v11  ;;  %v2848_v25 = vadd.f32 %v5752_v22, %v2775_v32 }
0x18fc   :  { %v2928_v37 = vsel %vm9003_vm0, %v2926_v40, 0.0  ;;  %v2923_v29 = vadd.f32 %v5790_v26, %v2848_v25 }
0x18fd   :  { %2929 = vadd.xlane.f32.xlu0 %v2928_v37 }
0x18fe   :  { %v2927_v30 = vadd.f32 %v2923_v29, %v7143_v5 }
0x1900   :  { %v2931_v31 = vsel %vm9003_vm0, %v2927_v30, 0.0 }
0x1913   :  { %2970 = vperm.xlu0 %5988, %v2966_v61  }
0x1917   :  { %5991 = vset.pattern.permute.xlu0 %v6080_v3 }
0x1918   :  { %2985 = vperm.xlu0 %5991, %v2967_v57  }
0x191c   :  { %5992 = vset.pattern.permute.xlu0 %v6081_v4 }
0x1986   :  { %v2930_v15 = vpop.xlane.xlu0 %2929 }
0x1987   :  { %v2934_v6 = vmul.f32 0.03125, %v2930_v15 }
0x1989   :  { %v2936_v7 = vsub.f32 %v2926_v40, %v2934_v6 }
0x198b   :  { %v2938_v8 = vmul.f32 %v2936_v7, %v2936_v7 }
0x198d   :  { %v2940_v11 = vsel %vm9003_vm0, %v2938_v8, 0.0 }
0x198e   :  { %2941 = vadd.xlane.f32.xlu1 %v2940_v11  ;;  %v2971_v43 = vpop.permute.xlu0 %2970 }
0x1993   :  { %v2986_v55 = vpop.permute.xlu0 %2985 }
0x199f   :  { %2981 = vperm.xlu1 %5989, %v2966_v61  }
0x19a3   :  { %5990 = vset.pattern.permute.xlu1 %v6081_v4 }
0x19c3   :  { %2932 = vadd.xlane.f32.xlu1 %v2931_v31 }
0x19d4   :  { %2975 = vperm.xlu1 %5990, %v2967_v57  }
0x1a17   :  { %v2942_v33 = vpop.xlane.xlu1 %2941 }
0x1a18   :  { %v2946_v34 = vmul.f32 0.03125, %v2942_v33 }
0x1a1a   :  { %v2948_v35 = vadd.f32 1e-05, %v2946_v34 }
0x1a1b   :  { %v2982_v5 = vpop.permute.xlu1 %2981 }
0x1a1c   :  { %6055 = vrsqrt.f32 %v2948_v35 }
0x1a29   :  { %v6056_v63 = vpop.eup %6055 }
0x1a2a   :  { %v2952_v16 = vmul.f32 %v6056_v63, %v2936_v7 }
0x1a2c   :  { %v2958_v1 = vmul.f32 %v2957_v39, %v2952_v16 }
0x1a2e   :  { %v7374_v44 = vadd.f32 %v2963_v18, %v2958_v1 }
0x1a30   :  { %v2978_v0 = vmul.f32 %v2971_v43, %v7374_v44 }
0x1a32   :  { %v2988_v58 = vadd.f32 %v2982_v5, %v2978_v0 }
0x1a34   :  { %5478 = vmatmul.mubr.msk.f32.vlgmr.msra.gmra.mxu0 %vm9003_vm0, %v2988_v58 }
0x1a35   :  { %3074 = vmatprep.mubr.f32.mxu0 %v6079_v36 }
0x1a4c   :  { %v2933_v46 = vpop.xlane.xlu1 %2932 }
0x1a4d   :  { %v2935_v45 = vmul.f32 0.03125, %v2933_v46 }
0x1a4f   :  { %v2937_v27 = vsub.f32 %v2927_v30, %v2935_v45 }
0x1a50   :  { %v2976_v28 = vpop.permute.xlu1 %2975 }
0x1a51   :  { %v2939_v9 = vmul.f32 %v2937_v27, %v2937_v27 }
0x1a53   :  { %v2943_v48 = vsel %vm9003_vm0, %v2939_v9, 0.0 }
0x1a54   :  { %2944 = vadd.xlane.f32.xlu1 %v2943_v48 }
0x1add   :  { %v2945_v19 = vpop.xlane.xlu1 %2944 }
0x1ade   :  { %v2947_v47 = vmul.f32 0.03125, %v2945_v19 }
0x1ae0   :  { %v2949_v49 = vadd.f32 1e-05, %v2947_v47 }
0x1ae2   :  { %6057 = vrsqrt.f32 %v2949_v49 }
0x1aef   :  { %v6058_v50 = vpop.eup %6057 }
0x1af0   :  { %v2953_v51 = vmul.f32 %v6058_v50, %v2937_v27 }
0x1af2   :  { %v2959_v52 = vmul.f32 %v2957_v39, %v2953_v51 }
0x1af4   :  { %v3070_v53 = vpop.f32.mrf.mxu0  ;;  %v7380_v59 = vadd.f32 %v2963_v18, %v2959_v52 }
0x1af5   :  { %v7382_v32 = vmax.f32 %v3070_v53, 0.0 }
0x1af6   :  { %v2979_v42 = vmul.f32 %v2976_v28, %v7380_v59  ;;  %v3072_v62 = vpop.f32.mrf.mxu0 }
0x1af7   :  { %3198 = vrot.lane.b32.xlu0 %v7382_v32, %s6082_s11  ;;  %3206 = vrot.lane.b32.xlu1 %v7382_v32, %s6083_s12  ;;  %v7414_v60 = vmax.f32 %v3072_v62, 0.0 }
0x1af8   :  { %v2989_v56 = vadd.f32 %v2986_v55, %v2979_v42 }
0x1afa   :  { %5479 = vmatmul.mubr.msk.f32.gmra.mxu0 %vm9003_vm0, %v2989_v56  ;;  %vm3391_vm0 = vcmask 785408  }
0x1afb   :  { %3190 = vrot.lane.b32.xlu0 %v7382_v32, %s6084_s9  ;;  %3158 = vrot.lane.b32.xlu1 %v7382_v32, %s6085_s23 }
0x1aff   :  { %3182 = vrot.lane.b32.xlu0 %v7382_v32, %s6086_s25  ;;  %3150 = vrot.lane.b32.xlu1 %v7382_v32, %s6087_s26 }
0x1b03   :  { %3174 = vrot.lane.b32.xlu0 %v7382_v32, %s6088_s4  ;;  %3142 = vrot.lane.b32.xlu1 %v7382_v32, %s6089_s6 }
0x1b07   :  { %3166 = vrot.lane.b32.xlu0 %v7382_v32, %s6090_s29  ;;  %3134 = vrot.lane.b32.xlu1 %v7382_v32, %s6091_s10 }
0x1b0b   :  { %3327 = vrot.lane.b32.xlu0 %v7382_v32, %s9024_s3  ;;  %3126 = vrot.lane.b32.xlu1 %v7382_v32, %s6092_s0 }
0x1b0f   :  { %3214 = vrot.lane.b32.xlu0 %v7382_v32, %s6093_s5  ;;  %3118 = vrot.lane.b32.xlu1 %v7382_v32, %s6094_s24 }
0x1b13   :  { %3200 = vrot.lane.b32.xlu0 %v7414_v60, %s6082_s11  ;;  %3110 = vrot.lane.b32.xlu1 %v7382_v32, %s6095_s7 }
0x1b17   :  { %3192 = vrot.lane.b32.xlu0 %v7414_v60, %s6084_s9  ;;  %3102 = vrot.lane.b32.xlu1 %v7382_v32, %s6096_s28 }
0x1b1b   :  { %3176 = vrot.lane.b32.xlu0 %v7414_v60, %s6088_s4  ;;  %3094 = vrot.lane.b32.xlu1 %v7382_v32, %s6097_s2 }
0x1b1f   :  { %3168 = vrot.lane.b32.xlu0 %v7414_v60, %s6090_s29  ;;  %3208 = vrot.lane.b32.xlu1 %v7414_v60, %s6083_s12 }
0x1b23   :  { %3160 = vrot.lane.b32.xlu0 %v7414_v60, %s6085_s23  ;;  %3184 = vrot.lane.b32.xlu1 %v7414_v60, %s6086_s25 }
0x1b27   :  { %3152 = vrot.lane.b32.xlu0 %v7414_v60, %s6087_s26  ;;  %3216 = vrot.lane.b32.xlu1 %v7414_v60, %s6093_s5 }
0x1b2b   :  { %3144 = vrot.lane.b32.xlu0 %v7414_v60, %s6089_s6 }
0x1b2f   :  { %3136 = vrot.lane.b32.xlu0 %v7414_v60, %s6091_s10 }
0x1b33   :  { %3128 = vrot.lane.b32.xlu0 %v7414_v60, %s6092_s0 }
0x1b37   :  { %3120 = vrot.lane.b32.xlu0 %v7414_v60, %s6094_s24 }
0x1b3b   :  { %3112 = vrot.lane.b32.xlu0 %v7414_v60, %s6095_s7 }
0x1b3f   :  { %3104 = vrot.lane.b32.xlu0 %v7414_v60, %s6096_s28 }
0x1b43   :  { %3096 = vrot.lane.b32.xlu0 %v7414_v60, %s6097_s2 }
0x1b47   :  { %3329 = vrot.lane.b32.xlu0 %v7414_v60, %s9024_s3 }
0x1b69   :  { %v3199_v2 = vpop.permute.xlu0 %3198  ;;  %v3207_v40 = vpop.permute.xlu1 %3206 }
0x1b6d   :  { %v3191_v37 = vpop.permute.xlu0 %3190  ;;  %v3159_v61 = vpop.permute.xlu1 %3158 }
0x1b71   :  { %v3183_v4 = vpop.permute.xlu0 %3182  ;;  %v3151_v15 = vpop.permute.xlu1 %3150 }
0x1b75   :  { %v3175_v6 = vpop.permute.xlu0 %3174  ;;  %v3143_v7 = vpop.permute.xlu1 %3142 }
0x1b79   :  { %v3167_v8 = vpop.permute.xlu0 %3166  ;;  %v7456_v11 = vpop.permute.xlu1 %3134 }
0x1b7d   :  { %v7458_v10 = vpop.permute.xlu0 %3327  ;;  %v7460_v12 = vpop.permute.xlu1 %3126 }
0x1b81   :  { %v7462_v13 = vpop.permute.xlu0 %3214  ;;  %v7464_v14 = vpop.permute.xlu1 %3118 }
0x1b85   :  { %v7466_v17 = vpop.permute.xlu0 %3200  ;;  %v7468_v41 = vpop.permute.xlu1 %3110 }
0x1b86   :  { %v7493_v24 = vsel %vm3202_vm4, %v3199_v2, %v7466_v17 }
0x1b89   :  { %v7470_v54 = vpop.permute.xlu0 %3192  ;;  %v7472_v57 = vpop.permute.xlu1 %3102 }
0x1b8a   :  { %v7505_v29 = vsel %vm3194_vm5, %v3191_v37, %v7470_v54 }
0x1b8d   :  { %v7474_v38 = vpop.permute.xlu0 %3176  ;;  %v7476_v20 = vpop.permute.xlu1 %3094 }
0x1b8e   :  { %v7521_v33 = vsel %vm3178_vm7, %v3175_v6, %v7474_v38 }
0x1b91   :  { %v7478_v21 = vpop.permute.xlu0 %3168  ;;  %v7480_v22 = vpop.permute.xlu1 %3208 }
0x1b92   :  { %3558 = vmatprep.subr.mxu1 %v7480_v22  ;;  %3389 = vrot.lane.b32.xlu0 %v7480_v22, %s9024_s3  ;;  %v7487_v23 = vsel %vm3210_vm3, %v3207_v40, %v7480_v22  ;;  %v7527_v34 = vsel %vm3170_vm8, %v3167_v8, %v7478_v21 }
0x1b93   :  { %3559 = vmatpush1.msra.mxu1 %v7487_v23 }
0x1b94   :  { %3560 = vmatprep.subr.mxu1 %v7466_v17 }
0x1b95   :  { %v7495_v25 = vpop.permute.xlu0 %3160  ;;  %3561 = vmatpush1.msra.mxu1 %v7493_v24  ;;  %v7498_v26 = vpop.permute.xlu1 %3184 }
0x1b96   :  { %3562 = vmatprep.subr.mxu1 %v7470_v54  ;;  %3385 = vrot.lane.b32.xlu0 %v7466_v17, %s9024_s3  ;;  %v7511_v30 = vsel %vm3186_vm6, %v3183_v4, %v7498_v26  ;;  %v7537_v39 = vsel %vm3162_vm9, %v3159_v61, %v7495_v25 }
0x1b97   :  { %3563 = vmatpush1.msra.mxu1 %v7505_v29 }
0x1b98   :  { %3564 = vmatprep.subr.mxu1 %v7498_v26 }
0x1b99   :  { %v7513_v31 = vpop.permute.xlu0 %3152  ;;  %3565 = vmatpush1.msra.mxu1 %v7511_v30  ;;  %v7728_v56 = vpop.permute.xlu1 %3216 }
0x1b9a   :  { %3381 = vrot.lane.b32.xlu0 %v7470_v54, %s9024_s3  ;;  %3566 = vmatprep.subr.mxu1 %v7474_v38  ;;  %v7543_v63 = vsel %vm3154_vm10, %v3151_v15, %v7513_v31 }
0x1b9b   :  { %3567 = vmatpush1.msra.mxu1 %v7521_v33 }
0x1b9c   :  { %3568 = vmatprep.subr.mxu1 %v7478_v21 }
0x1b9d   :  { %v7529_v35 = vpop.permute.xlu0 %3144  ;;  %3569 = vmatpush1.msra.mxu1 %v7527_v34 }
0x1b9e   :  { %3570 = vmatprep.subr.mxu1 %v7495_v25  ;;  %3377 = vrot.lane.b32.xlu0 %v7498_v26, %s9024_s3  ;;  %v7553_v18 = vsel %vm3146_vm11, %v3143_v7, %v7529_v35 }
0x1b9f   :  { %3571 = vmatpush1.msra.mxu1 %v7537_v39 }
0x1ba0   :  { %3572 = vmatprep.subr.mxu1 %v7513_v31 }
0x1ba1   :  { %v7545_v16 = vpop.permute.xlu0 %3136  ;;  %3573 = vmatpush1.msra.mxu1 %v7543_v63 }
0x1ba2   :  { %3574 = vmatprep.subr.mxu1 %v7529_v35  ;;  %3373 = vrot.lane.b32.xlu0 %v7474_v38, %s9024_s3  ;;  %v7560_v1 = vsel %vm9010_vm12, %v7456_v11, %v7545_v16 }
0x1ba3   :  { %3575 = vmatpush1.msra.mxu1 %v7553_v18 }
0x1ba4   :  { %3576 = vmatprep.subr.mxu1 %v7545_v16 }
0x1ba5   :  { %v7562_v43 = vpop.permute.xlu0 %3128  ;;  %3577 = vmatpush1.msra.mxu1 %v7560_v1 }
0x1ba6   :  { %3578 = vmatprep.subr.mxu1 %v7562_v43  ;;  %3369 = vrot.lane.b32.xlu0 %v7478_v21, %s9024_s3  ;;  %v7571_v5 = vsel %vm9009_vm13, %v7460_v12, %v7562_v43 }
0x1ba7   :  { %3579 = vmatpush1.msra.mxu1 %v7571_v5 }
0x1ba9   :  { %v3121_v0 = vpop.permute.xlu0 %3120 }
0x1baa   :  { %3580 = vmatprep.subr.mxu1 %v3121_v0  ;;  %3365 = vrot.lane.b32.xlu0 %v7495_v25, %s9024_s3  ;;  %v7578_v58 = vsel %vm9005_vm14, %v7464_v14, %v3121_v0  ;;  %vm9006_vm14 = vcmask 916480  }
0x1bab   :  { %3581 = vmatpush1.msra.mxu1 %v7578_v58 }
0x1bad   :  { %v3113_v46 = vpop.permute.xlu0 %3112 }
0x1bae   :  { %3582 = vmatprep.subr.mxu1 %v3113_v46  ;;  %3361 = vrot.lane.b32.xlu0 %v7513_v31, %s9024_s3  ;;  %v7585_v45 = vsel %vm9004_vm15, %v7468_v41, %v3113_v46  ;;  %vm9007_vm15 = vcmask 654336  }
0x1baf   :  { %3583 = vmatpush1.msra.mxu1 %v7585_v45 }
0x1bb1   :  { %v3105_v27 = vpop.permute.xlu0 %3104 }
0x1bb2   :  { %3584 = vmatprep.subr.mxu1 %v3105_v27  ;;  %3357 = vrot.lane.b32.xlu0 %v7529_v35, %s9024_s3  ;;  %v7592_v9 = vsel %vm3106_vm1, %v7472_v57, %v3105_v27 }
0x1bb3   :  { %3585 = vmatpush1.msra.mxu1 %v7592_v9 }
0x1bb5   :  { %v7595_v48 = vpop.permute.xlu0 %3096 }
0x1bb6   :  { %3333 = vrot.lane.b32.xlu1 %v7595_v48, %s9024_s3  ;;  %3586 = vmatprep.subr.mxu1 %v7595_v48  ;;  %v7603_v28 = vsel %vm3098_vm2, %v7476_v20, %v7595_v48 }
0x1bb7   :  { %3353 = vrot.lane.b32.xlu0 %v7545_v16, %s9024_s3  ;;  %3587 = vmatpush1.msra.mxu1 %v7603_v28 }
0x1bb8   :  { %3588 = vmatprep.subr.mxu1 %v7414_v60 }
0x1bb9   :  { %3589 = vmatpush1.msra.mxu1 %v7382_v32  ;;  %v7673_v19 = vpop.permute.xlu0 %3329 }
0x1bba   :  { %3232 = vrot.lane.b32.xlu1 %v3121_v0, %s6093_s5 }
0x1bbb   :  { %3349 = vrot.lane.b32.xlu0 %v7562_v43, %s9024_s3 }
0x1bbe   :  { %3462 = vrot.lane.b32.xlu1 %v7562_v43, %s6098_s1 }
0x1bbf   :  { %3345 = vrot.lane.b32.xlu0 %v3121_v0, %s9024_s3 }
0x1bc2   :  { %3228 = vrot.lane.b32.xlu1 %v3113_v46, %s6093_s5 }
0x1bc3   :  { %3341 = vrot.lane.b32.xlu0 %v3113_v46, %s9024_s3 }
0x1bc6   :  { %3458 = vrot.lane.b32.xlu1 %v3121_v0, %s6098_s1 }
0x1bc7   :  { %3337 = vrot.lane.b32.xlu0 %v3105_v27, %s9024_s3 }
0x1bca   :  { %3224 = vrot.lane.b32.xlu1 %v3105_v27, %s6093_s5 }
0x1bcb   :  { %3276 = vrot.lane.b32.xlu0 %v7480_v22, %s6093_s5 }
0x1bce   :  { %3454 = vrot.lane.b32.xlu1 %v3113_v46, %s6098_s1 }
0x1bcf   :  { %3272 = vrot.lane.b32.xlu0 %v7466_v17, %s6093_s5 }
0x1bd2   :  { %3220 = vrot.lane.b32.xlu1 %v7595_v48, %s6093_s5 }
0x1bd3   :  { %3502 = vrot.lane.b32.xlu0 %v7480_v22, %s6098_s1  ;;  %v3086_v22 = vld [vmem:[%s8984_s13 + $0x8] sm:$0xff] }
0x1bd4   :  { %3622 = vmatprep.mubr.f32.mxu1 %v3086_v22 }
0x1bd6   :  { %3450 = vrot.lane.b32.xlu1 %v3105_v27, %s6098_s1 }
0x1bd7   :  { %3268 = vrot.lane.b32.xlu0 %v7470_v54, %s6093_s5 }
0x1bda   :  { %3387 = vrot.lane.b32.xlu1 %v7487_v23, %s9024_s3 }
0x1bdb   :  { %3498 = vrot.lane.b32.xlu0 %v7466_v17, %s6098_s1 }
0x1bde   :  { %3383 = vrot.lane.b32.xlu1 %v7493_v24, %s9024_s3 }
0x1bdf   :  { %3264 = vrot.lane.b32.xlu0 %v7498_v26, %s6093_s5 }
0x1be2   :  { %3379 = vrot.lane.b32.xlu1 %v7505_v29, %s9024_s3 }
0x1be3   :  { %3494 = vrot.lane.b32.xlu0 %v7470_v54, %s6098_s1 }
0x1be6   :  { %3375 = vrot.lane.b32.xlu1 %v7511_v30, %s9024_s3 }
0x1be7   :  { %3260 = vrot.lane.b32.xlu0 %v7474_v38, %s6093_s5 }
0x1bea   :  { %3371 = vrot.lane.b32.xlu1 %v7521_v33, %s9024_s3 }
0x1beb   :  { %3490 = vrot.lane.b32.xlu0 %v7498_v26, %s6098_s1 }
0x1bee   :  { %3367 = vrot.lane.b32.xlu1 %v7527_v34, %s9024_s3 }
0x1bef   :  { %3256 = vrot.lane.b32.xlu0 %v7478_v21, %s6093_s5 }
0x1bf2   :  { %3363 = vrot.lane.b32.xlu1 %v7537_v39, %s9024_s3 }
0x1bf3   :  { %3486 = vrot.lane.b32.xlu0 %v7474_v38, %s6098_s1 }
0x1bf6   :  { %3359 = vrot.lane.b32.xlu1 %v7543_v63, %s9024_s3 }
0x1bf7   :  { %3252 = vrot.lane.b32.xlu0 %v7495_v25, %s6093_s5 }
0x1bfa   :  { %3355 = vrot.lane.b32.xlu1 %v7553_v18, %s9024_s3 }
0x1bfb   :  { %3482 = vrot.lane.b32.xlu0 %v7478_v21, %s6098_s1 }
0x1bfe   :  { %3351 = vrot.lane.b32.xlu1 %v7560_v1, %s9024_s3 }
0x1bff   :  { %3248 = vrot.lane.b32.xlu0 %v7513_v31, %s6093_s5 }
0x1c02   :  { %3270 = vrot.lane.b32.xlu1 %v7493_v24, %s6093_s5 }
0x1c03   :  { %3478 = vrot.lane.b32.xlu0 %v7495_v25, %s6098_s1  ;;  %v7821_v25 = vld [vmem:[%s8984_s13 + $0x18] sm:$0xff] }
0x1c04   :  { %v7679_v47 = vpop.permute.xlu0 %3389  ;;  %3693 = vmatprep.mubr.f32.mxu0 %v7821_v25 }
0x1c05   :  { %3629 = vmatprep.subr.mxu0 %v7679_v47 }
0x1c06   :  { %3500 = vrot.lane.b32.xlu1 %v7487_v23, %s6098_s1 }
0x1c07   :  { %3244 = vrot.lane.b32.xlu0 %v7529_v35, %s6093_s5 }
0x1c08   :  { %v7686_v49 = vpop.permute.xlu0 %3385 }
0x1c0a   :  { %3266 = vrot.lane.b32.xlu1 %v7505_v29, %s6093_s5 }
0x1c0b   :  { %3474 = vrot.lane.b32.xlu0 %v7513_v31, %s6098_s1 }
0x1c0c   :  { %v7692_v50 = vpop.permute.xlu0 %3381 }
0x1c0e   :  { %3496 = vrot.lane.b32.xlu1 %v7493_v24, %s6098_s1 }
0x1c0f   :  { %3240 = vrot.lane.b32.xlu0 %v7545_v16, %s6093_s5 }
0x1c10   :  { %v7698_v51 = vpop.permute.xlu0 %3377 }
0x1c12   :  { %3262 = vrot.lane.b32.xlu1 %v7511_v30, %s6093_s5 }
0x1c13   :  { %3470 = vrot.lane.b32.xlu0 %v7529_v35, %s6098_s1 }
0x1c14   :  { %v7704_v52 = vpop.permute.xlu0 %3373 }
0x1c16   :  { %3492 = vrot.lane.b32.xlu1 %v7505_v29, %s6098_s1 }
0x1c17   :  { %3236 = vrot.lane.b32.xlu0 %v7562_v43, %s6093_s5 }
0x1c18   :  { %v7710_v53 = vpop.permute.xlu0 %3369 }
0x1c1a   :  { %3258 = vrot.lane.b32.xlu1 %v7521_v33, %s6093_s5 }
0x1c1b   :  { %3466 = vrot.lane.b32.xlu0 %v7545_v16, %s6098_s1 }
0x1c1c   :  { %v7716_v55 = vpop.permute.xlu0 %3365 }
0x1c1e   :  { %3488 = vrot.lane.b32.xlu1 %v7511_v30, %s6098_s1 }
0x1c1f   :  { %3347 = vrot.lane.b32.xlu0 %v7571_v5, %s9024_s3 }
0x1c20   :  { %v7722_v42 = vpop.permute.xlu0 %3361 }
0x1c22   :  { %3254 = vrot.lane.b32.xlu1 %v7527_v34, %s6093_s5 }
0x1c23   :  { %3343 = vrot.lane.b32.xlu0 %v7578_v58, %s9024_s3 }
0x1c24   :  { %v7730_v62 = vpop.permute.xlu0 %3357 }
0x1c26   :  { %3484 = vrot.lane.b32.xlu1 %v7521_v33, %s6098_s1 }
0x1c27   :  { %3339 = vrot.lane.b32.xlu0 %v7585_v45, %s9024_s3 }
0x1c28   :  { %v7736_v2 = vpop.permute.xlu1 %3333 }
0x1c29   :  { %v7738_v40 = vpop.permute.xlu0 %3353 }
0x1c2a   :  { %3250 = vrot.lane.b32.xlu1 %v7537_v39, %s6093_s5 }
0x1c2b   :  { %3335 = vrot.lane.b32.xlu0 %v7592_v9, %s9024_s3 }
0x1c2c   :  { %v7744_v37 = vpop.permute.xlu1 %3232 }
0x1c2d   :  { %v7746_v61 = vpop.permute.xlu0 %3349 }
0x1c2e   :  { %3480 = vrot.lane.b32.xlu1 %v7527_v34, %s6098_s1 }
0x1c2f   :  { %3331 = vrot.lane.b32.xlu0 %v7603_v28, %s9024_s3 }
0x1c30   :  { %v7752_v4 = vpop.permute.xlu1 %3462 }
0x1c31   :  { %v7754_v15 = vpop.permute.xlu0 %3345 }
0x1c32   :  { %3246 = vrot.lane.b32.xlu1 %v7543_v63, %s6093_s5 }
0x1c33   :  { %3274 = vrot.lane.b32.xlu0 %v7487_v23, %s6093_s5 }
0x1c34   :  { %v7760_v6 = vpop.permute.xlu1 %3228 }
0x1c35   :  { %v7762_v7 = vpop.permute.xlu0 %3341 }
0x1c36   :  { %3476 = vrot.lane.b32.xlu1 %v7537_v39, %s6098_s1  ;;  %v7848_v39 = vld [vmem:[%s8985_s16] sm:$0xff] }
0x1c37   :  { %3230 = vrot.lane.b32.xlu0 %v7578_v58, %s6093_s5 }
0x1c38   :  { %v7768_v8 = vpop.permute.xlu1 %3458 }
0x1c39   :  { %v7770_v11 = vpop.permute.xlu0 %3337 }
0x1c3a   :  { %3242 = vrot.lane.b32.xlu1 %v7553_v18, %s6093_s5 }
0x1c3b   :  { %3460 = vrot.lane.b32.xlu0 %v7571_v5, %s6098_s1 }
0x1c3c   :  { %v7776_v12 = vpop.permute.xlu1 %3224 }
0x1c3d   :  { %v7778_v14 = vpop.permute.xlu0 %3276 }
0x1c3e   :  { %3590 = vmatprep.subr.mxu1 %v7778_v14  ;;  %3472 = vrot.lane.b32.xlu1 %v7543_v63, %s6098_s1 }
0x1c3f   :  { %3456 = vrot.lane.b32.xlu0 %v7578_v58, %s6098_s1 }
0x1c40   :  { %v7785_v17 = vpop.permute.xlu1 %3454 }
0x1c41   :  { %v7787_v41 = vpop.permute.xlu0 %3272 }
0x1c42   :  { %3238 = vrot.lane.b32.xlu1 %v7560_v1, %s6093_s5 }
0x1c43   :  { %3222 = vrot.lane.b32.xlu0 %v7592_v9, %s6093_s5 }
0x1c44   :  { %v7793_v54 = vpop.permute.xlu1 %3220 }
0x1c45   :  { %v7795_v57 = vpop.permute.xlu0 %3502 }
0x1c46   :  { %3468 = vrot.lane.b32.xlu1 %v7553_v18, %s6098_s1 }
0x1c47   :  { %3452 = vrot.lane.b32.xlu0 %v7585_v45, %s6098_s1 }
0x1c48   :  { %v7801_v38 = vpop.permute.xlu1 %3450 }
0x1c49   :  { %v7803_v20 = vpop.permute.xlu0 %3268 }
0x1c4a   :  { %3234 = vrot.lane.b32.xlu1 %v7571_v5, %s6093_s5 }
0x1c4b   :  { %3218 = vrot.lane.b32.xlu0 %v7603_v28, %s6093_s5 }
0x1c4c   :  { %v3388_v21 = vpop.permute.xlu1 %3387 }
0x1c4d   :  { %v7812_v23 = vpop.permute.xlu0 %3498  ;;  %v3407_v24 = vsel %vm3391_vm0, %v3388_v21, %v7679_v47 }
0x1c4e   :  { %3464 = vrot.lane.b32.xlu1 %v7560_v1, %s6098_s1  ;;  %3630 = vmatpush1.msra.mxu0 %v3407_v24 }
0x1c4f   :  { %3448 = vrot.lane.b32.xlu0 %v7592_v9, %s6098_s1  ;;  %3631 = vmatprep.subr.mxu0 %v7686_v49 }
0x1c50   :  { %v3384_v26 = vpop.permute.xlu1 %3383 }
0x1c51   :  { %v7827_v29 = vpop.permute.xlu0 %3264  ;;  %v3406_v30 = vsel %vm3391_vm0, %v3384_v26, %v7686_v49 }
0x1c52   :  { %3226 = vrot.lane.b32.xlu1 %v7585_v45, %s6093_s5  ;;  %3632 = vmatpush1.msra.mxu0 %v3406_v30 }
0x1c53   :  { %3444 = vrot.lane.b32.xlu0 %v7603_v28, %s6098_s1  ;;  %3633 = vmatprep.subr.mxu0 %v7692_v50 }
0x1c54   :  { %v3380_v31 = vpop.permute.xlu1 %3379 }
0x1c55   :  { %v7836_v33 = vpop.permute.xlu0 %3494  ;;  %v3405_v34 = vsel %vm3391_vm0, %v3380_v31, %v7692_v50 }
0x1c56   :  { %3446 = vrot.lane.b32.xlu1 %v7595_v48, %s6098_s1  ;;  %3634 = vmatpush1.msra.mxu0 %v3405_v34 }
0x1c57   :  { %3440 = vrot.lane.b32.xlu0 %v7382_v32, %s6098_s1  ;;  %3635 = vmatprep.subr.mxu0 %v7698_v51 }
0x1c58   :  { %v3376_v35 = vpop.permute.xlu1 %3375 }
0x1c59   :  { %v7850_v63 = vpop.permute.xlu0 %3260  ;;  %v3404_v16 = vsel %vm3391_vm0, %v3376_v35, %v7698_v51 }
0x1c5a   :  { %3442 = vrot.lane.b32.xlu1 %v7414_v60, %s6098_s1  ;;  %3636 = vmatpush1.msra.mxu0 %v3404_v16 }
0x1c5b   :  { %3637 = vmatprep.subr.mxu0 %v7704_v52  ;;  %3555 = vperm.xlu0 %5992, %v7848_v39  }
0x1c5c   :  { %v3372_v32 = vpop.permute.xlu1 %3371 }
0x1c5d   :  { %v7858_v18 = vpop.permute.xlu0 %3490  ;;  %v3403_v1 = vsel %vm3391_vm0, %v3372_v32, %v7704_v52 }
0x1c5e   :  { %3638 = vmatpush1.msra.mxu0 %v3403_v1 }
0x1c5f   :  { %3639 = vmatprep.subr.mxu0 %v7710_v53  ;;  %5993 = vset.pattern.permute.xlu0 %v6080_v3 }
0x1c60   :  { %v3368_v43 = vpop.permute.xlu1 %3367 }
0x1c61   :  { %v7864_v5 = vpop.permute.xlu0 %3256  ;;  %v3402_v60 = vsel %vm3391_vm0, %v3368_v43, %v7710_v53 }
0x1c62   :  { %3640 = vmatpush1.msra.mxu0 %v3402_v60 }
0x1c63   :  { %3641 = vmatprep.subr.mxu0 %v7716_v55 }
0x1c64   :  { %v3364_v0 = vpop.permute.xlu1 %3363 }
0x1c65   :  { %v7869_v58 = vpop.permute.xlu0 %3486  ;;  %v3401_v46 = vsel %vm3391_vm0, %v3364_v0, %v7716_v55 }
0x1c66   :  { %3642 = vmatpush1.msra.mxu0 %v3401_v46 }
0x1c67   :  { %3643 = vmatprep.subr.mxu0 %v7722_v42 }
0x1c68   :  { %v3360_v45 = vpop.permute.xlu1 %3359 }
0x1c69   :  { %v7874_v3 = vpop.permute.xlu0 %3252  ;;  %v3400_v27 = vsel %vm3391_vm0, %v3360_v45, %v7722_v42 }
0x1c6a   :  { %3644 = vmatpush1.msra.mxu0 %v3400_v27 }
0x1c6b   :  { %3645 = vmatprep.subr.mxu0 %v7730_v62 }
0x1c6c   :  { %v3356_v9 = vpop.permute.xlu1 %3355 }
0x1c6d   :  { %v7879_v48 = vpop.permute.xlu0 %3482  ;;  %v3399_v28 = vsel %vm3391_vm0, %v3356_v9, %v7730_v62 }
0x1c6e   :  { %3646 = vmatpush1.msra.mxu0 %v3399_v28 }
0x1c6f   :  { %3647 = vmatprep.subr.mxu0 %v7738_v40 }
0x1c70   :  { %v3352_v47 = vpop.permute.xlu1 %3351 }
0x1c71   :  { %v7884_v49 = vpop.permute.xlu0 %3248  ;;  %v3398_v50 = vsel %vm3391_vm0, %v3352_v47, %v7738_v40 }
0x1c72   :  { %3648 = vmatpush1.msra.mxu0 %v3398_v50 }
0x1c73   :  { %3649 = vmatprep.subr.mxu0 %v7746_v61 }
0x1c74   :  { %v3271_v51 = vpop.permute.xlu1 %3270 }
0x1c75   :  { %v7889_v52 = vpop.permute.xlu0 %3478 }
0x1c78   :  { %v3501_v53 = vpop.permute.xlu1 %3500 }
0x1c79   :  { %v7891_v55 = vpop.permute.xlu0 %3244 }
0x1c7c   :  { %v3267_v42 = vpop.permute.xlu1 %3266 }
0x1c7d   :  { %v7893_v62 = vpop.permute.xlu0 %3474 }
0x1c80   :  { %v3497_v21 = vpop.permute.xlu1 %3496 }
0x1c81   :  { %v7895_v22 = vpop.permute.xlu0 %3240 }
0x1c84   :  { %v3263_v24 = vpop.permute.xlu1 %3262 }
0x1c85   :  { %v7897_v26 = vpop.permute.xlu0 %3470 }
0x1c88   :  { %v3493_v30 = vpop.permute.xlu1 %3492 }
0x1c89   :  { %v7899_v40 = vpop.permute.xlu0 %3236 }
0x1c8c   :  { %v3259_v31 = vpop.permute.xlu1 %3258 }
0x1c8d   :  { %v7901_v34 = vpop.permute.xlu0 %3466 }
0x1c90   :  { %v3489_v35 = vpop.permute.xlu1 %3488 }
0x1c91   :  { %v3348_v16 = vpop.permute.xlu0 %3347 }
0x1c92   :  { %v3397_v32 = vsel %vm3391_vm0, %v3348_v16, %v7746_v61 }
0x1c93   :  { %3650 = vmatpush1.msra.mxu0 %v3397_v32 }
0x1c94   :  { %3651 = vmatprep.subr.mxu0 %v7754_v15  ;;  %v3255_v1 = vpop.permute.xlu1 %3254 }
0x1c95   :  { %v3344_v43 = vpop.permute.xlu0 %3343 }
0x1c96   :  { %v3396_v60 = vsel %vm3391_vm0, %v3344_v43, %v7754_v15 }
0x1c97   :  { %3652 = vmatpush1.msra.mxu0 %v3396_v60 }
0x1c98   :  { %3653 = vmatprep.subr.mxu0 %v7762_v7  ;;  %v3485_v0 = vpop.permute.xlu1 %3484 }
0x1c99   :  { %v3340_v46 = vpop.permute.xlu0 %3339 }
0x1c9a   :  { %v3395_v45 = vsel %vm3391_vm0, %v3340_v46, %v7762_v7  ;;  %v3392_v7 = vsel %vm3391_vm0, %v7458_v10, %v7673_v19  ;;  %v3519_v10 = vsel %vm9007_vm15, %v3497_v21, %v7812_v23 }
0x1c9b   :  { %3654 = vmatpush1.msra.mxu0 %v3395_v45 }
0x1c9c   :  { %3655 = vmatprep.subr.mxu0 %v7770_v11  ;;  %v3251_v61 = vpop.permute.xlu1 %3250 }
0x1c9d   :  { %v3336_v27 = vpop.permute.xlu0 %3335 }
0x1c9e   :  { %v3394_v9 = vsel %vm3391_vm0, %v3336_v27, %v7770_v11  ;;  %v3520_v11 = vsel %vm9007_vm15, %v3501_v53, %v7795_v57 }
0x1c9f   :  { %3656 = vmatpush1.msra.mxu0 %v3394_v9 }
0x1ca0   :  { %3657 = vmatprep.subr.mxu0 %v7736_v2  ;;  %v3481_v15 = vpop.permute.xlu1 %3480 }
0x1ca1   :  { %v3332_v28 = vpop.permute.xlu0 %3331 }
0x1ca2   :  { %v3393_v47 = vsel %vm3391_vm0, %v3332_v28, %v7736_v2  ;;  %v3293_v2 = vsel %vm9006_vm14, %v3271_v51, %v7787_v41 }
0x1ca3   :  { %3658 = vmatpush1.msra.mxu0 %v3393_v47 }
0x1ca4   :  { %3659 = vmatprep.subr.mxu0 %v7673_v19  ;;  %v3247_v50 = vpop.permute.xlu1 %3246 }
0x1ca5   :  { %v3275_v16 = vpop.permute.xlu0 %3274  ;;  %3660 = vmatpush1.msra.mxu0 %v3392_v7 }
0x1ca6   :  { %v3294_v32 = vsel %vm9006_vm14, %v3275_v16, %v7778_v14  ;;  %3661 = vmatprep.subr.mxu0 %v7795_v57  ;;  %v3292_v14 = vsel %vm9006_vm14, %v3267_v42, %v7803_v20  ;;  %v3518_v57 = vsel %vm9007_vm15, %v3493_v30, %v7836_v33 }
0x1ca7   :  { %3591 = vmatpush2.msra.mxu1 %v3294_v32  ;;  %3662 = vmatpush2.msra.mxu0 %v3520_v11 }
0x1ca8   :  { %3592 = vmatprep.subr.mxu1 %v7787_v41  ;;  %3663 = vmatprep.subr.mxu0 %v7812_v23  ;;  %v3477_v19 = vpop.permute.xlu1 %3476  ;;  %v3291_v41 = vsel %vm9006_vm14, %v3263_v24, %v7827_v29  ;;  %v3517_v23 = vsel %vm9007_vm15, %v3489_v35, %v7858_v18 }
0x1ca9   :  { %v7932_v43 = vpop.permute.xlu0 %3230  ;;  %3593 = vmatpush2.msra.mxu1 %v3293_v2  ;;  %3664 = vmatpush2.msra.mxu0 %v3519_v10 }
0x1caa   :  { %3594 = vmatprep.subr.mxu1 %v7803_v20  ;;  %3665 = vmatprep.subr.mxu0 %v7836_v33  ;;  %v3290_v20 = vsel %vm9006_vm14, %v3259_v31, %v7850_v63  ;;  %v3516_v33 = vsel %vm9007_vm15, %v3485_v0, %v7869_v58 }
0x1cab   :  { %3595 = vmatpush2.msra.mxu1 %v3292_v14  ;;  %3666 = vmatpush2.msra.mxu0 %v3518_v57 }
0x1cac   :  { %3596 = vmatprep.subr.mxu1 %v7827_v29  ;;  %3667 = vmatprep.subr.mxu0 %v7858_v18  ;;  %v3243_v51 = vpop.permute.xlu1 %3242  ;;  %v3289_v29 = vsel %vm9006_vm14, %v3255_v1, %v7864_v5  ;;  %v3515_v18 = vsel %vm9007_vm15, %v3481_v15, %v7879_v48 }
0x1cad   :  { %v3461_v53 = vpop.permute.xlu0 %3460  ;;  %3597 = vmatpush2.msra.mxu1 %v3291_v41  ;;  %3668 = vmatpush2.msra.mxu0 %v3517_v23 }
0x1cae   :  { %3598 = vmatprep.subr.mxu1 %v7850_v63  ;;  %3669 = vmatprep.subr.mxu0 %v7869_v58  ;;  %v3288_v63 = vsel %vm9006_vm14, %v3251_v61, %v7874_v3  ;;  %v3514_v58 = vsel %vm9007_vm15, %v3477_v19, %v7889_v52  ;;  %v3510_v46 = vsel %vm9007_vm15, %v3461_v53, %v7752_v4 }
0x1caf   :  { %3599 = vmatpush2.msra.mxu1 %v3290_v20  ;;  %3670 = vmatpush2.msra.mxu0 %v3516_v33 }
0x1cb0   :  { %3600 = vmatprep.subr.mxu1 %v7864_v5  ;;  %3671 = vmatprep.subr.mxu0 %v7879_v48  ;;  %v3473_v42 = vpop.permute.xlu1 %3472  ;;  %v3287_v5 = vsel %vm9006_vm14, %v3247_v50, %v7884_v49 }
0x1cb1   :  { %v3457_v21 = vpop.permute.xlu0 %3456  ;;  %3601 = vmatpush2.msra.mxu1 %v3289_v29  ;;  %3672 = vmatpush2.msra.mxu0 %v3515_v18  ;;  %v3513_v48 = vsel %vm9007_vm15, %v3473_v42, %v7893_v62 }
0x1cb2   :  { %3602 = vmatprep.subr.mxu1 %v7874_v3  ;;  %3673 = vmatprep.subr.mxu0 %v7889_v52  ;;  %v3286_v3 = vsel %vm9006_vm14, %v3243_v51, %v7891_v55  ;;  %v3509_v45 = vsel %vm9007_vm15, %v3457_v21, %v7768_v8 }
0x1cb3   :  { %3603 = vmatpush2.msra.mxu1 %v3288_v63  ;;  %3674 = vmatpush2.msra.mxu0 %v3514_v58 }
0x1cb4   :  { %3604 = vmatprep.subr.mxu1 %v7884_v49  ;;  %3675 = vmatprep.subr.mxu0 %v7893_v62  ;;  %v3239_v24 = vpop.permute.xlu1 %3238 }
0x1cb5   :  { %v3223_v30 = vpop.permute.xlu0 %3222  ;;  %3605 = vmatpush2.msra.mxu1 %v3287_v5  ;;  %3676 = vmatpush2.msra.mxu0 %v3513_v48  ;;  %v3285_v52 = vsel %vm9006_vm14, %v3239_v24, %v7895_v22 }
0x1cb6   :  { %3606 = vmatprep.subr.mxu1 %v7891_v55  ;;  %3677 = vmatprep.subr.mxu0 %v7897_v26 }
0x1cb7   :  { %3607 = vmatpush2.msra.mxu1 %v3286_v3 }
0x1cb8   :  { %3608 = vmatprep.subr.mxu1 %v7895_v22  ;;  %v3469_v49 = vpop.permute.xlu1 %3468  ;;  %v3283_v22 = vsel %vm9006_vm14, %v7932_v43, %v7744_v37 }
0x1cb9   :  { %v3453_v31 = vpop.permute.xlu0 %3452  ;;  %3609 = vmatpush2.msra.mxu1 %v3285_v52  ;;  %v3512_v62 = vsel %vm9007_vm15, %v3469_v49, %v7897_v26 }
0x1cba   :  { %3610 = vmatprep.subr.mxu1 %v7899_v40  ;;  %3678 = vmatpush2.msra.mxu0 %v3512_v62  ;;  %v3508_v27 = vsel %vm9007_vm15, %v3453_v31, %v7785_v17 }
0x1cbb   :  { %3679 = vmatprep.subr.mxu0 %v7901_v34 }
0x1cbc   :  { %v3235_v55 = vpop.permute.xlu1 %3234 }
0x1cbd   :  { %v3219_v35 = vpop.permute.xlu0 %3218  ;;  %v3284_v1 = vsel %vm9006_vm14, %v3235_v55, %v7899_v40 }
0x1cbe   :  { %3611 = vmatpush2.msra.mxu1 %v3284_v1 }
0x1cbf   :  { %3612 = vmatprep.subr.mxu1 %v7744_v37 }
0x1cc0   :  { %3613 = vmatpush2.msra.mxu1 %v3283_v22  ;;  %v3465_v60 = vpop.permute.xlu1 %3464 }
0x1cc1   :  { %v3449_v26 = vpop.permute.xlu0 %3448  ;;  %v3511_v0 = vsel %vm9007_vm15, %v3465_v60, %v7901_v34  ;;  %3614 = vmatprep.subr.mxu1 %v7760_v6  ;;  %v3281_v34 = vsel %vm9006_vm14, %v3223_v30, %v7776_v12 }
0x1cc2   :  { %3680 = vmatpush2.msra.mxu0 %v3511_v0 }
0x1cc3   :  { %3681 = vmatprep.subr.mxu0 %v7752_v4 }
0x1cc4   :  { %3682 = vmatpush2.msra.mxu0 %v3510_v46  ;;  %v3227_v40 = vpop.permute.xlu1 %3226 }
0x1cc5   :  { %v3282_v37 = vsel %vm9006_vm14, %v3227_v40, %v7760_v6  ;;  %3683 = vmatprep.subr.mxu0 %v7768_v8  ;;  %v3445_v61 = vpop.permute.xlu0 %3444  ;;  %v3280_v6 = vsel %vm9006_vm14, %v3219_v35, %v7793_v54  ;;  %v3507_v8 = vsel %vm9007_vm15, %v3449_v26, %v7801_v38 }
0x1cc6   :  { %3615 = vmatpush2.msra.mxu1 %v3282_v37  ;;  %3684 = vmatpush2.msra.mxu0 %v3509_v45 }
0x1cc7   :  { %3616 = vmatprep.subr.mxu1 %v7776_v12  ;;  %3685 = vmatprep.subr.mxu0 %v7785_v17  ;;  %v3085_v12 = vld [vmem:[%s8984_s13] sm:$0xff]  ;;  %v3279_v17 = vsel %vm9006_vm14, %v7462_v13, %v7728_v56  ;;  %v3076_v13 = vpop.f32.mrf.mxu0  ;;  %vm9025_vm14 = vcmask 1014784  }
0x1cc8   :  { %3617 = vmatpush2.msra.mxu1 %v3281_v34  ;;  %3686 = vmatpush2.msra.mxu0 %v3508_v27  ;;  %v3447_v4 = vpop.permute.xlu1 %3446  ;;  %v8103_v42 = vmax.f32 %v3076_v13, 0.0 }
0x1cc9   :  { %3618 = vmatprep.subr.mxu1 %v7793_v54  ;;  %3687 = vmatprep.subr.mxu0 %v7801_v38  ;;  %v3506_v9 = vsel %vm9007_vm15, %v3445_v61, %v3447_v4  ;;  %v3441_v15 = vpop.permute.xlu0 %3440  ;;  %v3087_v38 = vld [vmem:[%s8984_s13 + $0x10] sm:$0xff]  ;;  %v3078_v47 = vpop.f32.mrf.mxu0 }
0x1cca   :  { %3619 = vmatpush2.msra.mxu1 %v3280_v6  ;;  %3688 = vmatpush2.msra.mxu0 %v3507_v8  ;;  %v8098_v18 = vmax.f32 %v3078_v47, 0.0 }
0x1ccb   :  { %3620 = vmatprep.subr.mxu1 %v7728_v56  ;;  %3689 = vmatprep.subr.mxu0 %v3447_v4 }
0x1ccc   :  { %3621 = vmatpush2.msra.mxu1 %v3279_v17  ;;  %3690 = vmatpush2.msra.mxu0 %v3506_v9  ;;  %v3443_v54 = vpop.permute.xlu1 %3442 }
0x1ccd   :  { %3623 = vmatmul.mubr.f32.vlgmr.msra.gmra.mxu1 %v3085_v12  ;;  %3691 = vmatprep.subr.mxu0 %v3443_v54  ;;  %v3505_v28 = vsel %vm9007_vm15, %v3441_v15, %v3443_v54  ;;  %vm9026_vm15 = vcmask 1022976  }
0x1cce   :  { %3692 = vmatpush2.msra.mxu0 %v3505_v28  ;;  %3895 = vmatprep.mubr.f32.mxu1 %v6079_v36 }
0x1ccf   :  { %3694 = vmatmul.mubr.f32.vlgmr.msra.gmra.mxu0 %v3087_v38 }
0x1cd0   :  { %4010 = vmatprep.mubr.f32.mxu0 %v6079_v36 }
0x1cd6   :  { %v8024_v56 = vpop.permute.xlu0 %3555 }
0x1d8d   :  { %v3624_v7 = vpop.f32.mrf.mxu1 }
0x1d8e   :  { %v3625_v50 = vadd.f32 %v3624_v7, %v8024_v56 }
0x1d8f   :  { %v3626_v16 = vpop.f32.mrf.mxu1  ;;  %v3695_v11 = vpop.f32.mrf.mxu0 }
0x1d90   :  { %v3627_v32 = vadd.f32 %v3626_v16, %v8024_v56  ;;  %v3696_v2 = vadd.f32 %v3695_v11, %v3625_v50 }
0x1d91   :  { %v3697_v10 = vpop.f32.mrf.mxu0 }
0x1d92   :  { %3711 = vrot.lane.b32.xlu0 %v3696_v2, %s6096_s28  ;;  %3702 = vrot.lane.b32.xlu1 %v3696_v2, %s6097_s2  ;;  %v3698_v19 = vadd.f32 %v3697_v10, %v3627_v32  ;;  %v3089_v10 = vld [vmem:[%s8986_s14] sm:$0xff] }
0x1d96   :  { %3704 = vrot.lane.b32.xlu1 %v3698_v19, %s6097_s2 }
0x1d9a   :  { %3713 = vrot.lane.b32.xlu1 %v3698_v19, %s6096_s28 }
0x1e04   :  { %v3703_v43 = vpop.permute.xlu1 %3702  ;;  %v3712_v23 = vpop.permute.xlu0 %3711 }
0x1e08   :  { %v3705_v14 = vpop.permute.xlu1 %3704 }
0x1e09   :  { %v3706_v57 = vsel %vm3098_vm2, %v3703_v43, %v3705_v14  ;;  %v3710_v41 = vmax.f32 %v3698_v19, %v3705_v14 }
0x1e0a   :  { %v3709_v51 = vmax.f32 %v3696_v2, %v3706_v57 }
0x1e0c   :  { %v3714_v53 = vpop.permute.xlu1 %3713 }
0x1e0d   :  { %v3715_v20 = vsel %vm3106_vm1, %v3712_v23, %v3714_v53  ;;  %v8034_v33 = vmax.f32 %v3710_v41, %v3714_v53 }
0x1e0e   :  { %v8036_v29 = vmax.f32 %v3709_v51, %v3715_v20 }
0x1e0f   :  { %3822 = vrot.lane.b32.xlu1 %v8034_v33, %s6083_s12 }
0x1e10   :  { %3820 = vrot.lane.b32.xlu0 %v8036_v29, %s6083_s12 }
0x1e13   :  { %3815 = vrot.lane.b32.xlu1 %v8034_v33, %s6082_s11 }
0x1e14   :  { %3813 = vrot.lane.b32.xlu0 %v8036_v29, %s6082_s11 }
0x1e17   :  { %3808 = vrot.lane.b32.xlu1 %v8034_v33, %s6084_s9 }
0x1e18   :  { %3806 = vrot.lane.b32.xlu0 %v8036_v29, %s6084_s9 }
0x1e1b   :  { %3801 = vrot.lane.b32.xlu1 %v8034_v33, %s6086_s25 }
0x1e1c   :  { %3799 = vrot.lane.b32.xlu0 %v8036_v29, %s6086_s25 }
0x1e1f   :  { %3794 = vrot.lane.b32.xlu1 %v8034_v33, %s6088_s4 }
0x1e20   :  { %3792 = vrot.lane.b32.xlu0 %v8036_v29, %s6088_s4 }
0x1e23   :  { %3787 = vrot.lane.b32.xlu1 %v8034_v33, %s6090_s29 }
0x1e24   :  { %3785 = vrot.lane.b32.xlu0 %v8036_v29, %s6090_s29 }
0x1e27   :  { %3780 = vrot.lane.b32.xlu1 %v8034_v33, %s6085_s23 }
0x1e28   :  { %3778 = vrot.lane.b32.xlu0 %v8036_v29, %s6085_s23 }
0x1e2b   :  { %3773 = vrot.lane.b32.xlu1 %v8034_v33, %s6087_s26 }
0x1e2c   :  { %3771 = vrot.lane.b32.xlu0 %v8036_v29, %s6087_s26 }
0x1e2f   :  { %3766 = vrot.lane.b32.xlu1 %v8034_v33, %s6089_s6 }
0x1e30   :  { %3764 = vrot.lane.b32.xlu0 %v8036_v29, %s6089_s6 }
0x1e33   :  { %3759 = vrot.lane.b32.xlu1 %v8034_v33, %s6091_s10 }
0x1e34   :  { %3757 = vrot.lane.b32.xlu0 %v8036_v29, %s6091_s10 }
0x1e37   :  { %3752 = vrot.lane.b32.xlu1 %v8034_v33, %s6092_s0 }
0x1e38   :  { %3750 = vrot.lane.b32.xlu0 %v8036_v29, %s6092_s0 }
0x1e3b   :  { %3745 = vrot.lane.b32.xlu1 %v8034_v33, %s6094_s24 }
0x1e3c   :  { %3743 = vrot.lane.b32.xlu0 %v8036_v29, %s6094_s24 }
0x1e3f   :  { %3738 = vrot.lane.b32.xlu1 %v8034_v33, %s6095_s7 }
0x1e40   :  { %3736 = vrot.lane.b32.xlu0 %v8036_v29, %s6095_s7 }
0x1e43   :  { %3731 = vrot.lane.b32.xlu1 %v8034_v33, %s6096_s28 }
0x1e44   :  { %3729 = vrot.lane.b32.xlu0 %v8036_v29, %s6096_s28 }
0x1e47   :  { %3724 = vrot.lane.b32.xlu1 %v8034_v33, %s6097_s2 }
0x1e48   :  { %3722 = vrot.lane.b32.xlu0 %v8036_v29, %s6097_s2 }
0x1e4b   :  { %4174 = vrot.lane.b32.xlu1 %v8098_v18, %s6083_s12 }
0x1e4c   :  { %3828 = vperm.xlu0 %5993, %v7848_v39  }
0x1e4f   :  { %4167 = vrot.lane.b32.xlu1 %v8098_v18, %s6082_s11 }
0x1e50   :  { %4172 = vrot.lane.b32.xlu0 %v8103_v42, %s6083_s12 }
0x1e53   :  { %4160 = vrot.lane.b32.xlu1 %v8098_v18, %s6084_s9 }
0x1e54   :  { %4165 = vrot.lane.b32.xlu0 %v8103_v42, %s6082_s11 }
0x1e57   :  { %4153 = vrot.lane.b32.xlu1 %v8098_v18, %s6086_s25 }
0x1e58   :  { %4158 = vrot.lane.b32.xlu0 %v8103_v42, %s6084_s9 }
0x1e5b   :  { %4146 = vrot.lane.b32.xlu1 %v8098_v18, %s6088_s4 }
0x1e5c   :  { %4151 = vrot.lane.b32.xlu0 %v8103_v42, %s6086_s25 }
0x1e5f   :  { %4139 = vrot.lane.b32.xlu1 %v8098_v18, %s6090_s29 }
0x1e60   :  { %4144 = vrot.lane.b32.xlu0 %v8103_v42, %s6088_s4 }
0x1e63   :  { %4132 = vrot.lane.b32.xlu1 %v8098_v18, %s6085_s23 }
0x1e64   :  { %4137 = vrot.lane.b32.xlu0 %v8103_v42, %s6090_s29 }
0x1e67   :  { %4125 = vrot.lane.b32.xlu1 %v8098_v18, %s6087_s26 }
0x1e68   :  { %4130 = vrot.lane.b32.xlu0 %v8103_v42, %s6085_s23 }
0x1e6b   :  { %4118 = vrot.lane.b32.xlu1 %v8098_v18, %s6089_s6 }
0x1e6c   :  { %4123 = vrot.lane.b32.xlu0 %v8103_v42, %s6087_s26 }
0x1e6f   :  { %4111 = vrot.lane.b32.xlu1 %v8098_v18, %s6091_s10 }
0x1e70   :  { %4116 = vrot.lane.b32.xlu0 %v8103_v42, %s6089_s6 }
0x1e73   :  { %4104 = vrot.lane.b32.xlu1 %v8098_v18, %s6092_s0 }
0x1e74   :  { %4109 = vrot.lane.b32.xlu0 %v8103_v42, %s6091_s10 }
0x1e77   :  { %4097 = vrot.lane.b32.xlu1 %v8098_v18, %s6094_s24 }
0x1e78   :  { %4102 = vrot.lane.b32.xlu0 %v8103_v42, %s6092_s0 }
0x1e7b   :  { %4090 = vrot.lane.b32.xlu1 %v8098_v18, %s6095_s7 }
0x1e7c   :  { %4095 = vrot.lane.b32.xlu0 %v8103_v42, %s6094_s24 }
0x1e7f   :  { %4083 = vrot.lane.b32.xlu1 %v8098_v18, %s6096_s28 }
0x1e80   :  { %4088 = vrot.lane.b32.xlu0 %v8103_v42, %s6095_s7 }
0x1e81   :  { %v3823_v39 = vpop.permute.xlu1 %3822 }
0x1e82   :  { %3831 = vmatprep.subr.mxu1 %v3823_v39  ;;  %v3821_v21 = vpop.permute.xlu0 %3820 }
0x1e83   :  { %v3824_v63 = vsel %vm3210_vm3, %v3821_v21, %v3823_v39  ;;  %4076 = vrot.lane.b32.xlu1 %v8098_v18, %s6097_s2 }
0x1e84   :  { %4081 = vrot.lane.b32.xlu0 %v8103_v42, %s6096_s28  ;;  %3832 = vmatpush1.msra.mxu1 %v3824_v63 }
0x1e85   :  { %v3816_v58 = vpop.permute.xlu1 %3815 }
0x1e86   :  { %3833 = vmatprep.subr.mxu1 %v3816_v58  ;;  %v3814_v5 = vpop.permute.xlu0 %3813 }
0x1e87   :  { %v3817_v48 = vsel %vm3202_vm4, %v3814_v5, %v3816_v58 }
0x1e88   :  { %4074 = vrot.lane.b32.xlu0 %v8103_v42, %s6097_s2  ;;  %3834 = vmatpush1.msra.mxu1 %v3817_v48 }
0x1e89   :  { %v3809_v24 = vpop.permute.xlu1 %3808 }
0x1e8a   :  { %3835 = vmatprep.subr.mxu1 %v3809_v24  ;;  %v3807_v30 = vpop.permute.xlu0 %3806 }
0x1e8b   :  { %v3810_v3 = vsel %vm3194_vm5, %v3807_v30, %v3809_v24 }
0x1e8c   :  { %3836 = vmatpush1.msra.mxu1 %v3810_v3 }
0x1e8d   :  { %v3802_v52 = vpop.permute.xlu1 %3801 }
0x1e8e   :  { %3837 = vmatprep.subr.mxu1 %v3802_v52  ;;  %v3800_v49 = vpop.permute.xlu0 %3799 }
0x1e8f   :  { %v3803_v31 = vsel %vm3186_vm6, %v3800_v49, %v3802_v52 }
0x1e90   :  { %3838 = vmatpush1.msra.mxu1 %v3803_v31 }
0x1e91   :  { %v3795_v62 = vpop.permute.xlu1 %3794 }
0x1e92   :  { %3839 = vmatprep.subr.mxu1 %v3795_v62  ;;  %v3793_v55 = vpop.permute.xlu0 %3792 }
0x1e93   :  { %v3796_v35 = vsel %vm3178_vm7, %v3793_v55, %v3795_v62 }
0x1e94   :  { %3840 = vmatpush1.msra.mxu1 %v3796_v35 }
0x1e95   :  { %v3788_v1 = vpop.permute.xlu1 %3787 }
0x1e96   :  { %3841 = vmatprep.subr.mxu1 %v3788_v1  ;;  %v3786_v22 = vpop.permute.xlu0 %3785 }
0x1e97   :  { %v3789_v60 = vsel %vm3170_vm8, %v3786_v22, %v3788_v1 }
0x1e98   :  { %3842 = vmatpush1.msra.mxu1 %v3789_v60 }
0x1e99   :  { %v3781_v26 = vpop.permute.xlu1 %3780 }
0x1e9a   :  { %3843 = vmatprep.subr.mxu1 %v3781_v26  ;;  %v3779_v0 = vpop.permute.xlu0 %3778 }
0x1e9b   :  { %v3782_v46 = vsel %vm3162_vm9, %v3779_v0, %v3781_v26 }
0x1e9c   :  { %3844 = vmatpush1.msra.mxu1 %v3782_v46 }
0x1e9d   :  { %v3774_v40 = vpop.permute.xlu1 %3773 }
0x1e9e   :  { %3845 = vmatprep.subr.mxu1 %v3774_v40  ;;  %v3772_v45 = vpop.permute.xlu0 %3771 }
0x1e9f   :  { %v3775_v37 = vsel %vm3154_vm10, %v3772_v45, %v3774_v40 }
0x1ea0   :  { %3846 = vmatpush1.msra.mxu1 %v3775_v37 }
0x1ea1   :  { %v3767_v61 = vpop.permute.xlu1 %3766 }
0x1ea2   :  { %3847 = vmatprep.subr.mxu1 %v3767_v61  ;;  %v3765_v34 = vpop.permute.xlu0 %3764 }
0x1ea3   :  { %v3768_v27 = vsel %vm3146_vm11, %v3765_v34, %v3767_v61 }
0x1ea4   :  { %3848 = vmatpush1.msra.mxu1 %v3768_v27 }
0x1ea5   :  { %v3760_v4 = vpop.permute.xlu1 %3759 }
0x1ea6   :  { %3849 = vmatprep.subr.mxu1 %v3760_v4  ;;  %v3758_v6 = vpop.permute.xlu0 %3757 }
0x1ea7   :  { %v3761_v8 = vsel %vm9010_vm12, %v3758_v6, %v3760_v4 }
0x1ea8   :  { %3850 = vmatpush1.msra.mxu1 %v3761_v8 }
0x1ea9   :  { %v3753_v12 = vpop.permute.xlu1 %3752 }
0x1eaa   :  { %3851 = vmatprep.subr.mxu1 %v3753_v12  ;;  %v3751_v17 = vpop.permute.xlu0 %3750 }
0x1eab   :  { %v3754_v9 = vsel %vm9009_vm13, %v3751_v17, %v3753_v12 }
0x1eac   :  { %3852 = vmatpush1.msra.mxu1 %v3754_v9 }
0x1ead   :  { %v3746_v15 = vpop.permute.xlu1 %3745 }
0x1eae   :  { %3853 = vmatprep.subr.mxu1 %v3746_v15  ;;  %v3744_v54 = vpop.permute.xlu0 %3743 }
0x1eaf   :  { %v3747_v38 = vsel %vm9025_vm14, %v3744_v54, %v3746_v15 }
0x1eb0   :  { %3854 = vmatpush1.msra.mxu1 %v3747_v38 }
0x1eb1   :  { %v3739_v28 = vpop.permute.xlu1 %3738 }
0x1eb2   :  { %3855 = vmatprep.subr.mxu1 %v3739_v28  ;;  %v3737_v13 = vpop.permute.xlu0 %3736 }
0x1eb3   :  { %v3740_v47 = vsel %vm9026_vm15, %v3737_v13, %v3739_v28 }
0x1eb4   :  { %3856 = vmatpush1.msra.mxu1 %v3740_v47 }
0x1eb5   :  { %v3732_v7 = vpop.permute.xlu1 %3731 }
0x1eb6   :  { %3857 = vmatprep.subr.mxu1 %v3732_v7  ;;  %v3730_v50 = vpop.permute.xlu0 %3729 }
0x1eb7   :  { %v3733_v16 = vsel %vm3106_vm1, %v3730_v50, %v3732_v7 }
0x1eb8   :  { %3858 = vmatpush1.msra.mxu1 %v3733_v16 }
0x1eb9   :  { %v3725_v11 = vpop.permute.xlu1 %3724 }
0x1eba   :  { %3859 = vmatprep.subr.mxu1 %v3725_v11  ;;  %v3723_v32 = vpop.permute.xlu0 %3722 }
0x1ebb   :  { %v3726_v2 = vsel %vm3098_vm2, %v3723_v32, %v3725_v11 }
0x1ebc   :  { %3860 = vmatpush1.msra.mxu1 %v3726_v2 }
0x1ebd   :  { %v8181_v19 = vpop.permute.xlu1 %4174  ;;  %3861 = vmatprep.subr.mxu1 %v8034_v33 }
0x1ebe   :  { %4353 = vrot.lane.b32.xlu1 %v8181_v19, %s9024_s3  ;;  %3862 = vmatpush1.msra.mxu1 %v8036_v29 }
0x1ebf   :  { %3896 = vmatmul.mubr.f32.vlgmr.msra.gmra.mxu1 %v3089_v10 }
0x1ec0   :  { %4650 = vmatprep.mubr.f32.mxu1 %v7821_v25 }
0x1ec1   :  { %v8188_v43 = vpop.permute.xlu1 %4167 }
0x1ec2   :  { %4349 = vrot.lane.b32.xlu1 %v8188_v43, %s9024_s3 }
0x1ec5   :  { %v8192_v14 = vpop.permute.xlu1 %4160 }
0x1ec6   :  { %4345 = vrot.lane.b32.xlu1 %v8192_v14, %s9024_s3 }
0x1ec7   :  { %v8196_v57 = vpop.permute.xlu0 %3828 }
0x1ec9   :  { %v8198_v41 = vpop.permute.xlu1 %4153 }
0x1eca   :  { %4341 = vrot.lane.b32.xlu1 %v8198_v41, %s9024_s3 }
0x1ecb   :  { %v4173_v23 = vpop.permute.xlu0 %4172 }
0x1ecc   :  { %v8204_v25 = vsel %vm3210_vm3, %v4173_v23, %v8181_v19 }
0x1ecd   :  { %v8206_v51 = vpop.permute.xlu1 %4146  ;;  %4351 = vrot.lane.b32.xlu0 %v8204_v25, %s9024_s3 }
0x1ece   :  { %4337 = vrot.lane.b32.xlu1 %v8206_v51, %s9024_s3 }
0x1ecf   :  { %v4166_v53 = vpop.permute.xlu0 %4165 }
0x1ed0   :  { %v8214_v20 = vsel %vm3202_vm4, %v4166_v53, %v8188_v43 }
0x1ed1   :  { %v8216_v33 = vpop.permute.xlu1 %4139  ;;  %4347 = vrot.lane.b32.xlu0 %v8214_v20, %s9024_s3 }
0x1ed2   :  { %4333 = vrot.lane.b32.xlu1 %v8216_v33, %s9024_s3 }
0x1ed3   :  { %v4159_v29 = vpop.permute.xlu0 %4158 }
0x1ed4   :  { %v8224_v39 = vsel %vm3194_vm5, %v4159_v29, %v8192_v14 }
0x1ed5   :  { %v8226_v21 = vpop.permute.xlu1 %4132  ;;  %4343 = vrot.lane.b32.xlu0 %v8224_v39, %s9024_s3 }
0x1ed6   :  { %4329 = vrot.lane.b32.xlu1 %v8226_v21, %s9024_s3 }
0x1ed7   :  { %v4152_v63 = vpop.permute.xlu0 %4151 }
0x1ed8   :  { %v8234_v58 = vsel %vm3186_vm6, %v4152_v63, %v8198_v41 }
0x1ed9   :  { %v8236_v5 = vpop.permute.xlu1 %4125  ;;  %4339 = vrot.lane.b32.xlu0 %v8234_v58, %s9024_s3 }
0x1eda   :  { %4325 = vrot.lane.b32.xlu1 %v8236_v5, %s9024_s3 }
0x1edb   :  { %v4145_v48 = vpop.permute.xlu0 %4144 }
0x1edc   :  { %v8244_v24 = vsel %vm3178_vm7, %v4145_v48, %v8206_v51 }
0x1edd   :  { %v8246_v30 = vpop.permute.xlu1 %4118  ;;  %4335 = vrot.lane.b32.xlu0 %v8244_v24, %s9024_s3 }
0x1ede   :  { %4321 = vrot.lane.b32.xlu1 %v8246_v30, %s9024_s3 }
0x1edf   :  { %v4138_v3 = vpop.permute.xlu0 %4137 }
0x1ee0   :  { %v8254_v52 = vsel %vm3170_vm8, %v4138_v3, %v8216_v33 }
0x1ee1   :  { %v8256_v49 = vpop.permute.xlu1 %4111  ;;  %4331 = vrot.lane.b32.xlu0 %v8254_v52, %s9024_s3 }
0x1ee2   :  { %4317 = vrot.lane.b32.xlu1 %v8256_v49, %s9024_s3 }
0x1ee3   :  { %v4131_v31 = vpop.permute.xlu0 %4130 }
0x1ee4   :  { %v8264_v62 = vsel %vm3162_vm9, %v4131_v31, %v8226_v21 }
0x1ee5   :  { %v8266_v55 = vpop.permute.xlu1 %4104  ;;  %4327 = vrot.lane.b32.xlu0 %v8264_v62, %s9024_s3 }
0x1ee6   :  { %4313 = vrot.lane.b32.xlu1 %v8266_v55, %s9024_s3 }
0x1ee7   :  { %v4124_v35 = vpop.permute.xlu0 %4123 }
0x1ee8   :  { %v8274_v1 = vsel %vm3154_vm10, %v4124_v35, %v8236_v5 }
0x1ee9   :  { %v8276_v22 = vpop.permute.xlu1 %4097  ;;  %4323 = vrot.lane.b32.xlu0 %v8274_v1, %s9024_s3 }
0x1eea   :  { %4309 = vrot.lane.b32.xlu1 %v8276_v22, %s9024_s3 }
0x1eeb   :  { %v4117_v60 = vpop.permute.xlu0 %4116 }
0x1eec   :  { %v8284_v26 = vsel %vm3146_vm11, %v4117_v60, %v8246_v30 }
0x1eed   :  { %v8286_v0 = vpop.permute.xlu1 %4090  ;;  %4319 = vrot.lane.b32.xlu0 %v8284_v26, %s9024_s3 }
0x1eee   :  { %4305 = vrot.lane.b32.xlu1 %v8286_v0, %s9024_s3 }
0x1eef   :  { %v4110_v46 = vpop.permute.xlu0 %4109 }
0x1ef0   :  { %v8294_v40 = vsel %vm9010_vm12, %v4110_v46, %v8256_v49  ;;  %vm9049_vm12 = vcmask 654336  }
0x1ef1   :  { %v8296_v45 = vpop.permute.xlu1 %4083  ;;  %4315 = vrot.lane.b32.xlu0 %v8294_v40, %s9024_s3 }
0x1ef2   :  { %4301 = vrot.lane.b32.xlu1 %v8296_v45, %s9024_s3 }
0x1ef3   :  { %v4103_v37 = vpop.permute.xlu0 %4102 }
0x1ef4   :  { %v8304_v61 = vsel %vm9009_vm13, %v4103_v37, %v8266_v55 }
0x1ef5   :  { %v8306_v34 = vpop.permute.xlu1 %4076  ;;  %4311 = vrot.lane.b32.xlu0 %v8304_v61, %s9024_s3 }
0x1ef6   :  { %4297 = vrot.lane.b32.xlu1 %v8306_v34, %s9024_s3 }
0x1ef7   :  { %v4096_v27 = vpop.permute.xlu0 %4095 }
0x1ef8   :  { %v8314_v4 = vsel %vm9025_vm14, %v4096_v27, %v8276_v22 }
0x1ef9   :  { %4307 = vrot.lane.b32.xlu0 %v8314_v4, %s9024_s3 }
0x1efa   :  { %4241 = vrot.lane.b32.xlu1 %v8181_v19, %s6093_s5 }
0x1efb   :  { %v4089_v6 = vpop.permute.xlu0 %4088 }
0x1efc   :  { %v8322_v8 = vsel %vm9026_vm15, %v4089_v6, %v8286_v0 }
0x1efd   :  { %4303 = vrot.lane.b32.xlu0 %v8322_v8, %s9024_s3 }
0x1efe   :  { %4293 = vrot.lane.b32.xlu1 %v8098_v18, %s9024_s3 }
0x1eff   :  { %v4082_v12 = vpop.permute.xlu0 %4081 }
0x1f00   :  { %v8330_v17 = vsel %vm3106_vm1, %v4082_v12, %v8296_v45 }
0x1f01   :  { %4299 = vrot.lane.b32.xlu0 %v8330_v17, %s9024_s3 }
0x1f03   :  { %v4075_v9 = vpop.permute.xlu0 %4074 }
0x1f04   :  { %v8336_v15 = vsel %vm3098_vm2, %v4075_v9, %v8306_v34 }
0x1f05   :  { %4295 = vrot.lane.b32.xlu0 %v8336_v15, %s9024_s3 }
0x1f09   :  { %4239 = vrot.lane.b32.xlu0 %v8204_v25, %s6093_s5 }
0x1f0d   :  { %4291 = vrot.lane.b32.xlu0 %v8103_v42, %s9024_s3 }
0x1f30   :  { %v4354_v54 = vpop.permute.xlu1 %4353 }
0x1f31   :  { %4586 = vmatprep.subr.mxu1 %v4354_v54 }
0x1f34   :  { %v4350_v38 = vpop.permute.xlu1 %4349 }
0x1f38   :  { %v4346_v28 = vpop.permute.xlu1 %4345 }
0x1f3c   :  { %v4342_v13 = vpop.permute.xlu1 %4341 }
0x1f3f   :  { %v4352_v47 = vpop.permute.xlu0 %4351 }
0x1f40   :  { %v4370_v7 = vsel %vm3391_vm0, %v4352_v47, %v4354_v54  ;;  %v4338_v50 = vpop.permute.xlu1 %4337 }
0x1f41   :  { %4587 = vmatpush1.msra.mxu1 %v4370_v7 }
0x1f42   :  { %4588 = vmatprep.subr.mxu1 %v4350_v38 }
0x1f43   :  { %v4348_v16 = vpop.permute.xlu0 %4347 }
0x1f44   :  { %v4369_v11 = vsel %vm3391_vm0, %v4348_v16, %v4350_v38  ;;  %v4334_v32 = vpop.permute.xlu1 %4333 }
0x1f45   :  { %4589 = vmatpush1.msra.mxu1 %v4369_v11 }
0x1f46   :  { %4590 = vmatprep.subr.mxu1 %v4346_v28 }
0x1f47   :  { %v4344_v2 = vpop.permute.xlu0 %4343 }
0x1f48   :  { %v4368_v10 = vsel %vm3391_vm0, %v4344_v2, %v4346_v28  ;;  %v4330_v23 = vpop.permute.xlu1 %4329 }
0x1f49   :  { %4591 = vmatpush1.msra.mxu1 %v4368_v10 }
0x1f4a   :  { %4592 = vmatprep.subr.mxu1 %v4342_v13 }
0x1f4b   :  { %v4340_v53 = vpop.permute.xlu0 %4339 }
0x1f4c   :  { %v4367_v29 = vsel %vm3391_vm0, %v4340_v53, %v4342_v13  ;;  %v4326_v63 = vpop.permute.xlu1 %4325 }
0x1f4d   :  { %4593 = vmatpush1.msra.mxu1 %v4367_v29 }
0x1f4e   :  { %4594 = vmatprep.subr.mxu1 %v4338_v50 }
0x1f4f   :  { %v4336_v48 = vpop.permute.xlu0 %4335 }
0x1f50   :  { %v4366_v3 = vsel %vm3391_vm0, %v4336_v48, %v4338_v50  ;;  %v4322_v31 = vpop.permute.xlu1 %4321 }
0x1f51   :  { %4595 = vmatpush1.msra.mxu1 %v4366_v3 }
0x1f52   :  { %4596 = vmatprep.subr.mxu1 %v4334_v32 }
0x1f53   :  { %v4332_v35 = vpop.permute.xlu0 %4331 }
0x1f54   :  { %v4365_v60 = vsel %vm3391_vm0, %v4332_v35, %v4334_v32  ;;  %v4318_v46 = vpop.permute.xlu1 %4317 }
0x1f55   :  { %4597 = vmatpush1.msra.mxu1 %v4365_v60 }
0x1f56   :  { %4598 = vmatprep.subr.mxu1 %v4330_v23 }
0x1f57   :  { %v4328_v37 = vpop.permute.xlu0 %4327 }
0x1f58   :  { %v4364_v27 = vsel %vm3391_vm0, %v4328_v37, %v4330_v23  ;;  %v4314_v6 = vpop.permute.xlu1 %4313 }
0x1f59   :  { %4599 = vmatpush1.msra.mxu1 %v4364_v27 }
0x1f5a   :  { %4600 = vmatprep.subr.mxu1 %v4326_v63 }
0x1f5b   :  { %v4324_v12 = vpop.permute.xlu0 %4323 }
0x1f5c   :  { %v4363_v9 = vsel %vm3391_vm0, %v4324_v12, %v4326_v63  ;;  %v4310_v54 = vpop.permute.xlu1 %4309 }
0x1f5d   :  { %4601 = vmatpush1.msra.mxu1 %v4363_v9 }
0x1f5e   :  { %4602 = vmatprep.subr.mxu1 %v4322_v31 }
0x1f5f   :  { %v4320_v38 = vpop.permute.xlu0 %4319 }
0x1f60   :  { %v4362_v28 = vsel %vm3391_vm0, %v4320_v38, %v4322_v31  ;;  %v4306_v13 = vpop.permute.xlu1 %4305 }
0x1f61   :  { %4603 = vmatpush1.msra.mxu1 %v4362_v28 }
0x1f62   :  { %4604 = vmatprep.subr.mxu1 %v4318_v46 }
0x1f63   :  { %v4316_v47 = vpop.permute.xlu0 %4315 }
0x1f64   :  { %v4361_v7 = vsel %vm3391_vm0, %v4316_v47, %v4318_v46  ;;  %v4302_v50 = vpop.permute.xlu1 %4301 }
0x1f65   :  { %4605 = vmatpush1.msra.mxu1 %v4361_v7 }
0x1f66   :  { %4606 = vmatprep.subr.mxu1 %v4314_v6 }
0x1f67   :  { %v4312_v16 = vpop.permute.xlu0 %4311 }
0x1f68   :  { %v4360_v11 = vsel %vm3391_vm0, %v4312_v16, %v4314_v6  ;;  %v4298_v10 = vpop.permute.xlu1 %4297 }
0x1f69   :  { %4607 = vmatpush1.msra.mxu1 %v4360_v11 }
0x1f6a   :  { %4608 = vmatprep.subr.mxu1 %v4310_v54 }
0x1f6b   :  { %v4308_v32 = vpop.permute.xlu0 %4307 }
0x1f6c   :  { %v4359_v2 = vsel %vm3391_vm0, %v4308_v32, %v4310_v54  ;;  %v8357_v29 = vpop.permute.xlu1 %4241 }
0x1f6d   :  { %4609 = vmatpush1.msra.mxu1 %v4359_v2 }
0x1f6e   :  { %4610 = vmatprep.subr.mxu1 %v4306_v13 }
0x1f6f   :  { %v4304_v23 = vpop.permute.xlu0 %4303 }
0x1f70   :  { %v4358_v53 = vsel %vm3391_vm0, %v4304_v23, %v4306_v13  ;;  %v4294_v35 = vpop.permute.xlu1 %4293 }
0x1f71   :  { %4611 = vmatpush1.msra.mxu1 %v4358_v53 }
0x1f72   :  { %4612 = vmatprep.subr.mxu1 %v4302_v50 }
0x1f73   :  { %v4300_v63 = vpop.permute.xlu0 %4299 }
0x1f74   :  { %v4357_v48 = vsel %vm3391_vm0, %v4300_v63, %v4302_v50 }
0x1f75   :  { %4613 = vmatpush1.msra.mxu1 %v4357_v48 }
0x1f76   :  { %4614 = vmatprep.subr.mxu1 %v4298_v10 }
0x1f77   :  { %v4296_v3 = vpop.permute.xlu0 %4295 }
0x1f78   :  { %v4356_v31 = vsel %vm3391_vm0, %v4296_v3, %v4298_v10 }
0x1f79   :  { %4615 = vmatpush1.msra.mxu1 %v4356_v31 }
0x1f7a   :  { %4616 = vmatprep.subr.mxu1 %v4294_v35 }
0x1f7b   :  { %v8361_v60 = vpop.permute.xlu0 %4239 }
0x1f7f   :  { %v3897_v46 = vpop.f32.mrf.mxu1  ;;  %v4292_v37 = vpop.permute.xlu0 %4291 }
0x1f80   :  { %v3898_v27 = vadd.f32 %v3897_v46, %v8196_v57  ;;  %v4355_v6 = vsel %vm3391_vm0, %v4292_v37, %v4294_v35  ;;  %vm9027_vm0 = vcmask 654336  }
0x1f81   :  { %v3899_v12 = vpop.f32.mrf.mxu1  ;;  %4617 = vmatpush1.msra.mxu1 %v4355_v6  ;;  %vm9028_vm14 = vmmov %vm9027_vm0 }
0x1f82   :  { %3904 = vrot.lane.b32.xlu1 %v3898_v27, %s6097_s2  ;;  %3913 = vrot.lane.b32.xlu0 %v3898_v27, %s6096_s28  ;;  %v3900_v9 = vadd.f32 %v3899_v12, %v8196_v57  ;;  %vm9029_vm15 = vmmov %vm9027_vm0 }
0x1f86   :  { %3906 = vrot.lane.b32.xlu1 %v3900_v9, %s6097_s2  ;;  %4235 = vrot.lane.b32.xlu0 %v8214_v20, %s6093_s5 }
0x1f8a   :  { %3915 = vrot.lane.b32.xlu1 %v3900_v9, %s6096_s28  ;;  %4463 = vrot.lane.b32.xlu0 %v8204_v25, %s6098_s1 }
0x1f8e   :  { %4237 = vrot.lane.b32.xlu1 %v8188_v43, %s6093_s5  ;;  %4231 = vrot.lane.b32.xlu0 %v8224_v39, %s6093_s5 }
0x1f92   :  { %4465 = vrot.lane.b32.xlu1 %v8181_v19, %s6098_s1  ;;  %4459 = vrot.lane.b32.xlu0 %v8214_v20, %s6098_s1 }
0x1f96   :  { %4233 = vrot.lane.b32.xlu1 %v8192_v14, %s6093_s5  ;;  %4227 = vrot.lane.b32.xlu0 %v8234_v58, %s6093_s5 }
0x1f9a   :  { %4461 = vrot.lane.b32.xlu1 %v8188_v43, %s6098_s1  ;;  %4455 = vrot.lane.b32.xlu0 %v8224_v39, %s6098_s1 }
0x1f9e   :  { %4229 = vrot.lane.b32.xlu1 %v8198_v41, %s6093_s5  ;;  %4223 = vrot.lane.b32.xlu0 %v8244_v24, %s6093_s5 }
0x1fa2   :  { %4457 = vrot.lane.b32.xlu1 %v8192_v14, %s6098_s1  ;;  %4451 = vrot.lane.b32.xlu0 %v8234_v58, %s6098_s1 }
0x1fa6   :  { %4225 = vrot.lane.b32.xlu1 %v8206_v51, %s6093_s5  ;;  %4219 = vrot.lane.b32.xlu0 %v8254_v52, %s6093_s5 }
0x1faa   :  { %4453 = vrot.lane.b32.xlu1 %v8198_v41, %s6098_s1  ;;  %4447 = vrot.lane.b32.xlu0 %v8244_v24, %s6098_s1 }
0x1fae   :  { %4221 = vrot.lane.b32.xlu1 %v8216_v33, %s6093_s5  ;;  %4215 = vrot.lane.b32.xlu0 %v8264_v62, %s6093_s5 }
0x1fb2   :  { %4449 = vrot.lane.b32.xlu1 %v8206_v51, %s6098_s1  ;;  %4443 = vrot.lane.b32.xlu0 %v8254_v52, %s6098_s1 }
0x1fb6   :  { %4217 = vrot.lane.b32.xlu1 %v8226_v21, %s6093_s5  ;;  %4211 = vrot.lane.b32.xlu0 %v8274_v1, %s6093_s5 }
0x1fba   :  { %4445 = vrot.lane.b32.xlu1 %v8216_v33, %s6098_s1  ;;  %4439 = vrot.lane.b32.xlu0 %v8264_v62, %s6098_s1 }
0x1fbe   :  { %4213 = vrot.lane.b32.xlu1 %v8236_v5, %s6093_s5 }
0x1fc2   :  { %4441 = vrot.lane.b32.xlu1 %v8226_v21, %s6098_s1 }
0x1ff4   :  { %v3905_v54 = vpop.permute.xlu1 %3904  ;;  %v3914_v38 = vpop.permute.xlu0 %3913 }
0x1ff8   :  { %v3907_v28 = vpop.permute.xlu1 %3906  ;;  %v8426_v13 = vpop.permute.xlu0 %4235 }
0x1ff9   :  { %v3908_v47 = vsel %vm3098_vm2, %v3905_v54, %v3907_v28  ;;  %v3912_v7 = vmax.f32 %v3900_v9, %v3907_v28 }
0x1ffa   :  { %v3911_v50 = vmax.f32 %v3898_v27, %v3908_v47 }
0x1ffc   :  { %v3916_v16 = vpop.permute.xlu1 %3915  ;;  %v4464_v11 = vpop.permute.xlu0 %4463 }
0x1ffd   :  { %v3917_v32 = vsel %vm3106_vm1, %v3914_v38, %v3916_v16  ;;  %v8430_v2 = vmax.f32 %v3912_v7, %v3916_v16 }
0x1ffe   :  { %v8432_v10 = vmax.f32 %v3911_v50, %v3917_v32 }
0x1fff   :  { %3933 = vrot.lane.b32.xlu1 %v8430_v2, %s6096_s28 }
0x2000   :  { %v8436_v23 = vpop.permute.xlu1 %4237  ;;  %3931 = vrot.lane.b32.xlu0 %v8432_v10, %s6096_s28  ;;  %v8440_v53 = vpop.permute.xlu0 %4231 }
0x2003   :  { %3926 = vrot.lane.b32.xlu1 %v8430_v2, %s6097_s2 }
0x2004   :  { %v4466_v63 = vpop.permute.xlu1 %4465  ;;  %3924 = vrot.lane.b32.xlu0 %v8432_v10, %s6097_s2  ;;  %v4460_v48 = vpop.permute.xlu0 %4459 }
0x2005   :  { %4618 = vmatprep.subr.mxu1 %v4466_v63  ;;  %v4482_v3 = vsel %vm9027_vm0, %v4464_v11, %v4466_v63 }
0x2006   :  { %4619 = vmatpush2.msra.mxu1 %v4482_v3 }
0x2007   :  { %4209 = vrot.lane.b32.xlu1 %v8246_v30, %s6093_s5 }
0x2008   :  { %v8449_v31 = vpop.permute.xlu1 %4233  ;;  %4207 = vrot.lane.b32.xlu0 %v8284_v26, %s6093_s5  ;;  %v8453_v35 = vpop.permute.xlu0 %4227 }
0x200b   :  { %4437 = vrot.lane.b32.xlu1 %v8236_v5, %s6098_s1 }
0x200c   :  { %v4462_v46 = vpop.permute.xlu1 %4461  ;;  %4435 = vrot.lane.b32.xlu0 %v8274_v1, %s6098_s1  ;;  %v4456_v37 = vpop.permute.xlu0 %4455 }
0x200d   :  { %4620 = vmatprep.subr.mxu1 %v4462_v46  ;;  %v4481_v27 = vsel %vm9028_vm14, %v4460_v48, %v4462_v46  ;;  %vm9030_vm14 = vmmov %vm9027_vm0 }
0x200e   :  { %4621 = vmatpush2.msra.mxu1 %v4481_v27 }
0x200f   :  { %4205 = vrot.lane.b32.xlu1 %v8256_v49, %s6093_s5 }
0x2010   :  { %v8462_v6 = vpop.permute.xlu1 %4229  ;;  %4203 = vrot.lane.b32.xlu0 %v8294_v40, %s6093_s5  ;;  %v8466_v12 = vpop.permute.xlu0 %4223 }
0x2013   :  { %4433 = vrot.lane.b32.xlu1 %v8246_v30, %s6098_s1 }
0x2014   :  { %v4458_v9 = vpop.permute.xlu1 %4457  ;;  %4431 = vrot.lane.b32.xlu0 %v8284_v26, %s6098_s1  ;;  %v4452_v54 = vpop.permute.xlu0 %4451 }
0x2015   :  { %4622 = vmatprep.subr.mxu1 %v4458_v9  ;;  %v4480_v38 = vsel %vm9029_vm15, %v4456_v37, %v4458_v9  ;;  %vm9031_vm15 = vmmov %vm9027_vm0 }
0x2016   :  { %4623 = vmatpush2.msra.mxu1 %v4480_v38 }
0x2017   :  { %4201 = vrot.lane.b32.xlu1 %v8266_v55, %s6093_s5 }
0x2018   :  { %v8475_v28 = vpop.permute.xlu1 %4225  ;;  %4199 = vrot.lane.b32.xlu0 %v8304_v61, %s6093_s5  ;;  %v8479_v47 = vpop.permute.xlu0 %4219 }
0x201b   :  { %4429 = vrot.lane.b32.xlu1 %v8256_v49, %s6098_s1 }
0x201c   :  { %v4454_v7 = vpop.permute.xlu1 %4453  ;;  %4427 = vrot.lane.b32.xlu0 %v8294_v40, %s6098_s1  ;;  %v4448_v50 = vpop.permute.xlu0 %4447 }
0x201d   :  { %4624 = vmatprep.subr.mxu1 %v4454_v7  ;;  %v4479_v16 = vsel %vm9027_vm0, %v4452_v54, %v4454_v7 }
0x201e   :  { %4625 = vmatpush2.msra.mxu1 %v4479_v16 }
0x201f   :  { %4197 = vrot.lane.b32.xlu1 %v8276_v22, %s6093_s5 }
0x2020   :  { %v8488_v11 = vpop.permute.xlu1 %4221  ;;  %4195 = vrot.lane.b32.xlu0 %v8314_v4, %s6093_s5  ;;  %v8492_v32 = vpop.permute.xlu0 %4215 }
0x2023   :  { %4425 = vrot.lane.b32.xlu1 %v8266_v55, %s6098_s1 }
0x2024   :  { %v4450_v63 = vpop.permute.xlu1 %4449  ;;  %4423 = vrot.lane.b32.xlu0 %v8304_v61, %s6098_s1  ;;  %v4444_v3 = vpop.permute.xlu0 %4443 }
0x2025   :  { %4626 = vmatprep.subr.mxu1 %v4450_v63  ;;  %v4478_v48 = vsel %vm9030_vm14, %v4448_v50, %v4450_v63  ;;  %vm9008_vm14 = vcmask 195584  }
0x2026   :  { %4627 = vmatpush2.msra.mxu1 %v4478_v48 }
0x2027   :  { %4193 = vrot.lane.b32.xlu1 %v8286_v0, %s6093_s5 }
0x2028   :  { %v8501_v46 = vpop.permute.xlu1 %4217  ;;  %4191 = vrot.lane.b32.xlu0 %v8322_v8, %s6093_s5  ;;  %v8510_v9 = vpop.permute.xlu0 %4211 }
0x202b   :  { %4421 = vrot.lane.b32.xlu1 %v8276_v22, %s6098_s1 }
0x202c   :  { %v4446_v37 = vpop.permute.xlu1 %4445  ;;  %4419 = vrot.lane.b32.xlu0 %v8314_v4, %s6098_s1  ;;  %v4440_v38 = vpop.permute.xlu0 %4439 }
0x202d   :  { %4628 = vmatprep.subr.mxu1 %v4446_v37  ;;  %v4477_v27 = vsel %vm9031_vm15, %v4444_v3, %v4446_v37  ;;  %vm9032_vm15 = vmmov %vm9027_vm0 }
0x202e   :  { %4629 = vmatpush2.msra.mxu1 %v4477_v27 }
0x202f   :  { %4189 = vrot.lane.b32.xlu1 %v8296_v45, %s6093_s5 }
0x2030   :  { %v8514_v54 = vpop.permute.xlu1 %4213  ;;  %4187 = vrot.lane.b32.xlu0 %v8330_v17, %s6093_s5 }
0x2033   :  { %4417 = vrot.lane.b32.xlu1 %v8286_v0, %s6098_s1 }
0x2034   :  { %v4442_v7 = vpop.permute.xlu1 %4441  ;;  %4415 = vrot.lane.b32.xlu0 %v8322_v8, %s6098_s1 }
0x2035   :  { %v4476_v50 = vsel %vm9027_vm0, %v4440_v38, %v4442_v7  ;;  %4630 = vmatprep.subr.mxu1 %v4442_v7  ;;  %v8548_v38 = vld [vmem:[%s8987_s15] sm:$0xff] }
0x2036   :  { %4631 = vmatpush2.msra.mxu1 %v4476_v50 }
0x2037   :  { %4185 = vrot.lane.b32.xlu1 %v8306_v34, %s6093_s5 }
0x2038   :  { %4183 = vrot.lane.b32.xlu0 %v8336_v15, %s6093_s5 }
0x203b   :  { %4413 = vrot.lane.b32.xlu1 %v8296_v45, %s6098_s1 }
0x203c   :  { %4411 = vrot.lane.b32.xlu0 %v8330_v17, %s6098_s1 }
0x203f   :  { %4181 = vrot.lane.b32.xlu1 %v8098_v18, %s6093_s5 }
0x2040   :  { %4179 = vrot.lane.b32.xlu0 %v8103_v42, %s6093_s5 }
0x2043   :  { %4409 = vrot.lane.b32.xlu1 %v8306_v34, %s6098_s1 }
0x2044   :  { %4407 = vrot.lane.b32.xlu0 %v8336_v15, %s6098_s1 }
0x2047   :  { %4405 = vrot.lane.b32.xlu1 %v8098_v18, %s6098_s1 }
0x2048   :  { %4403 = vrot.lane.b32.xlu0 %v8103_v42, %s6098_s1 }
0x2071   :  { %v3934_v16 = vpop.permute.xlu1 %3933 }
0x2072   :  { %3972 = vmatprep.subr.mxu0 %v3934_v16  ;;  %v3932_v63 = vpop.permute.xlu0 %3931 }
0x2073   :  { %v3935_v48 = vsel %vm3106_vm1, %v3932_v63, %v3934_v16  ;;  %v6072_v16 = vld [vmem:[%s8984_s13 + $0x8] sm:$0xff] }
0x2074   :  { %3973 = vmatpush1.msra.mxu0 %v3935_v48 }
0x2075   :  { %v3927_v3 = vpop.permute.xlu1 %3926 }
0x2076   :  { %3974 = vmatprep.subr.mxu0 %v3927_v3  ;;  %v3925_v37 = vpop.permute.xlu0 %3924 }
0x2077   :  { %v3928_v27 = vsel %vm3098_vm2, %v3925_v37, %v3927_v3 }
0x2078   :  { %3975 = vmatpush1.msra.mxu0 %v3928_v27 }
0x2079   :  { %v8550_v7 = vpop.permute.xlu1 %4209  ;;  %3976 = vmatprep.subr.mxu0 %v8430_v2 }
0x207a   :  { %3977 = vmatpush1.msra.mxu0 %v8432_v10  ;;  %v8554_v50 = vpop.permute.xlu0 %4207 }
0x207b   :  { %5480 = vmatmul.mubr.msk.f32.vlgmr.msra.gmra.mxu0 %vm9008_vm14, %v8548_v38  ;;  %4515 = vmatprep.subr.mxu0 %v8181_v19  ;;  %vm9036_vm14 = vcmask 654336  }
0x207c   :  { %4516 = vmatpush1.msra.mxu0 %v8204_v25  ;;  %4579 = vmatprep.mubr.f32.mxu0 %v6072_v16  ;;  %v6073_v16 = vld [vmem:[%s8984_s13] sm:$0xff] }
0x207d   :  { %v4438_v63 = vpop.permute.xlu1 %4437  ;;  %4517 = vmatprep.subr.mxu0 %v8188_v43 }
0x207e   :  { %4518 = vmatpush1.msra.mxu0 %v8214_v20  ;;  %4632 = vmatprep.subr.mxu1 %v4438_v63  ;;  %v4436_v2 = vpop.permute.xlu0 %4435 }
0x207f   :  { %v4475_v10 = vsel %vm9032_vm15, %v4436_v2, %v4438_v63  ;;  %4519 = vmatprep.subr.mxu0 %v8192_v14  ;;  %vm9033_vm15 = vmmov %vm9027_vm0  ;;  %v6074_v63 = vld [vmem:[%s8984_s13 + $0x10] sm:$0xff] }
0x2080   :  { %4520 = vmatpush1.msra.mxu0 %v8224_v39  ;;  %4633 = vmatpush2.msra.mxu1 %v4475_v10 }
0x2081   :  { %v8568_v19 = vpop.permute.xlu1 %4205  ;;  %4521 = vmatprep.subr.mxu0 %v8198_v41 }
0x2082   :  { %4522 = vmatpush1.msra.mxu0 %v8234_v58  ;;  %v8572_v25 = vpop.permute.xlu0 %4203 }
0x2083   :  { %4523 = vmatprep.subr.mxu0 %v8206_v51 }
0x2084   :  { %4524 = vmatpush1.msra.mxu0 %v8244_v24 }
0x2085   :  { %v4434_v43 = vpop.permute.xlu1 %4433  ;;  %4525 = vmatprep.subr.mxu0 %v8216_v33 }
0x2086   :  { %4526 = vmatpush1.msra.mxu0 %v8254_v52  ;;  %4634 = vmatprep.subr.mxu1 %v4434_v43  ;;  %v4432_v14 = vpop.permute.xlu0 %4431 }
0x2087   :  { %v4474_v20 = vsel %vm9027_vm0, %v4432_v14, %v4434_v43  ;;  %4527 = vmatprep.subr.mxu0 %v8226_v21 }
0x2088   :  { %4528 = vmatpush1.msra.mxu0 %v8264_v62  ;;  %4635 = vmatpush2.msra.mxu1 %v4474_v20 }
0x2089   :  { %v8581_v41 = vpop.permute.xlu1 %4201  ;;  %4529 = vmatprep.subr.mxu0 %v8236_v5 }
0x208a   :  { %4530 = vmatpush1.msra.mxu0 %v8274_v1  ;;  %v8585_v51 = vpop.permute.xlu0 %4199 }
0x208b   :  { %4531 = vmatprep.subr.mxu0 %v8246_v30 }
0x208c   :  { %4532 = vmatpush1.msra.mxu0 %v8284_v26 }
0x208d   :  { %v4430_v33 = vpop.permute.xlu1 %4429  ;;  %4533 = vmatprep.subr.mxu0 %v8256_v49 }
0x208e   :  { %4534 = vmatpush1.msra.mxu0 %v8294_v40  ;;  %4636 = vmatprep.subr.mxu1 %v4430_v33  ;;  %v4428_v39 = vpop.permute.xlu0 %4427 }
0x208f   :  { %v4473_v21 = vsel %vm9033_vm15, %v4428_v39, %v4430_v33  ;;  %4535 = vmatprep.subr.mxu0 %v8266_v55  ;;  %vm9034_vm15 = vcmask 916480  }
0x2090   :  { %4536 = vmatpush1.msra.mxu0 %v8304_v61  ;;  %4637 = vmatpush2.msra.mxu1 %v4473_v21  ;;  %v4258_v55 = vsel %vm9034_vm15, %v8361_v60, %v8357_v29 }
0x2091   :  { %v8594_v58 = vpop.permute.xlu1 %4197  ;;  %4537 = vmatprep.subr.mxu0 %v8276_v22 }
0x2092   :  { %4538 = vmatpush1.msra.mxu0 %v8314_v4  ;;  %v8598_v5 = vpop.permute.xlu0 %4195 }
0x2093   :  { %4539 = vmatprep.subr.mxu0 %v8286_v0 }
0x2094   :  { %4540 = vmatpush1.msra.mxu0 %v8322_v8 }
0x2095   :  { %v4426_v24 = vpop.permute.xlu1 %4425  ;;  %4541 = vmatprep.subr.mxu0 %v8296_v45 }
0x2096   :  { %4542 = vmatpush1.msra.mxu0 %v8330_v17  ;;  %4638 = vmatprep.subr.mxu1 %v4426_v24  ;;  %v4424_v30 = vpop.permute.xlu0 %4423 }
0x2097   :  { %v4472_v52 = vsel %vm9027_vm0, %v4424_v30, %v4426_v24  ;;  %4543 = vmatprep.subr.mxu0 %v8306_v34  ;;  %vm9035_vm0 = vmmov %vm9034_vm15 }
0x2098   :  { %4544 = vmatpush1.msra.mxu0 %v8336_v15  ;;  %4639 = vmatpush2.msra.mxu1 %v4472_v52  ;;  %v4257_v22 = vsel %vm9035_vm0, %v8426_v13, %v8436_v23  ;;  %vm9037_vm15 = vmmov %vm9035_vm0  ;;  %v4253_v4 = vsel %vm9035_vm0, %v8479_v47, %v8488_v11 }
0x2099   :  { %v4194_v49 = vpop.permute.xlu1 %4193  ;;  %4545 = vmatprep.subr.mxu0 %v8098_v18  ;;  %v4256_v26 = vsel %vm9037_vm15, %v8440_v53, %v8449_v31  ;;  %vm9038_vm13 = vmmov %vm9035_vm0 }
0x209a   :  { %4546 = vmatpush1.msra.mxu0 %v8103_v42  ;;  %v4192_v62 = vpop.permute.xlu0 %4191  ;;  %v4255_v40 = vsel %vm9038_vm13, %v8453_v35, %v8462_v6  ;;  %vm9040_vm13 = vcmask 654336   ;;  %vm9041_vm15 = vmmov %vm9035_vm0 }
0x209b   :  { %4547 = vmatprep.subr.mxu0 %v8357_v29  ;;  %v4252_v15 = vsel %vm9041_vm15, %v8492_v32, %v8501_v46  ;;  %vm9044_vm15 = vmmov %vm9035_vm0 }
0x209c   :  { %4548 = vmatpush2.msra.mxu0 %v4258_v55 }
0x209d   :  { %v4422_v1 = vpop.permute.xlu1 %4421  ;;  %4549 = vmatprep.subr.mxu0 %v8436_v23  ;;  %v4250_v23 = vsel %vm9035_vm0, %v8554_v50, %v8550_v7 }
0x209e   :  { %4550 = vmatpush2.msra.mxu0 %v4257_v22  ;;  %4640 = vmatprep.subr.mxu1 %v4422_v1  ;;  %v4420_v18 = vpop.permute.xlu0 %4419 }
0x209f   :  { %v4471_v42 = vsel %vm9036_vm14, %v4420_v18, %v4422_v1  ;;  %4551 = vmatprep.subr.mxu0 %v8449_v31  ;;  %vm9039_vm14 = vmmov %vm9035_vm0 }
0x20a0   :  { %4552 = vmatpush2.msra.mxu0 %v4256_v26  ;;  %4641 = vmatpush2.msra.mxu1 %v4471_v42  ;;  %v4254_v61 = vsel %vm9039_vm14, %v8466_v12, %v8475_v28  ;;  %vm9042_vm14 = vmmov %vm9035_vm0 }
0x20a1   :  { %v4190_v0 = vpop.permute.xlu1 %4189  ;;  %4553 = vmatprep.subr.mxu0 %v8462_v6  ;;  %v4251_v60 = vsel %vm9042_vm14, %v8510_v9, %v8514_v54  ;;  %v4248_v6 = vsel %vm9044_vm15, %v8585_v51, %v8581_v41  ;;  %vm9045_vm14 = vcmask 654336   ;;  %vm9047_vm15 = vmmov %vm9035_vm0 }
0x20a2   :  { %4554 = vmatpush2.msra.mxu0 %v4255_v40  ;;  %v4188_v45 = vpop.permute.xlu0 %4187 }
0x20a3   :  { %4555 = vmatprep.subr.mxu0 %v8475_v28  ;;  %v4247_v28 = vsel %vm9035_vm0, %v8598_v5, %v8594_v58 }
0x20a4   :  { %4556 = vmatpush2.msra.mxu0 %v4254_v61 }
0x20a5   :  { %v4418_v34 = vpop.permute.xlu1 %4417  ;;  %4557 = vmatprep.subr.mxu0 %v8488_v11 }
0x20a6   :  { %4558 = vmatpush2.msra.mxu0 %v4253_v4  ;;  %4642 = vmatprep.subr.mxu1 %v4418_v34  ;;  %v4416_v8 = vpop.permute.xlu0 %4415 }
0x20a7   :  { %v4470_v17 = vsel %vm9040_vm13, %v4416_v8, %v4418_v34  ;;  %4559 = vmatprep.subr.mxu0 %v8501_v46  ;;  %vm9043_vm13 = vmmov %vm9035_vm0  ;;  %v4245_v46 = vsel %vm9047_vm15, %v4188_v45, %v4190_v0  ;;  %vm5060_vm15 = vcmask 605184  }
0x20a8   :  { %4560 = vmatpush2.msra.mxu0 %v4252_v15  ;;  %4643 = vmatpush2.msra.mxu1 %v4470_v17  ;;  %v4249_v53 = vsel %vm9043_vm13, %v8572_v25, %v8568_v19  ;;  %vm9046_vm13 = vmmov %vm9035_vm0 }
0x20a9   :  { %v4186_v29 = vpop.permute.xlu1 %4185  ;;  %4561 = vmatprep.subr.mxu0 %v8514_v54  ;;  %v4246_v32 = vsel %vm9046_vm13, %v4192_v62, %v4194_v49  ;;  %vm9050_vm13 = vmmov %vm9049_vm12 }
0x20aa   :  { %4562 = vmatpush2.msra.mxu0 %v4251_v60  ;;  %v4184_v13 = vpop.permute.xlu0 %4183 }
0x20ab   :  { %4563 = vmatprep.subr.mxu0 %v8550_v7 }
0x20ac   :  { %4564 = vmatpush2.msra.mxu0 %v4250_v23 }
0x20ad   :  { %v4414_v31 = vpop.permute.xlu1 %4413  ;;  %4565 = vmatprep.subr.mxu0 %v8568_v19 }
0x20ae   :  { %4566 = vmatpush2.msra.mxu0 %v4249_v53  ;;  %4644 = vmatprep.subr.mxu1 %v4414_v31  ;;  %v4412_v35 = vpop.permute.xlu0 %4411 }
0x20af   :  { %v4469_v12 = vsel %vm9045_vm14, %v4412_v35, %v4414_v31  ;;  %4567 = vmatprep.subr.mxu0 %v8581_v41  ;;  %vm9048_vm14 = vmmov %vm9035_vm0 }
0x20b0   :  { %4568 = vmatpush2.msra.mxu0 %v4248_v6  ;;  %4645 = vmatpush2.msra.mxu1 %v4469_v12  ;;  %v4244_v48 = vsel %vm9048_vm14, %v4184_v13, %v4186_v29  ;;  %vm6101_vm14 = vmmov 0  }
0x20b1   :  { %v4182_v47 = vpop.permute.xlu1 %4181  ;;  %4569 = vmatprep.subr.mxu0 %v8594_v58 }
0x20b2   :  { %4570 = vmatpush2.msra.mxu0 %v4247_v28  ;;  %v4180_v11 = vpop.permute.xlu0 %4179 }
0x20b3   :  { %4571 = vmatprep.subr.mxu0 %v4194_v49  ;;  %v4243_v37 = vsel %vm9035_vm0, %v4180_v11, %v4182_v47  ;;  %vm5154_vm0 = vcmask 523264  }
0x20b4   :  { %4572 = vmatpush2.msra.mxu0 %v4246_v32 }
0x20b5   :  { %v4410_v9 = vpop.permute.xlu1 %4409  ;;  %4573 = vmatprep.subr.mxu0 %v4190_v0 }
0x20b6   :  { %4574 = vmatpush2.msra.mxu0 %v4245_v46  ;;  %4646 = vmatprep.subr.mxu1 %v4410_v9  ;;  %v4408_v54 = vpop.permute.xlu0 %4407 }
0x20b7   :  { %v4468_v3 = vsel %vm9049_vm12, %v4408_v54, %v4410_v9  ;;  %4575 = vmatprep.subr.mxu0 %v4186_v29 }
0x20b8   :  { %4576 = vmatpush2.msra.mxu0 %v4244_v48  ;;  %4647 = vmatpush2.msra.mxu1 %v4468_v3 }
0x20b9   :  { %v4406_v27 = vpop.permute.xlu1 %4405  ;;  %4577 = vmatprep.subr.mxu0 %v4182_v47 }
0x20ba   :  { %4578 = vmatpush2.msra.mxu0 %v4243_v37  ;;  %4648 = vmatprep.subr.mxu1 %v4406_v27  ;;  %v4404_v7 = vpop.permute.xlu0 %4403 }
0x20bb   :  { %v4467_v50 = vsel %vm9050_vm13, %v4404_v7, %v4406_v27  ;;  %4580 = vmatmul.mubr.f32.vlgmr.msra.gmra.mxu0 %v6073_v16  ;;  %vm5234_vm13 = vcmask 1024  }
0x20bc   :  { %4649 = vmatpush2.msra.mxu1 %v4467_v50  ;;  %4848 = vmatprep.mubr.f32.mxu0 %v6079_v36 }
0x20bd   :  { %4651 = vmatmul.mubr.f32.vlgmr.msra.gmra.mxu1 %v6074_v63  ;;  %5068 = vmatprep.subr.mxu1 %v6079_v36 }
0x213b   :  { %v8674_v2 = vpop.f32.mrf.mxu0 }
0x213d   :  { %v8676_v10 = vpop.f32.mrf.mxu0 }
0x217b   :  { %v4581_v19 = vpop.f32.mrf.mxu0 }
0x217c   :  { %v4582_v25 = vadd.f32 %v4581_v19, %v8024_v56 }
0x217d   :  { %v4583_v43 = vpop.f32.mrf.mxu0  ;;  %v4652_v14 = vpop.f32.mrf.mxu1 }
0x217e   :  { %v4584_v20 = vadd.f32 %v4583_v43, %v8024_v56  ;;  %v4653_v41 = vadd.f32 %v4652_v14, %v4582_v25 }
0x217f   :  { %v4654_v51 = vpop.f32.mrf.mxu1 }
0x2180   :  { %v4655_v33 = vadd.f32 %v4654_v51, %v4584_v20  ;;  %4659 = vrot.lane.b32.xlu0 %v4653_v41, %s6097_s2  ;;  %v6075_v51 = vld [vmem:[%s8986_s14] sm:$0xff] }
0x2182   :  { %4661 = vrot.lane.b32.xlu1 %v4655_v33, %s6097_s2 }
0x2184   :  { %4668 = vrot.lane.b32.xlu0 %v4653_v41, %s6096_s28 }
0x2186   :  { %4670 = vrot.lane.b32.xlu1 %v4655_v33, %s6096_s28 }
0x21f2   :  { %v4660_v39 = vpop.permute.xlu0 %4659 }
0x21f4   :  { %v4662_v21 = vpop.permute.xlu1 %4661 }
0x21f5   :  { %v4663_v58 = vsel %vm3098_vm2, %v4660_v39, %v4662_v21  ;;  %v4667_v5 = vmax.f32 %v4655_v33, %v4662_v21 }
0x21f6   :  { %v4666_v24 = vmax.f32 %v4653_v41, %v4663_v58  ;;  %v4669_v30 = vpop.permute.xlu0 %4668 }
0x21f8   :  { %v4671_v52 = vpop.permute.xlu1 %4670 }
0x21f9   :  { %v4672_v56 = vsel %vm3106_vm1, %v4669_v30, %v4671_v52  ;;  %v8686_v49 = vmax.f32 %v4667_v5, %v4671_v52  ;;  %v6099_v5 = vmov 2  }
0x21fa   :  { %v8688_v62 = vmax.f32 %v4666_v24, %v4672_v56  ;;  %5994 = vset.pattern.permute.xlu0 %v6099_v5  ;;  %v5041_v5 = vld [vmem:[%s8988_s17 + $0x70] sm:$0xff] }
0x21fb   :  { %4779 = vrot.lane.b32.xlu1 %v8686_v49, %s6083_s12 }
0x21fc   :  { %4777 = vrot.lane.b32.xlu0 %v8688_v62, %s6083_s12 }
0x21ff   :  { %4772 = vrot.lane.b32.xlu1 %v8686_v49, %s6082_s11 }
0x2200   :  { %4770 = vrot.lane.b32.xlu0 %v8688_v62, %s6082_s11 }
0x2203   :  { %4765 = vrot.lane.b32.xlu1 %v8686_v49, %s6084_s9 }
0x2204   :  { %4763 = vrot.lane.b32.xlu0 %v8688_v62, %s6084_s9 }
0x2207   :  { %4758 = vrot.lane.b32.xlu1 %v8686_v49, %s6086_s25 }
0x2208   :  { %4756 = vrot.lane.b32.xlu0 %v8688_v62, %s6086_s25 }
0x220b   :  { %4751 = vrot.lane.b32.xlu1 %v8686_v49, %s6088_s4 }
0x220c   :  { %4749 = vrot.lane.b32.xlu0 %v8688_v62, %s6088_s4 }
0x220f   :  { %4744 = vrot.lane.b32.xlu1 %v8686_v49, %s6090_s29 }
0x2210   :  { %4742 = vrot.lane.b32.xlu0 %v8688_v62, %s6090_s29 }
0x2213   :  { %4737 = vrot.lane.b32.xlu1 %v8686_v49, %s6085_s23 }
0x2214   :  { %4735 = vrot.lane.b32.xlu0 %v8688_v62, %s6085_s23 }
0x2217   :  { %4730 = vrot.lane.b32.xlu1 %v8686_v49, %s6087_s26 }
0x2218   :  { %4728 = vrot.lane.b32.xlu0 %v8688_v62, %s6087_s26 }
0x221b   :  { %4723 = vrot.lane.b32.xlu1 %v8686_v49, %s6089_s6 }
0x221c   :  { %4721 = vrot.lane.b32.xlu0 %v8688_v62, %s6089_s6 }
0x221f   :  { %4716 = vrot.lane.b32.xlu1 %v8686_v49, %s6091_s10 }
0x2220   :  { %4714 = vrot.lane.b32.xlu0 %v8688_v62, %s6091_s10 }
0x2223   :  { %4709 = vrot.lane.b32.xlu1 %v8686_v49, %s6092_s0 }
0x2224   :  { %4707 = vrot.lane.b32.xlu0 %v8688_v62, %s6092_s0 }
0x2227   :  { %4702 = vrot.lane.b32.xlu1 %v8686_v49, %s6094_s24 }
0x2228   :  { %4700 = vrot.lane.b32.xlu0 %v8688_v62, %s6094_s24 }
0x222b   :  { %4695 = vrot.lane.b32.xlu1 %v8686_v49, %s6095_s7 }
0x222c   :  { %4693 = vrot.lane.b32.xlu0 %v8688_v62, %s6095_s7 }
0x222f   :  { %4688 = vrot.lane.b32.xlu1 %v8686_v49, %s6096_s28 }
0x2230   :  { %4686 = vrot.lane.b32.xlu0 %v8688_v62, %s6096_s28 }
0x2233   :  { %4681 = vrot.lane.b32.xlu1 %v8686_v49, %s6097_s2 }
0x2234   :  { %4679 = vrot.lane.b32.xlu0 %v8688_v62, %s6097_s2 }
0x226d   :  { %v4780_v55 = vpop.permute.xlu1 %4779 }
0x226e   :  { %4784 = vmatprep.subr.mxu0 %v4780_v55  ;;  %v4778_v1 = vpop.permute.xlu0 %4777 }
0x226f   :  { %v4781_v22 = vsel %vm3210_vm3, %v4778_v1, %v4780_v55  ;;  %vm9051_vm3 = vcmask 998400  }
0x2270   :  { %4785 = vmatpush1.msra.mxu0 %v4781_v22 }
0x2271   :  { %v4773_v18 = vpop.permute.xlu1 %4772 }
0x2272   :  { %4786 = vmatprep.subr.mxu0 %v4773_v18  ;;  %v4771_v42 = vpop.permute.xlu0 %4770 }
0x2273   :  { %v4774_v26 = vsel %vm3202_vm4, %v4771_v42, %v4773_v18  ;;  %vm9052_vm4 = vcmask 1006592   ;;  %v6076_v18 = vld [vmem:[%s8985_s16] sm:$0xff] }
0x2274   :  { %4787 = vmatpush1.msra.mxu0 %v4774_v26 }
0x2275   :  { %v4766_v0 = vpop.permute.xlu1 %4765 }
0x2276   :  { %4788 = vmatprep.subr.mxu0 %v4766_v0  ;;  %v4764_v40 = vpop.permute.xlu0 %4763 }
0x2277   :  { %v4767_v45 = vsel %vm3194_vm5, %v4764_v40, %v4766_v0  ;;  %vm9053_vm5 = vcmask 1014784  }
0x2278   :  { %4789 = vmatpush1.msra.mxu0 %v4767_v45 }
0x2279   :  { %v4759_v61 = vpop.permute.xlu1 %4758 }
0x227a   :  { %4790 = vmatprep.subr.mxu0 %v4759_v61  ;;  %v4757_v34 = vpop.permute.xlu0 %4756 }
0x227b   :  { %v4760_v4 = vsel %vm3186_vm6, %v4757_v34, %v4759_v61  ;;  %vm9054_vm6 = vcmask 1022976  }
0x227c   :  { %4791 = vmatpush1.msra.mxu0 %v4760_v4 }
0x227d   :  { %v4752_v8 = vpop.permute.xlu1 %4751 }
0x227e   :  { %4792 = vmatprep.subr.mxu0 %v4752_v8  ;;  %v4750_v17 = vpop.permute.xlu0 %4749 }
0x227f   :  { %v4753_v15 = vsel %vm3178_vm7, %v4750_v17, %v4752_v8  ;;  %vm9055_vm7 = vcmask 195584  }
0x2280   :  { %4793 = vmatpush1.msra.mxu0 %v4753_v15 }
0x2281   :  { %v4745_v29 = vpop.permute.xlu1 %4744 }
0x2282   :  { %4794 = vmatprep.subr.mxu0 %v4745_v29  ;;  %v4743_v60 = vpop.permute.xlu0 %4742 }
0x2283   :  { %v4746_v13 = vsel %vm3170_vm8, %v4743_v60, %v4745_v29  ;;  %vm4037_vm8 = vcmask 343040  }
0x2284   :  { %4795 = vmatpush1.msra.mxu0 %v4746_v13 }
0x2285   :  { %v4738_v23 = vpop.permute.xlu1 %4737 }
0x2286   :  { %4796 = vmatprep.subr.mxu0 %v4738_v23  ;;  %v4736_v53 = vpop.permute.xlu0 %4735 }
0x2287   :  { %v4739_v31 = vsel %vm3162_vm9, %v4736_v53, %v4738_v23  ;;  %vm5064_vm9 = vcmask 1041408  }
0x2288   :  { %4797 = vmatpush1.msra.mxu0 %v4739_v31 }
0x2289   :  { %v4731_v35 = vpop.permute.xlu1 %4730 }
0x228a   :  { %4798 = vmatprep.subr.mxu0 %v4731_v35  ;;  %v4729_v6 = vpop.permute.xlu0 %4728 }
0x228b   :  { %v4732_v12 = vsel %vm3154_vm10, %v4729_v6, %v4731_v35  ;;  %vm9056_vm10 = vcmask 261120  }
0x228c   :  { %4799 = vmatpush1.msra.mxu0 %v4732_v12  ;;  %vm9058_vm12 = vmmov %vm9056_vm10 }
0x228d   :  { %v4724_v28 = vpop.permute.xlu1 %4723 }
0x228e   :  { %4800 = vmatprep.subr.mxu0 %v4724_v28  ;;  %v4722_v47 = vpop.permute.xlu0 %4721 }
0x228f   :  { %v4725_v11 = vsel %vm3146_vm11, %v4722_v47, %v4724_v28  ;;  %vm9057_vm11 = vmmov %vm9056_vm10 }
0x2290   :  { %4801 = vmatpush1.msra.mxu0 %v4725_v11 }
0x2291   :  { %v4717_v32 = vpop.permute.xlu1 %4716 }
0x2292   :  { %4802 = vmatprep.subr.mxu0 %v4717_v32  ;;  %v4715_v46 = vpop.permute.xlu0 %4714 }
0x2293   :  { %v4718_v9 = vsel %vm9051_vm3, %v4715_v46, %v4717_v32 }
0x2294   :  { %4803 = vmatpush1.msra.mxu0 %v4718_v9 }
0x2295   :  { %v4710_v54 = vpop.permute.xlu1 %4709 }
0x2296   :  { %4804 = vmatprep.subr.mxu0 %v4710_v54  ;;  %v4708_v48 = vpop.permute.xlu0 %4707 }
0x2297   :  { %v4711_v3 = vsel %vm9052_vm4, %v4708_v48, %v4710_v54 }
0x2298   :  { %4805 = vmatpush1.msra.mxu0 %v4711_v3 }
0x2299   :  { %v4703_v37 = vpop.permute.xlu1 %4702 }
0x229a   :  { %4806 = vmatprep.subr.mxu0 %v4703_v37  ;;  %v4701_v27 = vpop.permute.xlu0 %4700 }
0x229b   :  { %v4704_v7 = vsel %vm9053_vm5, %v4701_v27, %v4703_v37 }
0x229c   :  { %4807 = vmatpush1.msra.mxu0 %v4704_v7 }
0x229d   :  { %v4696_v50 = vpop.permute.xlu1 %4695 }
0x229e   :  { %4808 = vmatprep.subr.mxu0 %v4696_v50  ;;  %v4694_v16 = vpop.permute.xlu0 %4693 }
0x229f   :  { %v4697_v63 = vsel %vm9054_vm6, %v4694_v16, %v4696_v50 }
0x22a0   :  { %4809 = vmatpush1.msra.mxu0 %v4697_v63 }
0x22a1   :  { %v4689_v19 = vpop.permute.xlu1 %4688 }
0x22a2   :  { %4810 = vmatprep.subr.mxu0 %v4689_v19  ;;  %v4687_v25 = vpop.permute.xlu0 %4686 }
0x22a3   :  { %v4690_v43 = vsel %vm3106_vm1, %v4687_v25, %v4689_v19 }
0x22a4   :  { %4811 = vmatpush1.msra.mxu0 %v4690_v43 }
0x22a5   :  { %v4682_v14 = vpop.permute.xlu1 %4681 }
0x22a6   :  { %4812 = vmatprep.subr.mxu0 %v4682_v14  ;;  %v4680_v20 = vpop.permute.xlu0 %4679 }
0x22a7   :  { %v4683_v41 = vsel %vm3098_vm2, %v4680_v20, %v4682_v14 }
0x22a8   :  { %4813 = vmatpush1.msra.mxu0 %v4683_v41 }
0x22a9   :  { %4814 = vmatprep.subr.mxu0 %v8686_v49 }
0x22aa   :  { %4815 = vmatpush1.msra.mxu0 %v8688_v62 }
0x22ab   :  { %4849 = vmatmul.mubr.f32.vlgmr.msra.gmra.mxu0 %v6075_v51 }
0x22ac   :  { %4955 = vmatprep.mubr.f32.mxu0 %v6079_v36 }
0x236b   :  { %v4850_v33 = vpop.f32.mrf.mxu0 }
0x236c   :  { %v4851_v39 = vadd.f32 %v4850_v33, %v8196_v57 }
0x236d   :  { %v4852_v21 = vpop.f32.mrf.mxu0 }
0x236e   :  { %v4853_v58 = vadd.f32 %v4852_v21, %v8196_v57  ;;  %4857 = vrot.lane.b32.xlu0 %v4851_v39, %s6097_s2 }
0x2370   :  { %4859 = vrot.lane.b32.xlu1 %v4853_v58, %s6097_s2 }
0x2372   :  { %4866 = vrot.lane.b32.xlu0 %v4851_v39, %s6096_s28 }
0x2374   :  { %4868 = vrot.lane.b32.xlu1 %v4853_v58, %s6096_s28 }
0x23e0   :  { %v4858_v24 = vpop.permute.xlu0 %4857 }
0x23e2   :  { %v4860_v30 = vpop.permute.xlu1 %4859 }
0x23e3   :  { %v4861_v52 = vsel %vm3098_vm2, %v4858_v24, %v4860_v30  ;;  %v4865_v56 = vmax.f32 %v4853_v58, %v4860_v30  ;;  %v5042_v58 = vld [vmem:[%s8988_s17 + $0x78] sm:$0xff] }
0x23e4   :  { %v4864_v49 = vmax.f32 %v4851_v39, %v4861_v52  ;;  %v4867_v62 = vpop.permute.xlu0 %4866  ;;  %5069 = vmatpush1.msra.mxu1 %v5042_v58  ;;  %v5040_v52 = vld [vmem:[%s8988_s17 + $0x68] sm:$0xff] }
0x23e5   :  { %5070 = vmatprep.subr.mxu1 %v6079_v36 }
0x23e6   :  { %v4869_v55 = vpop.permute.xlu1 %4868  ;;  %5071 = vmatpush1.msra.mxu1 %v5041_v5 }
0x23e7   :  { %v4870_v57 = vsel %vm3106_vm1, %v4867_v62, %v4869_v55  ;;  %v4874_v1 = vmax.f32 %v4865_v56, %v4869_v55  ;;  %5072 = vmatprep.subr.mxu1 %v6079_v36  ;;  %v5039_v62 = vld [vmem:[%s8988_s17 + $0x60] sm:$0xff] }
0x23e8   :  { %v4873_v22 = vmax.f32 %v4864_v49, %v4870_v57  ;;  %5073 = vmatpush1.msra.mxu1 %v5040_v52 }
0x23e9   :  { %4886 = vrot.lane.b32.xlu1 %v4874_v1, %s6096_s28  ;;  %5074 = vmatprep.subr.mxu1 %v6079_v36 }
0x23ea   :  { %4884 = vrot.lane.b32.xlu0 %v4873_v22, %s6096_s28  ;;  %5075 = vmatpush1.msra.mxu1 %v5039_v62 }
0x23eb   :  { %5076 = vmatprep.subr.mxu1 %v6079_v36 }
0x23ed   :  { %4879 = vrot.lane.b32.xlu1 %v4874_v1, %s6097_s2 }
0x23ee   :  { %4877 = vrot.lane.b32.xlu0 %v4873_v22, %s6097_s2 }
0x23f2   :  { %3939 = vperm.xlu0 %5994, %v6076_v18  }
0x245b   :  { %v4887_v42 = vpop.permute.xlu1 %4886 }
0x245c   :  { %4917 = vmatprep.subr.mxu0 %v4887_v42  ;;  %v4885_v26 = vpop.permute.xlu0 %4884 }
0x245d   :  { %v4888_v0 = vsel %vm3106_vm1, %v4885_v26, %v4887_v42  ;;  %v5037_v42 = vld [vmem:[%s8988_s17 + $0x50] sm:$0xff] }
0x245e   :  { %4918 = vmatpush1.msra.mxu0 %v4888_v0  ;;  %v5036_v0 = vld [vmem:[%s8988_s17 + $0x48] sm:$0xff] }
0x245f   :  { %v4880_v40 = vpop.permute.xlu1 %4879 }
0x2460   :  { %4919 = vmatprep.subr.mxu0 %v4880_v40  ;;  %v4878_v45 = vpop.permute.xlu0 %4877 }
0x2461   :  { %v4881_v61 = vsel %vm3098_vm2, %v4878_v45, %v4880_v40  ;;  %v5035_v40 = vld [vmem:[%s8988_s17 + $0x40] sm:$0xff]  ;;  %v5034_v45 = vld [vmem:[%s8988_s17 + $0x38] sm:$0xff] }
0x2462   :  { %4920 = vmatpush1.msra.mxu0 %v4881_v61  ;;  %v5033_v61 = vld [vmem:[%s8988_s17 + $0x30] sm:$0xff] }
0x2463   :  { %4921 = vmatprep.subr.mxu0 %v4874_v1  ;;  %v5038_v1 = vld [vmem:[%s8988_s17 + $0x58] sm:$0xff] }
0x2464   :  { %4922 = vmatpush1.msra.mxu0 %v4873_v22  ;;  %5077 = vmatpush1.msra.mxu1 %v5038_v1 }
0x2465   :  { %5481 = vmatmul.mubr.msk.f32.vlgmr.msra.gmra.mxu0 %vm9055_vm7, %v8548_v38  ;;  %5932 = vmatprep.subr.mxu0 %v6079_v36 }
0x2466   :  { %5078 = vmatprep.subr.mxu1 %v6079_v36  ;;  %5948 = vmatprep.mubr.msk.f32.mxu0 %vm6101_vm14, %v6079_v36 }
0x2467   :  { %5079 = vmatpush1.msra.mxu1 %v5037_v42  ;;  %v5139_v42 = vld [vmem:[%s8989_s19] sm:$0xff] }
0x2468   :  { %5080 = vmatprep.subr.mxu1 %v6079_v36 }
0x2469   :  { %5081 = vmatpush1.msra.mxu1 %v5036_v0  ;;  %v5482_v0 = vld [vmem:[%s8991_s18] ss:$0 sm:$0xff] }
0x246a   :  { %5082 = vmatprep.subr.mxu1 %v6079_v36 }
0x246b   :  { %5083 = vmatpush1.msra.mxu1 %v5035_v40 }
0x246c   :  { %5084 = vmatprep.subr.mxu1 %v6079_v36 }
0x246d   :  { %v3940_v34 = vpop.permute.xlu0 %3939  ;;  %5085 = vmatpush1.msra.mxu1 %v5034_v45 }
0x246e   :  { %v4013_v4 = vadd.f32 %v8674_v2, %v3940_v34  ;;  %v4015_v8 = vadd.f32 %v8676_v10, %v3940_v34  ;;  %5086 = vmatprep.subr.mxu1 %v6079_v36 }
0x246f   :  { %5087 = vmatpush1.msra.mxu1 %v5033_v61 }
0x2470   :  { %4028 = vrot.lane.b32.xlu0 %v4013_v4, %s6096_s28  ;;  %4019 = vrot.lane.b32.xlu1 %v4013_v4, %s6097_s2 }
0x2471   :  { %5088 = vmatprep.subr.mxu1 %v6079_v36 }
0x2474   :  { %4021 = vrot.lane.b32.xlu1 %v4015_v8, %s6097_s2 }
0x2478   :  { %4030 = vrot.lane.b32.xlu1 %v4015_v8, %s6096_s28 }
0x24e2   :  { %v4020_v38 = vpop.permute.xlu1 %4019  ;;  %v4029_v53 = vpop.permute.xlu0 %4028 }
0x24e6   :  { %v4022_v2 = vpop.permute.xlu1 %4021 }
0x24e7   :  { %v4023_v10 = vsel %vm3098_vm2, %v4020_v38, %v4022_v2  ;;  %v4027_v23 = vmax.f32 %v4015_v8, %v4022_v2  ;;  %v5030_v8 = vld [vmem:[%s8988_s17 + $0x18] sm:$0xff]  ;;  %v5051_v38 = vld [vmem:[%s8988_s17 + $0xc0] sm:$0xff] }
0x24e8   :  { %v4026_v6 = vmax.f32 %v4013_v4, %v4023_v10  ;;  %v5031_v4 = vld [vmem:[%s8988_s17 + $0x20] sm:$0xff]  ;;  %v5050_v2 = vld [vmem:[%s8988_s17 + $0xb8] sm:$0xff]  ;;  %v5048_v10 = vld [vmem:[%s8988_s17 + $0xa8] sm:$0xff] }
0x24ea   :  { %v4031_v13 = vpop.permute.xlu1 %4030 }
0x24eb   :  { %v4032_v31 = vsel %vm3106_vm1, %v4029_v53, %v4031_v13  ;;  %v4036_v35 = vmax.f32 %v4027_v23, %v4031_v13  ;;  %v5049_v13 = vld [vmem:[%s8988_s17 + $0xb0] sm:$0xff]  ;;  %v5047_v23 = vld [vmem:[%s8988_s17 + $0xa0] sm:$0xff]  ;;  %v5046_v53 = vld [vmem:[%s8988_s17 + $0x98] sm:$0xff] }
0x24ec   :  { %v4035_v12 = vmax.f32 %v4026_v6, %v4032_v31 }
0x24ed   :  { %v4038_v28 = vsel %vm4037_vm8, %v4036_v35, 0.0 }
0x24ee   :  { %v4039_v47 = vadd.f32 %v4038_v28, %v4035_v12 }
0x2525   :  { %v4957_v17 = vpop.f32.mrf.mxu0 }
0x2526   :  { %v4958_v15 = vadd.f32 %v4957_v17, %v3940_v34  ;;  %v5029_v17 = vld [vmem:[%s8988_s17 + $0x10] sm:$0xff] }
0x2527   :  { %v4959_v29 = vpop.f32.mrf.mxu0 }
0x2528   :  { %v4960_v60 = vadd.f32 %v4959_v29, %v3940_v34  ;;  %4964 = vrot.lane.b32.xlu0 %v4958_v15, %s6097_s2  ;;  %v5032_v34 = vld [vmem:[%s8988_s17 + $0x28] sm:$0xff]  ;;  %v5027_v29 = vld [vmem:[%s8988_s17] sm:$0xff] }
0x2529   :  { %5089 = vmatpush1.msra.mxu1 %v5032_v34 }
0x252a   :  { %4966 = vrot.lane.b32.xlu1 %v4960_v60, %s6097_s2  ;;  %5090 = vmatprep.subr.mxu1 %v6079_v36 }
0x252b   :  { %5091 = vmatpush1.msra.mxu1 %v5031_v4 }
0x252c   :  { %4973 = vrot.lane.b32.xlu0 %v4958_v15, %s6096_s28  ;;  %5092 = vmatprep.subr.mxu1 %v6079_v36 }
0x252d   :  { %5093 = vmatpush1.msra.mxu1 %v5030_v8 }
0x252e   :  { %4975 = vrot.lane.b32.xlu1 %v4960_v60, %s6096_s28  ;;  %s6100_s28 = smov 32   ;;  %5094 = vmatprep.subr.mxu1 %v6079_v36 }
0x252f   :  { %5095 = vmatpush1.msra.mxu1 %v5029_v17 }
0x2530   :  { %5096 = vmatprep.subr.mxu1 %v6079_v36 }
0x254b   :  { %4040 = vadd.xlane.f32.xlu0 %v4039_v47 }
0x259a   :  { %v4965_v11 = vpop.permute.xlu0 %4964 }
0x259c   :  { %v4967_v32 = vpop.permute.xlu1 %4966 }
0x259d   :  { %v4968_v46 = vsel %vm3098_vm2, %v4965_v11, %v4967_v32  ;;  %v4972_v9 = vmax.f32 %v4960_v60, %v4967_v32  ;;  %v5052_v60 = vld [vmem:[%s8988_s17 + $0xc8] sm:$0x3]  ;;  %vm5024_vm2 = vcmask 1040384  }
0x259e   :  { %v4971_v54 = vmax.f32 %v4958_v15, %v4968_v46  ;;  %v4974_v48 = vpop.permute.xlu0 %4973  ;;  %v5028_v15 = vld [vmem:[%s8988_s17 + $0x8] sm:$0xff] }
0x259f   :  { %5097 = vmatpush1.msra.mxu1 %v5028_v15 }
0x25a0   :  { %v4976_v3 = vpop.permute.xlu1 %4975  ;;  %5098 = vmatprep.subr.mxu1 %v6079_v36 }
0x25a1   :  { %v4977_v37 = vsel %vm3106_vm1, %v4974_v48, %v4976_v3  ;;  %v8806_v27 = vmax.f32 %v4972_v9, %v4976_v3  ;;  %5099 = vmatpush1.msra.mxu1 %v5027_v29  ;;  %v5045_v9 = vld [vmem:[%s8988_s17 + $0x90] sm:$0xff]  ;;  %v5044_v48 = vld [vmem:[%s8988_s17 + $0x88] sm:$0xff]  ;;  %vm9059_vm1 = vmmov %vm9056_vm10 }
0x25a2   :  { %v8808_v7 = vmax.f32 %v4971_v54, %v4977_v37  ;;  %5112 = vmatprep.subr.mxu1 %v6079_v36  ;;  %v5043_v37 = vld [vmem:[%s8988_s17 + $0x80] sm:$0xff] }
0x25a3   :  { %v4982_v50 = vsel %vm4037_vm8, %v8806_v27, 0.0  ;;  %5483 = vmatpush2.msk.msra.mxu1 %vm5064_vm9, %v5052_v60 }
0x25a4   :  { %v4983_v16 = vadd.f32 %v4982_v50, %v8808_v7  ;;  %5114 = vmatprep.subr.mxu1 %v6079_v36 }
0x25a5   :  { %5115 = vmatpush2.msra.mxu1 %v5051_v38 }
0x25a6   :  { %4984 = vadd.xlane.f32.xlu1 %v4983_v16  ;;  %5116 = vmatprep.subr.mxu1 %v6079_v36 }
0x25a7   :  { %5117 = vmatpush2.msra.mxu1 %v5050_v2 }
0x25a8   :  { %5118 = vmatprep.subr.mxu1 %v6079_v36 }
0x25a9   :  { %5119 = vmatpush2.msra.mxu1 %v5049_v13 }
0x25aa   :  { %5120 = vmatprep.subr.mxu1 %v6079_v36 }
0x25ab   :  { %5121 = vmatpush2.msra.mxu1 %v5048_v10 }
0x25ac   :  { %5122 = vmatprep.subr.mxu1 %v6079_v36 }
0x25ad   :  { %5123 = vmatpush2.msra.mxu1 %v5047_v23 }
0x25ae   :  { %5124 = vmatprep.subr.mxu1 %v6079_v36 }
0x25af   :  { %5125 = vmatpush2.msra.mxu1 %v5046_v53 }
0x25b0   :  { %5126 = vmatprep.subr.mxu1 %v6079_v36 }
0x25b1   :  { %5127 = vmatpush2.msra.mxu1 %v5045_v9 }
0x25b2   :  { %5128 = vmatprep.subr.mxu1 %v6079_v36 }
0x25b3   :  { %5129 = vmatpush2.msra.mxu1 %v5044_v48 }
0x25b4   :  { %5130 = vmatprep.subr.mxu1 %v6079_v36 }
0x25b5   :  { %5131 = vmatpush2.msra.mxu1 %v5043_v37 }
0x25d4   :  { %v4041_v63 = vpop.xlane.xlu0 %4040 }
0x25d5   :  { %v4043_v19 = vmul.f32 0.005882353, %v4041_v63  ;;  %v5146_v63 = vld [vmem:[%s8989_s19 + $0x38] sm:$0xff] }
0x25d6   :  { %5933 = vmatpush3.msra.mxu0 %v5146_v63 }
0x25d7   :  { %6059 = vtanh.f32 %v4043_v19  ;;  %v5145_v19 = vld [vmem:[%s8989_s19 + $0x30] sm:$0xff]  ;;  %5934 = vmatprep.subr.mxu0 %v6079_v36 }
0x25d8   :  { %5935 = vmatpush3.msra.mxu0 %v5145_v19 }
0x25d9   :  { %5936 = vmatprep.subr.mxu0 %v6079_v36 }
0x25e4   :  { %v6060_v25 = vpop.eup %6059 }
0x25e5   :  { %v4045_v43 = vmul.f32 %v6060_v25, %v4035_v12  ;;  %v4046_v14 = vmul.f32 %v6060_v25, %v4036_v35 }
0x25e7   :  { %v4047_v20 = vrot.slane %v4045_v43, 4  ;;  %v4053_v41 = vsel %vm4037_vm8, %v4046_v14, 0.0  ;;  %v5144_v14 = vld [vmem:[%s8989_s19 + $0x28] sm:$0xff] }
0x25e8   :  { %v4054_v51 = vrot.slane %v4053_v41, 4  ;;  %5937 = vmatpush3.msra.mxu0 %v5144_v14 }
0x25e9   :  { %v4048_v33 = vadd.f32 %v4047_v20, %v4045_v43  ;;  %5938 = vmatprep.subr.mxu0 %v6079_v36 }
0x25ea   :  { %v4055_v39 = vadd.f32 %v4054_v51, %v4053_v41  ;;  %v5143_v51 = vld [vmem:[%s8989_s19 + $0x20] sm:$0xff] }
0x25eb   :  { %v4049_v21 = vrot.slane %v4048_v33, 2  ;;  %5939 = vmatpush3.msra.mxu0 %v5143_v51 }
0x25ec   :  { %v4056_v24 = vrot.slane %v4055_v39, 2  ;;  %5940 = vmatprep.subr.mxu0 %v6079_v36 }
0x25ed   :  { %v4050_v30 = vadd.f32 %v4049_v21, %v4048_v33 }
0x25ee   :  { %v4057_v56 = vadd.f32 %v4056_v24, %v4055_v39  ;;  %v5142_v39 = vld [vmem:[%s8989_s19 + $0x18] sm:$0xff] }
0x25ef   :  { %v4051_v49 = vrot.slane %v4050_v30, 1  ;;  %5941 = vmatpush3.msra.mxu0 %v5142_v39 }
0x25f0   :  { %v4058_v55 = vrot.slane %v4057_v56, 1  ;;  %5942 = vmatprep.subr.mxu0 %v6079_v36 }
0x25f1   :  { %v4052_v57 = vadd.f32 %v4051_v49, %v4050_v30 }
0x25f2   :  { %v4059_v22 = vadd.f32 %v4058_v55, %v4057_v56 }
0x25f3   :  { %v4061_v18 = vmul.f32 0.125, %v4052_v57 }
0x25f4   :  { %v4062_v26 = vmul.f32 0.125, %v4059_v22 }
0x25f5   :  { %4065 = vrot.lane.b32.xlu0 %v4061_v18, %s6100_s28 }
0x25f6   :  { %4067 = vrot.lane.b32.xlu1 %v4062_v26, %s6100_s28  ;;  %v26_v26 = vstv %s8990_s20 }
0x25f7   :  { %27 = vst [vmem:[#allocation2] sm:$0x1] %v26_v26 }
0x25fe   :  { %v5485_v4 = vld [vmem:[#allocation2] ss:$0 sm:$0xff] }
0x262f   :  { %v4985_v31 = vpop.xlane.xlu1 %4984 }
0x2630   :  { %v4986_v35 = vmul.f32 0.005882353, %v4985_v31 }
0x2632   :  { %6061 = vtanh.f32 %v4986_v35 }
0x263f   :  { %v6062_v6 = vpop.eup %6061 }
0x2640   :  { %v4988_v12 = vmul.f32 %v6062_v6, %v8808_v7  ;;  %v4989_v28 = vmul.f32 %v6062_v6, %v8806_v27 }
0x2642   :  { %v4990_v47 = vrot.slane %v4988_v12, 4  ;;  %v4996_v11 = vsel %vm4037_vm8, %v4989_v28, 0.0 }
0x2643   :  { %v4997_v32 = vrot.slane %v4996_v11, 4 }
0x2644   :  { %v4991_v46 = vadd.f32 %v4990_v47, %v4988_v12 }
0x2645   :  { %v4998_v54 = vadd.f32 %v4997_v32, %v4996_v11 }
0x2646   :  { %v4992_v3 = vrot.slane %v4991_v46, 2 }
0x2647   :  { %v4999_v27 = vrot.slane %v4998_v54, 2 }
0x2648   :  { %v4993_v7 = vadd.f32 %v4992_v3, %v4991_v46 }
0x2649   :  { %v5000_v50 = vadd.f32 %v4999_v27, %v4998_v54 }
0x264a   :  { %v4994_v16 = vrot.slane %v4993_v7, 1 }
0x264b   :  { %v5001_v25 = vrot.slane %v5000_v50, 1 }
0x264c   :  { %v4995_v43 = vadd.f32 %v4994_v16, %v4993_v7 }
0x264d   :  { %v5002_v20 = vadd.f32 %v5001_v25, %v5000_v50 }
0x264e   :  { %v5003_v41 = vmul.f32 0.125, %v4995_v43 }
0x264f   :  { %v5004_v33 = vmul.f32 0.125, %v5002_v20 }
0x2650   :  { %5007 = vrot.lane.b32.xlu0 %v5003_v41, %s6100_s28 }
0x2651   :  { %5009 = vrot.lane.b32.xlu1 %v5004_v33, %s6100_s28 }
0x2667   :  { %v4066_v21 = vpop.permute.xlu0 %4065 }
0x2668   :  { %v4068_v58 = vpop.permute.xlu1 %4067  ;;  %v4071_v30 = vsel %vm9057_vm11, %v7374_v44, %v4066_v21  ;;  %v5141_v44 = vld [vmem:[%s8989_s19 + $0x10] sm:$0xff] }
0x2669   :  { %v4069_v5 = vsel %vm9056_vm10, %v4066_v21, %v4068_v58  ;;  %v5015_v1 = vrot.slane %v4071_v30, 7  ;;  %5943 = vmatpush3.msra.mxu0 %v5141_v44 }
0x266a   :  { %v5016_v55 = vrot.slane %v4069_v5, 7  ;;  %5944 = vmatprep.subr.mxu0 %v6079_v36 }
0x26c2   :  { %v5008_v24 = vpop.permute.xlu0 %5007 }
0x26c3   :  { %v5013_v52 = vsel %vm9058_vm12, %v7380_v59, %v5008_v24  ;;  %v5010_v56 = vpop.permute.xlu1 %5009  ;;  %v5140_v59 = vld [vmem:[%s8989_s19 + $0x8] sm:$0xff] }
0x26c4   :  { %v5020_v49 = vrot.slane %v5013_v52, 6  ;;  %v5011_v62 = vsel %vm9059_vm1, %v5008_v24, %v5010_v56  ;;  %5945 = vmatpush3.msra.mxu0 %v5140_v59 }
0x26c5   :  { %v5021_v57 = vrot.slane %v5011_v62, 6  ;;  %5946 = vmatprep.subr.mxu0 %v6079_v36 }
0x26c6   :  { %v5025_v18 = vsel %vm5024_vm2, %v5015_v1, %v5020_v49  ;;  %5947 = vmatpush3.msra.mxu0 %v5139_v42 }
0x26c7   :  { %v5026_v22 = vsel %vm5024_vm2, %v5016_v55, %v5021_v57 }
0x26c8   :  { %5484 = vmatprep.mubr.msk.f32.mxu1 %vm5060_vm15, %v5026_v22 }
0x26c9   :  { %5133 = vmatmul.mubr.f32.vlgmr.msra.gmra.mxu1 %v5025_v18 }
0x2789   :  { %v5134_v40 = vpop.f32.mrf.mxu1 }
0x278a   :  { %v5135_v45 = vadd.f32 %v5482_v0, %v5134_v40 }
0x278b   :  { %v5136_v61 = vpop.f32.mrf.mxu1 }
0x278c   :  { %v5138_v34 = vmax.f32 %v5135_v45, 0.0 }
0x278e   :  { %5949 = vmatmul.mubr.msk.f32.vlgmr.msra.gmra.mxu0 %vm5154_vm0, %v5138_v34 }
0x284e   :  { %v5224_v8 = vpop.f32.mrf.mxu0 }
0x284f   :  { %v5225_v17 = vadd.f32 %v5485_v4, %v5224_v8 }
0x2850   :  { %v5950_v36 = vpop.f32.mrf.mxu0 }
0x2851   :  { %v5487_v15 = vmul.f32 -1.442695, %v5225_v17 }
0x2853   :  { %6063 = vpow2.f32 %v5487_v15 }
0x2860   :  { %v6064_v29 = vpop.eup %6063 }
0x2861   :  { %v5231_v60 = vadd.f32 1.0, %v6064_v29 }
0x2863   :  { %6065 = vrcp.f32 %v5231_v60 }
0x2870   :  { %v6066_v38 = vpop.eup %6065 }
0x2871   :  { %5235 = vst.msk [vmem:[%s8992_s21] sm:$0x3] %vm5234_vm13, %v6066_v38 }

</bundles_post_ra>
